<compile_context>
chip_gen: v7x
topology: tpu7x:2x2x1
jax: 0.10.0
libtpu: 0.0.40
codegen_flags: <defaults>
</compile_context>

<pallas_src>
import jax
import jax.numpy as jnp
from jax.experimental import pallas as pl
from jax.experimental.pallas import tpu as pltpu


# ---------------------------------------------------------------------------
# Fused IBasicBlock kernel (one batch element per grid step)
# ---------------------------------------------------------------------------
def _iblock_kernel(x_ref, p_ref, w1_ref, w2_ref, o_ref, pad_ref, col_ref):
    H, W, C = x_ref.shape[1], x_ref.shape[2], x_ref.shape[3]
    P = w1_ref.shape[1]
    HW = H * W

    # --- zero ONLY the 1-px halo strips; the interior is fully overwritten
    # below.  Unconditional every step so a "parallel" (megacore) batch split
    # cannot skip the initialization.
    zrow = jnp.zeros((1, W + 2, C), jnp.bfloat16)
    zcol = jnp.zeros((H + 2, 1, C), jnp.bfloat16)
    pad_ref[0:1, :, :] = zrow
    pad_ref[H + 1:H + 2, :, :] = zrow
    pad_ref[:, 0:1, :] = zcol
    pad_ref[:, W + 1:W + 2, :] = zcol

    # packed per-channel params: [s1, b1, s2, b2, alpha, s3, b3, pad]
    s1, b1 = p_ref[0:1, :], p_ref[1:2, :]
    s2, b2 = p_ref[2:3, :], p_ref[3:4, :]
    alpha = p_ref[4:5, :]
    s3, b3 = p_ref[5:6, :], p_ref[6:7, :]

    x = x_ref[0]                                            # (H, W, C) f32

    # --- bn1 (eval-mode, folded to scale/bias), single cast to bf16
    pad_ref[1:H + 1, 1:W + 1, :] = (x * s1 + b1).astype(jnp.bfloat16)

    # --- conv1: build im2col slab once, then ONE big-K MXU matmul
    for k in range(9):
        dy, dx = k // 3, k % 3
        col_ref[:, :, k * C:(k + 1) * C] = pad_ref[dy:dy + H, dx:dx + W, :]
    y = jnp.dot(col_ref[...].reshape(HW, 9 * C), w1_ref[...],
                preferred_element_type=jnp.float32)         # (HW, P) f32

    # --- bn2 + per-channel PReLU (f32), cast once, reuse padded scratch (C==P)
    z = y * s2 + b2
    z = jnp.where(z >= 0.0, z, alpha * z)
    pad_ref[1:H + 1, 1:W + 1, :] = z.astype(jnp.bfloat16).reshape(H, W, P)

    # --- conv2: same im2col + single matmul
    for k in range(9):
        dy, dx = k // 3, k % 3
        col_ref[:, :, k * P:(k + 1) * P] = pad_ref[dy:dy + H, dx:dx + W, :]
    y2 = jnp.dot(col_ref[...].reshape(HW, 9 * P), w2_ref[...],
                 preferred_element_type=jnp.float32)        # (HW, P) f32

    # --- bn3 + identity residual
    out = y2 * s3 + b3
    o_ref[0] = (out.reshape(H, W, P) + x).astype(o_ref.dtype)


# ---------------------------------------------------------------------------
# Module wrapper (holds folded parameters, builds the pallas_call)
# ---------------------------------------------------------------------------
class IBasicBlockPallas:
    expansion = 1

    def __init__(self, inplanes, planes, stride=1, downsample=None, *,
                 key, eps=1e-5):
        if stride != 1 or downsample is not None:
            # TODO(synk): strided conv2 + downsample path not implemented.
            raise NotImplementedError("only stride=1, downsample=None supported")
        assert inplanes == planes, "identity residual requires inplanes == planes"
        self.inplanes, self.planes, self.eps = inplanes, planes, eps

        keys = iter(jax.random.split(key, 16))

        def bn_folded(c):
            gamma = 1.0 + 0.1 * jax.random.normal(next(keys), (c,), jnp.float32)
            beta = 0.1 * jax.random.normal(next(keys), (c,), jnp.float32)
            mean = 0.1 * jax.random.normal(next(keys), (c,), jnp.float32)
            var = 1.0 + 0.5 * jax.random.uniform(next(keys), (c,), jnp.float32)
            s = gamma * jax.lax.rsqrt(var + eps)            # eval-mode BN scale
            b = beta - mean * s                             # eval-mode BN bias
            return s, b

        self.s1, self.b1 = bn_folded(inplanes)
        # f32 weight masters (HWIO), fan-in scaled; bf16 im2col copies for MXU.
        self.w1 = (9 * inplanes) ** -0.5 * jax.random.normal(
            next(keys), (3, 3, inplanes, planes), jnp.float32)
        self.s2, self.b2 = bn_folded(planes)
        self.alpha = 0.25 + 0.05 * jax.random.normal(next(keys), (planes,),
                                                     jnp.float32)
        self.w2 = (9 * planes) ** -0.5 * jax.random.normal(
            next(keys), (3, 3, planes, planes), jnp.float32)
        self.s3, self.b3 = bn_folded(planes)

        # One packed (8, C) per-channel parameter block -> single DMA.
        self.params = jnp.stack(
            [self.s1, self.b1, self.s2, self.b2, self.alpha,
             self.s3, self.b3, jnp.zeros_like(self.s1)], axis=0)

        # im2col weight layout: row (dy*3+dx)*Cin + c , col q.
        self.w1_k = self.w1.reshape(9 * inplanes, planes).astype(jnp.bfloat16)
        self.w2_k = self.w2.reshape(9 * planes, planes).astype(jnp.bfloat16)

    def __call__(self, x):                                  # x: (N, H, W, C) f32
        N, H, W, C = x.shape
        assert C == self.inplanes
        P = self.planes

        # Rough per-step VMEM working set -> explicit scoped-VMEM budget that
        # also fits a 64 MiB (v7x) part.
        est = (2 * 2 * H * W * max(C, P) * 4                # dbl-buffered x / out
               + 2 * (9 * C * P + 9 * P * P) * 2            # dbl-buffered bf16 weights
               + (H + 2) * (W + 2) * C * 2                  # padded scratch (bf16)
               + H * W * 9 * C * 2                          # im2col scratch (bf16)
               + 8 * C * 4 * 2)                             # packed params
        vmem_limit = int(min(max(2 * est, 32 * 1024 * 1024), 56 * 1024 * 1024))

        grid_spec = pltpu.PrefetchScalarGridSpec(
            num_scalar_prefetch=0,
            grid=(N,),
            in_specs=[
                pl.BlockSpec((1, H, W, C), lambda n: (n, 0, 0, 0)),   # x
                pl.BlockSpec((8, C), lambda n: (0, 0)),               # packed params
                pl.BlockSpec((9 * C, P), lambda n: (0, 0)),           # w1 (im2col, bf16)
                pl.BlockSpec((9 * P, P), lambda n: (0, 0)),           # w2 (im2col, bf16)
            ],
            out_specs=pl.BlockSpec((1, H, W, P), lambda n: (n, 0, 0, 0)),
            scratch_shapes=[
                pltpu.VMEM((H + 2, W + 2, C), jnp.bfloat16),          # padded activations
                pltpu.VMEM((H, W, 9 * C), jnp.bfloat16),              # im2col slab
            ],
        )
        return pl.pallas_call(
            _iblock_kernel,
            out_shape=jax.ShapeDtypeStruct((N, H, W, P), jnp.float32),
            grid_spec=grid_spec,
            compiler_params=pltpu.CompilerParams(
                dimension_semantics=("parallel",),
                vmem_limit_bytes=vmem_limit),
        )(x, self.params, self.w1_k, self.w2_k)

    # Pure-JAX f32 reference of the same forward pass.
    def reference(self, x):
        dn = ("NHWC", "HWIO", "NHWC")
        pad = ((1, 1), (1, 1))
        c = lambda v: v.reshape(1, 1, 1, -1)
        y = x * c(self.s1) + c(self.b1)
        y = jax.lax.conv_general_dilated(y, self.w1, (1, 1), pad,
                                         dimension_numbers=dn,
                                         precision=jax.lax.Precision.HIGHEST)
        y = y * c(self.s2) + c(self.b2)
        y = jnp.where(y >= 0.0, y, c(self.alpha) * y)
        y = jax.lax.conv_general_dilated(y, self.w2, (1, 1), pad,
                                         dimension_numbers=dn,
                                         precision=jax.lax.Precision.HIGHEST)
        y = y * c(self.s3) + c(self.b3)
        return y + x


if __name__ == "__main__":
    key = jax.random.PRNGKey(0)
    k_params, k_x = jax.random.split(key)

    # Lane-dense config: channels-last with C = P = 128 (production iresnet
    # stage width) so stores and matmuls are unmasked / 128-aligned.
    N, H, W = 2, 16, 16
    inplanes = planes = 128

    block = IBasicBlockPallas(inplanes, planes, stride=1, downsample=None,
                              key=k_params)

    x = jax.random.normal(k_x, (N, H, W, inplanes), dtype=jnp.float32)

    out = block(x)
    jax.block_until_ready(out)

    ref = block.reference(x)
    assert out.shape == ref.shape, (out.shape, ref.shape)
    # bf16 matmul operands with f32 accumulation vs f32 reference.
    max_err = float(jnp.max(jnp.abs(out - ref)))
    assert jnp.allclose(out, ref, rtol=5e-2, atol=1e-1), max_err

    print("KERNEL_OK")
</pallas_src>

<mosaic_0001>
module attributes {stable_mosaic.version = 11 : i64} {
  func.func @_iblock_kernel(%arg0: i32, %arg1: memref<1x16x16x128xf32, #tpu.memory_space<vmem>>, %arg2: memref<8x128xf32, #tpu.memory_space<vmem>>, %arg3: memref<1152x128xbf16, #tpu.memory_space<vmem>>, %arg4: memref<1152x128xbf16, #tpu.memory_space<vmem>>, %arg5: memref<1x16x16x128xf32, #tpu.memory_space<vmem>>, %arg6: memref<18x18x128xbf16, #tpu.memory_space<vmem>>, %arg7: memref<16x16x1152xbf16, #tpu.memory_space<vmem>>) attributes {dimension_semantics = [#tpu.dimension_semantics<parallel>], iteration_bounds = array<i64: 2>, scalar_prefetch = 0 : i64, scratch_operands = 2 : i64, tpu.core_type = #tpu.core_type<tc>, window_params = [{transform_indices = @transform_0, window_bounds = array<i64: 1, 16, 16, 128>}, {pipeline_mode = #tpu.pipeline_mode<synchronous>, transform_indices = @transform_1, window_bounds = array<i64: 8, 128>}, {pipeline_mode = #tpu.pipeline_mode<synchronous>, transform_indices = @transform_2, window_bounds = array<i64: 1152, 128>}, {pipeline_mode = #tpu.pipeline_mode<synchronous>, transform_indices = @transform_3, window_bounds = array<i64: 1152, 128>}, {transform_indices = @transform_4, window_bounds = array<i64: 1, 16, 16, 128>}]} {
    %cst = arith.constant 0.000000e+00 : bf16
    %0 = vector.broadcast %cst : bf16 to vector<1x18x128xbf16>
    %cst_0 = arith.constant 0.000000e+00 : bf16
    %1 = vector.broadcast %cst_0 : bf16 to vector<18x1x128xbf16>
    %c0 = arith.constant 0 : index
    %c0_1 = arith.constant 0 : index
    %c0_2 = arith.constant 0 : index
    %2 = vector.load %arg6[%c0, %c0_1, %c0_2] : memref<18x18x128xbf16, #tpu.memory_space<vmem>>, vector<1x18x128xbf16>
    tpu.vector_store %arg6[%c0, %c0_1, %c0_2], %0 {strides = array<i32>} : memref<18x18x128xbf16, #tpu.memory_space<vmem>>, vector<1x18x128xbf16>,
    %c17 = arith.constant 17 : index
    %c0_3 = arith.constant 0 : index
    %c0_4 = arith.constant 0 : index
    %3 = vector.load %arg6[%c17, %c0_3, %c0_4] : memref<18x18x128xbf16, #tpu.memory_space<vmem>>, vector<1x18x128xbf16>
    tpu.vector_store %arg6[%c17, %c0_3, %c0_4], %0 {strides = array<i32>} : memref<18x18x128xbf16, #tpu.memory_space<vmem>>, vector<1x18x128xbf16>,
    %c0_5 = arith.constant 0 : index
    %c0_6 = arith.constant 0 : index
    %c0_7 = arith.constant 0 : index
    %4 = vector.load %arg6[%c0_5, %c0_6, %c0_7] : memref<18x18x128xbf16, #tpu.memory_space<vmem>>, vector<18x1x128xbf16>
    tpu.vector_store %arg6[%c0_5, %c0_6, %c0_7], %1 {strides = array<i32>} : memref<18x18x128xbf16, #tpu.memory_space<vmem>>, vector<18x1x128xbf16>,
    %c0_8 = arith.constant 0 : index
    %c17_9 = arith.constant 17 : index
    %c0_10 = arith.constant 0 : index
    %5 = vector.load %arg6[%c0_8, %c17_9, %c0_10] : memref<18x18x128xbf16, #tpu.memory_space<vmem>>, vector<18x1x128xbf16>
    tpu.vector_store %arg6[%c0_8, %c17_9, %c0_10], %1 {strides = array<i32>} : memref<18x18x128xbf16, #tpu.memory_space<vmem>>, vector<18x1x128xbf16>,
    %c0_11 = arith.constant 0 : index
    %c0_12 = arith.constant 0 : index
    %6 = vector.load %arg2[%c0_11, %c0_12] : memref<8x128xf32, #tpu.memory_space<vmem>>, vector<1x128xf32>
    %c1 = arith.constant 1 : index
    %c0_13 = arith.constant 0 : index
    %7 = vector.load %arg2[%c1, %c0_13] : memref<8x128xf32, #tpu.memory_space<vmem>>, vector<1x128xf32>
    %c2 = arith.constant 2 : index
    %c0_14 = arith.constant 0 : index
    %8 = vector.load %arg2[%c2, %c0_14] : memref<8x128xf32, #tpu.memory_space<vmem>>, vector<1x128xf32>
    %c3 = arith.constant 3 : index
    %c0_15 = arith.constant 0 : index
    %9 = vector.load %arg2[%c3, %c0_15] : memref<8x128xf32, #tpu.memory_space<vmem>>, vector<1x128xf32>
    %c4 = arith.constant 4 : index
    %c0_16 = arith.constant 0 : index
    %10 = vector.load %arg2[%c4, %c0_16] : memref<8x128xf32, #tpu.memory_space<vmem>>, vector<1x128xf32>
    %c5 = arith.constant 5 : index
    %c0_17 = arith.constant 0 : index
    %11 = vector.load %arg2[%c5, %c0_17] : memref<8x128xf32, #tpu.memory_space<vmem>>, vector<1x128xf32>
    %c6 = arith.constant 6 : index
    %c0_18 = arith.constant 0 : index
    %12 = vector.load %arg2[%c6, %c0_18] : memref<8x128xf32, #tpu.memory_space<vmem>>, vector<1x128xf32>
    %c0_19 = arith.constant 0 : index
    %c0_20 = arith.constant 0 : index
    %c0_21 = arith.constant 0 : index
    %c0_22 = arith.constant 0 : index
    %13 = vector.load %arg1[%c0_19, %c0_20, %c0_21, %c0_22] : memref<1x16x16x128xf32, #tpu.memory_space<vmem>>, vector<1x16x16x128xf32>
    %14 = vector.shape_cast %13 : vector<1x16x16x128xf32> to vector<16x16x128xf32>
    %15 = vector.shape_cast %6 : vector<1x128xf32> to vector<1x1x128xf32>
    %16 = vector.broadcast %15 : vector<1x1x128xf32> to vector<16x16x128xf32>
    %17 = arith.mulf %14, %16 : vector<16x16x128xf32>
    %18 = vector.shape_cast %7 : vector<1x128xf32> to vector<1x1x128xf32>
    %19 = vector.broadcast %18 : vector<1x1x128xf32> to vector<16x16x128xf32>
    %20 = arith.addf %17, %19 : vector<16x16x128xf32>
    %21 = arith.truncf %20 : vector<16x16x128xf32> to vector<16x16x128xbf16>
    %c1_23 = arith.constant 1 : index
    %c1_24 = arith.constant 1 : index
    %c0_25 = arith.constant 0 : index
    %22 = vector.load %arg6[%c1_23, %c1_24, %c0_25] : memref<18x18x128xbf16, #tpu.memory_space<vmem>>, vector<16x16x128xbf16>
    tpu.vector_store %arg6[%c1_23, %c1_24, %c0_25], %21 {strides = array<i32>} : memref<18x18x128xbf16, #tpu.memory_space<vmem>>, vector<16x16x128xbf16>,
    %c0_26 = arith.constant 0 : index
    %c0_27 = arith.constant 0 : index
    %c0_28 = arith.constant 0 : index
    %23 = vector.load %arg6[%c0_26, %c0_27, %c0_28] : memref<18x18x128xbf16, #tpu.memory_space<vmem>>, vector<16x16x128xbf16>
    %c0_29 = arith.constant 0 : index
    %c0_30 = arith.constant 0 : index
    %c0_31 = arith.constant 0 : index
    %24 = vector.load %arg7[%c0_29, %c0_30, %c0_31] : memref<16x16x1152xbf16, #tpu.memory_space<vmem>>, vector<16x16x128xbf16>
    tpu.vector_store %arg7[%c0_29, %c0_30, %c0_31], %23 {strides = array<i32>} : memref<16x16x1152xbf16, #tpu.memory_space<vmem>>, vector<16x16x128xbf16>,
    %c0_32 = arith.constant 0 : index
    %c1_33 = arith.constant 1 : index
    %c0_34 = arith.constant 0 : index
    %25 = vector.load %arg6[%c0_32, %c1_33, %c0_34] : memref<18x18x128xbf16, #tpu.memory_space<vmem>>, vector<16x16x128xbf16>
    %c0_35 = arith.constant 0 : index
    %c0_36 = arith.constant 0 : index
    %c128 = arith.constant 128 : index
    %26 = vector.load %arg7[%c0_35, %c0_36, %c128] : memref<16x16x1152xbf16, #tpu.memory_space<vmem>>, vector<16x16x128xbf16>
    tpu.vector_store %arg7[%c0_35, %c0_36, %c128], %25 {strides = array<i32>} : memref<16x16x1152xbf16, #tpu.memory_space<vmem>>, vector<16x16x128xbf16>,
    %c0_37 = arith.constant 0 : index
    %c2_38 = arith.constant 2 : index
    %c0_39 = arith.constant 0 : index
    %27 = vector.load %arg6[%c0_37, %c2_38, %c0_39] : memref<18x18x128xbf16, #tpu.memory_space<vmem>>, vector<16x16x128xbf16>
    %c0_40 = arith.constant 0 : index
    %c0_41 = arith.constant 0 : index
    %c256 = arith.constant 256 : index
    %28 = vector.load %arg7[%c0_40, %c0_41, %c256] : memref<16x16x1152xbf16, #tpu.memory_space<vmem>>, vector<16x16x128xbf16>
    tpu.vector_store %arg7[%c0_40, %c0_41, %c256], %27 {strides = array<i32>} : memref<16x16x1152xbf16, #tpu.memory_space<vmem>>, vector<16x16x128xbf16>,
    %c1_42 = arith.constant 1 : index
    %c0_43 = arith.constant 0 : index
    %c0_44 = arith.constant 0 : index
    %29 = vector.load %arg6[%c1_42, %c0_43, %c0_44] : memref<18x18x128xbf16, #tpu.memory_space<vmem>>, vector<16x16x128xbf16>
    %c0_45 = arith.constant 0 : index
    %c0_46 = arith.constant 0 : index
    %c384 = arith.constant 384 : index
    %30 = vector.load %arg7[%c0_45, %c0_46, %c384] : memref<16x16x1152xbf16, #tpu.memory_space<vmem>>, vector<16x16x128xbf16>
    tpu.vector_store %arg7[%c0_45, %c0_46, %c384], %29 {strides = array<i32>} : memref<16x16x1152xbf16, #tpu.memory_space<vmem>>, vector<16x16x128xbf16>,
    %c1_47 = arith.constant 1 : index
    %c1_48 = arith.constant 1 : index
    %c0_49 = arith.constant 0 : index
    %31 = vector.load %arg6[%c1_47, %c1_48, %c0_49] : memref<18x18x128xbf16, #tpu.memory_space<vmem>>, vector<16x16x128xbf16>
    %c0_50 = arith.constant 0 : index
    %c0_51 = arith.constant 0 : index
    %c512 = arith.constant 512 : index
    %32 = vector.load %arg7[%c0_50, %c0_51, %c512] : memref<16x16x1152xbf16, #tpu.memory_space<vmem>>, vector<16x16x128xbf16>
    tpu.vector_store %arg7[%c0_50, %c0_51, %c512], %31 {strides = array<i32>} : memref<16x16x1152xbf16, #tpu.memory_space<vmem>>, vector<16x16x128xbf16>,
    %c1_52 = arith.constant 1 : index
    %c2_53 = arith.constant 2 : index
    %c0_54 = arith.constant 0 : index
    %33 = vector.load %arg6[%c1_52, %c2_53, %c0_54] : memref<18x18x128xbf16, #tpu.memory_space<vmem>>, vector<16x16x128xbf16>
    %c0_55 = arith.constant 0 : index
    %c0_56 = arith.constant 0 : index
    %c640 = arith.constant 640 : index
    %34 = vector.load %arg7[%c0_55, %c0_56, %c640] : memref<16x16x1152xbf16, #tpu.memory_space<vmem>>, vector<16x16x128xbf16>
    tpu.vector_store %arg7[%c0_55, %c0_56, %c640], %33 {strides = array<i32>} : memref<16x16x1152xbf16, #tpu.memory_space<vmem>>, vector<16x16x128xbf16>,
    %c2_57 = arith.constant 2 : index
    %c0_58 = arith.constant 0 : index
    %c0_59 = arith.constant 0 : index
    %35 = vector.load %arg6[%c2_57, %c0_58, %c0_59] : memref<18x18x128xbf16, #tpu.memory_space<vmem>>, vector<16x16x128xbf16>
    %c0_60 = arith.constant 0 : index
    %c0_61 = arith.constant 0 : index
    %c768 = arith.constant 768 : index
    %36 = vector.load %arg7[%c0_60, %c0_61, %c768] : memref<16x16x1152xbf16, #tpu.memory_space<vmem>>, vector<16x16x128xbf16>
    tpu.vector_store %arg7[%c0_60, %c0_61, %c768], %35 {strides = array<i32>} : memref<16x16x1152xbf16, #tpu.memory_space<vmem>>, vector<16x16x128xbf16>,
    %c2_62 = arith.constant 2 : index
    %c1_63 = arith.constant 1 : index
    %c0_64 = arith.constant 0 : index
    %37 = vector.load %arg6[%c2_62, %c1_63, %c0_64] : memref<18x18x128xbf16, #tpu.memory_space<vmem>>, vector<16x16x128xbf16>
    %c0_65 = arith.constant 0 : index
    %c0_66 = arith.constant 0 : index
    %c896 = arith.constant 896 : index
    %38 = vector.load %arg7[%c0_65, %c0_66, %c896] : memref<16x16x1152xbf16, #tpu.memory_space<vmem>>, vector<16x16x128xbf16>
    tpu.vector_store %arg7[%c0_65, %c0_66, %c896], %37 {strides = array<i32>} : memref<16x16x1152xbf16, #tpu.memory_space<vmem>>, vector<16x16x128xbf16>,
    %c2_67 = arith.constant 2 : index
    %c2_68 = arith.constant 2 : index
    %c0_69 = arith.constant 0 : index
    %39 = vector.load %arg6[%c2_67, %c2_68, %c0_69] : memref<18x18x128xbf16, #tpu.memory_space<vmem>>, vector<16x16x128xbf16>
    %c0_70 = arith.constant 0 : index
    %c0_71 = arith.constant 0 : index
    %c1024 = arith.constant 1024 : index
    %40 = vector.load %arg7[%c0_70, %c0_71, %c1024] : memref<16x16x1152xbf16, #tpu.memory_space<vmem>>, vector<16x16x128xbf16>
    tpu.vector_store %arg7[%c0_70, %c0_71, %c1024], %39 {strides = array<i32>} : memref<16x16x1152xbf16, #tpu.memory_space<vmem>>, vector<16x16x128xbf16>,
    %c0_72 = arith.constant 0 : index
    %c0_73 = arith.constant 0 : index
    %c0_74 = arith.constant 0 : index
    %41 = vector.load %arg7[%c0_72, %c0_73, %c0_74] : memref<16x16x1152xbf16, #tpu.memory_space<vmem>>, vector<16x16x1152xbf16>
    %42 = vector.shape_cast %41 : vector<16x16x1152xbf16> to vector<256x1152xbf16>
    %c0_75 = arith.constant 0 : index
    %c0_76 = arith.constant 0 : index
    %43 = vector.load %arg3[%c0_75, %c0_76] : memref<1152x128xbf16, #tpu.memory_space<vmem>>, vector<1152x128xbf16>
    %cst_77 = arith.constant dense<0.000000e+00> : vector<256x128xf32>
    %44 = tpu.matmul %42, %43, %cst_77 {dimension_numbers = #tpu.dot_dimension_numbers<[1], [0], [0], [1], [0, 0, 1, 1], [], []>} : vector<256x1152xbf16>, vector<1152x128xbf16>, vector<256x128xf32> -> vector<256x128xf32>
    %45 = vector.broadcast %8 : vector<1x128xf32> to vector<256x128xf32>
    %46 = arith.mulf %44, %45 : vector<256x128xf32>
    %47 = vector.broadcast %9 : vector<1x128xf32> to vector<256x128xf32>
    %48 = arith.addf %46, %47 : vector<256x128xf32>
    %cst_78 = arith.constant 0.000000e+00 : f32
    %49 = vector.broadcast %cst_78 : f32 to vector<256x128xf32>
    %50 = arith.cmpf oge, %48, %49 : vector<256x128xf32>
    %51 = vector.broadcast %10 : vector<1x128xf32> to vector<256x128xf32>
    %52 = arith.mulf %51, %48 : vector<256x128xf32>
    %53 = arith.select %50, %48, %52 : vector<256x128xi1>, vector<256x128xf32>
    %54 = arith.truncf %53 : vector<256x128xf32> to vector<256x128xbf16>
    %55 = vector.shape_cast %54 : vector<256x128xbf16> to vector<16x16x128xbf16>
    %c1_79 = arith.constant 1 : index
    %c1_80 = arith.constant 1 : index
    %c0_81 = arith.constant 0 : index
    %56 = vector.load %arg6[%c1_79, %c1_80, %c0_81] : memref<18x18x128xbf16, #tpu.memory_space<vmem>>, vector<16x16x128xbf16>
    tpu.vector_store %arg6[%c1_79, %c1_80, %c0_81], %55 {strides = array<i32>} : memref<18x18x128xbf16, #tpu.memory_space<vmem>>, vector<16x16x128xbf16>,
    %c0_82 = arith.constant 0 : index
    %c0_83 = arith.constant 0 : index
    %c0_84 = arith.constant 0 : index
    %57 = vector.load %arg6[%c0_82, %c0_83, %c0_84] : memref<18x18x128xbf16, #tpu.memory_space<vmem>>, vector<16x16x128xbf16>
    %c0_85 = arith.constant 0 : index
    %c0_86 = arith.constant 0 : index
    %c0_87 = arith.constant 0 : index
    %58 = vector.load %arg7[%c0_85, %c0_86, %c0_87] : memref<16x16x1152xbf16, #tpu.memory_space<vmem>>, vector<16x16x128xbf16>
    tpu.vector_store %arg7[%c0_85, %c0_86, %c0_87], %57 {strides = array<i32>} : memref<16x16x1152xbf16, #tpu.memory_space<vmem>>, vector<16x16x128xbf16>,
    %c0_88 = arith.constant 0 : index
    %c1_89 = arith.constant 1 : index
    %c0_90 = arith.constant 0 : index
    %59 = vector.load %arg6[%c0_88, %c1_89, %c0_90] : memref<18x18x128xbf16, #tpu.memory_space<vmem>>, vector<16x16x128xbf16>
    %c0_91 = arith.constant 0 : index
    %c0_92 = arith.constant 0 : index
    %c128_93 = arith.constant 128 : index
    %60 = vector.load %arg7[%c0_91, %c0_92, %c128_93] : memref<16x16x1152xbf16, #tpu.memory_space<vmem>>, vector<16x16x128xbf16>
    tpu.vector_store %arg7[%c0_91, %c0_92, %c128_93], %59 {strides = array<i32>} : memref<16x16x1152xbf16, #tpu.memory_space<vmem>>, vector<16x16x128xbf16>,
    %c0_94 = arith.constant 0 : index
    %c2_95 = arith.constant 2 : index
    %c0_96 = arith.constant 0 : index
    %61 = vector.load %arg6[%c0_94, %c2_95, %c0_96] : memref<18x18x128xbf16, #tpu.memory_space<vmem>>, vector<16x16x128xbf16>
    %c0_97 = arith.constant 0 : index
    %c0_98 = arith.constant 0 : index
    %c256_99 = arith.constant 256 : index
    %62 = vector.load %arg7[%c0_97, %c0_98, %c256_99] : memref<16x16x1152xbf16, #tpu.memory_space<vmem>>, vector<16x16x128xbf16>
    tpu.vector_store %arg7[%c0_97, %c0_98, %c256_99], %61 {strides = array<i32>} : memref<16x16x1152xbf16, #tpu.memory_space<vmem>>, vector<16x16x128xbf16>,
    %c1_100 = arith.constant 1 : index
    %c0_101 = arith.constant 0 : index
    %c0_102 = arith.constant 0 : index
    %63 = vector.load %arg6[%c1_100, %c0_101, %c0_102] : memref<18x18x128xbf16, #tpu.memory_space<vmem>>, vector<16x16x128xbf16>
    %c0_103 = arith.constant 0 : index
    %c0_104 = arith.constant 0 : index
    %c384_105 = arith.constant 384 : index
    %64 = vector.load %arg7[%c0_103, %c0_104, %c384_105] : memref<16x16x1152xbf16, #tpu.memory_space<vmem>>, vector<16x16x128xbf16>
    tpu.vector_store %arg7[%c0_103, %c0_104, %c384_105], %63 {strides = array<i32>} : memref<16x16x1152xbf16, #tpu.memory_space<vmem>>, vector<16x16x128xbf16>,
    %c1_106 = arith.constant 1 : index
    %c1_107 = arith.constant 1 : index
    %c0_108 = arith.constant 0 : index
    %65 = vector.load %arg6[%c1_106, %c1_107, %c0_108] : memref<18x18x128xbf16, #tpu.memory_space<vmem>>, vector<16x16x128xbf16>
    %c0_109 = arith.constant 0 : index
    %c0_110 = arith.constant 0 : index
    %c512_111 = arith.constant 512 : index
    %66 = vector.load %arg7[%c0_109, %c0_110, %c512_111] : memref<16x16x1152xbf16, #tpu.memory_space<vmem>>, vector<16x16x128xbf16>
    tpu.vector_store %arg7[%c0_109, %c0_110, %c512_111], %65 {strides = array<i32>} : memref<16x16x1152xbf16, #tpu.memory_space<vmem>>, vector<16x16x128xbf16>,
    %c1_112 = arith.constant 1 : index
    %c2_113 = arith.constant 2 : index
    %c0_114 = arith.constant 0 : index
    %67 = vector.load %arg6[%c1_112, %c2_113, %c0_114] : memref<18x18x128xbf16, #tpu.memory_space<vmem>>, vector<16x16x128xbf16>
    %c0_115 = arith.constant 0 : index
    %c0_116 = arith.constant 0 : index
    %c640_117 = arith.constant 640 : index
    %68 = vector.load %arg7[%c0_115, %c0_116, %c640_117] : memref<16x16x1152xbf16, #tpu.memory_space<vmem>>, vector<16x16x128xbf16>
    tpu.vector_store %arg7[%c0_115, %c0_116, %c640_117], %67 {strides = array<i32>} : memref<16x16x1152xbf16, #tpu.memory_space<vmem>>, vector<16x16x128xbf16>,
    %c2_118 = arith.constant 2 : index
    %c0_119 = arith.constant 0 : index
    %c0_120 = arith.constant 0 : index
    %69 = vector.load %arg6[%c2_118, %c0_119, %c0_120] : memref<18x18x128xbf16, #tpu.memory_space<vmem>>, vector<16x16x128xbf16>
    %c0_121 = arith.constant 0 : index
    %c0_122 = arith.constant 0 : index
    %c768_123 = arith.constant 768 : index
    %70 = vector.load %arg7[%c0_121, %c0_122, %c768_123] : memref<16x16x1152xbf16, #tpu.memory_space<vmem>>, vector<16x16x128xbf16>
    tpu.vector_store %arg7[%c0_121, %c0_122, %c768_123], %69 {strides = array<i32>} : memref<16x16x1152xbf16, #tpu.memory_space<vmem>>, vector<16x16x128xbf16>,
    %c2_124 = arith.constant 2 : index
    %c1_125 = arith.constant 1 : index
    %c0_126 = arith.constant 0 : index
    %71 = vector.load %arg6[%c2_124, %c1_125, %c0_126] : memref<18x18x128xbf16, #tpu.memory_space<vmem>>, vector<16x16x128xbf16>
    %c0_127 = arith.constant 0 : index
    %c0_128 = arith.constant 0 : index
    %c896_129 = arith.constant 896 : index
    %72 = vector.load %arg7[%c0_127, %c0_128, %c896_129] : memref<16x16x1152xbf16, #tpu.memory_space<vmem>>, vector<16x16x128xbf16>
    tpu.vector_store %arg7[%c0_127, %c0_128, %c896_129], %71 {strides = array<i32>} : memref<16x16x1152xbf16, #tpu.memory_space<vmem>>, vector<16x16x128xbf16>,
    %c2_130 = arith.constant 2 : index
    %c2_131 = arith.constant 2 : index
    %c0_132 = arith.constant 0 : index
    %73 = vector.load %arg6[%c2_130, %c2_131, %c0_132] : memref<18x18x128xbf16, #tpu.memory_space<vmem>>, vector<16x16x128xbf16>
    %c0_133 = arith.constant 0 : index
    %c0_134 = arith.constant 0 : index
    %c1024_135 = arith.constant 1024 : index
    %74 = vector.load %arg7[%c0_133, %c0_134, %c1024_135] : memref<16x16x1152xbf16, #tpu.memory_space<vmem>>, vector<16x16x128xbf16>
    tpu.vector_store %arg7[%c0_133, %c0_134, %c1024_135], %73 {strides = array<i32>} : memref<16x16x1152xbf16, #tpu.memory_space<vmem>>, vector<16x16x128xbf16>,
    %c0_136 = arith.constant 0 : index
    %c0_137 = arith.constant 0 : index
    %c0_138 = arith.constant 0 : index
    %75 = vector.load %arg7[%c0_136, %c0_137, %c0_138] : memref<16x16x1152xbf16, #tpu.memory_space<vmem>>, vector<16x16x1152xbf16>
    %76 = vector.shape_cast %75 : vector<16x16x1152xbf16> to vector<256x1152xbf16>
    %c0_139 = arith.constant 0 : index
    %c0_140 = arith.constant 0 : index
    %77 = vector.load %arg4[%c0_139, %c0_140] : memref<1152x128xbf16, #tpu.memory_space<vmem>>, vector<1152x128xbf16>
    %cst_141 = arith.constant dense<0.000000e+00> : vector<256x128xf32>
    %78 = tpu.matmul %76, %77, %cst_141 {dimension_numbers = #tpu.dot_dimension_numbers<[1], [0], [0], [1], [0, 0, 1, 1], [], []>} : vector<256x1152xbf16>, vector<1152x128xbf16>, vector<256x128xf32> -> vector<256x128xf32>
    %79 = vector.broadcast %11 : vector<1x128xf32> to vector<256x128xf32>
    %80 = arith.mulf %78, %79 : vector<256x128xf32>
    %81 = vector.broadcast %12 : vector<1x128xf32> to vector<256x128xf32>
    %82 = arith.addf %80, %81 : vector<256x128xf32>
    %83 = vector.shape_cast %82 : vector<256x128xf32> to vector<16x16x128xf32>
    %84 = arith.addf %83, %14 : vector<16x16x128xf32>
    %c0_142 = arith.constant 0 : index
    %c0_143 = arith.constant 0 : index
    %c0_144 = arith.constant 0 : index
    %c0_145 = arith.constant 0 : index
    %85 = vector.load %arg5[%c0_142, %c0_143, %c0_144, %c0_145] : memref<1x16x16x128xf32, #tpu.memory_space<vmem>>, vector<1x16x16x128xf32>
    %86 = vector.shape_cast %85 : vector<1x16x16x128xf32> to vector<16x16x128xf32>
    %87 = vector.shape_cast %84 : vector<16x16x128xf32> to vector<1x16x16x128xf32>
    tpu.vector_store %arg5[%c0_142, %c0_143, %c0_144, %c0_145], %87 {strides = array<i32>} : memref<1x16x16x128xf32, #tpu.memory_space<vmem>>, vector<1x16x16x128xf32>,
    return
  }
  func.func @transform_0(%arg0: i32) -> (i32, i32, i32, i32) {
    %c0_i32 = arith.constant 0 : i32
    %c0_i32_0 = arith.constant 0 : i32
    %c0_i32_1 = arith.constant 0 : i32
    %c0_i32_2 = arith.constant 0 : i32
    return %arg0, %c0_i32, %c0_i32_0, %c0_i32_1 : i32, i32, i32, i32
  }
  func.func @transform_1(%arg0: i32) -> (i32, i32) {
    %c0_i32 = arith.constant 0 : i32
    %c0_i32_0 = arith.constant 0 : i32
    %c0_i32_1 = arith.constant 0 : i32
    return %c0_i32, %c0_i32_0 : i32, i32
  }
  func.func @transform_2(%arg0: i32) -> (i32, i32) {
    %c0_i32 = arith.constant 0 : i32
    %c0_i32_0 = arith.constant 0 : i32
    %c0_i32_1 = arith.constant 0 : i32
    return %c0_i32, %c0_i32_0 : i32, i32
  }
  func.func @transform_3(%arg0: i32) -> (i32, i32) {
    %c0_i32 = arith.constant 0 : i32
    %c0_i32_0 = arith.constant 0 : i32
    %c0_i32_1 = arith.constant 0 : i32
    return %c0_i32, %c0_i32_0 : i32, i32
  }
  func.func @transform_4(%arg0: i32) -> (i32, i32, i32, i32) {
    %c0_i32 = arith.constant 0 : i32
    %c0_i32_0 = arith.constant 0 : i32
    %c0_i32_1 = arith.constant 0 : i32
    %c0_i32_2 = arith.constant 0 : i32
    return %arg0, %c0_i32, %c0_i32_0, %c0_i32_1 : i32, i32, i32, i32
  }
}

</mosaic_0001>

<bundles_post_ra>
// kernel: tpu_custom_call.1
= control target key start
LH: loop header
LB: loop body
LE: loop exit
PB: predicated region body
PF: predicated region fallthrough
CT: control target
= control target key end

     0   :  { %9 = vsyncpa [#allocation5], 0  ;;  %s14286_s0 = inlined_call_operand.hbm [shape: f32[2,16,16,128], index: 0, kind: input, shape index: {}]   ;;  %s14287_s1 = inlined_call_operand.hbm [shape: f32[8,128], index: 1, kind: input, shape index: {}]   ;;  %s14288_s2 = inlined_call_operand.hbm [shape: bf16[1152,128], index: 2, kind: input, shape index: {}]   ;;  %s14289_s3 = inlined_call_operand.hbm [shape: bf16[1152,128], index: 3, kind: input, shape index: {}]   ;;  %s14290_s4 = inlined_call_operand.hbm [shape: f32[2,16,16,128], index: 4, kind: output, shape index: {}]  }
   0x1   :  { %11 = vsyncpa [#allocation5 + $0x1], 0 }
   0x2   :  { %12 = vsyncpa [#allocation8], 0 }
   0x3   :  { %13 = vsyncpa [#allocation11], 0 }
   0x4   :  { %14 = vsyncpa [#allocation6], 0 }
   0x5   :  { %16 = vsyncpa [#allocation6 + $0x1], 0  ;;  %s12621_s15 = smov 0   ;;  %s12623_s16 = smov 0  }
   0x6   :  { %s12625_s17 = smov 0   ;;  %s12627_s18 = smov 0  }
   0x7 LB: > { %s12642_s19 = sadd.s32 4294967295, %s12582_s18   ;;  %s9828_s20 = sadd.s32 4294967294, %s12582_s18   ;;  %s12582_s18 = sphi %s12627_s18, %s14321_s18   ;;  %s12578_s17 = sphi %s12625_s17, %s14320_s17   ;;  %s12574_s16 = sphi %s12623_s16, %s14319_s16   ;;  %s12570_s15 = sphi %s12621_s15, %s14318_s15  }
   0x8   : > { %p42_p0 = scmp.ne.s32.totalorder %s12574_s16, %s12570_s15  ;;  %p14291_p1 = scmp.eq.s32.totalorder %s12642_s19, 0 }
   0x9   : > { %p135_p3 = scmp.eq.s32.totalorder %s9828_s20, 1  ;;  %p9829_p5 = scmp.ge.s32.totalorder %s12582_s18, 1 }
   0xa   : > { %p12651_p4 = por %p14291_p1, %p42_p0  ;;  %p142_p7 = scmp.lt.s32.totalorder %s12582_s18, 3 }
   0xb   : > { %p12656_p6 = por %p135_p3, %p42_p0  ;;  %s12584_s24 = smov [#allocation7]  }
   0xc   : > { %s14294_s21 = scalar_select %p12651_p4, 1, 0 }
   0xd   : > { %s14295_s22 = scalar_select %p12656_p6, 1, 0 }
   0xe   : > { %p12661_p8 = pnand %p9829_p5, %p142_p7  ;;  %s155_s25 = sshll.u32 %s12584_s24, 4  ;;  %s156_s25 = int_to_ptr.vmem [resolvable:$true] %s155_s25 }
   0xf   : > { %s12585_s26 = smov [#allocation9]   ;;  %s12586_s29 = smov [#allocation10]  }
  0x10   : > { %s14296_s23 = scalar_select %p12661_p8, 1, 0 }
  0x11   : > { %p11665_p10 = pneg %p12661_p8  ;;  %s165_s27 = sshll.u32 %s12585_s26, 4  ;;  %s12674_s27 = int_to_ptr.vmem [resolvable:$true] %s165_s27 }
  0x12   : > { %s12676_s30 = sshll.u32 %s12586_s29, 4  ;;  %s12394_s7 = scalar_lea.hbm %s14287_s1, 128  ;;  %s179_s30 = int_to_ptr.vmem [resolvable:$true] %s12676_s30 }
  0x13   : > { %p12670_p11 = pnand %p11665_p10, %p14291_p1  ;;  %p12395_p12 = scmp.ne.s32.totalorder %s14287_s1, %s12394_s7 }
  0x14   : > { %p12401_p5 = scmp.lt.u32.totalorder %s12394_s7, %s14287_s1 }
  0x15   : > { %p12686_p13 = pneg %p12670_p11 }
  0x17   : > { %p12397_p0 = pnand %p12686_p13, %p12395_p12 }
  0x19   : > { %p12398_p3 = pneg %p12397_p0 }
  0x1b   : > { %p12403_p7 = pnand %p12401_p5, %p12398_p3 }
  0x1d   : > { %12406 = shalt.err (!%p12403_p7)
}
  0x1e   : > { %s12407_s13 = scalar_lea.vmem %s156_s25, 128  ;;  %p12415_p2 = scmp.lt.s32.totalorder %s156_s25, %s156_s25 }
  0x1f   : > { %p12408_p10 = scmp.ne.s32.totalorder %s156_s25, %s12407_s13  ;;  %p12416_p6 = scmp.lt.s32.totalorder %s12407_s13, %s12407_s13 }
  0x21   : > { %p12410_p9 = pnand %p12408_p10, %p12686_p13  ;;  %p12417_p4 = por %p12416_p6, %p12415_p2 }
  0x23   : > { %p12411_p1 = pneg %p12410_p9 }
  0x25   : > { %p12418_p8 = pnand %p12417_p4, %p12411_p1 }
  0x27   : > { %12421 = shalt.err (!%p12418_p8)
}
  0x28   : > { %11668 = dma.hbm_to_vmem [thread:$0]  (!%p12670_p11), %s14287_s1, 128, %s156_s25, [#allocation8]  }
  0x29   : > { %s12422_s29 = scalar_lea.hbm %s14288_s2, 9216 }
  0x2a   : > { %p12423_p9 = scmp.ne.s32.totalorder %s14288_s2, %s12422_s29  ;;  %p12429_p1 = scmp.lt.u32.totalorder %s12422_s29, %s14288_s2 }
  0x2c   : > { %p12425_p12 = pnand %p12423_p9, %p12686_p13 }
  0x2e   : > { %p12426_p2 = pneg %p12425_p12 }
  0x30   : > { %p12431_p4 = pnand %p12429_p1, %p12426_p2 }
  0x32   : > { %12434 = shalt.err (!%p12431_p4)
}
  0x33   : > { %s12435_s25 = scalar_lea.vmem %s12674_s27, 9216  ;;  %p12443_p3 = scmp.lt.s32.totalorder %s12674_s27, %s12674_s27 }
  0x34   : > { %p12436_p6 = scmp.ne.s32.totalorder %s12674_s27, %s12435_s25  ;;  %p12444_p5 = scmp.lt.s32.totalorder %s12435_s25, %s12435_s25 }
  0x36   : > { %p12438_p8 = pnand %p12436_p6, %p12686_p13  ;;  %p12445_p7 = por %p12444_p5, %p12443_p3 }
  0x38   : > { %p12439_p0 = pneg %p12438_p8 }
  0x3a   : > { %p12446_p10 = pnand %p12445_p7, %p12439_p0 }
  0x3c   : > { %12449 = shalt.err (!%p12446_p10)
}
  0x3d   : > { %s12587_s9 = smov 64   ;;  %s12588_s11 = smov 4  }
  0x3e   : > { %11671 = dma.hbm_to_vmem [thread:$0]  (!%p12670_p11), %s14288_s2, 9216, %s12674_s27, [#allocation8], %s12587_s9, %s12587_s9, %s12588_s11  }
  0x3f   : > { %s12450_s24 = scalar_lea.hbm %s14289_s3, 9216 }
  0x40   : > { %p12451_p9 = scmp.ne.s32.totalorder %s14289_s3, %s12450_s24  ;;  %p12457_p1 = scmp.lt.u32.totalorder %s12450_s24, %s14289_s3 }
  0x42   : > { %p12453_p12 = pnand %p12451_p9, %p12686_p13 }
  0x44   : > { %p12454_p2 = pneg %p12453_p12 }
  0x46   : > { %p12459_p4 = pnand %p12457_p1, %p12454_p2 }
  0x48   : > { %12462 = shalt.err (!%p12459_p4)
}
  0x49   : > { %s12463_s7 = scalar_lea.vmem %s179_s30, 9216  ;;  %p12471_p3 = scmp.lt.s32.totalorder %s179_s30, %s179_s30 }
  0x4a   : > { %p12464_p6 = scmp.ne.s32.totalorder %s179_s30, %s12463_s7  ;;  %p12472_p5 = scmp.lt.s32.totalorder %s12463_s7, %s12463_s7 }
  0x4c   : > { %p12466_p8 = pnand %p12464_p6, %p12686_p13  ;;  %p12473_p7 = por %p12472_p5, %p12471_p3 }
  0x4e   : > { %p12467_p0 = pneg %p12466_p8 }
  0x50   : > { %p12474_p10 = pnand %p12473_p7, %p12467_p0 }
  0x52   : > { %12477 = shalt.err (!%p12474_p10)
}
  0x53   : > { %11674 = dma.hbm_to_vmem [thread:$0]  (!%p12670_p11), %s14289_s3, 9216, %s179_s30, [#allocation11], %s12587_s9, %s12587_s9, %s12588_s11  }
  0x54   : > { %s12745_s10 = sadd.s32 1, %s12582_s18   ;;  %s29_s28 = sadd.s32 1, %s12578_s17 }
  0x55   : > { %s26_s25 = ssub.s32 %s12582_s18, %s12745_s10  ;;  %p36_p9 = scmp.ne.s32.totalorder %s12578_s17, %s12574_s16 }
  0x56   : > { %p27_p13 = scmp.eq.s32.totalorder %s26_s25, 0  ;;  %p37_p12 = scmp.eq.s32.totalorder %s12582_s18, 0 }
  0x57   : > { %p11686_p2 = scmp.lt.s32.totalorder %s12582_s18, 2  ;;  %p14299_p4 = scmp.eq.s32.totalorder %s12642_s19, 1 }
  0x58   : > { %s12755_s12 = scalar_select %p27_p13, %s12578_s17, %s29_s28  }
  0x59   : > { %p38_p1 = por %p37_p12, %p36_p9  ;;  %p12759_p6 = por %p14299_p4, %p36_p9 }
  0x5a   : > { %s192_s14 = sand.u32 1, %s12578_s17   ;;  %s10543_s20 = sshll.u32 %s12582_s18, 12 }
  0x5b   : > { %s9834_s30 = sshll.u32 %s192_s14, 8  ;;  %s12768_s24 = scalar_lea.hbm %s14286_s0, %s10543_s20 }
  0x5c   : > { %s196_s26 = scalar_lea.vmem [#allocation4], %s9834_s30  ;;  %p12770_p11 = pnand %p11686_p2, %p38_p1 }
  0x5d   : > { %s203_s29 = sshll.u32 %s196_s26, 4  ;;  %s12776_s6 = scalar_lea.sflag [#allocation5], %s192_s14  ;;  %s12774_s29 = int_to_ptr.vmem [resolvable:$true] %s203_s29 }
  0x5e   : > { %s12478_s7 = scalar_lea.hbm %s12768_s24, 4096  ;;  %p12480_p0 = pneg %p12770_p11 }
  0x5f   : > { %p12479_p8 = scmp.ne.s32.totalorder %s12768_s24, %s12478_s7  ;;  %s12483_s25 = scalar_lea.hbm %s14286_s0, 8192 }
  0x60   : > { %p12484_p7 = scmp.lt.u32.totalorder %s12768_s24, %s14286_s0  ;;  %p12485_p10 = scmp.lt.u32.totalorder %s12483_s25, %s12478_s7 }
  0x61   : > { %p12481_p3 = pnand %p12480_p0, %p12479_p8  ;;  %p12487_p9 = scmp.lt.u32.totalorder %s12478_s7, %s12768_s24 }
  0x62   : > { %p12486_p13 = por %p12485_p10, %p12484_p7 }
  0x63   : > { %p12482_p5 = pneg %p12481_p3 }
  0x64   : > { %p12488_p12 = por %p12487_p9, %p12486_p13 }
  0x66   : > { %p12489_p2 = pnand %p12488_p12, %p12482_p5 }
  0x68   : > { %12492 = shalt.err (!%p12489_p2)
}
  0x69   : > { %s12493_s14 = scalar_lea.vmem %s12774_s29, 4096  ;;  %s12589_s30 = smov [#allocation4]  }
  0x6a   : > { %p12494_p1 = scmp.ne.s32.totalorder %s12774_s29, %s12493_s14  ;;  %s12498_s9 = sshll.u32 %s12589_s30, 4  ;;  %s12499_s9 = int_to_ptr.vmem [resolvable:$false] %s12498_s9 }
  0x6b   : > { %s12500_s11 = scalar_lea.vmem %s12499_s9, 8192  ;;  %p12501_p3 = scmp.lt.s32.totalorder %s12774_s29, %s12499_s9 }
  0x6c   : > { %p12496_p4 = pnand %p12494_p1, %p12480_p0  ;;  %p12502_p7 = scmp.lt.s32.totalorder %s12500_s11, %s12493_s14 }
  0x6e   : > { %p12497_p8 = pneg %p12496_p4  ;;  %p12503_p10 = por %p12502_p7, %p12501_p3 }
  0x70   : > { %p12504_p13 = pnand %p12503_p10, %p12497_p8 }
  0x72   : > { %12507 = shalt.err (!%p12504_p13)
}
  0x73   : > { %s12590_s26 = smov 128   ;;  %s12591_s7 = smov 8  }
  0x74   : > { %11678 = dma.hbm_to_vmem [thread:$0]  (!%p12770_p11), %s12768_s24, 4096, %s12774_s29, %s12776_s6, %s12590_s26, %s12590_s26, %s12591_s7  }
  0x75   : > { %p14302_p0 = scmp.ne.s32.totalorder %s14296_s23, 0 }
  0x76   : > { %s12807_s27 = sand.u32 (!%p14302_p0), 1, %s12574_s16   ;;  %p14303_p5 = scmp.ne.s32.totalorder (!%p14302_p0), %s14294_s21, 0 }
  0x77   : > { %215 = sbr.rel (%p14302_p0) target bundleno = 1288 (0x508), region = 36  ;;  %s9838_s8 = sshll.u32 (!%p14302_p0), %s12807_s27, 8 }
  0x78   : > { %s218_s25 = scalar_lea.sflag (!%p14302_p0), [#allocation5], %s12807_s27  ;;  %s12813_s28 = scalar_lea.vmem (!%p14302_p0), [#allocation4], %s9838_s8 }
  0x7e   : > { %12553 = dma.done.wait (%p14303_p5), %s218_s25, 4096  }
  0x7f   : > { %12555 = vsyncadd (%p14303_p5), %s218_s25, 4294963200  ;;  %p14304_p11 = scmp.eq.s32.totalorder %s12642_s19, 0 }
  0x81   : > { %12557 = dma.done.wait (%p14304_p11), [#allocation8], 9344   ;;  %p14305_p9 = pmov %p14304_p11 }
  0x83   : > { %12559 = vsyncadd (%p14305_p9), [#allocation8], 4294957952  ;;  %p14306_p12 = pmov %p14305_p9 }
  0x84   : > { %p14307_p2 = pmov %p14305_p9 }
  0x85   : > { %12561 = dma.done.wait (%p14306_p12), [#allocation11], 9216  }
  0x86   : > { %12563 = vsyncadd (%p14307_p2), [#allocation11], 4294958080  ;;  %v12592_v0 = vmov 0   ;;  %v11733_v1 = vld [vmem:[#allocation9 + $0x40] sm:$0xff]   ;;  %v11737_v5 = vld [vmem:[#allocation9 + $0x48] sm:$0xff]   ;;  %vm266_vm2 = vcmask 1040384  }
  0x87   : > { %259 = vst [vmem:[#allocation2] sm:$0xf] %v12592_v0  ;;  %260 = vst [vmem:[#allocation2 + $0x4] sm:$0xf] %v12592_v0  ;;  %v11734_v2 = vld [vmem:[#allocation9 + $0xc0] sm:$0xff]   ;;  %10609 = vmatprep.subr.bf16.mxu0 %v11733_v1  ;;  %v11738_v6 = vld [vmem:[#allocation9 + $0xc8] sm:$0xff]  }
  0x88   : > { %261 = vst [vmem:[#allocation2 + $0x8] sm:$0x1] %v12592_v0  ;;  %263 = vst [vmem:[#allocation2 + $0xcc] sm:$0xf] %v12592_v0  ;;  %v11735_v3 = vld [vmem:[#allocation9] sm:$0xff]   ;;  %10721 = vmatprep.subr.bf16.mxu1 %v11734_v2  ;;  %v11739_v7 = vld [vmem:[#allocation9 + $0x8] sm:$0xff]  }
  0x89   : > { %264 = vst [vmem:[#allocation2 + $0xd0] sm:$0xf] %v12592_v0  ;;  %265 = vst [vmem:[#allocation2 + $0xd4] sm:$0x1] %v12592_v0  ;;  %v11736_v4 = vld [vmem:[#allocation9 + $0x80] sm:$0xff]   ;;  %10610 = vmatpush3.bf16.msra.mxu0 %v11735_v3  ;;  %v11740_v8 = vld [vmem:[#allocation9 + $0x88] sm:$0xff]  }
  0x8a   : > { %10722 = vmatpush3.bf16.msra.mxu1 %v11736_v4  ;;  %10611 = vmatprep.subr.bf16.mxu0 %v11737_v5  ;;  %v11741_v9 = vld [vmem:[#allocation9 + $0x50] sm:$0xff]   ;;  %vm323_vm0 = vsmask.f32 7938  ;;  %v11745_v13 = vld [vmem:[#allocation9 + $0x58] sm:$0xff]   ;;  %vm267_vm1 = vsmask.f32 256 }
  0x8b   : > { %10723 = vmatprep.subr.bf16.mxu1 %v11738_v6  ;;  %v11742_v10 = vld [vmem:[#allocation9 + $0xd0] sm:$0xff]   ;;  %v11746_v14 = vld [vmem:[#allocation9 + $0xd8] sm:$0xff]   ;;  %v11749_v17 = vld [vmem:[#allocation9 + $0x60] sm:$0xff]   ;;  %vm909_vm5 = vcmask 1043456   ;;  %vm1343_vm6 = vsmask.f32 7424 }
  0x8c   : > { %v11743_v11 = vld [vmem:[#allocation9 + $0x10] sm:$0xff]   ;;  %v11747_v15 = vld [vmem:[#allocation9 + $0x18] sm:$0xff]   ;;  %v11750_v18 = vld [vmem:[#allocation9 + $0xe0] sm:$0xff]   ;;  %vm586_vm7 = vsmask.f32 4368  ;;  %vm1744_vm10 = vcmask 1046528  }
  0x8d   : > { %10612 = vmatpush3.bf16.msra.mxu0 %v11739_v7  ;;  %v11744_v12 = vld [vmem:[#allocation9 + $0x90] sm:$0xff]   ;;  %v11748_v16 = vld [vmem:[#allocation9 + $0x98] sm:$0xff]   ;;  %v11751_v19 = vld [vmem:[#allocation9 + $0x20] sm:$0xff]   ;;  %s14087_s21 = scalar_lea.vmem [#allocation12], %s9838_s8  ;;  %s10608_s23 = sshll.u32 %s12642_s19, 12 }
  0x8e   : > { %10724 = vmatpush3.bf16.msra.mxu1 %v11740_v8  ;;  %10613 = vmatprep.subr.bf16.mxu0 %v11741_v9  ;;  %v11752_v20 = vld [vmem:[#allocation9 + $0xa0] sm:$0xff]   ;;  %v11753_v21 = vld [vmem:[#allocation9 + $0x68] sm:$0xff]   ;;  %vm12828_vm3 = vmand %vm266_vm2, %vm323_vm0  ;;  %s9726_s24 = sshll.u32 %s14087_s21, 4  ;;  %s14236_s19 = scalar_lea.hbm %s14290_s4, %s10608_s23  ;;  %s14238_s24 = int_to_ptr.vmem [resolvable:$true] %s9726_s24 }
  0x8f   : > { %10725 = vmatprep.subr.bf16.mxu1 %v11742_v10  ;;  %v11754_v22 = vld [vmem:[#allocation9 + $0xe8] sm:$0xff]   ;;  %vm12833_vm4 = vmand %vm266_vm2, %vm267_vm1  ;;  %v11757_v27 = vld [vmem:[#allocation9 + $0x70] sm:$0xff]   ;;  %s9713_s6 = scalar_lea.sflag [#allocation6], %s12807_s27  ;;  %s12508_s20 = scalar_lea.vmem %s14238_s24, 4096 }
  0x90   : > { %v11755_v23 = vld [vmem:[#allocation9 + $0x28] sm:$0xff]   ;;  %v11758_v28 = vld [vmem:[#allocation9 + $0xf0] sm:$0xff]   ;;  %v11761_v31 = vld [vmem:[#allocation9 + $0x78] sm:$0xff]   ;;  %p12509_p1 = scmp.ne.s32.totalorder %s14238_s24, %s12508_s20  ;;  %s12593_s14 = smov [#allocation12]  }
  0x91   : > { %10614 = vmatpush3.bf16.msra.mxu0 %v11743_v11  ;;  %v11756_v25 = vld [vmem:[#allocation9 + $0xa8] sm:$0xff]   ;;  %v11759_v29 = vld [vmem:[#allocation9 + $0x30] sm:$0xff]   ;;  %v11762_v32 = vld [vmem:[#allocation9 + $0xf8] sm:$0xff]   ;;  %s12512_s30 = sshll.u32 %s12593_s14, 4  ;;  %s12513_s30 = int_to_ptr.vmem [resolvable:$false] %s12512_s30 }
  0x92   : > { %10726 = vmatpush3.bf16.msra.mxu1 %v11744_v12  ;;  %10615 = vmatprep.subr.bf16.mxu0 %v11745_v13  ;;  %v11760_v30 = vld [vmem:[#allocation9 + $0xb0] sm:$0xff]   ;;  %v11763_v33 = vld [vmem:[#allocation9 + $0x38] sm:$0xff]   ;;  %v269_v35 = vld [vmem:[#allocation2] sm:$0x1]  ;;  %p12510_p4 = pnand %p12509_p1, %p12759_p6  ;;  %s12514_s9 = scalar_lea.vmem %s12513_s30, 8192 }
  0x93   : > { %10727 = vmatprep.subr.bf16.mxu1 %v11746_v14  ;;  %v11764_v34 = vld [vmem:[#allocation9 + $0xb8] sm:$0xff]   ;;  %v325_v36 = vld [vmem:[#allocation2 + $0x8] sm:$0x1]  ;;  %v270_v37 = vsel %vm12833_vm4, 0, %v269_v35  ;;  %v272_v39 = vld [vmem:[#allocation2 + $0xc] sm:$0x1]  ;;  %p12515_p3 = scmp.lt.s32.totalorder %s14238_s24, %s12513_s30  ;;  %p12516_p7 = scmp.lt.s32.totalorder %s12514_s9, %s12508_s20 }
  0x94   : > { %v326_v38 = vsel %vm12828_vm3, 0, %v325_v36  ;;  %v12841_v40 = vld [vmem:[#allocation7] ss:$0 sm:$0xff]  ;;  %271 = vst [vmem:[#allocation2] sm:$0x1] %v270_v37  ;;  %v273_v41 = vsel %vm12833_vm4, 0, %v272_v39  ;;  %vm12873_vm8 = vmand %vm909_vm5, %vm323_vm0  ;;  %p12511_p8 = pneg %p12510_p4 }
  0x95   : > { %10616 = vmatpush3.bf16.msra.mxu0 %v11747_v15  ;;  %327 = vst [vmem:[#allocation2 + $0x8] sm:$0x1] %v326_v38  ;;  %v12845_v42 = vld [vmem:[#allocation7 + $0x1] ss:$0 sm:$0xff]  ;;  %v387_v44 = vld [vmem:[%s12813_s28 + $0x8] sm:$0xff]  ;;  %v388_v57 = vld [vmem:[%s12813_s28 + $0x10] sm:$0xff]  ;;  %p12517_p10 = por %p12516_p7, %p12515_p3 }
  0x96   : > { %10728 = vmatpush3.bf16.msra.mxu1 %v11748_v16  ;;  %10617 = vmatprep.subr.bf16.mxu0 %v11749_v17  ;;  %v386_v43 = vld [vmem:[%s12813_s28] sm:$0xff]  ;;  %274 = vst [vmem:[#allocation2 + $0xc] sm:$0x1] %v273_v41  ;;  %v423_v46 = vmul.f32 %v12841_v40, %v387_v44  ;;  %v12851_v47 = vld [vmem:[#allocation2] sm:$0xfe]   ;;  %v389_v58 = vld [vmem:[%s12813_s28 + $0x18] sm:$0xff]  ;;  %v424_v61 = vmul.f32 %v12841_v40, %v388_v57 }
  0x97   : > { %10729 = vmatprep.subr.bf16.mxu1 %v11750_v18  ;;  %v422_v45 = vmul.f32 %v12841_v40, %v386_v43  ;;  %v11771_v50 = vld [vmem:[#allocation9 + $0x140] sm:$0xff]   ;;  %v328_v51 = vld [vmem:[#allocation2 + $0x14] sm:$0x1]  ;;  %v275_v52 = vld [vmem:[#allocation2 + $0x18] sm:$0x1]  ;;  %v1745_v60 = vrot.slane %v12851_v47, 1  ;;  %v425_v62 = vmul.f32 %v12841_v40, %v389_v58  ;;  %p12518_p13 = pnand %p12517_p10, %p12511_p8 }
  0x98   : > { %v459_v49 = vadd.f32 %v12845_v42, %v423_v46  ;;  %v329_v55 = vsel %vm12828_vm3, 0, %v328_v51  ;;  %v276_v56 = vsel %vm12833_vm4, 0, %v275_v52  ;;  %v331_v59 = vld [vmem:[#allocation2 + $0x20] sm:$0x1]  ;;  %v390_v0 = vld [vmem:[%s12813_s28 + $0x20] sm:$0xff]  ;;  %v460_v9 = vadd.f32 %v12845_v42, %v424_v61  ;;  %vm12880_vm9 = vmor %vm267_vm1, %vm586_vm7 }
  0x99   : > { %10618 = vmatpush3.bf16.msra.mxu0 %v11751_v19  ;;  %v458_v48 = vadd.f32 %v12845_v42, %v422_v45  ;;  %330 = vst [vmem:[#allocation2 + $0x14] sm:$0x1] %v329_v55  ;;  %277 = vst [vmem:[#allocation2 + $0x18] sm:$0x1] %v276_v56  ;;  %v332_v63 = vsel %vm12828_vm3, 0, %v331_v59  ;;  %v391_v1 = vld [vmem:[%s12813_s28 + $0x28] sm:$0xff]  ;;  %v426_v4 = vmul.f32 %v12841_v40, %v390_v0 }
  0x9a   : > { %10730 = vmatpush3.bf16.msra.mxu1 %v11752_v20  ;;  %10619 = vmatprep.subr.bf16.mxu0 %v11753_v21  ;;  %v10545_v54 = vpack.c.bf16 %v459_v49, %v459_v49  ;;  %333 = vst [vmem:[#allocation2 + $0x20] sm:$0x1] %v332_v63  ;;  %v461_v14 = vadd.f32 %v12845_v42, %v425_v62  ;;  %v278_v19 = vld [vmem:[#allocation2 + $0x24] sm:$0x1]  ;;  %v11785_v41 = vld [vmem:[#allocation9 + $0x148] sm:$0xff]  }
  0x9b   : > { %10731 = vmatprep.subr.bf16.mxu1 %v11754_v22  ;;  %v10544_v53 = vpack.c.bf16 %v458_v48, %v458_v48  ;;  %v11765_v2 = vld [vmem:[#allocation2] sm:$0xff]   ;;  %v10546_v18 = vpack.c.bf16 %v460_v9, %v460_v9  ;;  %v427_v20 = vmul.f32 %v12841_v40, %v391_v1  ;;  %v462_v39 = vadd.f32 %v12845_v42, %v426_v4  ;;  %v334_v56 = vld [vmem:[#allocation2 + $0x2c] sm:$0x1]  ;;  %v281_v57 = vld [vmem:[#allocation2 + $0x30] sm:$0x1] }
  0x9c   : > { %v11766_v5 = vld [vmem:[#allocation2 + $0x8] ss:$0 sps:$4 sm:$0x11]   ;;  %v597_v7 = vshrl.u32 %v10545_v54, 16  ;;  %v600_v8 = vshll.u32 %v10545_v54, 16  ;;  %v1345_v10 = vshrl.u32 %v11765_v2, 16 }
  0x9d   : > { %10620 = vmatpush3.bf16.msra.mxu0 %v11755_v23  ;;  %v589_v3 = vshrl.u32 %v10544_v53, 16  ;;  %v592_v6 = vshll.u32 %v10544_v53, 16  ;;  %v1347_v11 = vshll.u32 %v11765_v2, 16  ;;  %v911_v13 = vld [vmem:[#allocation2 + $0xc] sm:$0xf]  ;;  %v1352_v16 = vshll.u32 %v11766_v5, 16 }
  0x9e   : > { %10732 = vmatpush3.bf16.msra.mxu1 %v11756_v25  ;;  %10621 = vmatprep.subr.bf16.mxu0 %v11757_v27  ;;  %v599_v17 = vrot.slane %v597_v7, 7  ;;  %v12884_v27 = vld [vmem:[#allocation2 + $0x8] ss:$0 sps:$4 sm:$0x11]   ;;  %v11768_v36 = vld [vmem:[#allocation2] sm:$0xff]   ;;  %v609_v38 = vshll.u32 %v10546_v18, 16  ;;  %v463_v55 = vadd.f32 %v12845_v42, %v427_v20  ;;  %v10548_v61 = vpack.c.bf16 %v462_v39, %v462_v39 }
  0x9f   : > { %10733 = vmatprep.subr.bf16.mxu1 %v11758_v28  ;;  %v591_v12 = vrot.slane %v589_v3, 7  ;;  %v1349_v21 = vrot.slane %v1347_v11, 1  ;;  %v10547_v28 = vpack.c.bf16 %v461_v14, %v461_v14  ;;  %v279_v51 = vsel %vm12833_vm4, 0, %v278_v19  ;;  %v392_v0 = vld [vmem:[%s12813_s28 + $0x30] sm:$0xff]  ;;  %v393_v7 = vld [vmem:[%s12813_s28 + $0x38] sm:$0xff] }
  0xa0   : > { %v915_v37 = vld [vmem:[#allocation2 + $0x14] sm:$0x1]  ;;  %v918_v48 = vld [vmem:[#allocation2 + $0x18] sm:$0xf]  ;;  %280 = vst [vmem:[#allocation2 + $0x24] sm:$0x1] %v279_v51  ;;  %v10549_v4 = vpack.c.bf16 %v463_v55, %v463_v55 }
  0xa1   : > { %10622 = vmatpush3.bf16.msra.mxu0 %v11759_v29  ;;  %v594_v23 = vor.u32 %v592_v6, %v591_v12  ;;  %v595_v25 = vrot.slane %v591_v12, 4  ;;  %v1354_v29 = vrot.slane %v1352_v16, 1  ;;  %v614_v46 = vshrl.u32 %v10547_v28, 16  ;;  %v922_v59 = vld [vmem:[#allocation2 + $0x20] sm:$0x1]  ;;  %v11786_v5 = vld [vmem:[#allocation9 + $0x108] sm:$0xff]  }
  0xa2   : > { %10734 = vmatpush3.bf16.msra.mxu1 %v11760_v30  ;;  %10623 = vmatprep.subr.bf16.mxu0 %v11761_v31  ;;  %v602_v30 = vor.u32 %v600_v8, %v599_v17  ;;  %v604_v31 = vrot.slane %v599_v17, 4  ;;  %v1746_v58 = vrot.slane %v12884_v27, 1  ;;  %v335_v62 = vsel %vm12828_vm3, 0, %v334_v56  ;;  %v11800_v14 = vld [vmem:[#allocation9 + $0x110] sm:$0xff]   ;;  %v394_v16 = vld [vmem:[%s12813_s28 + $0x40] sm:$0xff]  ;;  %v395_v17 = vld [vmem:[%s12813_s28 + $0x48] sm:$0xff] }
  0xa3   : > { %10735 = vmatprep.subr.bf16.mxu1 %v11762_v32  ;;  %v11772_v32 = vld [vmem:[#allocation9 + $0x100] sm:$0xff]   ;;  %v912_v35 = vsel %vm12873_vm8, %v594_v23, %v911_v13  ;;  %v616_v54 = vrot.slane %v614_v46, 7  ;;  %v282_v63 = vsel %vm12833_vm4, 0, %v281_v57  ;;  %336 = vst [vmem:[#allocation2 + $0x2c] sm:$0x1] %v335_v62  ;;  %v623_v6 = vshrl.u32 %v10548_v61, 16 }
  0xa4   : > { %v603_v43 = vsel %vm12880_vm9, %v595_v25, %v602_v30  ;;  %913 = vst [vmem:[#allocation2 + $0xc] sm:$0xf] %v912_v35  ;;  %v916_v44 = vsel %vm12833_vm4, %v604_v31, %v915_v37  ;;  %283 = vst [vmem:[#allocation2 + $0x30] sm:$0x1] %v282_v63  ;;  %v428_v8 = vmul.f32 %v12841_v40, %v392_v0  ;;  %v631_v11 = vshrl.u32 %v10549_v4, 16  ;;  %v11799_v13 = vld [vmem:[#allocation9 + $0x150] sm:$0xff]  }
  0xa5   : > { %10624 = vmatpush3.bf16.msra.mxu0 %v11763_v33  ;;  %v606_v33 = vshrl.u32 %v10546_v18, 16  ;;  %914 = vst [vmem:[#allocation2 + $0x10] sm:$0xf] %v603_v43  ;;  %917 = vst [vmem:[#allocation2 + $0x14] sm:$0x1] %v916_v44  ;;  %v621_v2 = vrot.slane %v616_v54, 4  ;;  %v1747_v19 = vsel %vm1744_vm10, %v1745_v60, %v1746_v58  ;;  %v430_v60 = vmul.f32 %v12841_v40, %v394_v16 }
  0xa6   : > { %10736 = vmatpush3.bf16.msra.mxu1 %v11764_v34  ;;  %10833 = vmatprep.subr.bf16.mxu0 %v11771_v50  ;;  %v1350_v34 = vor.u32 %v1349_v21, %v1345_v10  ;;  %v617_v50 = vshll.u32 %v10547_v28, 16  ;;  %v634_v12 = vshll.u32 %v10549_v4, 16  ;;  %v625_v20 = vrot.slane %v623_v6, 7  ;;  %v337_v62 = vld [vmem:[#allocation2 + $0x38] sm:$0x1] }
  0xa7   : > { %v608_v45 = vrot.slane %v606_v33, 7  ;;  %v923_v10 = vsel %vm12833_vm4, %v621_v2, %v922_v59  ;;  %v626_v25 = vshll.u32 %v10548_v61, 16  ;;  %v429_v28 = vmul.f32 %v12841_v40, %v393_v7 }
  0xa8   : > { %v1355_v49 = vsel %vm1343_vm6, %v1350_v34, %v1354_v29  ;;  %v619_v1 = vor.u32 %v617_v50, %v616_v54  ;;  %924 = vst [vmem:[#allocation2 + $0x20] sm:$0x1] %v923_v10  ;;  %v629_v27 = vrot.slane %v625_v20, 4  ;;  %v464_v29 = vadd.f32 %v12845_v42, %v428_v8  ;;  %v925_v54 = vld [vmem:[#allocation2 + $0x24] sm:$0xf] }
  0xa9   : > { %4178 = vmatprep.mubr.bf16.mxu0 %v1355_v49  ;;  %v611_v52 = vor.u32 %v609_v38, %v608_v45  ;;  %v612_v53 = vrot.slane %v608_v45, 4  ;;  %v633_v33 = vrot.slane %v631_v11, 7  ;;  %v431_v34 = vmul.f32 %v12841_v40, %v395_v17 }
  0xaa   : > { %4179 = vmatmul.mubr.bf16.vlgmr.msra.gmra.mrb[0].mxu0 %v11768_v36  ;;  %v628_v44 = vor.u32 %v626_v25, %v625_v20  ;;  %v465_v45 = vadd.f32 %v12845_v42, %v429_v28  ;;  %v10550_v46 = vpack.c.bf16 %v464_v29, %v464_v29  ;;  %v466_v55 = vadd.f32 %v12845_v42, %v430_v60 }
  0xab   : > { %10834 = vmatpush3.bf16.msra.mxu0 %v11772_v32  ;;  %v919_v3 = vsel %vm12873_vm8, %v611_v52, %v918_v48  ;;  %v620_v9 = vsel %vm12880_vm9, %v612_v53, %v619_v1  ;;  %v636_v39 = vor.u32 %v634_v12, %v633_v33  ;;  %v638_v53 = vrot.slane %v633_v33, 4 }
  0xac   : > { %920 = vst [vmem:[#allocation2 + $0x18] sm:$0xf] %v919_v3  ;;  %10835 = vmatprep.subr.bf16.mxu0 %v11785_v41  ;;  %921 = vst [vmem:[#allocation2 + $0x1c] sm:$0xf] %v620_v9  ;;  %v11767_v18 = vld [vmem:[#allocation2 + $0xc] sm:$0xff]   ;;  %v467_v56 = vadd.f32 %v12845_v42, %v431_v34  ;;  %v926_v0 = vsel %vm12873_vm8, %v628_v44, %v925_v54  ;;  %v10551_v1 = vpack.c.bf16 %v465_v45, %v465_v45 }
  0xad   : > { %v11773_v21 = vld [vmem:[#allocation2 + $0xc] sm:$0xff]   ;;  %v11774_v23 = vld [vmem:[#allocation2 + $0x14] ss:$0 sps:$4 sm:$0x11]   ;;  %4339 = vmatprep.mubr.bf16.mxu1 %v11767_v18  ;;  %v637_v51 = vsel %vm12880_vm9, %v629_v27, %v636_v39  ;;  %v640_v2 = vshrl.u32 %v10550_v46, 16  ;;  %v643_v6 = vshll.u32 %v10550_v46, 16  ;;  %v10552_v10 = vpack.c.bf16 %v466_v55, %v466_v55 }
  0xae   : > { %4340 = vmatmul.mubr.bf16.vlgmr.msra.gmra.mrb[0].mxu1 %v1747_v19  ;;  %v1357_v30 = vshrl.u32 %v11773_v21, 16  ;;  %v1359_v31 = vshll.u32 %v11773_v21, 16  ;;  %v1364_v32 = vshll.u32 %v11774_v23, 16  ;;  %v11777_v47 = vld [vmem:[#allocation2 + $0xc] sm:$0xfe]   ;;  %v10553_v11 = vpack.c.bf16 %v467_v56, %v467_v56 }
  0xaf   : > { %10836 = vmatpush3.bf16.msra.mxu0 %v11786_v5  ;;  %v11776_v37 = vld [vmem:[#allocation2 + $0xc] sm:$0xff]   ;;  %v11778_v38 = vld [vmem:[#allocation2 + $0x14] ss:$0 sps:$4 sm:$0x11]   ;;  %v1748_v43 = vrot.slane %v11777_v47, 1  ;;  %v642_v17 = vrot.slane %v640_v2, 7 }
  0xb0   : > { %10837 = vmatprep.subr.bf16.mxu0 %v11799_v13  ;;  %v1361_v35 = vrot.slane %v1359_v31, 1  ;;  %v1366_v36 = vrot.slane %v1364_v32, 1  ;;  %v1749_v49 = vrot.slane %v11778_v38, 1  ;;  %v11780_v52 = vld [vmem:[#allocation2 + $0x20] ss:$0 sps:$4 sm:$0x11]  }
  0xb1   : > { %928 = vst [vmem:[#allocation2 + $0x28] sm:$0xf] %v637_v51  ;;  %v1376_v63 = vshll.u32 %v11780_v52, 16  ;;  %v284_v3 = vld [vmem:[#allocation2 + $0x3c] sm:$0x1]  ;;  %v648_v19 = vshrl.u32 %v10551_v1, 16  ;;  %v645_v27 = vor.u32 %v643_v6, %v642_v17 }
  0xb2   : > { %v1362_v48 = vor.u32 %v1361_v35, %v1357_v30  ;;  %v1750_v58 = vsel %vm1744_vm10, %v1748_v43, %v1749_v49  ;;  %927 = vst [vmem:[#allocation2 + $0x24] sm:$0xf] %v926_v0  ;;  %v11784_v8 = vld [vmem:[#allocation2 + $0x20] ss:$0 sps:$4 sm:$0x11]   ;;  %v651_v20 = vshll.u32 %v10551_v1, 16 }
  0xb3   : > { %10838 = vmatpush3.bf16.msra.mxu0 %v11800_v14  ;;  %v11775_v41 = vld [vmem:[#allocation2 + $0x18] sm:$0xff]   ;;  %v1378_v7 = vrot.slane %v1376_v63, 1  ;;  %v929_v9 = vld [vmem:[#allocation2 + $0x2c] sm:$0x1]  ;;  %v1752_v18 = vrot.slane %v11784_v8, 1  ;;  %v338_v23 = vsel %vm12828_vm3, 0, %v337_v62 }
  0xb4   : > { %v11779_v50 = vld [vmem:[#allocation2 + $0x18] sm:$0xff]   ;;  %4347 = vmatprep.mubr.bf16.mxu1 %v11775_v41  ;;  %v1367_v57 = vsel %vm1343_vm6, %v1362_v48, %v1366_v36  ;;  %v930_v16 = vsel %vm12833_vm4, %v638_v53, %v929_v9  ;;  %v932_v21 = vld [vmem:[#allocation2 + $0x30] sm:$0xf]  ;;  %v646_v28 = vrot.slane %v642_v17, 4  ;;  %339 = vst [vmem:[#allocation2 + $0x38] sm:$0x1] %v338_v23 }
  0xb5   : > { %v1369_v59 = vshrl.u32 %v11779_v50, 16  ;;  %v1371_v61 = vshll.u32 %v11779_v50, 16  ;;  %4186 = vmatprep.mubr.bf16.mxu0 %v1367_v57  ;;  %v11783_v5 = vld [vmem:[#allocation2 + $0x18] sm:$0xfe]   ;;  %931 = vst [vmem:[#allocation2 + $0x2c] sm:$0x1] %v930_v16  ;;  %v933_v33 = vsel %vm12873_vm8, %v645_v27, %v932_v21 }
  0xb6   : > { %4187 = vmatmul.mubr.bf16.gmra.mrb[4].mxu0 %v11776_v37  ;;  %4348 = vmatmul.mubr.bf16.gmra.mrb[4].mxu1 %v1750_v58  ;;  %v11782_v13 = vld [vmem:[#allocation2 + $0x18] sm:$0xff]   ;;  %v1751_v14 = vrot.slane %v11783_v5, 1  ;;  %v285_v29 = vsel %vm12833_vm4, 0, %v284_v3  ;;  %v340_v30 = vld [vmem:[#allocation2 + $0x44] sm:$0x1]  ;;  %v650_v31 = vrot.slane %v648_v19, 7 }
  0xb7   : > { %v1373_v4 = vrot.slane %v1371_v61, 1  ;;  %286 = vst [vmem:[#allocation2 + $0x3c] sm:$0x1] %v285_v29  ;;  %v657_v32 = vshrl.u32 %v10552_v10, 16  ;;  %v660_v47 = vshll.u32 %v10552_v10, 16  ;;  %v665_v60 = vshrl.u32 %v10553_v11, 16 }
  0xb8   : > { %v668_v34 = vshll.u32 %v10553_v11, 16  ;;  %v287_v35 = vld [vmem:[#allocation2 + $0x48] sm:$0x1]  ;;  %v1753_v38 = vsel %vm1744_vm10, %v1751_v14, %v1752_v18  ;;  %v653_v39 = vor.u32 %v651_v20, %v650_v31  ;;  %934 = vst [vmem:[#allocation2 + $0x30] sm:$0xf] %v933_v33  ;;  %v655_v44 = vrot.slane %v650_v31, 4 }
  0xb9   : > { %v1374_v12 = vor.u32 %v1373_v4, %v1369_v59  ;;  %v396_v36 = vld [vmem:[%s12813_s28 + $0x50] sm:$0xff]  ;;  %v659_v45 = vrot.slane %v657_v32, 7  ;;  %v12941_v46 = vrot.slane %v665_v60, 7  ;;  %v341_v50 = vsel %vm12828_vm3, 0, %v340_v30  ;;  %v397_v6 = vld [vmem:[%s12813_s28 + $0x58] sm:$0xff]  ;;  %v399_v21 = vld [vmem:[%s12813_s28 + $0x68] sm:$0xff] }
  0xba   : > { %v11781_v37 = vld [vmem:[#allocation2 + $0x24] sm:$0xff]   ;;  %v432_v41 = vmul.f32 %v12841_v40, %v396_v36  ;;  %v654_v48 = vsel %vm12880_vm9, %v646_v28, %v653_v39  ;;  %v288_v51 = vsel %vm12833_vm4, 0, %v287_v35  ;;  %342 = vst [vmem:[#allocation2 + $0x44] sm:$0x1] %v341_v50  ;;  %v433_v11 = vmul.f32 %v12841_v40, %v397_v6  ;;  %v343_v19 = vld [vmem:[#allocation2 + $0x50] sm:$0x1] }
  0xbb   : > { %v1379_v25 = vsel %vm1343_vm6, %v1374_v12, %v1378_v7  ;;  %v11787_v43 = vld [vmem:[#allocation2 + $0x24] sm:$0xff]   ;;  %4355 = vmatprep.mubr.bf16.mxu1 %v11781_v37  ;;  %935 = vst [vmem:[#allocation2 + $0x34] sm:$0xf] %v654_v48  ;;  %v662_v55 = vor.u32 %v660_v47, %v659_v45  ;;  %v670_v56 = vor.u32 %v668_v34, %v12941_v46  ;;  %289 = vst [vmem:[#allocation2 + $0x48] sm:$0x1] %v288_v51  ;;  %v398_v12 = vld [vmem:[%s12813_s28 + $0x60] sm:$0xff] }
  0xbc   : > { %4194 = vmatprep.mubr.bf16.mxu0 %v1379_v25  ;;  %v11791_v49 = vld [vmem:[#allocation2 + $0x24] sm:$0xfe]   ;;  %v468_v52 = vadd.f32 %v12845_v42, %v432_v41  ;;  %v11788_v53 = vld [vmem:[#allocation2 + $0x2c] ss:$0 sps:$4 sm:$0x11]   ;;  %v1381_v54 = vshrl.u32 %v11787_v43, 16  ;;  %v469_v18 = vadd.f32 %v12845_v42, %v433_v11  ;;  %v434_v23 = vmul.f32 %v12841_v40, %v398_v12 }
  0xbd   : > { %v1383_v57 = vshll.u32 %v11787_v43, 16  ;;  %v11792_v58 = vld [vmem:[#allocation2 + $0x2c] ss:$0 sps:$4 sm:$0x11]   ;;  %v1388_v61 = vshll.u32 %v11788_v53, 16  ;;  %v1754_v62 = vrot.slane %v11791_v49, 1  ;;  %v435_v36 = vmul.f32 %v12841_v40, %v399_v21 }
  0xbe   : > { %4195 = vmatmul.mubr.bf16.gmra.mrb[8].mxu0 %v11782_v13  ;;  %4356 = vmatmul.mubr.bf16.gmra.mrb[8].mxu1 %v1753_v38  ;;  %v10554_v59 = vpack.c.bf16 %v468_v52, %v468_v52  ;;  %v936_v63 = vld [vmem:[#allocation2 + $0x38] sm:$0x1]  ;;  %v663_v0 = vrot.slane %v659_v45, 4  ;;  %v11790_v2 = vld [vmem:[#allocation2 + $0x24] sm:$0xff]   ;;  %v1755_v3 = vrot.slane %v11792_v58, 1  ;;  %v672_v17 = vrot.slane %v12941_v46, 4 }
  0xbf   : > { %v1385_v1 = vrot.slane %v1383_v57, 1  ;;  %v937_v4 = vsel %vm12833_vm4, %v655_v44, %v936_v63  ;;  %v939_v5 = vld [vmem:[#allocation2 + $0x3c] sm:$0xf]  ;;  %v1390_v8 = vrot.slane %v1388_v61, 1  ;;  %v290_v20 = vld [vmem:[#allocation2 + $0x54] sm:$0x1]  ;;  %v10555_v32 = vpack.c.bf16 %v469_v18, %v469_v18 }
  0xc0   : > { %v674_v7 = vshrl.u32 %v10554_v59, 16  ;;  %938 = vst [vmem:[#allocation2 + $0x38] sm:$0x1] %v937_v4  ;;  %v671_v9 = vsel %vm12880_vm9, %v663_v0, %v670_v56  ;;  %v940_v10 = vsel %vm12873_vm8, %v662_v55, %v939_v5  ;;  %v677_v16 = vshll.u32 %v10554_v59, 16  ;;  %v11813_v44 = vld [vmem:[#allocation9 + $0x158] sm:$0xff]  }
  0xc1   : > { %v1386_v13 = vor.u32 %v1385_v1, %v1381_v54  ;;  %941 = vst [vmem:[#allocation2 + $0x3c] sm:$0xf] %v940_v10  ;;  %942 = vst [vmem:[#allocation2 + $0x40] sm:$0xf] %v671_v9  ;;  %v1756_v28 = vsel %vm1744_vm10, %v1754_v62, %v1755_v3  ;;  %v344_v33 = vsel %vm12828_vm3, 0, %v343_v19  ;;  %v291_v47 = vsel %vm12833_vm4, 0, %v290_v20  ;;  %10839 = vmatprep.subr.bf16.mxu0 %v11813_v44 }
  0xc2   : > { %v12960_v14 = vrot.slane %v674_v7, 7  ;;  %v11789_v27 = vld [vmem:[#allocation2 + $0x30] sm:$0xff]   ;;  %v470_v60 = vadd.f32 %v12845_v42, %v434_v23  ;;  %v943_v35 = vld [vmem:[#allocation2 + $0x44] sm:$0x1]  ;;  %345 = vst [vmem:[#allocation2 + $0x50] sm:$0x1] %v344_v33  ;;  %v471_v54 = vadd.f32 %v12845_v42, %v435_v36 }
  0xc3   : > { %v1391_v25 = vsel %vm1343_vm6, %v1386_v13, %v1390_v8  ;;  %v11793_v31 = vld [vmem:[#allocation2 + $0x30] sm:$0xff]   ;;  %4363 = vmatprep.mubr.bf16.mxu1 %v11789_v27  ;;  %292 = vst [vmem:[#allocation2 + $0x54] sm:$0x1] %v291_v47  ;;  %v944_v39 = vsel %vm12833_vm4, %v672_v17, %v943_v35  ;;  %v682_v41 = vshrl.u32 %v10555_v32, 16  ;;  %v946_v43 = vld [vmem:[#allocation2 + $0x48] sm:$0xf] }
  0xc4   : > { %v679_v29 = vor.u32 %v677_v16, %v12960_v14  ;;  %v680_v30 = vrot.slane %v12960_v14, 4  ;;  %4202 = vmatprep.mubr.bf16.mxu0 %v1391_v25  ;;  %v11797_v34 = vld [vmem:[#allocation2 + $0x30] sm:$0xfe]   ;;  %v1393_v37 = vshrl.u32 %v11793_v31, 16  ;;  %v1395_v38 = vshll.u32 %v11793_v31, 16  ;;  %v11814_v25 = vld [vmem:[#allocation9 + $0x118] sm:$0xff]  }
  0xc5   : > { %v1757_v46 = vrot.slane %v11797_v34, 1  ;;  %945 = vst [vmem:[#allocation2 + $0x44] sm:$0x1] %v944_v39  ;;  %v10556_v51 = vpack.c.bf16 %v470_v60, %v470_v60  ;;  %v684_v57 = vrot.slane %v682_v41, 7  ;;  %v11796_v59 = vld [vmem:[#allocation2 + $0x30] sm:$0xff]   ;;  %v685_v62 = vshll.u32 %v10555_v32, 16  ;;  %10840 = vmatpush3.bf16.msra.mxu0 %v11814_v25 }
  0xc6   : > { %4203 = vmatmul.mubr.bf16.gmra.mrb[12].mxu0 %v11790_v2  ;;  %4364 = vmatmul.mubr.bf16.gmra.mrb[12].mxu1 %v1756_v28  ;;  %v947_v48 = vsel %vm12873_vm8, %v679_v29, %v946_v43  ;;  %v1397_v49 = vrot.slane %v1395_v38, 1  ;;  %v10557_v7 = vpack.c.bf16 %v471_v54, %v471_v54  ;;  %v400_v31 = vld [vmem:[%s12813_s28 + $0x70] sm:$0xff]  ;;  %v401_v47 = vld [vmem:[%s12813_s28 + $0x78] sm:$0xff]  ;;  %v346_v38 = vld [vmem:[#allocation2 + $0x5c] sm:$0x1] }
  0xc7   : > { %v11794_v45 = vld [vmem:[#allocation2 + $0x38] ss:$0 sps:$4 sm:$0x11]   ;;  %948 = vst [vmem:[#allocation2 + $0x48] sm:$0xf] %v947_v48  ;;  %v689_v1 = vrot.slane %v684_v57, 4  ;;  %v687_v5 = vor.u32 %v685_v62, %v684_v57  ;;  %v436_v60 = vmul.f32 %v12841_v40, %v400_v31  ;;  %v437_v35 = vmul.f32 %v12841_v40, %v401_v47 }
  0xc8   : > { %v11795_v50 = vld [vmem:[#allocation2 + $0x3c] sm:$0xff]   ;;  %v1400_v52 = vshll.u32 %v11794_v45, 16  ;;  %v11798_v53 = vld [vmem:[#allocation2 + $0x38] ss:$0 sps:$4 sm:$0x11]   ;;  %v1398_v55 = vor.u32 %v1397_v49, %v1393_v37  ;;  %v691_v2 = vshrl.u32 %v10556_v51, 16 }
  0xc9   : > { %4371 = vmatprep.mubr.bf16.mxu1 %v11795_v50  ;;  %v11801_v56 = vld [vmem:[#allocation2 + $0x3c] sm:$0xff]   ;;  %v1758_v61 = vrot.slane %v11798_v53, 1  ;;  %v688_v10 = vsel %vm12880_vm9, %v680_v30, %v687_v5  ;;  %v950_v17 = vld [vmem:[#allocation2 + $0x50] sm:$0x1]  ;;  %v694_v20 = vshll.u32 %v10556_v51, 16  ;;  %v699_v23 = vshrl.u32 %v10557_v7, 16 }
  0xca   : > { %v1402_v58 = vrot.slane %v1400_v52, 1  ;;  %v1405_v63 = vshrl.u32 %v11801_v56, 16  ;;  %v1407_v0 = vshll.u32 %v11801_v56, 16  ;;  %v11805_v6 = vld [vmem:[#allocation2 + $0x3c] sm:$0xfe]   ;;  %v693_v12 = vrot.slane %v691_v2, 7 }
  0xcb   : > { %v1759_v4 = vsel %vm1744_vm10, %v1757_v46, %v1758_v61  ;;  %v1760_v11 = vrot.slane %v11805_v6, 1  ;;  %949 = vst [vmem:[#allocation2 + $0x4c] sm:$0xf] %v688_v10  ;;  %v11804_v18 = vld [vmem:[#allocation2 + $0x3c] sm:$0xff]   ;;  %v951_v19 = vsel %vm12833_vm4, %v689_v1, %v950_v17  ;;  %v702_v29 = vshll.u32 %v10557_v7, 16 }
  0xcc   : > { %v1403_v3 = vsel %vm1343_vm6, %v1398_v55, %v1402_v58  ;;  %v11802_v8 = vld [vmem:[#allocation2 + $0x44] ss:$0 sps:$4 sm:$0x11]   ;;  %v1409_v9 = vrot.slane %v1407_v0, 1  ;;  %v697_v21 = vrot.slane %v693_v12, 4  ;;  %v696_v32 = vor.u32 %v694_v20, %v693_v12  ;;  %v402_v41 = vld [vmem:[%s12813_s28 + $0x80] sm:$0xff] }
  0xcd   : > { %4210 = vmatprep.mubr.bf16.mxu0 %v1403_v3  ;;  %v1412_v14 = vshll.u32 %v11802_v8, 16  ;;  %v11806_v16 = vld [vmem:[#allocation2 + $0x44] ss:$0 sps:$4 sm:$0x11]   ;;  %952 = vst [vmem:[#allocation2 + $0x50] sm:$0x1] %v951_v19  ;;  %v472_v39 = vadd.f32 %v12845_v42, %v436_v60  ;;  %v473_v46 = vadd.f32 %v12845_v42, %v437_v35  ;;  %v438_v50 = vmul.f32 %v12841_v40, %v402_v41 }
  0xce   : > { %4372 = vmatmul.mubr.bf16.gmra.mrb[16].mxu1 %v1759_v4  ;;  %4211 = vmatmul.mubr.bf16.gmra.mrb[16].mxu0 %v11796_v59  ;;  %v1410_v13 = vor.u32 %v1409_v9, %v1405_v63  ;;  %v1761_v28 = vrot.slane %v11806_v16, 1  ;;  %v953_v30 = vld [vmem:[#allocation2 + $0x54] sm:$0xf]  ;;  %v12988_v33 = vrot.slane %v699_v23, 7  ;;  %v347_v44 = vsel %vm12828_vm3, 0, %v346_v38  ;;  %v403_v49 = vld [vmem:[%s12813_s28 + $0x88] sm:$0xff] }
  0xcf   : > { %v1414_v27 = vrot.slane %v1412_v14, 1  ;;  %v954_v37 = vsel %vm12873_vm8, %v696_v32, %v953_v30  ;;  %v293_v45 = vld [vmem:[#allocation2 + $0x60] sm:$0x1]  ;;  %v349_v48 = vld [vmem:[#allocation2 + $0x68] sm:$0x1]  ;;  %v10558_v54 = vpack.c.bf16 %v472_v39, %v472_v39  ;;  %v439_v55 = vmul.f32 %v12841_v40, %v403_v49 }
  0xd0   : > { %v704_v36 = vor.u32 %v702_v29, %v12988_v33  ;;  %v1762_v43 = vsel %vm1744_vm10, %v1760_v11, %v1761_v28  ;;  %955 = vst [vmem:[#allocation2 + $0x54] sm:$0xf] %v954_v37  ;;  %348 = vst [vmem:[#allocation2 + $0x5c] sm:$0x1] %v347_v44  ;;  %v294_v53 = vsel %vm12833_vm4, 0, %v293_v45  ;;  %v706_v57 = vrot.slane %v12988_v33, 4 }
  0xd1   : > { %v1415_v34 = vsel %vm1343_vm6, %v1410_v13, %v1414_v27  ;;  %295 = vst [vmem:[#allocation2 + $0x60] sm:$0x1] %v294_v53  ;;  %v10559_v58 = vpack.c.bf16 %v473_v46, %v473_v46  ;;  %v350_v59 = vsel %vm12828_vm3, 0, %v349_v48  ;;  %v474_v61 = vadd.f32 %v12845_v42, %v438_v50  ;;  %v296_v11 = vld [vmem:[#allocation2 + $0x6c] sm:$0x1]  ;;  %v11827_v50 = vld [vmem:[#allocation9 + $0x160] sm:$0xff]  }
  0xd2   : > { %4218 = vmatprep.mubr.bf16.mxu0 %v1415_v34  ;;  %v11803_v51 = vld [vmem:[#allocation2 + $0x48] sm:$0xff]   ;;  %v705_v52 = vsel %vm12880_vm9, %v697_v21, %v704_v36  ;;  %v708_v63 = vshrl.u32 %v10558_v54, 16  ;;  %351 = vst [vmem:[#allocation2 + $0x68] sm:$0x1] %v350_v59  ;;  %v475_v4 = vadd.f32 %v12845_v42, %v439_v55  ;;  %v711_v9 = vshll.u32 %v10558_v54, 16  ;;  %10841 = vmatprep.subr.bf16.mxu0 %v11827_v50 }
  0xd3   : > { %v11807_v56 = vld [vmem:[#allocation2 + $0x48] sm:$0xff]   ;;  %956 = vst [vmem:[#allocation2 + $0x58] sm:$0xf] %v705_v52  ;;  %4379 = vmatprep.mubr.bf16.mxu1 %v11803_v51  ;;  %v10560_v5 = vpack.c.bf16 %v474_v61, %v474_v61  ;;  %v716_v10 = vshrl.u32 %v10559_v58, 16  ;;  %v719_v16 = vshll.u32 %v10559_v58, 16  ;;  %v297_v27 = vsel %vm12833_vm4, 0, %v296_v11 }
  0xd4   : > { %v11808_v62 = vld [vmem:[#allocation2 + $0x50] ss:$0 sps:$4 sm:$0x11]   ;;  %v1417_v0 = vshrl.u32 %v11807_v56, 16  ;;  %v1419_v1 = vshll.u32 %v11807_v56, 16  ;;  %v11810_v7 = vld [vmem:[#allocation2 + $0x48] sm:$0xff]   ;;  %v10561_v28 = vpack.c.bf16 %v475_v4, %v475_v4 }
  0xd5   : > { %v1424_v2 = vshll.u32 %v11808_v62, 16  ;;  %v11811_v40 = vld [vmem:[#allocation2 + $0x48] sm:$0xfe]   ;;  %v11812_v3 = vld [vmem:[#allocation2 + $0x50] ss:$0 sps:$4 sm:$0x11]  }
  0xd6   : > { %4219 = vmatmul.mubr.bf16.gmra.mrb[20].mxu0 %v11804_v18  ;;  %4380 = vmatmul.mubr.bf16.gmra.mrb[20].mxu1 %v1762_v43  ;;  %v1421_v6 = vrot.slane %v1419_v1, 1  ;;  %v710_v8 = vrot.slane %v708_v63, 7  ;;  %v1763_v13 = vrot.slane %v11811_v40, 1  ;;  %v1764_v14 = vrot.slane %v11812_v3, 1  ;;  %298 = vst [vmem:[#allocation2 + $0x6c] sm:$0x1] %v297_v27 }
  0xd7   : > { %v1426_v12 = vrot.slane %v1424_v2, 1  ;;  %v957_v18 = vld [vmem:[#allocation2 + $0x5c] sm:$0x1]  ;;  %v718_v21 = vrot.slane %v716_v10, 7  ;;  %v725_v60 = vshrl.u32 %v10560_v5, 16  ;;  %v733_v41 = vshrl.u32 %v10561_v28, 16 }
  0xd8   : > { %v1422_v17 = vor.u32 %v1421_v6, %v1417_v0  ;;  %v713_v19 = vor.u32 %v711_v9, %v710_v8  ;;  %v714_v20 = vrot.slane %v710_v8, 4  ;;  %v1765_v25 = vsel %vm1744_vm10, %v1763_v13, %v1764_v14  ;;  %v960_v33 = vld [vmem:[#allocation2 + $0x60] sm:$0xf]  ;;  %v352_v52 = vld [vmem:[#allocation2 + $0x74] sm:$0x1]  ;;  %v404_v14 = vld [vmem:[%s12813_s28 + $0x90] sm:$0xff] }
  0xd9   : > { %v958_v42 = vsel %vm12833_vm4, %v706_v57, %v957_v18  ;;  %v721_v31 = vor.u32 %v719_v16, %v718_v21  ;;  %v723_v32 = vrot.slane %v718_v21, 4  ;;  %v964_v38 = vld [vmem:[#allocation2 + $0x68] sm:$0x1]  ;;  %v727_v39 = vrot.slane %v725_v60, 7  ;;  %v11828_v51 = vld [vmem:[#allocation9 + $0x120] sm:$0xff]  }
  0xda   : > { %v11809_v23 = vld [vmem:[#allocation2 + $0x54] sm:$0xff]   ;;  %v1427_v29 = vsel %vm1343_vm6, %v1422_v17, %v1426_v12  ;;  %959 = vst [vmem:[#allocation2 + $0x5c] sm:$0x1] %v958_v42  ;;  %v961_v47 = vsel %vm12873_vm8, %v713_v19, %v960_v33  ;;  %v736_v43 = vshll.u32 %v10561_v28, 16  ;;  %v728_v46 = vshll.u32 %v10560_v5, 16  ;;  %10842 = vmatpush3.bf16.msra.mxu0 %v11828_v51 }
  0xdb   : > { %v11815_v30 = vld [vmem:[#allocation2 + $0x54] sm:$0xff]   ;;  %4226 = vmatprep.mubr.bf16.mxu0 %v1427_v29  ;;  %4387 = vmatprep.mubr.bf16.mxu1 %v11809_v23  ;;  %v722_v35 = vsel %vm12880_vm9, %v714_v20, %v721_v31  ;;  %962 = vst [vmem:[#allocation2 + $0x60] sm:$0xf] %v961_v47  ;;  %v965_v45 = vsel %vm12833_vm4, %v723_v32, %v964_v38  ;;  %v731_v48 = vrot.slane %v727_v39, 4  ;;  %v735_v49 = vrot.slane %v733_v41, 7  ;;  %v407_v38 = vld [vmem:[%s12813_s28 + $0xa8] sm:$0xff] }
  0xdc   : > { %v1431_v34 = vshll.u32 %v11815_v30, 16  ;;  %v11819_v36 = vld [vmem:[#allocation2 + $0x54] sm:$0xfe]   ;;  %v1429_v37 = vshrl.u32 %v11815_v30, 16  ;;  %963 = vst [vmem:[#allocation2 + $0x64] sm:$0xf] %v722_v35  ;;  %v730_v58 = vor.u32 %v728_v46, %v727_v39 }
  0xdd   : > { %966 = vst [vmem:[#allocation2 + $0x68] sm:$0x1] %v965_v45  ;;  %v299_v53 = vld [vmem:[#allocation2 + $0x78] sm:$0x1]  ;;  %v1766_v55 = vrot.slane %v11819_v36, 1  ;;  %v738_v56 = vor.u32 %v736_v43, %v735_v49  ;;  %v353_v59 = vsel %vm12828_vm3, 0, %v352_v52 }
  0xde   : > { %4227 = vmatmul.mubr.bf16.gmra.mrb[24].mxu0 %v11810_v7  ;;  %4388 = vmatmul.mubr.bf16.gmra.mrb[24].mxu1 %v1765_v25  ;;  %v1433_v44 = vrot.slane %v1431_v34, 1  ;;  %v11818_v63 = vld [vmem:[#allocation2 + $0x54] sm:$0xff]   ;;  %354 = vst [vmem:[#allocation2 + $0x74] sm:$0x1] %v353_v59  ;;  %v300_v1 = vsel %vm12833_vm4, 0, %v299_v53  ;;  %v740_v8 = vrot.slane %v735_v49, 4 }
  0xdf   : > { %v739_v0 = vsel %vm12880_vm9, %v731_v48, %v738_v56  ;;  %301 = vst [vmem:[#allocation2 + $0x78] sm:$0x1] %v300_v1  ;;  %v967_v5 = vld [vmem:[#allocation2 + $0x6c] sm:$0xf]  ;;  %v13038_v19 = vld [vmem:[#allocation7] ss:$0 sm:$0xff] }
  0xe0   : > { %v1434_v61 = vor.u32 %v1433_v44, %v1429_v37  ;;  %970 = vst [vmem:[#allocation2 + $0x70] sm:$0xf] %v739_v0  ;;  %v968_v9 = vsel %vm12873_vm8, %v730_v58, %v967_v5  ;;  %v440_v20 = vmul.f32 %v13038_v19, %v404_v14  ;;  %v405_v25 = vld [vmem:[%s12813_s28 + $0x98] sm:$0xff]  ;;  %v355_v42 = vld [vmem:[#allocation2 + $0x80] sm:$0x1]  ;;  %v406_v37 = vld [vmem:[%s12813_s28 + $0xa0] sm:$0xff]  ;;  %v443_v48 = vmul.f32 %v13038_v19, %v407_v38 }
  0xe1   : > { %v11816_v54 = vld [vmem:[#allocation2 + $0x5c] ss:$0 sps:$4 sm:$0x11]   ;;  %969 = vst [vmem:[#allocation2 + $0x6c] sm:$0xf] %v968_v9  ;;  %v441_v32 = vmul.f32 %v13038_v19, %v405_v25  ;;  %v356_v35 = vsel %vm12828_vm3, 0, %v355_v42  ;;  %v442_v45 = vmul.f32 %v13038_v19, %v406_v37 }
  0xe2   : > { %v11820_v57 = vld [vmem:[#allocation2 + $0x5c] ss:$0 sps:$4 sm:$0x11]   ;;  %v1436_v62 = vshll.u32 %v11816_v54, 16  ;;  %v13045_v33 = vld [vmem:[#allocation7 + $0x1] ss:$0 sm:$0xff] }
  0xe3   : > { %v11817_v2 = vld [vmem:[#allocation2 + $0x60] sm:$0xff]   ;;  %v1767_v40 = vrot.slane %v11820_v57, 1  ;;  %v476_v47 = vadd.f32 %v13045_v33, %v440_v20  ;;  %v477_v41 = vadd.f32 %v13045_v33, %v441_v32  ;;  %357 = vst [vmem:[#allocation2 + $0x80] sm:$0x1] %v356_v35  ;;  %v478_v52 = vadd.f32 %v13045_v33, %v442_v45  ;;  %v308_v35 = vld [vmem:[#allocation2 + $0x9c] sm:$0x1] }
  0xe4   : > { %v1438_v3 = vrot.slane %v1436_v62, 1  ;;  %v11821_v4 = vld [vmem:[#allocation2 + $0x60] sm:$0xff]   ;;  %4395 = vmatprep.mubr.bf16.mxu1 %v11817_v2  ;;  %v11822_v7 = vld [vmem:[#allocation2 + $0x68] ss:$0 sps:$4 sm:$0x11]   ;;  %v479_v57 = vadd.f32 %v13045_v33, %v443_v48 }
  0xe5   : > { %v1768_v6 = vsel %vm1744_vm10, %v1766_v55, %v1767_v40  ;;  %v1441_v11 = vshrl.u32 %v11821_v4, 16  ;;  %v1443_v12 = vshll.u32 %v11821_v4, 16  ;;  %v1448_v13 = vshll.u32 %v11822_v7, 16  ;;  %v11825_v17 = vld [vmem:[#allocation2 + $0x60] sm:$0xfe]   ;;  %v11841_v62 = vld [vmem:[#allocation9 + $0x168] sm:$0xff]  }
  0xe6   : > { %v1439_v10 = vsel %vm1343_vm6, %v1434_v61, %v1438_v3  ;;  %4396 = vmatmul.mubr.bf16.gmra.mrb[28].mxu1 %v1768_v6  ;;  %v11826_v18 = vld [vmem:[#allocation2 + $0x68] ss:$0 sps:$4 sm:$0x11]   ;;  %v971_v23 = vld [vmem:[#allocation2 + $0x74] sm:$0x1]  ;;  %v1769_v28 = vrot.slane %v11825_v17, 1  ;;  %v10562_v43 = vpack.c.bf16 %v476_v47, %v476_v47  ;;  %v10563_v49 = vpack.c.bf16 %v477_v41, %v477_v41  ;;  %10843 = vmatprep.subr.bf16.mxu0 %v11841_v62 }
  0xe7   : > { %4234 = vmatprep.mubr.bf16.mxu0 %v1439_v10  ;;  %v1445_v16 = vrot.slane %v1443_v12, 1  ;;  %v1450_v21 = vrot.slane %v1448_v13, 1  ;;  %v1770_v29 = vrot.slane %v11826_v18, 1  ;;  %v972_v30 = vsel %vm12833_vm4, %v740_v8, %v971_v23  ;;  %v11824_v31 = vld [vmem:[#allocation2 + $0x60] sm:$0xff]   ;;  %v974_v55 = vld [vmem:[#allocation2 + $0x78] sm:$0xf] }
  0xe8   : > { %4235 = vmatmul.mubr.bf16.gmra.mrb[28].mxu0 %v11818_v63  ;;  %973 = vst [vmem:[#allocation2 + $0x74] sm:$0x1] %v972_v30  ;;  %v302_v36 = vld [vmem:[#allocation2 + $0x84] sm:$0x1]  ;;  %v11823_v39 = vld [vmem:[#allocation2 + $0x6c] sm:$0xff]   ;;  %v742_v50 = vshrl.u32 %v10562_v43, 16  ;;  %v10564_v2 = vpack.c.bf16 %v478_v52, %v478_v52  ;;  %v10565_v40 = vpack.c.bf16 %v479_v57, %v479_v57 }
  0xe9   : > { %v1446_v27 = vor.u32 %v1445_v16, %v1441_v11  ;;  %v1771_v34 = vsel %vm1744_vm10, %v1769_v28, %v1770_v29  ;;  %v303_v44 = vsel %vm12833_vm4, 0, %v302_v36  ;;  %v11829_v46 = vld [vmem:[#allocation2 + $0x6c] sm:$0xff]   ;;  %4403 = vmatprep.mubr.bf16.mxu1 %v11823_v39  ;;  %v745_v51 = vshll.u32 %v10562_v43, 16  ;;  %v410_v41 = vld [vmem:[%s12813_s28 + $0xc0] sm:$0xff]  ;;  %v411_v43 = vld [vmem:[%s12813_s28 + $0xc8] sm:$0xff] }
  0xea   : > { %304 = vst [vmem:[#allocation2 + $0x84] sm:$0x1] %v303_v44  ;;  %v1453_v53 = vshrl.u32 %v11829_v46, 16  ;;  %v1455_v54 = vshll.u32 %v11829_v46, 16  ;;  %v13060_v56 = vld [vmem:[#allocation2 + $0x6c] sm:$0xfe]  }
  0xeb   : > { %v1451_v60 = vsel %vm1343_vm6, %v1446_v27, %v1450_v21  ;;  %v744_v58 = vrot.slane %v742_v50, 7  ;;  %v750_v59 = vshrl.u32 %v10563_v49, 16  ;;  %v753_v61 = vshll.u32 %v10563_v49, 16  ;;  %v11842_v63 = vld [vmem:[#allocation9 + $0x128] sm:$0xff]   ;;  %v978_v9 = vld [vmem:[#allocation2 + $0x80] sm:$0x1] }
  0xec   : > { %4242 = vmatprep.mubr.bf16.mxu0 %v1451_v60  ;;  %v1457_v1 = vrot.slane %v1455_v54, 1  ;;  %10844 = vmatpush3.bf16.msra.mxu0 %v11842_v63  ;;  %v11832_v13 = vld [vmem:[#allocation2 + $0x6c] sm:$0xff]   ;;  %v759_v14 = vshrl.u32 %v10564_v2, 16  ;;  %v1772_v17 = vrot.slane %v13060_v56, 1  ;;  %v762_v18 = vshll.u32 %v10564_v2, 16 }
  0xed   : > { %v747_v3 = vor.u32 %v745_v51, %v744_v58  ;;  %v748_v4 = vrot.slane %v744_v58, 4  ;;  %v752_v5 = vrot.slane %v750_v59, 7  ;;  %v767_v20 = vshrl.u32 %v10565_v40, 16  ;;  %v358_v23 = vld [vmem:[#allocation2 + $0x8c] sm:$0x1]  ;;  %v11855_v49 = vld [vmem:[#allocation9 + $0x170] sm:$0xff]  }
  0xee   : > { %4404 = vmatmul.mubr.bf16.gmra.mrb[32].mxu1 %v1771_v34  ;;  %v1458_v6 = vor.u32 %v1457_v1, %v1453_v53  ;;  %v761_v27 = vrot.slane %v759_v14, 7  ;;  %v770_v28 = vshll.u32 %v10565_v40, 16  ;;  %v305_v29 = vld [vmem:[#allocation2 + $0x90] sm:$0x1]  ;;  %v408_v30 = vld [vmem:[%s12813_s28 + $0xb0] sm:$0xff]  ;;  %v359_v60 = vsel %vm12828_vm3, 0, %v358_v23  ;;  %10845 = vmatprep.subr.bf16.mxu0 %v11855_v49 }
  0xef   : > { %v11830_v0 = vld [vmem:[#allocation2 + $0x74] ss:$0 sps:$4 sm:$0x11]   ;;  %v755_v10 = vor.u32 %v753_v61, %v752_v5  ;;  %v757_v11 = vrot.slane %v752_v5, 4  ;;  %v975_v12 = vsel %vm12873_vm8, %v747_v3, %v974_v55  ;;  %v769_v47 = vrot.slane %v767_v20, 7  ;;  %v11857_v55 = vld [vmem:[#allocation9 + $0x1c0] sm:$0xff]  }
  0xf0   : > { %4243 = vmatmul.mubr.bf16.gmra.mrb[32].mxu0 %v11824_v31  ;;  %v1460_v7 = vshll.u32 %v11830_v0, 16  ;;  %v13063_v8 = vld [vmem:[#allocation2 + $0x74] ss:$0 sps:$4 sm:$0x11]   ;;  %976 = vst [vmem:[#allocation2 + $0x78] sm:$0xf] %v975_v12  ;;  %v764_v36 = vor.u32 %v762_v18, %v761_v27  ;;  %v444_v39 = vmul.f32 %v13038_v19, %v408_v30  ;;  %v446_v54 = vmul.f32 %v13038_v19, %v410_v41 }
  0xf1   : > { %v981_v21 = vld [vmem:[#allocation2 + $0x84] sm:$0xf]  ;;  %v756_v25 = vsel %vm12880_vm9, %v748_v4, %v755_v10  ;;  %v979_v42 = vsel %vm12833_vm4, %v757_v11, %v978_v9  ;;  %v409_v31 = vld [vmem:[%s12813_s28 + $0xb8] sm:$0xff]  ;;  %v361_v34 = vld [vmem:[#allocation2 + $0x98] sm:$0x1]  ;;  %v765_v37 = vrot.slane %v761_v27, 4  ;;  %v772_v45 = vor.u32 %v770_v28, %v769_v47  ;;  %10945 = vmatprep.subr.bf16.mxu1 %v11857_v55 }
  0xf2   : > { %v1462_v16 = vrot.slane %v1460_v7, 1  ;;  %977 = vst [vmem:[#allocation2 + $0x7c] sm:$0xf] %v756_v25  ;;  %980 = vst [vmem:[#allocation2 + $0x80] sm:$0x1] %v979_v42  ;;  %v306_v38 = vsel %vm12833_vm4, 0, %v305_v29  ;;  %v445_v46 = vmul.f32 %v13038_v19, %v409_v31  ;;  %v982_v51 = vsel %vm12873_vm8, %v764_v36, %v981_v21 }
  0xf3   : > { %360 = vst [vmem:[#allocation2 + $0x8c] sm:$0x1] %v359_v60  ;;  %v1773_v44 = vrot.slane %v13063_v8, 1  ;;  %307 = vst [vmem:[#allocation2 + $0x90] sm:$0x1] %v306_v38  ;;  %v362_v48 = vsel %vm12828_vm3, 0, %v361_v34  ;;  %v480_v52 = vadd.f32 %v13045_v33, %v444_v39  ;;  %v773_v56 = vsel %vm12880_vm9, %v765_v37, %v772_v45 }
  0xf4   : > { %v1463_v32 = vsel %vm1343_vm6, %v1458_v6, %v1462_v16  ;;  %v11856_v50 = vld [vmem:[#allocation9 + $0x130] sm:$0xff]   ;;  %363 = vst [vmem:[#allocation2 + $0x98] sm:$0x1] %v362_v48  ;;  %v309_v53 = vsel %vm12833_vm4, 0, %v308_v35  ;;  %983 = vst [vmem:[#allocation2 + $0x84] sm:$0xf] %v982_v51  ;;  %v447_v58 = vmul.f32 %v13038_v19, %v411_v43  ;;  %v481_v0 = vadd.f32 %v13045_v33, %v445_v46 }
  0xf5   : > { %4250 = vmatprep.mubr.bf16.mxu0 %v1463_v32  ;;  %310 = vst [vmem:[#allocation2 + $0x9c] sm:$0x1] %v309_v53  ;;  %984 = vst [vmem:[#allocation2 + $0x88] sm:$0xf] %v773_v56  ;;  %v10566_v57 = vpack.c.bf16 %v480_v52, %v480_v52  ;;  %10846 = vmatpush3.bf16.msra.mxu0 %v11856_v50  ;;  %v774_v59 = vrot.slane %v769_v47, 4  ;;  %v11858_v61 = vld [vmem:[#allocation9 + $0x180] sm:$0xff]   ;;  %v1774_v63 = vsel %vm1744_vm10, %v1772_v17, %v1773_v44 }
  0xf6   : > { %v482_v2 = vadd.f32 %v13045_v33, %v446_v54  ;;  %10946 = vmatpush3.bf16.msra.mxu1 %v11858_v61  ;;  %v483_v5 = vadd.f32 %v13045_v33, %v447_v58  ;;  %v10567_v12 = vpack.c.bf16 %v481_v0, %v481_v0  ;;  %v11859_v0 = vld [vmem:[#allocation9 + $0x1c8] sm:$0xff]  }
  0xf7   : > { %v776_v1 = vshrl.u32 %v10566_v57, 16  ;;  %v779_v9 = vshll.u32 %v10566_v57, 16  ;;  %10947 = vmatprep.subr.bf16.mxu1 %v11859_v0 }
  0xf8   : > { %4251 = vmatmul.mubr.bf16.gmra.mrb[36].mxu0 %v11832_v13  ;;  %v10568_v13 = vpack.c.bf16 %v482_v2, %v482_v2  ;;  %v10569_v30 = vpack.c.bf16 %v483_v5, %v483_v5  ;;  %v784_v32 = vshrl.u32 %v10567_v12, 16  ;;  %v787_v47 = vshll.u32 %v10567_v12, 16  ;;  %v311_v5 = vld [vmem:[#allocation2 + $0xa8] sm:$0x1]  ;;  %v413_v12 = vld [vmem:[%s12813_s28 + $0xd8] sm:$0xff] }
  0xf9   : > { %v11831_v62 = vld [vmem:[#allocation2 + $0x78] sm:$0xff]   ;;  %v11836_v3 = vld [vmem:[#allocation2 + $0x80] ss:$0 sps:$4 sm:$0x11]   ;;  %v778_v4 = vrot.slane %v776_v1, 7 }
  0xfa   : > { %v11835_v40 = vld [vmem:[#allocation2 + $0x78] sm:$0xff]   ;;  %4411 = vmatprep.mubr.bf16.mxu1 %v11831_v62  ;;  %v1472_v8 = vshll.u32 %v11836_v3, 16  ;;  %v985_v11 = vld [vmem:[#allocation2 + $0x8c] sm:$0x1]  ;;  %v988_v60 = vld [vmem:[#allocation2 + $0x90] sm:$0xf] }
  0xfb   : > { %4412 = vmatmul.mubr.bf16.gmra.mrb[36].mxu1 %v1774_v63  ;;  %v1465_v6 = vshrl.u32 %v11835_v40, 16  ;;  %v1467_v7 = vshll.u32 %v11835_v40, 16  ;;  %v11839_v10 = vld [vmem:[#allocation2 + $0x78] sm:$0xfe]   ;;  %v986_v18 = vsel %vm12833_vm4, %v774_v59, %v985_v11  ;;  %v781_v21 = vor.u32 %v779_v9, %v778_v4  ;;  %v992_v46 = vld [vmem:[#allocation2 + $0x98] sm:$0x1] }
  0xfc   : > { %v1474_v16 = vrot.slane %v1472_v8, 1  ;;  %v11837_v17 = vld [vmem:[#allocation2 + $0x84] sm:$0xff]   ;;  %v11840_v23 = vld [vmem:[#allocation2 + $0x80] ss:$0 sps:$4 sm:$0x11]   ;;  %v1775_v25 = vrot.slane %v11839_v10, 1 }
  0xfd   : > { %v1469_v14 = vrot.slane %v1467_v7, 1  ;;  %v11843_v20 = vld [vmem:[#allocation2 + $0x84] sm:$0xff]   ;;  %987 = vst [vmem:[#allocation2 + $0x8c] sm:$0x1] %v986_v18  ;;  %4419 = vmatprep.mubr.bf16.mxu1 %v11837_v17  ;;  %v11838_v27 = vld [vmem:[#allocation2 + $0x78] sm:$0xff]   ;;  %v1776_v31 = vrot.slane %v11840_v23, 1  ;;  %v989_v37 = vsel %vm12873_vm8, %v781_v21, %v988_v60 }
  0xfe   : > { %v1477_v28 = vshrl.u32 %v11843_v20, 16  ;;  %v1479_v29 = vshll.u32 %v11843_v20, 16  ;;  %v793_v34 = vshrl.u32 %v10568_v13, 16  ;;  %v782_v36 = vrot.slane %v778_v4, 4  ;;  %990 = vst [vmem:[#allocation2 + $0x90] sm:$0xf] %v989_v37 }
  0xff   : > { %v1470_v42 = vor.u32 %v1469_v14, %v1465_v6  ;;  %v796_v38 = vshll.u32 %v10568_v13, 16  ;;  %v1777_v39 = vsel %vm1744_vm10, %v1775_v25, %v1776_v31  ;;  %v786_v41 = vrot.slane %v784_v32, 7  ;;  %v11847_v45 = vld [vmem:[#allocation2 + $0x84] sm:$0xfe]   ;;  %v995_v53 = vld [vmem:[#allocation2 + $0x9c] sm:$0xf] }
 0x100   : > { %v795_v43 = vrot.slane %v793_v34, 7  ;;  %v1481_v44 = vrot.slane %v1479_v29, 1  ;;  %v801_v48 = vshrl.u32 %v10569_v30, 16  ;;  %v804_v52 = vshll.u32 %v10569_v30, 16  ;;  %v364_v1 = vld [vmem:[#allocation2 + $0xa4] sm:$0x1] }
 0x101   : > { %v1475_v35 = vsel %vm1343_vm6, %v1470_v42, %v1474_v16  ;;  %v789_v49 = vor.u32 %v787_v47, %v786_v41  ;;  %v791_v50 = vrot.slane %v786_v41, 4  ;;  %v11846_v2 = vld [vmem:[#allocation2 + $0x84] sm:$0xff]   ;;  %v1778_v40 = vrot.slane %v11847_v45, 1  ;;  %v11867_v18 = vld [vmem:[#allocation9 + $0x1d0] sm:$0xff]  }
 0x102   : > { %4258 = vmatprep.mubr.bf16.mxu0 %v1475_v35  ;;  %v798_v51 = vor.u32 %v796_v38, %v795_v43  ;;  %v799_v55 = vrot.slane %v795_v43, 4  ;;  %v803_v59 = vrot.slane %v801_v48, 7  ;;  %v1482_v62 = vor.u32 %v1481_v44, %v1477_v28  ;;  %v412_v6 = vld [vmem:[%s12813_s28 + $0xd0] sm:$0xff]  ;;  %v11868_v23 = vld [vmem:[#allocation9 + $0x190] sm:$0xff]  }
 0x103   : > { %4259 = vmatmul.mubr.bf16.gmra.mrb[40].mxu0 %v11838_v27  ;;  %4420 = vmatmul.mubr.bf16.gmra.mrb[40].mxu1 %v1777_v39  ;;  %v790_v56 = vsel %vm12880_vm9, %v782_v36, %v789_v49  ;;  %v993_v58 = vsel %vm12833_vm4, %v791_v50, %v992_v46  ;;  %v365_v4 = vsel %vm12828_vm3, 0, %v364_v1  ;;  %v312_v8 = vsel %vm12833_vm4, 0, %v311_v5  ;;  %v11863_v17 = vld [vmem:[#allocation9 + $0x188] sm:$0xff]   ;;  %v414_v1 = vld [vmem:[%s12813_s28 + $0xe0] sm:$0xff] }
 0x104   : > { %v11844_v54 = vld [vmem:[#allocation2 + $0x8c] ss:$0 sps:$4 sm:$0x11]   ;;  %v996_v61 = vsel %vm12873_vm8, %v798_v51, %v995_v53  ;;  %991 = vst [vmem:[#allocation2 + $0x94] sm:$0xf] %v790_v56  ;;  %v806_v3 = vor.u32 %v804_v52, %v803_v59  ;;  %v448_v9 = vmul.f32 %v13038_v19, %v412_v6  ;;  %v449_v14 = vmul.f32 %v13038_v19, %v413_v12 }
 0x105   : > { %v11848_v57 = vld [vmem:[#allocation2 + $0x8c] ss:$0 sps:$4 sm:$0x11]   ;;  %v1484_v63 = vshll.u32 %v11844_v54, 16  ;;  %994 = vst [vmem:[#allocation2 + $0x98] sm:$0x1] %v993_v58  ;;  %10948 = vmatpush3.bf16.msra.mxu1 %v11863_v17  ;;  %v450_v5 = vmul.f32 %v13038_v19, %v414_v1 }
 0x106   : > { %997 = vst [vmem:[#allocation2 + $0x9c] sm:$0xf] %v996_v61  ;;  %366 = vst [vmem:[#allocation2 + $0xa4] sm:$0x1] %v365_v4  ;;  %v1779_v10 = vrot.slane %v11848_v57, 1  ;;  %v807_v11 = vsel %vm12880_vm9, %v799_v55, %v806_v3  ;;  %v484_v16 = vadd.f32 %v13045_v33, %v448_v9  ;;  %v485_v20 = vadd.f32 %v13045_v33, %v449_v14  ;;  %v415_v4 = vld [vmem:[%s12813_s28 + $0xe8] sm:$0xff] }
 0x107   : > { %v1486_v7 = vrot.slane %v1484_v63, 1  ;;  %313 = vst [vmem:[#allocation2 + $0xa8] sm:$0x1] %v312_v8  ;;  %998 = vst [vmem:[#allocation2 + $0xa0] sm:$0xf] %v807_v11  ;;  %10949 = vmatprep.subr.bf16.mxu1 %v11867_v18  ;;  %v808_v29 = vrot.slane %v803_v59, 4  ;;  %v451_v8 = vmul.f32 %v13038_v19, %v415_v4 }
 0x108   : > { %v10570_v21 = vpack.c.bf16 %v484_v16, %v484_v16  ;;  %v1780_v42 = vsel %vm1744_vm10, %v1778_v40, %v1779_v10  ;;  %v10571_v30 = vpack.c.bf16 %v485_v20, %v485_v20  ;;  %v367_v6 = vld [vmem:[#allocation2 + $0xb0] sm:$0x1]  ;;  %v486_v16 = vadd.f32 %v13045_v33, %v450_v5  ;;  %v11877_v18 = vld [vmem:[#allocation9 + $0x178] sm:$0xff]  }
 0x109   : > { %v1487_v13 = vsel %vm1343_vm6, %v1482_v62, %v1486_v7  ;;  %10950 = vmatpush3.bf16.msra.mxu1 %v11868_v23  ;;  %v11869_v62 = vld [vmem:[#allocation9 + $0x1d8] sm:$0xff]   ;;  %v314_v7 = vld [vmem:[#allocation2 + $0xb4] sm:$0x1]  ;;  %v368_v11 = vsel %vm12828_vm3, 0, %v367_v6  ;;  %v487_v17 = vadd.f32 %v13045_v33, %v451_v8  ;;  %10847 = vmatprep.subr.bf16.mxu0 %v11877_v18 }
 0x10a   : > { %4266 = vmatprep.mubr.bf16.mxu0 %v1487_v13  ;;  %v810_v31 = vshrl.u32 %v10570_v21, 16  ;;  %v813_v34 = vshll.u32 %v10570_v21, 16  ;;  %v818_v52 = vshrl.u32 %v10571_v30, 16  ;;  %v821_v56 = vshll.u32 %v10571_v30, 16  ;;  %10951 = vmatprep.subr.bf16.mxu1 %v11869_v62  ;;  %v11873_v13 = vld [vmem:[#allocation9 + $0x198] sm:$0xff]  }
 0x10b   : > { %4267 = vmatmul.mubr.bf16.gmra.mrb[44].mxu0 %v11846_v2  ;;  %v11845_v25 = vld [vmem:[#allocation2 + $0x90] sm:$0xff]   ;;  %v315_v12 = vsel %vm12833_vm4, 0, %v314_v7  ;;  %369 = vst [vmem:[#allocation2 + $0xb0] sm:$0x1] %v368_v11  ;;  %v11878_v21 = vld [vmem:[#allocation9 + $0x138] sm:$0xff]  }
 0x10c   : > { %v11849_v27 = vld [vmem:[#allocation2 + $0x90] sm:$0xff]   ;;  %v11850_v28 = vld [vmem:[#allocation2 + $0x98] ss:$0 sps:$4 sm:$0x11]   ;;  %4427 = vmatprep.mubr.bf16.mxu1 %v11845_v25  ;;  %v812_v36 = vrot.slane %v810_v31, 7  ;;  %v13128_v59 = vrot.slane %v818_v52, 7  ;;  %10848 = vmatpush3.bf16.msra.mxu0 %v11878_v21 }
 0x10d   : > { %4428 = vmatmul.mubr.bf16.gmra.mrb[44].mxu1 %v1780_v42  ;;  %v1489_v32 = vshrl.u32 %v11849_v27, 16  ;;  %v1491_v47 = vshll.u32 %v11849_v27, 16  ;;  %v1496_v60 = vshll.u32 %v11850_v28, 16  ;;  %v11853_v39 = vld [vmem:[#allocation2 + $0x90] sm:$0xfe]   ;;  %v10572_v27 = vpack.c.bf16 %v486_v16, %v486_v16  ;;  %v11880_v31 = vld [vmem:[#allocation9 + $0x1a0] sm:$0xff]  }
 0x10e   : > { %v11851_v35 = vld [vmem:[#allocation2 + $0x9c] sm:$0xff]   ;;  %v999_v41 = vld [vmem:[#allocation2 + $0xa4] sm:$0x1]  ;;  %v11854_v43 = vld [vmem:[#allocation2 + $0x98] ss:$0 sps:$4 sm:$0x11]   ;;  %v815_v46 = vor.u32 %v813_v34, %v812_v36  ;;  %v823_v2 = vor.u32 %v821_v56, %v13128_v59  ;;  %10952 = vmatpush3.bf16.msra.mxu1 %v11873_v13  ;;  %v10573_v28 = vpack.c.bf16 %v487_v17, %v487_v17 }
 0x10f   : > { %v1493_v37 = vrot.slane %v1491_v47, 1  ;;  %v1498_v38 = vrot.slane %v1496_v60, 1  ;;  %4435 = vmatprep.mubr.bf16.mxu1 %v11851_v35  ;;  %v1000_v44 = vsel %vm12833_vm4, %v808_v29, %v999_v41  ;;  %v11860_v45 = vld [vmem:[#allocation2 + $0x9c] sm:$0xff]   ;;  %v11852_v49 = vld [vmem:[#allocation2 + $0x90] sm:$0xff]   ;;  %v1781_v50 = vrot.slane %v11853_v39, 1 }
 0x110   : > { %1001 = vst [vmem:[#allocation2 + $0xa4] sm:$0x1] %v1000_v44  ;;  %v816_v51 = vrot.slane %v812_v36, 4  ;;  %v1782_v53 = vrot.slane %v11854_v43, 1  ;;  %v1501_v54 = vshrl.u32 %v11860_v45, 16  ;;  %v1503_v55 = vshll.u32 %v11860_v45, 16 }
 0x111   : > { %v1494_v48 = vor.u32 %v1493_v37, %v1489_v32  ;;  %v1002_v57 = vld [vmem:[#allocation2 + $0xa8] sm:$0xf]  ;;  %v825_v40 = vrot.slane %v13128_v59, 4  ;;  %v11865_v3 = vld [vmem:[#allocation2 + $0x9c] sm:$0xfe]   ;;  %v827_v47 = vshrl.u32 %v10572_v27, 16 }
 0x112   : > { %v1003_v61 = vsel %vm12873_vm8, %v815_v46, %v1002_v57  ;;  %v1783_v63 = vsel %vm1744_vm10, %v1781_v50, %v1782_v53  ;;  %v1505_v0 = vrot.slane %v1503_v55, 1  ;;  %v824_v9 = vsel %vm12880_vm9, %v816_v51, %v823_v2  ;;  %316 = vst [vmem:[#allocation2 + $0xb4] sm:$0x1] %v315_v12  ;;  %v11864_v42 = vld [vmem:[#allocation2 + $0x9c] sm:$0xff]   ;;  %v11881_v36 = vld [vmem:[#allocation9 + $0x1e8] sm:$0xff]   ;;  %v417_v2 = vld [vmem:[%s12813_s28 + $0xf8] sm:$0xff] }
 0x113   : > { %v1499_v58 = vsel %vm1343_vm6, %v1494_v48, %v1498_v38  ;;  %1004 = vst [vmem:[#allocation2 + $0xa8] sm:$0xf] %v1003_v61  ;;  %v1784_v10 = vrot.slane %v11865_v3, 1  ;;  %1005 = vst [vmem:[#allocation2 + $0xac] sm:$0xf] %v824_v9  ;;  %v11879_v29 = vld [vmem:[#allocation9 + $0x1e0] sm:$0xff]   ;;  %v453_v4 = vmul.f32 %v13038_v19, %v417_v2 }
 0x114   : > { %4274 = vmatprep.mubr.bf16.mxu0 %v1499_v58  ;;  %v1506_v23 = vor.u32 %v1505_v0, %v1501_v54  ;;  %v830_v60 = vshll.u32 %v10572_v27, 16  ;;  %v835_v34 = vshrl.u32 %v10573_v28, 16  ;;  %10953 = vmatprep.subr.bf16.mxu1 %v11879_v29  ;;  %v838_v35 = vshll.u32 %v10573_v28, 16  ;;  %v1006_v44 = vld [vmem:[#allocation2 + $0xb0] sm:$0x1]  ;;  %v11885_v3 = vld [vmem:[#allocation9 + $0x1a8] sm:$0xff]  }
 0x115   : > { %4275 = vmatmul.mubr.bf16.gmra.mrb[48].mxu0 %v11852_v49  ;;  %4436 = vmatmul.mubr.bf16.gmra.mrb[48].mxu1 %v1783_v63  ;;  %v829_v38 = vrot.slane %v827_v47, 7  ;;  %v1007_v45 = vsel %vm12833_vm4, %v825_v40, %v1006_v44  ;;  %v370_v61 = vld [vmem:[#allocation2 + $0xbc] sm:$0x1]  ;;  %v317_v62 = vld [vmem:[#allocation2 + $0xc0] sm:$0x1]  ;;  %v416_v63 = vld [vmem:[%s12813_s28 + $0xf0] sm:$0xff]  ;;  %v489_v9 = vadd.f32 %v13045_v33, %v453_v4 }
 0x116   : > { %10954 = vmatpush3.bf16.msra.mxu1 %v11880_v31  ;;  %v13148_v39 = vrot.slane %v835_v34, 7  ;;  %1008 = vst [vmem:[#allocation2 + $0xb0] sm:$0x1] %v1007_v45  ;;  %v371_v0 = vsel %vm12828_vm3, 0, %v370_v61  ;;  %v318_v1 = vsel %vm12833_vm4, 0, %v317_v62  ;;  %v452_v40 = vmul.f32 %v13038_v19, %v416_v63  ;;  %v11889_v7 = vld [vmem:[#allocation9 + $0x1f0] sm:$0xff]  }
 0x117   : > { %v11861_v14 = vld [vmem:[#allocation2 + $0xa4] ss:$0 sps:$4 sm:$0x11]   ;;  %10955 = vmatprep.subr.bf16.mxu1 %v11881_v36  ;;  %v832_v48 = vor.u32 %v830_v60, %v829_v38  ;;  %v833_v49 = vrot.slane %v829_v38, 4  ;;  %372 = vst [vmem:[#allocation2 + $0xbc] sm:$0x1] %v371_v0  ;;  %v10575_v18 = vpack.c.bf16 %v489_v9, %v489_v9 }
 0x118   : > { %v11866_v20 = vld [vmem:[#allocation2 + $0xa4] ss:$0 sps:$4 sm:$0x11]   ;;  %v1508_v25 = vshll.u32 %v11861_v14, 16  ;;  %v840_v50 = vor.u32 %v838_v35, %v13148_v39  ;;  %v842_v54 = vrot.slane %v13148_v39, 4  ;;  %v488_v6 = vadd.f32 %v13045_v33, %v452_v40  ;;  %v11891_v33 = vld [vmem:[#allocation9 + $0x1f8] sm:$0xff]  }
 0x119   : > { %v1785_v30 = vrot.slane %v11866_v20, 1  ;;  %v1009_v51 = vld [vmem:[#allocation2 + $0xb4] sm:$0xf]  ;;  %319 = vst [vmem:[#allocation2 + $0xc0] sm:$0x1] %v318_v1  ;;  %v852_v27 = vshrl.u32 %v10575_v18, 16 }
 0x11a   : > { %v1510_v32 = vrot.slane %v1508_v25, 1  ;;  %v11862_v41 = vld [vmem:[#allocation2 + $0xa8] sm:$0xff]   ;;  %v841_v53 = vsel %vm12880_vm9, %v833_v49, %v840_v50  ;;  %v1010_v55 = vsel %vm12873_vm8, %v832_v48, %v1009_v51  ;;  %10956 = vmatpush3.bf16.msra.mxu1 %v11885_v3  ;;  %v10574_v14 = vpack.c.bf16 %v488_v6, %v488_v6  ;;  %v13178_v45 = vld [vmem:[#allocation9 + $0x200] sm:$0xff]   ;;  %v11893_v50 = vld [vmem:[#allocation2 + $0x14] ss:$0 sps:$4 sm:$0x11]  }
 0x11b   : > { %v1786_v43 = vsel %vm1744_vm10, %v1784_v10, %v1785_v30  ;;  %v11870_v46 = vld [vmem:[#allocation2 + $0xa8] sm:$0xff]   ;;  %4443 = vmatprep.mubr.bf16.mxu1 %v11862_v41  ;;  %1011 = vst [vmem:[#allocation2 + $0xb4] sm:$0xf] %v1010_v55  ;;  %1012 = vst [vmem:[#allocation2 + $0xb8] sm:$0xf] %v841_v53  ;;  %v11890_v10 = vld [vmem:[#allocation9 + $0x1b0] sm:$0xff]   ;;  %10957 = vmatprep.subr.bf16.mxu1 %v11889_v7 }
 0x11c   : > { %v1511_v37 = vsel %vm1343_vm6, %v1506_v23, %v1510_v32  ;;  %v1515_v52 = vshll.u32 %v11870_v46, 16  ;;  %v11875_v56 = vld [vmem:[#allocation2 + $0xa8] sm:$0xfe]   ;;  %v1513_v57 = vshrl.u32 %v11870_v46, 16  ;;  %v844_v21 = vshrl.u32 %v10574_v14, 16  ;;  %11553 = vmatprep.subr.bf16.mxu0 %v13178_v45 }
 0x11d   : > { %4282 = vmatprep.mubr.bf16.mxu0 %v1511_v37  ;;  %4444 = vmatmul.mubr.bf16.gmra.mrb[52].mxu1 %v1786_v43  ;;  %v1787_v59 = vrot.slane %v11875_v56, 1  ;;  %v11871_v5 = vld [vmem:[#allocation2 + $0xb0] ss:$0 sps:$4 sm:$0x11]   ;;  %v11874_v19 = vld [vmem:[#allocation2 + $0xa8] sm:$0xff]   ;;  %v847_v23 = vshll.u32 %v10574_v14, 16 }
 0x11e   : > { %4283 = vmatmul.mubr.bf16.gmra.mrb[52].mxu0 %v11864_v42  ;;  %v1517_v58 = vrot.slane %v1515_v52, 1  ;;  %v11876_v8 = vld [vmem:[#allocation2 + $0xb0] ss:$0 sps:$4 sm:$0x11]   ;;  %v1520_v12 = vshll.u32 %v11871_v5, 16  ;;  %10958 = vmatpush3.bf16.msra.mxu1 %v11890_v10  ;;  %v846_v30 = vrot.slane %v844_v21, 7 }
 0x11f   : > { %v1788_v16 = vrot.slane %v11876_v8, 1  ;;  %v1013_v29 = vld [vmem:[#allocation2 + $0xbc] sm:$0x1]  ;;  %v855_v31 = vshll.u32 %v10575_v18, 16  ;;  %v13173_v60 = vrot.slane %v852_v27, 7  ;;  %10959 = vmatprep.subr.bf16.mxu1 %v11891_v33  ;;  %v11895_v41 = vld [vmem:[#allocation2 + $0xc] sm:$0xff]  }
 0x120   : > { %v1518_v11 = vor.u32 %v1517_v58, %v1513_v57  ;;  %v1522_v20 = vrot.slane %v1520_v12, 1  ;;  %v1016_v32 = vld [vmem:[#allocation2 + $0xc0] sm:$0xf]  ;;  %v1014_v47 = vsel %vm12833_vm4, %v842_v54, %v1013_v29  ;;  %v849_v34 = vor.u32 %v847_v23, %v846_v30  ;;  %v11894_v37 = vld [vmem:[#allocation9 + $0x1b8] sm:$0xff]   ;;  %v11892_v48 = vld [vmem:[#allocation2 + $0xc] sm:$0xfe]  }
 0x121   : > { %v1789_v25 = vsel %vm1744_vm10, %v1787_v59, %v1788_v16  ;;  %1015 = vst [vmem:[#allocation2 + $0xbc] sm:$0x1] %v1014_v47  ;;  %v850_v35 = vrot.slane %v846_v30, 4  ;;  %v857_v39 = vor.u32 %v855_v31, %v13173_v60  ;;  %v2146_v51 = vshrl.u32 %v11895_v41, 16  ;;  %v11898_v54 = vld [vmem:[#allocation2 + $0x18] sm:$0xff]   ;;  %v11905_v21 = vld [vmem:[#allocation2 + $0x24] sm:$0xff]  }
 0x122   : > { %v11872_v13 = vld [vmem:[#allocation2 + $0xb4] sm:$0xff]   ;;  %v1523_v28 = vsel %vm1343_vm6, %v1518_v11, %v1522_v20  ;;  %v1017_v44 = vsel %vm12873_vm8, %v849_v34, %v1016_v32  ;;  %10960 = vmatpush3.bf16.msra.mxu1 %v11894_v37  ;;  %v2148_v52 = vshll.u32 %v11895_v41, 16  ;;  %v2545_v53 = vrot.slane %v11892_v48, 1  ;;  %v11899_v8 = vld [vmem:[#allocation2 + $0x20] ss:$0 sps:$4 sm:$0x11]  }
 0x123   : > { %v11882_v17 = vld [vmem:[#allocation2 + $0xb4] sm:$0xff]   ;;  %4451 = vmatprep.mubr.bf16.mxu1 %v11872_v13  ;;  %4290 = vmatprep.mubr.bf16.mxu0 %v1523_v28  ;;  %v858_v46 = vsel %vm12880_vm9, %v850_v35, %v857_v39  ;;  %1018 = vst [vmem:[#allocation2 + $0xc0] sm:$0xf] %v1017_v44  ;;  %v2546_v56 = vrot.slane %v11893_v50, 1  ;;  %v2949_v1 = vshll.u32 %v11898_v54, 16  ;;  %v2947_v4 = vshrl.u32 %v11898_v54, 16 }
 0x124   : > { %v1527_v42 = vshll.u32 %v11882_v17, 16  ;;  %v11887_v36 = vld [vmem:[#allocation2 + $0xb4] sm:$0xfe]   ;;  %v1525_v38 = vshrl.u32 %v11882_v17, 16  ;;  %1019 = vst [vmem:[#allocation2 + $0xc4] sm:$0xf] %v858_v46 }
 0x125   : > { %4452 = vmatmul.mubr.bf16.gmra.mrb[56].mxu1 %v1789_v25  ;;  %v1790_v49 = vrot.slane %v11887_v36, 1  ;;  %v2150_v58 = vrot.slane %v2148_v52, 1  ;;  %v11886_v62 = vld [vmem:[#allocation2 + $0xb4] sm:$0xff]   ;;  %v2547_v7 = vsel %vm1744_vm10, %v2545_v53, %v2546_v56  ;;  %v2951_v9 = vrot.slane %v2949_v1, 1  ;;  %v11910_v32 = vld [vmem:[#allocation2 + $0x24] sm:$0xff]  }
 0x126   : > { %4291 = vmatmul.mubr.bf16.gmra.mrb[56].mxu0 %v11874_v19  ;;  %v1529_v43 = vrot.slane %v1527_v42, 1  ;;  %v11896_v63 = vld [vmem:[#allocation2 + $0x14] ss:$0 sps:$4 sm:$0x11]   ;;  %v11903_v10 = vld [vmem:[#allocation2 + $0x18] sm:$0xff]   ;;  %v2954_v13 = vshll.u32 %v11899_v8, 16 }
 0x127   : > { %v2153_v3 = vshll.u32 %v11896_v63, 16  ;;  %v2952_v12 = vor.u32 %v2951_v9, %v2947_v4  ;;  %v2151_v14 = vor.u32 %v2150_v58, %v2146_v51  ;;  %v11900_v16 = vld [vmem:[#allocation2 + $0x18] sm:$0xff]   ;;  %v11902_v18 = vld [vmem:[#allocation2 + $0x20] ss:$0 sps:$4 sm:$0x11]   ;;  %v2160_v20 = vshll.u32 %v11903_v10, 16 }
 0x128   : > { %v11883_v55 = vld [vmem:[#allocation2 + $0xbc] ss:$0 sps:$4 sm:$0x11]   ;;  %v1530_v59 = vor.u32 %v1529_v43, %v1525_v38  ;;  %v2956_v19 = vrot.slane %v2954_v13, 1  ;;  %v2549_v25 = vrot.slane %v11902_v18, 1  ;;  %v2158_v42 = vshrl.u32 %v11903_v10, 16 }
 0x129   : > { %v11888_v57 = vld [vmem:[#allocation2 + $0xbc] ss:$0 sps:$4 sm:$0x11]   ;;  %v1532_v61 = vshll.u32 %v11883_v55, 16  ;;  %v2155_v11 = vrot.slane %v2153_v3, 1  ;;  %v2162_v27 = vrot.slane %v2160_v20, 1 }
 0x12a   : > { %v1791_v0 = vrot.slane %v11888_v57, 1  ;;  %v11901_v17 = vld [vmem:[#allocation2 + $0x18] sm:$0xfe]   ;;  %v2957_v33 = vsel %vm1343_vm6, %v2952_v12, %v2956_v19  ;;  %v11904_v28 = vld [vmem:[#allocation2 + $0x20] ss:$0 sps:$4 sm:$0x11]  }
 0x12b   : > { %v1534_v2 = vrot.slane %v1532_v61, 1  ;;  %v11884_v40 = vld [vmem:[#allocation2 + $0xc0] sm:$0xff]   ;;  %v2548_v23 = vrot.slane %v11901_v17, 1  ;;  %v2959_v29 = vshrl.u32 %v11905_v21, 16  ;;  %v2156_v30 = vsel %vm1343_vm6, %v2151_v14, %v2155_v11  ;;  %v11912_v50 = vld [vmem:[#allocation9 + $0x208] sm:$0xff]   ;;  %v11913_v54 = vld [vmem:[#allocation2 + $0x30] sm:$0xff]  }
 0x12c   : > { %v1792_v5 = vsel %vm1744_vm10, %v1790_v49, %v1791_v0  ;;  %4459 = vmatprep.mubr.bf16.mxu1 %v11884_v40  ;;  %v2961_v31 = vshll.u32 %v11905_v21, 16  ;;  %v2165_v34 = vshll.u32 %v11904_v28, 16  ;;  %v11906_v35 = vld [vmem:[#allocation2 + $0x2c] ss:$0 sps:$4 sm:$0x11]   ;;  %v2163_v39 = vor.u32 %v2162_v27, %v2158_v42  ;;  %v11907_v43 = vld [vmem:[#allocation2 + $0x24] sm:$0xff]  }
 0x12d   : > { %v1535_v6 = vsel %vm1343_vm6, %v1530_v59, %v1534_v2  ;;  %4460 = vmatmul.mubr.bf16.gmra.mrb[60].mxu1 %v1792_v5  ;;  %v2550_v47 = vsel %vm1744_vm10, %v2548_v23, %v2549_v25  ;;  %v2966_v38 = vshll.u32 %v11906_v35, 16  ;;  %v11908_v44 = vld [vmem:[#allocation2 + $0x24] sm:$0xfe]   ;;  %v11909_v46 = vld [vmem:[#allocation2 + $0x2c] ss:$0 sps:$4 sm:$0x11]  }
 0x12e   : > { %4298 = vmatprep.mubr.bf16.mxu0 %v1535_v6  ;;  %4661 = vmatprep.mubr.bf16.mxu1 %v2957_v33  ;;  %v2963_v36 = vrot.slane %v2961_v31, 1  ;;  %v2167_v37 = vrot.slane %v2165_v34, 1  ;;  %v2172_v48 = vshll.u32 %v11910_v32, 16  ;;  %v2551_v51 = vrot.slane %v11908_v44, 1  ;;  %v11915_v3 = vld [vmem:[#allocation2 + $0x30] sm:$0xff]   ;;  %v11920_v14 = vld [vmem:[#allocation2 + $0x3c] sm:$0xff]  }
 0x12f   : > { %4299 = vmatmul.mubr.bf16.gmra.mrb[60].mxu0 %v11886_v62  ;;  %v2968_v49 = vrot.slane %v2966_v38, 1  ;;  %v2552_v52 = vrot.slane %v11909_v46, 1  ;;  %v2170_v53 = vshrl.u32 %v11910_v32, 16  ;;  %v11911_v56 = vld [vmem:[#allocation2 + $0x2c] ss:$0 sps:$4 sm:$0x11]  }
 0x130   : > { %4500 = vmatprep.mubr.bf16.mxu0 %v2547_v7  ;;  %v2964_v41 = vor.u32 %v2963_v36, %v2959_v29  ;;  %v2174_v57 = vrot.slane %v2172_v48, 1  ;;  %v2177_v59 = vshll.u32 %v11911_v56, 16  ;;  %v11914_v61 = vld [vmem:[#allocation2 + $0x38] ss:$0 sps:$4 sm:$0x11]   ;;  %v2971_v62 = vshrl.u32 %v11913_v54, 16 }
 0x131   : > { %v2553_v58 = vsel %vm1744_vm10, %v2551_v51, %v2552_v52  ;;  %v2973_v63 = vshll.u32 %v11913_v54, 16  ;;  %v2978_v1 = vshll.u32 %v11914_v61, 16  ;;  %v11916_v4 = vld [vmem:[#allocation2 + $0x30] sm:$0xfe]   ;;  %v2983_v23 = vshrl.u32 %v11920_v14, 16  ;;  %v11922_v29 = vld [vmem:[#allocation2 + $0x3c] sm:$0xff]  }
 0x132   : > { %v2969_v55 = vsel %vm1343_vm6, %v2964_v41, %v2968_v49  ;;  %v2179_v0 = vrot.slane %v2177_v59, 1  ;;  %v2175_v2 = vor.u32 %v2174_v57, %v2170_v53  ;;  %v11918_v5 = vld [vmem:[#allocation2 + $0x30] sm:$0xff]   ;;  %v11917_v7 = vld [vmem:[#allocation2 + $0x38] ss:$0 sps:$4 sm:$0x11]   ;;  %v2554_v9 = vrot.slane %v11916_v4, 1 }
 0x133   : > { %v2975_v40 = vrot.slane %v2973_v63, 1  ;;  %v2980_v6 = vrot.slane %v2978_v1, 1  ;;  %v2182_v10 = vshrl.u32 %v11918_v5, 16  ;;  %v2555_v11 = vrot.slane %v11917_v7, 1  ;;  %v11925_v31 = vld [vmem:[#allocation2 + $0x3c] sm:$0xff]   ;;  %v11927_v41 = vld [vmem:[#allocation9 + $0x210] sm:$0xff]  }
 0x134   : > { %v11919_v12 = vld [vmem:[#allocation2 + $0x38] ss:$0 sps:$4 sm:$0x11]   ;;  %v2184_v13 = vshll.u32 %v11918_v5, 16  ;;  %v2985_v25 = vshll.u32 %v11920_v14, 16  ;;  %v2194_v36 = vshrl.u32 %v11925_v31, 16 }
 0x135   : > { %4662 = vmatmul.mubr.bf16.vlgmr.msra.gmra.mrb[64].mxu1 %v11900_v16  ;;  %v2976_v8 = vor.u32 %v2975_v40, %v2971_v62  ;;  %v2180_v16 = vsel %vm1343_vm6, %v2175_v2, %v2179_v0  ;;  %v2556_v18 = vsel %vm1744_vm10, %v2554_v9, %v2555_v11  ;;  %v2189_v19 = vshll.u32 %v11919_v12, 16  ;;  %v11921_v21 = vld [vmem:[#allocation2 + $0x44] ss:$0 sps:$4 sm:$0x11]   ;;  %v11933_v57 = vld [vmem:[#allocation2 + $0x48] sm:$0xff]  }
 0x136   : > { %4669 = vmatprep.mubr.bf16.mxu1 %v2969_v55  ;;  %v2186_v20 = vrot.slane %v2184_v13, 1  ;;  %v2990_v27 = vshll.u32 %v11921_v21, 16  ;;  %v2987_v28 = vrot.slane %v2985_v25, 1  ;;  %v11926_v38 = vld [vmem:[#allocation2 + $0x44] ss:$0 sps:$4 sm:$0x11]  }
 0x137   : > { %4501 = vmatmul.mubr.bf16.vlgmr.msra.gmra.mrb[64].mxu0 %v2156_v30  ;;  %v2981_v17 = vsel %vm1343_vm6, %v2976_v8, %v2980_v6  ;;  %v2191_v42 = vrot.slane %v2189_v19, 1  ;;  %v11923_v30 = vld [vmem:[#allocation2 + $0x3c] sm:$0xfe]   ;;  %v2201_v49 = vshll.u32 %v11926_v38, 16  ;;  %v11930_v61 = vld [vmem:[#allocation2 + $0x48] sm:$0xff]   ;;  %v2206_v63 = vshrl.u32 %v11933_v57, 16 }
 0x138   : > { %11554 = vmatpush3.bf16.msra.mxu0 %v13178_v45  ;;  %4508 = vmatprep.mubr.bf16.mxu0 %v2550_v47  ;;  %v2168_v45 = vsel %vm1343_vm6, %v2163_v39, %v2167_v37  ;;  %v2187_v33 = vor.u32 %v2186_v20, %v2182_v10  ;;  %v2992_v32 = vrot.slane %v2990_v27, 1  ;;  %v11924_v47 = vld [vmem:[#allocation2 + $0x44] ss:$0 sps:$4 sm:$0x11]   ;;  %v2988_v34 = vor.u32 %v2987_v28, %v2983_v23  ;;  %v11935_v6 = vld [vmem:[#allocation2 + $0x54] sm:$0xff]  }
 0x139   : > { %11555 = vmatprep.subr.bf16.mxu0 %v11912_v50  ;;  %v2557_v35 = vrot.slane %v11923_v30, 1  ;;  %v2558_v37 = vrot.slane %v11924_v47, 1  ;;  %v2196_v39 = vshll.u32 %v11925_v31, 16  ;;  %v11929_v51 = vld [vmem:[#allocation2 + $0x50] ss:$0 sps:$4 sm:$0x11]  }
 0x13a   : > { %v2993_v44 = vsel %vm1343_vm6, %v2988_v34, %v2992_v32  ;;  %v2203_v52 = vrot.slane %v2201_v49, 1  ;;  %v3002_v56 = vshll.u32 %v11929_v51, 16  ;;  %v11932_v62 = vld [vmem:[#allocation2 + $0x50] ss:$0 sps:$4 sm:$0x11]   ;;  %v2208_v1 = vshll.u32 %v11933_v57, 16 }
 0x13b   : > { %v2559_v46 = vsel %vm1744_vm10, %v2557_v35, %v2558_v37  ;;  %v2198_v48 = vrot.slane %v2196_v39, 1  ;;  %v11934_v4 = vld [vmem:[#allocation2 + $0x50] ss:$0 sps:$4 sm:$0x11]   ;;  %v3007_v11 = vshrl.u32 %v11935_v6, 16  ;;  %v3009_v12 = vshll.u32 %v11935_v6, 16 }
 0x13c   : > { %11556 = vmatpush3.bf16.msra.mxu0 %v11912_v50  ;;  %v11928_v50 = vld [vmem:[#allocation2 + $0x48] sm:$0xff]   ;;  %v3004_v59 = vrot.slane %v3002_v56, 1  ;;  %v2210_v5 = vrot.slane %v2208_v1, 1  ;;  %v2213_v9 = vshll.u32 %v11934_v4, 16  ;;  %v11940_v13 = vld [vmem:[#allocation2 + $0x54] sm:$0xff]  }
 0x13d   : > { %4670 = vmatmul.mubr.bf16.gmra.mrb[68].mxu1 %v11907_v43  ;;  %v2192_v43 = vsel %vm1343_vm6, %v2187_v33, %v2191_v42  ;;  %11557 = vmatprep.subr.bf16.mxu0 %v11927_v41  ;;  %v2199_v53 = vor.u32 %v2198_v48, %v2194_v36  ;;  %v2995_v54 = vshrl.u32 %v11928_v50, 16  ;;  %v2997_v55 = vshll.u32 %v11928_v50, 16  ;;  %v11936_v10 = vld [vmem:[#allocation2 + $0x5c] ss:$0 sps:$4 sm:$0x11]   ;;  %v11937_v23 = vld [vmem:[#allocation2 + $0x54] sm:$0xff]  }
 0x13e   : > { %4677 = vmatprep.mubr.bf16.mxu1 %v2981_v17  ;;  %v2211_v14 = vor.u32 %v2210_v5, %v2206_v63  ;;  %v3014_v17 = vshll.u32 %v11936_v10, 16  ;;  %v11938_v20 = vld [vmem:[#allocation2 + $0x54] sm:$0xfe]   ;;  %v2218_v19 = vshrl.u32 %v11940_v13, 16  ;;  %v2220_v33 = vshll.u32 %v11940_v13, 16  ;;  %v11943_v36 = vld [vmem:[#allocation2 + $0x60] sm:$0xff]  }
 0x13f   : > { %4509 = vmatmul.mubr.bf16.gmra.mrb[68].mxu0 %v2168_v45  ;;  %v11931_v45 = vld [vmem:[#allocation2 + $0x48] sm:$0xfe]   ;;  %v2204_v2 = vsel %vm1343_vm6, %v2199_v53, %v2203_v52  ;;  %v11939_v25 = vld [vmem:[#allocation2 + $0x5c] ss:$0 sps:$4 sm:$0x11]   ;;  %v2563_v27 = vrot.slane %v11938_v20, 1 }
 0x140   : > { %4516 = vmatprep.mubr.bf16.mxu0 %v2553_v58  ;;  %11558 = vmatpush3.bf16.msra.mxu0 %v11927_v41  ;;  %v2999_v58 = vrot.slane %v2997_v55, 1  ;;  %v2560_v0 = vrot.slane %v11931_v45, 1  ;;  %v3016_v21 = vrot.slane %v3014_v17, 1  ;;  %v11941_v30 = vld [vmem:[#allocation2 + $0x5c] ss:$0 sps:$4 sm:$0x11]  }
 0x141   : > { %v2222_v32 = vrot.slane %v2220_v33, 1  ;;  %v11942_v47 = vld [vmem:[#allocation9 + $0x218] sm:$0xff]   ;;  %v2225_v35 = vshll.u32 %v11941_v30, 16  ;;  %v11944_v37 = vld [vmem:[#allocation2 + $0x68] ss:$0 sps:$4 sm:$0x11]  }
 0x142   : > { %v3000_v40 = vor.u32 %v2999_v58, %v2995_v54  ;;  %11559 = vmatprep.subr.bf16.mxu0 %v11942_v47  ;;  %v3019_v41 = vshrl.u32 %v11943_v36, 16  ;;  %v11950_v48 = vld [vmem:[#allocation2 + $0x6c] sm:$0xff]   ;;  %v11945_v50 = vld [vmem:[#allocation2 + $0x60] sm:$0xff]   ;;  %v11947_v54 = vld [vmem:[#allocation2 + $0x68] ss:$0 sps:$4 sm:$0x11]  }
 0x143   : > { %v2223_v38 = vor.u32 %v2222_v32, %v2218_v19  ;;  %v2227_v39 = vrot.slane %v2225_v35, 1  ;;  %v11946_v51 = vld [vmem:[#allocation2 + $0x60] sm:$0xfe]   ;;  %v2567_v58 = vrot.slane %v11947_v54, 1  ;;  %v11961_v35 = vld [vmem:[#allocation2 + $0x78] sm:$0xfe]  }
 0x144   : > { %v3005_v7 = vsel %vm1343_vm6, %v3000_v40, %v3004_v59  ;;  %11560 = vmatpush3.bf16.msra.mxu0 %v11942_v47  ;;  %v2566_v57 = vrot.slane %v11946_v51, 1  ;;  %v11949_v59 = vld [vmem:[#allocation2 + $0x68] ss:$0 sps:$4 sm:$0x11]   ;;  %v3033_v40 = vshll.u32 %v11950_v48, 16 }
 0x145   : > { %4678 = vmatmul.mubr.bf16.gmra.mrb[72].mxu1 %v11915_v3  ;;  %v2561_v3 = vrot.slane %v11932_v62, 1  ;;  %v2228_v55 = vsel %vm1343_vm6, %v2223_v38, %v2227_v39  ;;  %v11951_v1 = vld [vmem:[#allocation2 + $0x74] ss:$0 sps:$4 sm:$0x11]  }
 0x146   : > { %4685 = vmatprep.mubr.bf16.mxu1 %v2993_v44  ;;  %v11948_v44 = vld [vmem:[#allocation2 + $0x60] sm:$0xff]   ;;  %v2568_v63 = vsel %vm1744_vm10, %v2566_v57, %v2567_v58  ;;  %v3035_v5 = vrot.slane %v3033_v40, 1  ;;  %v3038_v6 = vshll.u32 %v11951_v1, 16  ;;  %v11966_v57 = vld [vmem:[#allocation2 + $0x8c] ss:$0 sps:$4 sm:$0x11]  }
 0x147   : > { %4517 = vmatmul.mubr.bf16.gmra.mrb[72].mxu0 %v2180_v16  ;;  %v2562_v8 = vsel %vm1744_vm10, %v2560_v0, %v2561_v3  ;;  %v2215_v16 = vrot.slane %v2213_v9, 1  ;;  %v2230_v52 = vshrl.u32 %v11948_v44, 16  ;;  %v2232_v45 = vshll.u32 %v11948_v44, 16  ;;  %v11953_v9 = vld [vmem:[#allocation2 + $0x6c] sm:$0xfe]  }
 0x148   : > { %4524 = vmatprep.mubr.bf16.mxu0 %v2556_v18  ;;  %v3011_v18 = vrot.slane %v3009_v12, 1  ;;  %v2237_v0 = vshll.u32 %v11949_v59, 16  ;;  %v11954_v12 = vld [vmem:[#allocation2 + $0x74] ss:$0 sps:$4 sm:$0x11]   ;;  %v2572_v44 = vrot.slane %v11961_v35, 1 }
 0x149   : > { %v2216_v28 = vsel %vm1343_vm6, %v2211_v14, %v2215_v16  ;;  %v2234_v62 = vrot.slane %v2232_v45, 1  ;;  %v2569_v14 = vrot.slane %v11953_v9, 1  ;;  %v11956_v16 = vld [vmem:[#allocation2 + $0x74] ss:$0 sps:$4 sm:$0x11]  }
 0x14a   : > { %v3012_v42 = vor.u32 %v3011_v18, %v3007_v11  ;;  %v2239_v4 = vrot.slane %v2237_v0, 1  ;;  %v3040_v11 = vrot.slane %v3038_v6, 1  ;;  %v2570_v18 = vrot.slane %v11954_v12, 1  ;;  %v11964_v51 = vld [vmem:[#allocation2 + $0x80] ss:$0 sps:$4 sm:$0x11]  }
 0x14b   : > { %v2235_v3 = vor.u32 %v2234_v62, %v2230_v52  ;;  %v11967_v62 = vld [vmem:[#allocation2 + $0x84] sm:$0xff]   ;;  %v11969_v1 = vld [vmem:[#allocation2 + $0x8c] ss:$0 sps:$4 sm:$0x11]  }
 0x14c   : > { %v3017_v31 = vsel %vm1343_vm6, %v3012_v42, %v3016_v21  ;;  %v11957_v21 = vld [vmem:[#allocation9 + $0x220] sm:$0xff]   ;;  %v2571_v42 = vsel %vm1744_vm10, %v2569_v14, %v2570_v18  ;;  %v2576_v6 = vrot.slane %v11969_v1, 1  ;;  %v11974_v18 = vld [vmem:[#allocation2 + $0x98] ss:$0 sps:$4 sm:$0x11]  }
 0x14d   : > { %4686 = vmatmul.mubr.bf16.gmra.mrb[76].mxu1 %v11922_v29  ;;  %v2564_v29 = vrot.slane %v11939_v25, 1  ;;  %v2240_v13 = vsel %vm1343_vm6, %v2235_v3, %v2239_v4  ;;  %v11958_v25 = vld [vmem:[#allocation2 + $0x78] sm:$0xff]   ;;  %11561 = vmatprep.subr.bf16.mxu0 %v11957_v21  ;;  %v11968_v0 = vld [vmem:[#allocation2 + $0x84] sm:$0xfe]  }
 0x14e   : > { %4693 = vmatprep.mubr.bf16.mxu1 %v3005_v7  ;;  %v11955_v7 = vld [vmem:[#allocation2 + $0x6c] sm:$0xff]   ;;  %v3045_v30 = vshll.u32 %v11958_v25, 16  ;;  %11562 = vmatpush3.bf16.msra.mxu0 %v11957_v21 }
 0x14f   : > { %4525 = vmatmul.mubr.bf16.gmra.mrb[76].mxu0 %v2192_v43  ;;  %v2565_v34 = vsel %vm1744_vm10, %v2563_v27, %v2564_v29  ;;  %v3021_v43 = vshll.u32 %v11943_v36, 16  ;;  %v2242_v20 = vshrl.u32 %v11955_v7, 16  ;;  %v2244_v19 = vshll.u32 %v11955_v7, 16  ;;  %v11962_v36 = vld [vmem:[#allocation2 + $0x80] ss:$0 sps:$4 sm:$0x11]  }
 0x150   : > { %4532 = vmatprep.mubr.bf16.mxu0 %v2559_v46  ;;  %v3026_v46 = vshll.u32 %v11944_v37, 16  ;;  %v3043_v29 = vshrl.u32 %v11958_v25, 16  ;;  %v3047_v32 = vrot.slane %v3045_v30, 1  ;;  %v11963_v37 = vld [vmem:[#allocation2 + $0x78] sm:$0xff]   ;;  %v11972_v4 = vld [vmem:[#allocation9 + $0x228] sm:$0xff]   ;;  %v11978_v25 = vld [vmem:[#allocation2 + $0x90] sm:$0xff]  }
 0x151   : > { %v3023_v49 = vrot.slane %v3021_v43, 1  ;;  %v2246_v27 = vrot.slane %v2244_v19, 1  ;;  %v11965_v43 = vld [vmem:[#allocation2 + $0x84] sm:$0xff]   ;;  %11563 = vmatprep.subr.bf16.mxu0 %v11972_v4 }
 0x152   : > { %v3028_v53 = vrot.slane %v3026_v46, 1  ;;  %v3048_v39 = vor.u32 %v3047_v32, %v3043_v29  ;;  %v2573_v46 = vrot.slane %v11962_v36, 1  ;;  %v3055_v52 = vshrl.u32 %v11965_v43, 16  ;;  %11564 = vmatpush3.bf16.msra.mxu0 %v11972_v4 }
 0x153   : > { %v3024_v56 = vor.u32 %v3023_v49, %v3019_v41  ;;  %v2256_v49 = vshll.u32 %v11963_v37, 16 }
 0x155   : > { %4694 = vmatmul.mubr.bf16.gmra.mrb[80].mxu1 %v11930_v61  ;;  %v3029_v61 = vsel %vm1343_vm6, %v3024_v56, %v3028_v53  ;;  %v2574_v53 = vsel %vm1744_vm10, %v2572_v44, %v2573_v46  ;;  %v2258_v54 = vrot.slane %v2256_v49, 1  ;;  %v2261_v56 = vshll.u32 %v11964_v51, 16  ;;  %v11977_v46 = vld [vmem:[#allocation2 + $0x98] ss:$0 sps:$4 sm:$0x11]  }
 0x156   : > { %4701 = vmatprep.mubr.bf16.mxu1 %v3017_v31  ;;  %v2247_v31 = vor.u32 %v2246_v27, %v2242_v20  ;;  %v3074_v27 = vshll.u32 %v11974_v18, 16 }
 0x157   : > { %4533 = vmatmul.mubr.bf16.gmra.mrb[80].mxu0 %v2204_v2  ;;  %v3031_v2 = vshrl.u32 %v11950_v48, 16  ;;  %v2254_v48 = vshrl.u32 %v11963_v37, 16  ;;  %v2263_v59 = vrot.slane %v2261_v56, 1 }
 0x158   : > { %4540 = vmatprep.mubr.bf16.mxu0 %v2562_v8  ;;  %v11952_v8 = vld [vmem:[#allocation2 + $0x6c] sm:$0xff]   ;;  %v3076_v36 = vrot.slane %v3074_v27, 1 }
 0x159   : > { %v3036_v10 = vor.u32 %v3035_v5, %v3031_v2  ;;  %v2259_v45 = vor.u32 %v2258_v54, %v2254_v48  ;;  %v11970_v2 = vld [vmem:[#allocation2 + $0x84] sm:$0xff]   ;;  %v2575_v5 = vrot.slane %v11968_v0, 1  ;;  %v2280_v48 = vshll.u32 %v11978_v25, 16  ;;  %v11979_v54 = vld [vmem:[#allocation2 + $0x98] ss:$0 sps:$4 sm:$0x11]  }
 0x15a   : > { %v2266_v7 = vshrl.u32 %v11970_v2, 16 }
 0x15b   : > { %v3041_v17 = vsel %vm1343_vm6, %v3036_v10, %v3040_v11  ;;  %v2264_v40 = vsel %vm1343_vm6, %v2259_v45, %v2263_v59  ;;  %v11971_v10 = vld [vmem:[#allocation2 + $0x8c] ss:$0 sps:$4 sm:$0x11]   ;;  %v11973_v11 = vld [vmem:[#allocation2 + $0x90] sm:$0xff]   ;;  %v2577_v12 = vsel %vm1744_vm10, %v2575_v5, %v2576_v6  ;;  %v11982_v5 = vld [vmem:[#allocation2 + $0x9c] sm:$0xff]  }
 0x15c   : > { %v2273_v14 = vshll.u32 %v11971_v10, 16  ;;  %v3069_v20 = vshll.u32 %v11973_v11, 16  ;;  %v11981_v59 = vld [vmem:[#allocation2 + $0xa4] ss:$0 sps:$4 sm:$0x11]   ;;  %v11985_v10 = vld [vmem:[#allocation2 + $0x9c] sm:$0xff]  }
 0x15d   : > { %4702 = vmatmul.mubr.bf16.gmra.mrb[84].mxu1 %v11937_v23  ;;  %v2249_v23 = vshll.u32 %v11956_v16, 16  ;;  %v3067_v16 = vshrl.u32 %v11973_v11, 16 }
 0x15e   : > { %4709 = vmatprep.mubr.bf16.mxu1 %v3029_v61  ;;  %v3062_v61 = vshll.u32 %v11966_v57, 16  ;;  %v2275_v19 = vrot.slane %v2273_v14, 1 }
 0x15f   : > { %4541 = vmatmul.mubr.bf16.gmra.mrb[84].mxu0 %v2216_v28  ;;  %v2251_v33 = vrot.slane %v2249_v23, 1  ;;  %v11959_v28 = vld [vmem:[#allocation2 + $0x80] ss:$0 sps:$4 sm:$0x11]  }
 0x160   : > { %4548 = vmatprep.mubr.bf16.mxu0 %v2565_v34  ;;  %v3050_v47 = vshll.u32 %v11959_v28, 16  ;;  %v11960_v34 = vld [vmem:[#allocation2 + $0x78] sm:$0xff]   ;;  %v3064_v3 = vrot.slane %v3062_v61, 1 }
 0x161   : > { %v2252_v38 = vsel %vm1343_vm6, %v2247_v31, %v2251_v33  ;;  %v11975_v33 = vld [vmem:[#allocation2 + $0x90] sm:$0xff]  }
 0x162   : > { %v3052_v41 = vrot.slane %v3050_v47, 1 }
 0x165   : > { %4710 = vmatmul.mubr.bf16.gmra.mrb[88].mxu1 %v11945_v50  ;;  %v3053_v50 = vsel %vm1343_vm6, %v3048_v39, %v3052_v41  ;;  %v11976_v39 = vld [vmem:[#allocation2 + $0x90] sm:$0xfe]   ;;  %v2278_v41 = vshrl.u32 %v11978_v25, 16 }
 0x166   : > { %4717 = vmatprep.mubr.bf16.mxu1 %v3041_v17  ;;  %v2578_v51 = vrot.slane %v11976_v39, 1 }
 0x167   : > { %4549 = vmatmul.mubr.bf16.gmra.mrb[88].mxu0 %v2228_v55  ;;  %v3057_v55 = vshll.u32 %v11965_v43, 16 }
 0x168   : > { %4556 = vmatprep.mubr.bf16.mxu0 %v2568_v63 }
 0x169   : > { %v3059_v58 = vrot.slane %v3057_v55, 1  ;;  %v2282_v55 = vrot.slane %v2280_v48, 1 }
 0x16b   : > { %v3060_v63 = vor.u32 %v3059_v58, %v3055_v52  ;;  %v11980_v52 = vld [vmem:[#allocation2 + $0x9c] sm:$0xff]   ;;  %v2283_v45 = vor.u32 %v2282_v55, %v2278_v41  ;;  %v2285_v58 = vshll.u32 %v11979_v54, 16 }
 0x16c   : > { %v3079_v61 = vshrl.u32 %v11980_v52, 16 }
 0x16d   : > { %4718 = vmatmul.mubr.bf16.gmra.mrb[92].mxu1 %v11952_v8  ;;  %v2268_v8 = vshll.u32 %v11970_v2, 16  ;;  %v3065_v9 = vsel %vm1343_vm6, %v3060_v63, %v3064_v3  ;;  %v3081_v63 = vshll.u32 %v11980_v52, 16  ;;  %v2287_v1 = vrot.slane %v2285_v58, 1  ;;  %v11990_v58 = vld [vmem:[#allocation2 + $0xa8] sm:$0xff]  }
 0x16e   : > { %4725 = vmatprep.mubr.bf16.mxu1 %v3053_v50  ;;  %v3086_v2 = vshll.u32 %v11981_v59, 16 }
 0x16f   : > { %4557 = vmatmul.mubr.bf16.gmra.mrb[92].mxu0 %v2240_v13  ;;  %v2270_v13 = vrot.slane %v2268_v8, 1  ;;  %v3083_v4 = vrot.slane %v3081_v63, 1  ;;  %v2288_v11 = vsel %vm1343_vm6, %v2283_v45, %v2287_v1  ;;  %v11992_v1 = vld [vmem:[#allocation2 + $0xb0] ss:$0 sps:$4 sm:$0x11]  }
 0x170   : > { %4564 = vmatprep.mubr.bf16.mxu0 %v2571_v42  ;;  %v3071_v42 = vrot.slane %v3069_v20, 1 }
 0x171   : > { %v2271_v17 = vor.u32 %v2270_v13, %v2266_v7 }
 0x172   : > { %v3072_v35 = vor.u32 %v3071_v42, %v3067_v16  ;;  %v11987_v16 = vld [vmem:[#allocation9 + $0x230] sm:$0xff]  }
 0x173   : > { %v2276_v30 = vsel %vm1343_vm6, %v2271_v17, %v2275_v19  ;;  %v3084_v17 = vor.u32 %v3083_v4, %v3079_v61  ;;  %v11983_v19 = vld [vmem:[#allocation2 + $0x9c] sm:$0xfe]   ;;  %11565 = vmatprep.subr.bf16.mxu0 %v11987_v16 }
 0x174   : > { %v3077_v50 = vsel %vm1343_vm6, %v3072_v35, %v3076_v36  ;;  %v2581_v27 = vrot.slane %v11983_v19, 1  ;;  %11566 = vmatpush3.bf16.msra.mxu0 %v11987_v16  ;;  %v11989_v35 = vld [vmem:[#allocation2 + $0xb0] ss:$0 sps:$4 sm:$0x11]  }
 0x175   : > { %4726 = vmatmul.mubr.bf16.gmra.mrb[96].mxu1 %v11960_v34 }
 0x176   : > { %4733 = vmatprep.mubr.bf16.mxu1 %v3065_v9 }
 0x177   : > { %4565 = vmatmul.mubr.bf16.gmra.mrb[96].mxu0 %v2252_v38 }
 0x178   : > { %4572 = vmatprep.mubr.bf16.mxu0 %v2574_v53  ;;  %v2579_v53 = vrot.slane %v11977_v46, 1 }
 0x17a   : > { %v2580_v57 = vsel %vm1744_vm10, %v2578_v51, %v2579_v53 }
 0x17d   : > { %4734 = vmatmul.mubr.bf16.gmra.mrb[100].mxu1 %v11967_v62  ;;  %v10625_v21 = vpop.f32.mrb[0].mxu0 }
 0x17e   : > { %v10626_v28 = vpop.f32.mrb[1].mxu0  ;;  %4741 = vmatprep.mubr.bf16.mxu1 %v3077_v50  ;;  %v11993_v50 = vld [vmem:[#allocation2 + $0xa8] sm:$0xff]  }
 0x17f   : > { %4573 = vmatmul.mubr.bf16.gmra.mrb[100].mxu0 %v2264_v40  ;;  %v10627_v31 = vadd.f32 %v10626_v28, %v10625_v21  ;;  %v10628_v47 = vpop.f32.mrb[2].mxu0  ;;  %v11984_v21 = vld [vmem:[#allocation2 + $0xa4] ss:$0 sps:$4 sm:$0x11]  }
 0x180   : > { %4580 = vmatprep.mubr.bf16.mxu0 %v2577_v12  ;;  %v10629_v37 = vpop.f32.mrb[3].mxu0  ;;  %v3088_v12 = vrot.slane %v3086_v2, 1  ;;  %v11986_v28 = vld [vmem:[#allocation2 + $0xa4] ss:$0 sps:$4 sm:$0x11]   ;;  %v2302_v2 = vshrl.u32 %v11993_v50, 16 }
 0x181   : > { %v10737_v23 = vpop.f32.mrb[0].mxu1  ;;  %v10630_v43 = vadd.f32 %v10629_v37, %v10628_v47  ;;  %v2297_v47 = vshll.u32 %v11986_v28, 16 }
 0x182   : > { %v10738_v29 = vpop.f32.mrb[1].mxu1  ;;  %v3089_v42 = vsel %vm1343_vm6, %v3084_v17, %v3088_v12 }
 0x183   : > { %v10739_v32 = vadd.f32 %v10738_v29, %v10737_v23  ;;  %v10740_v34 = vpop.f32.mrb[2].mxu1  ;;  %v2290_v23 = vshrl.u32 %v11985_v10, 16  ;;  %v2292_v29 = vshll.u32 %v11985_v10, 16  ;;  %v2299_v37 = vrot.slane %v2297_v47, 1 }
 0x184   : > { %v10741_v38 = vpop.f32.mrb[3].mxu1 }
 0x185   : > { %v10742_v44 = vadd.f32 %v10741_v38, %v10740_v34  ;;  %v13218_v49 = vadd.f32 %v10739_v32, %v10627_v31  ;;  %4742 = vmatmul.mubr.bf16.gmra.mrb[104].mxu1 %v11975_v33  ;;  %v2582_v33 = vrot.slane %v11984_v21, 1  ;;  %v2294_v32 = vrot.slane %v2292_v29, 1  ;;  %v11988_v34 = vld [vmem:[#allocation2 + $0xa8] sm:$0xff]  }
 0x186   : > { %4749 = vmatprep.mubr.bf16.mxu1 %v3089_v42  ;;  %v3091_v41 = vshrl.u32 %v11988_v34, 16  ;;  %v12000_v42 = vld [vmem:[#allocation2 + $0xb4] sm:$0xff]  }
 0x187   : > { %4581 = vmatmul.mubr.bf16.gmra.mrb[104].mxu0 %v2276_v30  ;;  %v13221_v56 = vadd.f32 %v10742_v44, %v10630_v43  ;;  %v2583_v31 = vsel %vm1744_vm10, %v2581_v27, %v2582_v33  ;;  %v2295_v36 = vor.u32 %v2294_v32, %v2290_v23  ;;  %v3093_v43 = vshll.u32 %v11988_v34, 16  ;;  %v11997_v34 = vld [vmem:[#allocation2 + $0xb4] sm:$0xff]  }
 0x188   : > { %4588 = vmatprep.mubr.bf16.mxu0 %v2580_v57  ;;  %v3098_v44 = vshll.u32 %v11989_v35, 16 }
 0x189   : > { %v10631_v62 = vpop.f32.mrb[4].mxu0  ;;  %v10743_v0 = vpop.f32.mrb[4].mxu1  ;;  %v2300_v51 = vsel %vm1343_vm6, %v2295_v36, %v2299_v37  ;;  %v3095_v57 = vrot.slane %v3093_v43, 1 }
 0x18a   : > { %v10632_v40 = vpop.f32.mrb[5].mxu0  ;;  %v10744_v3 = vpop.f32.mrb[5].mxu1  ;;  %v3100_v45 = vrot.slane %v3098_v44, 1  ;;  %v11998_v44 = vld [vmem:[#allocation2 + $0xb4] sm:$0xfe]  }
 0x18b   : > { %v10633_v6 = vadd.f32 %v10632_v40, %v10631_v62  ;;  %v10745_v7 = vadd.f32 %v10744_v3, %v10743_v0  ;;  %v10634_v8 = vpop.f32.mrb[6].mxu0  ;;  %v10746_v9 = vpop.f32.mrb[6].mxu1  ;;  %v11991_v0 = vld [vmem:[#allocation2 + $0xa8] sm:$0xfe]   ;;  %v3096_v3 = vor.u32 %v3095_v57, %v3091_v41 }
 0x18c   : > { %v10635_v13 = vpop.f32.mrb[7].mxu0  ;;  %v10747_v14 = vpop.f32.mrb[7].mxu1  ;;  %v2584_v4 = vrot.slane %v11991_v0, 1  ;;  %v12001_v57 = vld [vmem:[#allocation2 + $0xbc] ss:$0 sps:$4 sm:$0x11]  }
 0x18d   : > { %v10636_v18 = vadd.f32 %v10635_v13, %v10634_v8  ;;  %v10748_v20 = vadd.f32 %v10747_v14, %v10746_v9  ;;  %v13225_v25 = vadd.f32 %v10745_v7, %v10633_v6  ;;  %4750 = vmatmul.mubr.bf16.gmra.mrb[108].mxu1 %v11982_v5  ;;  %v2585_v5 = vrot.slane %v11992_v1, 1  ;;  %v11994_v6 = vld [vmem:[#allocation2 + $0xb0] ss:$0 sps:$4 sm:$0x11]   ;;  %v11995_v13 = vld [vmem:[#allocation2 + $0xb4] sm:$0xff]  }
 0x18e   : > { %v2304_v7 = vshll.u32 %v11993_v50, 16  ;;  %v3101_v9 = vsel %vm1343_vm6, %v3096_v3, %v3100_v45  ;;  %v2309_v12 = vshll.u32 %v11994_v6, 16  ;;  %v11996_v14 = vld [vmem:[#allocation2 + $0xbc] ss:$0 sps:$4 sm:$0x11]   ;;  %v3105_v19 = vshll.u32 %v11995_v13, 16 }
 0x18f   : > { %4589 = vmatmul.mubr.bf16.gmra.mrb[108].mxu0 %v2288_v11  ;;  %v13228_v30 = vadd.f32 %v10748_v20, %v10636_v18  ;;  %4757 = vmatprep.mubr.bf16.mxu1 %v3101_v9  ;;  %v2586_v10 = vsel %vm1744_vm10, %v2584_v4, %v2585_v5  ;;  %v3103_v20 = vshrl.u32 %v11995_v13, 16  ;;  %v3110_v27 = vshll.u32 %v11996_v14, 16  ;;  %v11999_v50 = vld [vmem:[#allocation2 + $0xbc] ss:$0 sps:$4 sm:$0x11]  }
 0x190   : > { %4596 = vmatprep.mubr.bf16.mxu0 %v2583_v31  ;;  %v2306_v11 = vrot.slane %v2304_v7, 1  ;;  %v2311_v18 = vrot.slane %v2309_v12, 1  ;;  %v12002_v31 = vld [vmem:[#allocation9 + $0x238] sm:$0xff]   ;;  %v3107_v47 = vrot.slane %v3105_v19, 1  ;;  %v12045_v7 = vld [vmem:[#allocation10 + $0x40] sm:$0xff]   ;;  %v859_v14 = vrot.slane %v13173_v60, 4 }
 0x191   : > { %v10637_v38 = vpop.f32.mrb[8].mxu0  ;;  %v10749_v39 = vpop.f32.mrb[8].mxu1  ;;  %11567 = vmatprep.subr.bf16.mxu0 %v12002_v31  ;;  %11081 = vmatprep.subr.bf16.mxu1 %v12045_v7 }
 0x192   : > { %v10638_v46 = vpop.f32.mrb[9].mxu0  ;;  %v10750_v48 = vpop.f32.mrb[9].mxu1  ;;  %v2307_v17 = vor.u32 %v2306_v11, %v2302_v2  ;;  %11568 = vmatpush3.bf16.msra.mxu0 %v12002_v31  ;;  %v13247_v2 = vld [vmem:[#allocation2 + $0xc0] sm:$0xff]  }
 0x193   : > { %v10639_v52 = vadd.f32 %v10638_v46, %v10637_v38  ;;  %v10751_v53 = vadd.f32 %v10750_v48, %v10749_v39  ;;  %v10640_v54 = vpop.f32.mrb[10].mxu0  ;;  %v10752_v55 = vpop.f32.mrb[10].mxu1  ;;  %v2314_v38 = vshrl.u32 %v12000_v42, 16  ;;  %v3112_v39 = vrot.slane %v3110_v27, 1 }
 0x194   : > { %v10641_v59 = vpop.f32.mrb[11].mxu0  ;;  %v10753_v61 = vpop.f32.mrb[11].mxu1  ;;  %v2312_v32 = vsel %vm1343_vm6, %v2307_v17, %v2311_v18  ;;  %v3108_v46 = vor.u32 %v3107_v47, %v3103_v20  ;;  %v3117_v18 = vshll.u32 %v13247_v2, 16 }
 0x195   : > { %v10642_v62 = vadd.f32 %v10641_v59, %v10640_v54  ;;  %v10754_v63 = vadd.f32 %v10753_v61, %v10752_v55  ;;  %v13232_v40 = vadd.f32 %v10751_v53, %v10639_v52  ;;  %4758 = vmatmul.mubr.bf16.gmra.mrb[112].mxu1 %v11990_v58  ;;  %v2587_v53 = vrot.slane %v11998_v44, 1  ;;  %v373_v59 = vld [vmem:[#allocation2 + $0xc8] sm:$0x1] }
 0x196   : > { %v3113_v54 = vsel %vm1343_vm6, %v3108_v46, %v3112_v39  ;;  %v2588_v55 = vrot.slane %v11999_v50, 1  ;;  %v374_v0 = vsel %vm12828_vm3, 0, %v373_v59  ;;  %v12013_v50 = vld [vmem:[#allocation2 + $0x18] sm:$0xfe]  }
 0x197   : > { %4597 = vmatmul.mubr.bf16.gmra.mrb[112].mxu0 %v2300_v51  ;;  %v13234_v8 = vadd.f32 %v10754_v63, %v10642_v62  ;;  %v2316_v51 = vshll.u32 %v12000_v42, 16  ;;  %4765 = vmatprep.mubr.bf16.mxu1 %v3113_v54  ;;  %v2321_v63 = vshll.u32 %v12001_v57, 16  ;;  %375 = vst [vmem:[#allocation2 + $0xc8] sm:$0x1] %v374_v0  ;;  %v3115_v54 = vshrl.u32 %v13247_v2, 16 }
 0x198   : > { %4604 = vmatprep.mubr.bf16.mxu0 %v2586_v10  ;;  %v2589_v61 = vsel %vm1744_vm10, %v2587_v53, %v2588_v55  ;;  %v3119_v57 = vrot.slane %v3117_v18, 1  ;;  %v3346_v7 = vrot.slane %v12013_v50, 1  ;;  %v12015_v18 = vld [vmem:[#allocation2 + $0x24] sm:$0xfe]  }
 0x199   : > { %v10643_v16 = vpop.f32.mrb[12].mxu0  ;;  %v10755_v21 = vpop.f32.mrb[12].mxu1  ;;  %v2318_v45 = vrot.slane %v2316_v51, 1  ;;  %v2323_v1 = vrot.slane %v2321_v63, 1 }
 0x19a   : > { %v10644_v23 = vpop.f32.mrb[13].mxu0  ;;  %v10756_v28 = vpop.f32.mrb[13].mxu1 }
 0x19b   : > { %v10645_v33 = vadd.f32 %v10644_v23, %v10643_v16  ;;  %v10646_v29 = vpop.f32.mrb[14].mxu0  ;;  %v10757_v35 = vadd.f32 %v10756_v28, %v10755_v21  ;;  %v10758_v36 = vpop.f32.mrb[14].mxu1  ;;  %v2319_v62 = vor.u32 %v2318_v45, %v2314_v38  ;;  %v320_v21 = vld [vmem:[#allocation2 + $0xcc] sm:$0x1]  ;;  %v376_v23 = vld [vmem:[#allocation2 + $0xd4] sm:$0x1] }
 0x19c   : > { %v10647_v37 = vpop.f32.mrb[15].mxu0  ;;  %v10759_v43 = vpop.f32.mrb[15].mxu1  ;;  %v12008_v28 = vld [vmem:[#allocation2 + $0xc0] sm:$0xff]   ;;  %v377_v60 = vsel %vm12828_vm3, 0, %v376_v23 }
 0x19d   : > { %v10648_v41 = vadd.f32 %v10647_v37, %v10646_v29  ;;  %v10760_v48 = vadd.f32 %v10759_v43, %v10758_v36  ;;  %v13239_v52 = vadd.f32 %v10757_v35, %v10645_v33  ;;  %4766 = vmatmul.mubr.bf16.gmra.mrb[116].mxu1 %v11997_v34  ;;  %v2324_v9 = vsel %vm1343_vm6, %v2319_v62, %v2323_v1  ;;  %v13254_v33 = vld [vmem:[#allocation2 + $0xc0] sm:$0xfe]   ;;  %v12014_v62 = vld [vmem:[#allocation2 + $0x20] ss:$0 sps:$4 sm:$0x11]  }
 0x19e   : > { %v321_v29 = vsel %vm12833_vm4, 0, %v320_v21  ;;  %378 = vst [vmem:[#allocation2 + $0xd4] sm:$0x1] %v377_v60  ;;  %v2328_v24 = vshll.u32 %v12008_v28, 16  ;;  %v2590_v45 = vrot.slane %v13254_v33, 1  ;;  %v2326_v59 = vshrl.u32 %v12008_v28, 16 }
 0x19f   : > { %4605 = vmatmul.mubr.bf16.gmra.mrb[116].mxu0 %v2312_v32  ;;  %v13242_v58 = vadd.f32 %v10760_v48, %v10648_v41  ;;  %v1020_v32 = vld [vmem:[#allocation2 + $0xc8] sm:$0x1]  ;;  %322 = vst [vmem:[#allocation2 + $0xcc] sm:$0x1] %v321_v29 }
 0x1a0   : > { %4612 = vmatprep.mubr.bf16.mxu0 %v2589_v61  ;;  %v1021_v36 = vsel %vm12833_vm4, %v859_v14, %v1020_v32  ;;  %v2330_v1 = vrot.slane %v2328_v24, 1 }
 0x1a1   : > { %v10649_v3 = vpop.f32.mrb[16].mxu0  ;;  %v10761_v4 = vpop.f32.mrb[16].mxu1  ;;  %1022 = vst [vmem:[#allocation2 + $0xc8] sm:$0x1] %v1021_v36 }
 0x1a2   : > { %v10650_v5 = vpop.f32.mrb[17].mxu0  ;;  %v10762_v6 = vpop.f32.mrb[17].mxu1  ;;  %v2331_v60 = vor.u32 %v2330_v1, %v2326_v59  ;;  %v12046_v59 = vld [vmem:[#allocation10] sm:$0xff]  }
 0x1a3   : > { %v10651_v10 = vadd.f32 %v10650_v5, %v10649_v3  ;;  %v10763_v11 = vadd.f32 %v10762_v6, %v10761_v4  ;;  %v10652_v12 = vpop.f32.mrb[18].mxu0  ;;  %v10764_v13 = vpop.f32.mrb[18].mxu1  ;;  %11082 = vmatpush3.bf16.msra.mxu1 %v12046_v59  ;;  %v12023_v59 = vld [vmem:[#allocation2 + $0x54] sm:$0xfe]  }
 0x1a4   : > { %v10653_v16 = vpop.f32.mrb[19].mxu0  ;;  %v10765_v17 = vpop.f32.mrb[19].mxu1 }
 0x1a5   : > { %v10654_v20 = vadd.f32 %v10653_v16, %v10652_v12  ;;  %v10766_v19 = vadd.f32 %v10765_v17, %v10764_v13  ;;  %v13252_v27 = vadd.f32 %v10763_v11, %v10651_v10  ;;  %v12011_v6 = vld [vmem:[#allocation2 + $0xd4] ss:$0 sps:$4 sm:$0x11]   ;;  %v3120_v13 = vor.u32 %v3119_v57, %v3115_v54  ;;  %v12005_v16 = vld [vmem:[#allocation2 + $0xc0] sm:$0xff]  }
 0x1a6   : > { %v12010_v3 = vld [vmem:[#allocation2 + $0xcc] sm:$0xff]   ;;  %v3134_v23 = vshll.u32 %v12011_v6, 16  ;;  %v3349_v54 = vrot.slane %v12015_v18, 1 }
 0x1a7   : > { %4613 = vmatmul.mubr.bf16.gmra.mrb[120].mxu0 %v2324_v9  ;;  %v13260_v35 = vadd.f32 %v10766_v19, %v10654_v20  ;;  %v3127_v10 = vshrl.u32 %v12010_v3, 16  ;;  %v3129_v12 = vshll.u32 %v12010_v3, 16  ;;  %v12016_v20 = vld [vmem:[#allocation2 + $0x2c] ss:$0 sps:$4 sm:$0x11]  }
 0x1a8   : > { %v12004_v9 = vld [vmem:[#allocation2 + $0xc8] ss:$0 sps:$4 sm:$0x11]  }
 0x1a9   : > { %v10655_v42 = vpop.f32.mrb[20].mxu0  ;;  %v10767_v31 = vpop.f32.mrb[20].mxu1  ;;  %v12007_v2 = vld [vmem:[#allocation2 + $0xc8] ss:$0 sps:$4 sm:$0x11]   ;;  %v3122_v14 = vshll.u32 %v12004_v9, 16 }
 0x1aa   : > { %v10656_v47 = vpop.f32.mrb[21].mxu0  ;;  %v10768_v34 = vpop.f32.mrb[21].mxu1  ;;  %v12009_v17 = vld [vmem:[#allocation2 + $0xc8] ss:$0 sps:$4 sm:$0x11]   ;;  %v2591_v19 = vrot.slane %v12007_v2, 1 }
 0x1ab   : > { %v10657_v37 = vadd.f32 %v10656_v47, %v10655_v42  ;;  %v10769_v38 = vadd.f32 %v10768_v34, %v10767_v31  ;;  %v10658_v39 = vpop.f32.mrb[22].mxu0  ;;  %v10770_v41 = vpop.f32.mrb[22].mxu1  ;;  %v3131_v21 = vrot.slane %v3129_v12, 1  ;;  %v3347_v42 = vrot.slane %v12014_v62, 1  ;;  %v12048_v2 = vld [vmem:[#allocation10 + $0x8] sm:$0xff]  }
 0x1ac   : > { %v10659_v43 = vpop.f32.mrb[23].mxu0  ;;  %v10771_v44 = vpop.f32.mrb[23].mxu1  ;;  %v3124_v29 = vrot.slane %v3122_v14, 1  ;;  %v2333_v31 = vshll.u32 %v12009_v17, 16  ;;  %v2592_v34 = vsel %vm1744_vm10, %v2590_v45, %v2591_v19  ;;  %v12019_v12 = vld [vmem:[#allocation2 + $0x3c] sm:$0xfe]  }
 0x1ad   : > { %v10660_v46 = vadd.f32 %v10659_v43, %v10658_v39  ;;  %v10772_v48 = vadd.f32 %v10771_v44, %v10770_v41  ;;  %v13264_v53 = vadd.f32 %v10769_v38, %v10657_v37  ;;  %v3132_v36 = vor.u32 %v3131_v21, %v3127_v10  ;;  %v12017_v38 = vld [vmem:[#allocation2 + $0x30] sm:$0xfe]   ;;  %v12018_v39 = vld [vmem:[#allocation2 + $0x38] ss:$0 sps:$4 sm:$0x11]   ;;  %4620 = vmatprep.mubr.bf16.mxu0 %v2592_v34 }
 0x1ae   : > { %v3136_v37 = vrot.slane %v3134_v23, 1  ;;  %v3125_v41 = vsel %vm1343_vm6, %v3120_v13, %v3124_v29  ;;  %v2335_v43 = vrot.slane %v2333_v31, 1  ;;  %v3348_v50 = vsel %vm1744_vm10, %v3346_v7, %v3347_v42  ;;  %v12020_v17 = vld [vmem:[#allocation2 + $0x44] ss:$0 sps:$4 sm:$0x11]  }
 0x1af   : > { %v13268_v61 = vadd.f32 %v10772_v48, %v10660_v46  ;;  %4773 = vmatprep.mubr.bf16.mxu1 %v3125_v41  ;;  %v3353_v6 = vrot.slane %v12018_v39, 1  ;;  %v12021_v42 = vld [vmem:[#allocation2 + $0x48] sm:$0xfe]  }
 0x1b0   : > { %v3137_v48 = vsel %vm1343_vm6, %v3132_v36, %v3136_v37  ;;  %4774 = vmatmul.mubr.bf16.gmra.mrb[120].mxu1 %v12005_v16  ;;  %v3355_v37 = vrot.slane %v12019_v12, 1 }
 0x1b1   : > { %v10661_v51 = vpop.f32.mrb[24].mxu0  ;;  %v10773_v55 = vpop.f32.mrb[24].mxu1  ;;  %4781 = vmatprep.mubr.bf16.mxu1 %v3137_v48 }
 0x1b2   : > { %v10662_v63 = vpop.f32.mrb[25].mxu0  ;;  %v10774_v0 = vpop.f32.mrb[25].mxu1 }
 0x1b3   : > { %v10663_v4 = vadd.f32 %v10662_v63, %v10661_v51  ;;  %v10775_v5 = vadd.f32 %v10774_v0, %v10773_v55  ;;  %v10664_v33 = vpop.f32.mrb[26].mxu0  ;;  %v10776_v28 = vpop.f32.mrb[26].mxu1  ;;  %v2336_v51 = vsel %vm1343_vm6, %v2331_v60, %v2335_v43  ;;  %v3350_v55 = vrot.slane %v12016_v20, 1 }
 0x1b4   : > { %v10665_v32 = vpop.f32.mrb[27].mxu0  ;;  %v10777_v47 = vpop.f32.mrb[27].mxu1  ;;  %4621 = vmatmul.mubr.bf16.gmra.mrb[124].mxu0 %v2336_v51  ;;  %v3352_v63 = vrot.slane %v12017_v38, 1  ;;  %v3356_v38 = vrot.slane %v12020_v17, 1 }
 0x1b5   : > { %v13270_v11 = vadd.f32 %v10775_v5, %v10663_v4  ;;  %v10666_v44 = vadd.f32 %v10665_v32, %v10664_v33  ;;  %v10778_v24 = vadd.f32 %v10777_v47, %v10776_v28  ;;  %v12047_v4 = vld [vmem:[#allocation10 + $0x48] sm:$0xff]   ;;  %11569 = vmatprep.mubr.bf16.mxu0 %v3348_v50  ;;  %v3351_v23 = vsel %vm1744_vm10, %v3349_v54, %v3350_v55  ;;  %v12022_v33 = vld [vmem:[#allocation2 + $0x50] ss:$0 sps:$4 sm:$0x11]  }
 0x1b6   : > { %v12012_v5 = vld [vmem:[#allocation2 + $0xcc] sm:$0xff]   ;;  %11083 = vmatprep.subr.bf16.mxu1 %v12047_v4  ;;  %v3354_v60 = vsel %vm1744_vm10, %v3352_v63, %v3353_v6  ;;  %v12024_v51 = vld [vmem:[#allocation2 + $0x5c] ss:$0 sps:$4 sm:$0x11]  }
 0x1b7   : > { %v13277_v62 = vadd.f32 %v10778_v24, %v10666_v44  ;;  %11084 = vmatpush3.bf16.msra.mxu1 %v12048_v2  ;;  %v3358_v24 = vrot.slane %v12021_v42, 1  ;;  %v12026_v63 = vld [vmem:[#allocation2 + $0x68] ss:$0 sps:$4 sm:$0x11]   ;;  %v12025_v2 = vld [vmem:[#allocation2 + $0x60] sm:$0xfe]  }
 0x1b8   : > { %4782 = vmatmul.mubr.bf16.gmra.mrb[124].mxu1 %v12012_v5  ;;  %v3357_v5 = vsel %vm1744_vm10, %v3355_v37, %v3356_v38  ;;  %v12027_v38 = vld [vmem:[#allocation2 + $0x6c] sm:$0xfe]  }
 0x1b9   : > { %v10779_v57 = vpop.f32.mrb[28].mxu1 }
 0x1ba   : > { %v10780_v1 = vpop.f32.mrb[29].mxu1 }
 0x1bb   : > { %v10667_v46 = vpop.f32.mrb[28].mxu0  ;;  %v10781_v7 = vadd.f32 %v10780_v1, %v10779_v57  ;;  %v10782_v9 = vpop.f32.mrb[30].mxu1 }
 0x1bc   : > { %v10668_v45 = vpop.f32.mrb[29].mxu0  ;;  %v10783_v14 = vpop.f32.mrb[31].mxu1  ;;  %11570 = vmatmul.mubr.bf16.vlgmr.msra.gmra.mrb[128].mxu0 %v3351_v23 }
 0x1bd   : > { %v10669_v0 = vadd.f32 %v10668_v45, %v10667_v46  ;;  %v10670_v3 = vpop.f32.mrb[30].mxu0  ;;  %v10784_v18 = vadd.f32 %v10783_v14, %v10782_v9  ;;  %11573 = vmatprep.mubr.bf16.mxu0 %v3354_v60  ;;  %v3359_v46 = vrot.slane %v12022_v33, 1  ;;  %v12049_v45 = vld [vmem:[#allocation10 + $0x50] sm:$0xff]   ;;  %v3364_v33 = vrot.slane %v12025_v2, 1  ;;  %v12051_v2 = vld [vmem:[#allocation10 + $0x58] sm:$0xff]  }
 0x1be   : > { %v10671_v10 = vpop.f32.mrb[31].mxu0  ;;  %11085 = vmatprep.subr.bf16.mxu1 %v12049_v45  ;;  %v12050_v9 = vld [vmem:[#allocation10 + $0x10] sm:$0xff]  }
 0x1bf   : > { %v10672_v13 = vadd.f32 %v10671_v10, %v10670_v3  ;;  %v13279_v19 = vadd.f32 %v10781_v7, %v10669_v0  ;;  %v3360_v10 = vsel %vm1744_vm10, %v3358_v24, %v3359_v46  ;;  %11086 = vmatpush3.bf16.msra.mxu1 %v12050_v9  ;;  %v12028_v60 = vld [vmem:[#allocation2 + $0x74] ss:$0 sps:$4 sm:$0x11]   ;;  %v12029_v46 = vld [vmem:[#allocation2 + $0x78] sm:$0xfe]  }
 0x1c0   : > { %11087 = vmatprep.subr.bf16.mxu1 %v12051_v2 }
 0x1c1   : > { %v10785_v20 = vpop.f32.mrb[32].mxu1  ;;  %v13282_v29 = vadd.f32 %v10784_v18, %v10672_v13 }
 0x1c2   : > { %v10786_v31 = vpop.f32.mrb[33].mxu1 }
 0x1c3   : > { %v10673_v16 = vpop.f32.mrb[32].mxu0  ;;  %v10787_v47 = vadd.f32 %v10786_v31, %v10785_v20  ;;  %v10788_v34 = vpop.f32.mrb[34].mxu1  ;;  %v3361_v20 = vrot.slane %v12023_v59, 1 }
 0x1c4   : > { %v10674_v21 = vpop.f32.mrb[33].mxu0  ;;  %v10789_v41 = vpop.f32.mrb[35].mxu1  ;;  %11574 = vmatmul.mubr.bf16.gmra.mrb[132].mxu0 %v3357_v5 }
 0x1c5   : > { %v10675_v28 = vadd.f32 %v10674_v21, %v10673_v16  ;;  %v10676_v32 = vpop.f32.mrb[34].mxu0  ;;  %v10790_v44 = vadd.f32 %v10789_v41, %v10788_v34  ;;  %11577 = vmatprep.mubr.bf16.mxu0 %v3360_v10  ;;  %v3362_v21 = vrot.slane %v12024_v51, 1  ;;  %v12030_v51 = vld [vmem:[#allocation2 + $0x80] ss:$0 sps:$4 sm:$0x11]  }
 0x1c6   : > { %v10677_v36 = vpop.f32.mrb[35].mxu0 }
 0x1c7   : > { %v10678_v39 = vadd.f32 %v10677_v36, %v10676_v32  ;;  %v13285_v43 = vadd.f32 %v10787_v47, %v10675_v28  ;;  %v3365_v28 = vrot.slane %v12026_v63, 1  ;;  %v3363_v24 = vsel %vm1744_vm10, %v3361_v20, %v3362_v21  ;;  %v12032_v20 = vld [vmem:[#allocation2 + $0x8c] ss:$0 sps:$4 sm:$0x11]  }
 0x1c8   : > { %v3367_v63 = vrot.slane %v12027_v38, 1 }
 0x1c9   : > { %v13287_v54 = vadd.f32 %v10790_v44, %v10678_v39 }
 0x1cb   : > { %v10679_v48 = vpop.f32.mrb[36].mxu0 }
 0x1cc   : > { %v10680_v55 = vpop.f32.mrb[37].mxu0  ;;  %11578 = vmatmul.mubr.bf16.gmra.mrb[136].mxu0 %v3363_v24  ;;  %v3374_v24 = vrot.slane %v12032_v20, 1 }
 0x1cd   : > { %v10681_v0 = vadd.f32 %v10680_v55, %v10679_v48  ;;  %v10682_v3 = vpop.f32.mrb[38].mxu0 }
 0x1ce   : > { %v10791_v50 = vpop.f32.mrb[36].mxu1  ;;  %v10683_v6 = vpop.f32.mrb[39].mxu0 }
 0x1cf   : > { %v10792_v57 = vpop.f32.mrb[37].mxu1  ;;  %v10684_v13 = vadd.f32 %v10683_v6, %v10682_v3  ;;  %v3370_v6 = vrot.slane %v12029_v46, 1 }
 0x1d0   : > { %v10793_v1 = vadd.f32 %v10792_v57, %v10791_v50  ;;  %v10794_v4 = vpop.f32.mrb[38].mxu1  ;;  %v3366_v50 = vsel %vm1744_vm10, %v3364_v33, %v3365_v28 }
 0x1d1   : > { %v10795_v7 = vpop.f32.mrb[39].mxu1  ;;  %11581 = vmatprep.mubr.bf16.mxu0 %v3366_v50  ;;  %v12035_v50 = vld [vmem:[#allocation2 + $0x9c] sm:$0xfe]  }
 0x1d2   : > { %v13291_v12 = vadd.f32 %v10793_v1, %v10681_v0  ;;  %v10796_v14 = vadd.f32 %v10795_v7, %v10794_v4  ;;  %v3368_v0 = vrot.slane %v12028_v60, 1  ;;  %v12031_v7 = vld [vmem:[#allocation2 + $0x84] sm:$0xfe]   ;;  %v12034_v60 = vld [vmem:[#allocation2 + $0x98] ss:$0 sps:$4 sm:$0x11]  }
 0x1d4   : > { %v13293_v17 = vadd.f32 %v10796_v14, %v10684_v13  ;;  %v3371_v13 = vrot.slane %v12030_v51, 1  ;;  %v3369_v28 = vsel %vm1744_vm10, %v3367_v63, %v3368_v0  ;;  %v12036_v63 = vld [vmem:[#allocation2 + $0xa4] ss:$0 sps:$4 sm:$0x11]   ;;  %v3377_v0 = vrot.slane %v12034_v60, 1 }
 0x1d5   : > { %11582 = vmatmul.mubr.bf16.gmra.mrb[140].mxu0 %v3369_v28 }
 0x1d6   : > { %v10685_v16 = vpop.f32.mrb[40].mxu0  ;;  %v10797_v18 = vpop.f32.mrb[40].mxu1 }
 0x1d7   : > { %v10686_v23 = vpop.f32.mrb[41].mxu0  ;;  %v10798_v42 = vpop.f32.mrb[41].mxu1 }
 0x1d8   : > { %v10687_v31 = vadd.f32 %v10686_v23, %v10685_v16  ;;  %v10799_v32 = vadd.f32 %v10798_v42, %v10797_v18  ;;  %v10688_v47 = vpop.f32.mrb[42].mxu0  ;;  %v10800_v34 = vpop.f32.mrb[42].mxu1  ;;  %v12033_v23 = vld [vmem:[#allocation2 + $0x90] sm:$0xfe]  }
 0x1d9   : > { %v10689_v36 = vpop.f32.mrb[43].mxu0  ;;  %v10801_v37 = vpop.f32.mrb[43].mxu1 }
 0x1da   : > { %v13295_v39 = vadd.f32 %v10799_v32, %v10687_v31  ;;  %v10690_v41 = vadd.f32 %v10689_v36, %v10688_v47  ;;  %v10802_v44 = vadd.f32 %v10801_v37, %v10800_v34  ;;  %v3372_v47 = vsel %vm1744_vm10, %v3370_v6, %v3371_v13 }
 0x1db   : > { %11585 = vmatprep.mubr.bf16.mxu0 %v3372_v47  ;;  %v3379_v13 = vrot.slane %v12035_v50, 1 }
 0x1dc   : > { %v13299_v55 = vadd.f32 %v10802_v44, %v10690_v41  ;;  %v12052_v41 = vld [vmem:[#allocation10 + $0x18] sm:$0xff]   ;;  %v3373_v44 = vrot.slane %v12031_v7, 1 }
 0x1dd   : > { %11088 = vmatpush3.bf16.msra.mxu1 %v12052_v41 }
 0x1de   : > { %v10691_v48 = vpop.f32.mrb[44].mxu0  ;;  %v3375_v2 = vsel %vm1744_vm10, %v3373_v44, %v3374_v24  ;;  %v12042_v44 = vld [vmem:[#allocation2 + $0xc8] ss:$0 sps:$4 sm:$0x11]  }
 0x1df   : > { %v10692_v45 = vpop.f32.mrb[45].mxu0  ;;  %11586 = vmatmul.mubr.bf16.gmra.mrb[144].mxu0 %v3375_v2 }
 0x1e0   : > { %v10803_v57 = vpop.f32.mrb[44].mxu1  ;;  %v10693_v1 = vadd.f32 %v10692_v45, %v10691_v48  ;;  %v10694_v4 = vpop.f32.mrb[46].mxu0 }
 0x1e1   : > { %v10804_v59 = vpop.f32.mrb[45].mxu1  ;;  %v10695_v9 = vpop.f32.mrb[47].mxu0 }
 0x1e2   : > { %v10805_v3 = vadd.f32 %v10804_v59, %v10803_v57  ;;  %v10806_v5 = vpop.f32.mrb[46].mxu1  ;;  %v10696_v16 = vadd.f32 %v10695_v9, %v10694_v4  ;;  %v3376_v59 = vrot.slane %v12033_v23, 1 }
 0x1e3   : > { %v10807_v10 = vpop.f32.mrb[47].mxu1 }
 0x1e4   : > { %v13301_v14 = vadd.f32 %v10805_v3, %v10693_v1  ;;  %v10808_v18 = vadd.f32 %v10807_v10, %v10806_v5  ;;  %v12037_v1 = vld [vmem:[#allocation2 + $0xa8] sm:$0xfe]   ;;  %v12038_v5 = vld [vmem:[#allocation2 + $0xb0] ss:$0 sps:$4 sm:$0x11]  }
 0x1e5   : > { %v3382_v23 = vrot.slane %v12037_v1, 1 }
 0x1e6   : > { %v13303_v42 = vadd.f32 %v10808_v18, %v10696_v16  ;;  %v3380_v16 = vrot.slane %v12036_v63, 1  ;;  %v12044_v63 = vld [vmem:[#allocation2 + $0xd4] ss:$0 sps:$4 sm:$0x11]  }
 0x1e8   : > { %v10697_v21 = vpop.f32.mrb[48].mxu0  ;;  %v10809_v33 = vpop.f32.mrb[48].mxu1 }
 0x1e9   : > { %v10698_v31 = vpop.f32.mrb[49].mxu0  ;;  %v10810_v32 = vpop.f32.mrb[49].mxu1 }
 0x1ea   : > { %v10699_v34 = vadd.f32 %v10698_v31, %v10697_v21  ;;  %v10811_v36 = vadd.f32 %v10810_v32, %v10809_v33  ;;  %v10700_v37 = vpop.f32.mrb[50].mxu0  ;;  %v10812_v38 = vpop.f32.mrb[50].mxu1  ;;  %v3378_v21 = vsel %vm1744_vm10, %v3376_v59, %v3377_v0  ;;  %v12039_v33 = vld [vmem:[#allocation2 + $0xb4] sm:$0xfe]   ;;  %v3383_v32 = vrot.slane %v12038_v5, 1  ;;  %v12054_v59 = vld [vmem:[#allocation10 + $0x20] sm:$0xff]  }
 0x1eb   : > { %v10701_v46 = vpop.f32.mrb[51].mxu0  ;;  %v10813_v48 = vpop.f32.mrb[51].mxu1  ;;  %11589 = vmatprep.mubr.bf16.mxu0 %v3378_v21  ;;  %v3385_v24 = vrot.slane %v12039_v33, 1 }
 0x1ec   : > { %v13307_v51 = vadd.f32 %v10811_v36, %v10699_v34  ;;  %v10702_v57 = vadd.f32 %v10701_v46, %v10700_v37  ;;  %v10814_v45 = vadd.f32 %v10813_v48, %v10812_v38  ;;  %v12040_v34 = vld [vmem:[#allocation2 + $0xbc] ss:$0 sps:$4 sm:$0x11]   ;;  %v12041_v38 = vld [vmem:[#allocation2 + $0xc0] sm:$0xfe]   ;;  %v3381_v48 = vsel %vm1744_vm10, %v3379_v13, %v3380_v16 }
 0x1ed   : > { %v12053_v46 = vld [vmem:[#allocation10 + $0x60] sm:$0xff]   ;;  %v3384_v50 = vsel %vm1744_vm10, %v3382_v23, %v3383_v32  ;;  %11590 = vmatmul.mubr.bf16.gmra.mrb[148].mxu0 %v3381_v48  ;;  %v3388_v0 = vrot.slane %v12041_v38, 1  ;;  %v3392_v23 = vrot.slane %v12044_v63, 1 }
 0x1ee   : > { %v13309_v3 = vadd.f32 %v10814_v45, %v10702_v57  ;;  %v3386_v57 = vrot.slane %v12040_v34, 1  ;;  %v12043_v45 = vld [vmem:[#allocation2 + $0xcc] sm:$0xfe]   ;;  %11089 = vmatprep.subr.bf16.mxu1 %v12053_v46  ;;  %11593 = vmatprep.mubr.bf16.mxu0 %v3384_v50 }
 0x1ef   : > { %11090 = vmatpush3.bf16.msra.mxu1 %v12054_v59  ;;  %v3391_v13 = vrot.slane %v12043_v45, 1  ;;  %v12055_v34 = vld [vmem:[#allocation10 + $0x68] sm:$0xff]  }
 0x1f0   : > { %v10815_v7 = vpop.f32.mrb[52].mxu1  ;;  %v3387_v21 = vsel %vm1744_vm10, %v3385_v24, %v3386_v57  ;;  %11091 = vmatprep.subr.bf16.mxu1 %v12055_v34  ;;  %v12056_v50 = vld [vmem:[#allocation10 + $0x28] sm:$0xff]  }
 0x1f1   : > { %v10703_v4 = vpop.f32.mrb[52].mxu0  ;;  %v10816_v18 = vpop.f32.mrb[53].mxu1 }
 0x1f2   : > { %v10704_v6 = vpop.f32.mrb[53].mxu0  ;;  %v10817_v28 = vadd.f32 %v10816_v18, %v10815_v7  ;;  %v10818_v60 = vpop.f32.mrb[54].mxu1 }
 0x1f3   : > { %v10705_v9 = vadd.f32 %v10704_v6, %v10703_v4  ;;  %v10706_v10 = vpop.f32.mrb[54].mxu0  ;;  %v10819_v47 = vpop.f32.mrb[55].mxu1  ;;  %v3389_v4 = vrot.slane %v12042_v44, 1  ;;  %11092 = vmatpush3.bf16.msra.mxu1 %v12056_v50 }
 0x1f4   : > { %v10707_v20 = vpop.f32.mrb[55].mxu0  ;;  %v10820_v37 = vadd.f32 %v10819_v47, %v10818_v60  ;;  %v3393_v47 = vsel %vm1744_vm10, %v3391_v13, %v3392_v23 }
 0x1f5   : > { %v10708_v31 = vadd.f32 %v10707_v20, %v10706_v10  ;;  %v13313_v36 = vadd.f32 %v10817_v28, %v10705_v9  ;;  %v3390_v28 = vsel %vm1744_vm10, %v3388_v0, %v3389_v4  ;;  %11594 = vmatmul.mubr.bf16.gmra.mrb[152].mxu0 %v3387_v21 }
 0x1f6   : > { %11597 = vmatprep.mubr.bf16.mxu0 %v3390_v28 }
 0x1f7   : > { %v13315_v41 = vadd.f32 %v10820_v37, %v10708_v31 }
 0x1f8   : > { %v10821_v1 = vpop.f32.mrb[56].mxu1 }
 0x1f9   : > { %v10822_v5 = vpop.f32.mrb[57].mxu1  ;;  %v10709_v6 = vpop.f32.mrb[56].mxu0 }
 0x1fa   : > { %v10823_v7 = vadd.f32 %v10822_v5, %v10821_v1  ;;  %v10824_v9 = vpop.f32.mrb[58].mxu1  ;;  %v10710_v10 = vpop.f32.mrb[57].mxu0 }
 0x1fb   : > { %v10825_v2 = vpop.f32.mrb[59].mxu1  ;;  %v10711_v16 = vadd.f32 %v10710_v10, %v10709_v6  ;;  %v10712_v18 = vpop.f32.mrb[58].mxu0 }
 0x1fc   : > { %v10826_v20 = vadd.f32 %v10825_v2, %v10824_v9  ;;  %v10713_v33 = vpop.f32.mrb[59].mxu0 }
 0x1fd   : > { %v13321_v60 = vadd.f32 %v10823_v7, %v10711_v16  ;;  %v10714_v31 = vadd.f32 %v10713_v33, %v10712_v18  ;;  %11598 = vmatmul.mubr.bf16.gmra.mrb[156].mxu0 %v3393_v47 }
 0x1ff   : > { %v13323_v32 = vadd.f32 %v10826_v20, %v10714_v31 }
 0x200   : > { %v10827_v37 = vpop.f32.mrb[60].mxu1 }
 0x201   : > { %v10828_v44 = vpop.f32.mrb[61].mxu1 }
 0x202   : > { %v10715_v38 = vpop.f32.mrb[60].mxu0  ;;  %v10829_v46 = vadd.f32 %v10828_v44, %v10827_v37  ;;  %v10830_v48 = vpop.f32.mrb[62].mxu1 }
 0x203   : > { %v10716_v24 = vpop.f32.mrb[61].mxu0  ;;  %v10831_v59 = vpop.f32.mrb[63].mxu1 }
 0x204   : > { %v10717_v57 = vadd.f32 %v10716_v24, %v10715_v38  ;;  %v10718_v45 = vpop.f32.mrb[62].mxu0  ;;  %v10832_v0 = vadd.f32 %v10831_v59, %v10830_v48 }
 0x205   : > { %v10719_v63 = vpop.f32.mrb[63].mxu0 }
 0x206   : > { %v13326_v1 = vadd.f32 %v10829_v46, %v10717_v57  ;;  %v10720_v4 = vadd.f32 %v10719_v63, %v10718_v45 }
 0x208   : > { %v13328_v5 = vadd.f32 %v10832_v0, %v10720_v4  ;;  %v10961_v6 = vpop.f32.mrb[64].mxu1 }
 0x209   : > { %v10962_v9 = vpop.f32.mrb[65].mxu1 }
 0x20a   : > { %v10849_v7 = vpop.f32.mrb[64].mxu0  ;;  %v10963_v2 = vadd.f32 %v10962_v9, %v10961_v6  ;;  %v10964_v13 = vpop.f32.mrb[66].mxu1 }
 0x20b   : > { %v10850_v10 = vpop.f32.mrb[65].mxu0  ;;  %v10965_v20 = vpop.f32.mrb[67].mxu1 }
 0x20c   : > { %v10851_v16 = vadd.f32 %v10850_v10, %v10849_v7  ;;  %v10852_v18 = vpop.f32.mrb[66].mxu0  ;;  %v10966_v23 = vadd.f32 %v10965_v20, %v10964_v13 }
 0x20d   : > { %v10853_v21 = vpop.f32.mrb[67].mxu0 }
 0x20e   : > { %v4503_v33 = vadd.f32 %v10851_v16, %v13218_v49  ;;  %v10854_v28 = vadd.f32 %v10853_v21, %v10852_v18 }
 0x210   : > { %v4506_v31 = vadd.f32 %v10854_v28, %v13221_v56  ;;  %v13332_v47 = vadd.f32 %v10963_v2, %v4503_v33  ;;  %v10967_v34 = vpop.f32.mrb[68].mxu1 }
 0x211   : > { %v10968_v38 = vpop.f32.mrb[69].mxu1 }
 0x212   : > { %v10855_v37 = vpop.f32.mrb[68].mxu0  ;;  %v13334_v44 = vadd.f32 %v10966_v23, %v4506_v31  ;;  %v10969_v46 = vadd.f32 %v10968_v38, %v10967_v34  ;;  %v10970_v48 = vpop.f32.mrb[70].mxu1  ;;  %v12059_v31 = vld [vmem:[#allocation10 + $0xc0] sm:$0xff]  }
 0x213   : > { %v10856_v24 = vpop.f32.mrb[69].mxu0  ;;  %v10971_v45 = vpop.f32.mrb[71].mxu1  ;;  %v12060_v34 = vld [vmem:[#allocation10 + $0x80] sm:$0xff]   ;;  %11193 = vmatprep.subr.bf16.mxu0 %v12059_v31 }
 0x214   : > { %v10857_v50 = vadd.f32 %v10856_v24, %v10855_v37  ;;  %v10858_v57 = vpop.f32.mrb[70].mxu0  ;;  %v10972_v63 = vadd.f32 %v10971_v45, %v10970_v48  ;;  %11194 = vmatpush3.bf16.msra.mxu0 %v12060_v34 }
 0x215   : > { %v10859_v59 = vpop.f32.mrb[71].mxu0 }
 0x216   : > { %v4511_v49 = vadd.f32 %v10857_v50, %v13225_v25  ;;  %v10860_v0 = vadd.f32 %v10859_v59, %v10858_v57  ;;  %v12061_v59 = vld [vmem:[#allocation10 + $0xc8] sm:$0xff]  }
 0x217   : > { %11195 = vmatprep.subr.bf16.mxu0 %v12061_v59  ;;  %v12065_v59 = vld [vmem:[#allocation10 + $0xd8] sm:$0xff]  }
 0x218   : > { %v4514_v56 = vadd.f32 %v10860_v0, %v13228_v30  ;;  %v13338_v4 = vadd.f32 %v10969_v46, %v4511_v49  ;;  %v10973_v6 = vpop.f32.mrb[72].mxu1  ;;  %v12062_v0 = vld [vmem:[#allocation10 + $0x88] sm:$0xff]  }
 0x219   : > { %v10974_v9 = vpop.f32.mrb[73].mxu1  ;;  %11196 = vmatpush3.bf16.msra.mxu0 %v12062_v0 }
 0x21a   : > { %v10861_v7 = vpop.f32.mrb[72].mxu0  ;;  %v13340_v10 = vadd.f32 %v10972_v63, %v4514_v56  ;;  %v10975_v13 = vadd.f32 %v10974_v9, %v10973_v6  ;;  %v10976_v16 = vpop.f32.mrb[74].mxu1  ;;  %v12063_v9 = vld [vmem:[#allocation10 + $0xd0] sm:$0xff]  }
 0x21b   : > { %v10862_v2 = vpop.f32.mrb[73].mxu0  ;;  %v10977_v21 = vpop.f32.mrb[75].mxu1  ;;  %11197 = vmatprep.subr.bf16.mxu0 %v12063_v9 }
 0x21c   : > { %v10863_v18 = vadd.f32 %v10862_v2, %v10861_v7  ;;  %v10864_v20 = vpop.f32.mrb[74].mxu0  ;;  %v10978_v33 = vadd.f32 %v10977_v21, %v10976_v16 }
 0x21d   : > { %v10865_v23 = vpop.f32.mrb[75].mxu0 }
 0x21e   : > { %v4519_v25 = vadd.f32 %v10863_v18, %v13232_v40  ;;  %v10866_v28 = vadd.f32 %v10865_v23, %v10864_v20 }
 0x220   : > { %v4522_v30 = vadd.f32 %v10866_v28, %v13234_v8  ;;  %v13344_v37 = vadd.f32 %v10975_v13, %v4519_v25  ;;  %v10979_v38 = vpop.f32.mrb[76].mxu1 }
 0x221   : > { %v10980_v46 = vpop.f32.mrb[77].mxu1 }
 0x222   : > { %v10867_v24 = vpop.f32.mrb[76].mxu0  ;;  %v13346_v48 = vadd.f32 %v10978_v33, %v4522_v30  ;;  %v10981_v57 = vadd.f32 %v10980_v46, %v10979_v38  ;;  %v10982_v45 = vpop.f32.mrb[78].mxu1  ;;  %v12057_v46 = vld [vmem:[#allocation10 + $0x70] sm:$0xff]  }
 0x223   : > { %v10868_v50 = vpop.f32.mrb[77].mxu0  ;;  %v10983_v49 = vpop.f32.mrb[79].mxu1  ;;  %11093 = vmatprep.subr.bf16.mxu1 %v12057_v46 }
 0x224   : > { %v10869_v63 = vadd.f32 %v10868_v50, %v10867_v24  ;;  %v10870_v40 = vpop.f32.mrb[78].mxu0  ;;  %v10984_v56 = vadd.f32 %v10983_v49, %v10982_v45  ;;  %v12064_v24 = vld [vmem:[#allocation10 + $0x90] sm:$0xff]  }
 0x225   : > { %v10871_v8 = vpop.f32.mrb[79].mxu0  ;;  %11198 = vmatpush3.bf16.msra.mxu0 %v12064_v24 }
 0x226   : > { %v4527_v6 = vadd.f32 %v10869_v63, %v13239_v52  ;;  %v10872_v7 = vadd.f32 %v10871_v8, %v10870_v40  ;;  %v12066_v40 = vld [vmem:[#allocation10 + $0x98] sm:$0xff]   ;;  %11199 = vmatprep.subr.bf16.mxu0 %v12065_v59  ;;  %v12071_v59 = vld [vmem:[#allocation10 + $0xe8] sm:$0xff]  }
 0x228   : > { %v4530_v2 = vadd.f32 %v10872_v7, %v13242_v58  ;;  %v13350_v13 = vadd.f32 %v10981_v57, %v4527_v6  ;;  %v10985_v21 = vpop.f32.mrb[80].mxu1  ;;  %v12058_v57 = vld [vmem:[#allocation10 + $0x30] sm:$0xff]  }
 0x229   : > { %v10986_v25 = vpop.f32.mrb[81].mxu1  ;;  %11094 = vmatpush3.bf16.msra.mxu1 %v12058_v57  ;;  %11200 = vmatpush3.bf16.msra.mxu0 %v12066_v40  ;;  %v12067_v57 = vld [vmem:[#allocation10 + $0x78] sm:$0xff]  }
 0x22a   : > { %v10873_v16 = vpop.f32.mrb[80].mxu0  ;;  %v13352_v18 = vadd.f32 %v10984_v56, %v4530_v2  ;;  %v10987_v30 = vadd.f32 %v10986_v25, %v10985_v21  ;;  %v10988_v31 = vpop.f32.mrb[82].mxu1  ;;  %v12069_v2 = vld [vmem:[#allocation10 + $0xe0] sm:$0xff]   ;;  %11095 = vmatprep.subr.bf16.mxu1 %v12067_v57 }
 0x22b   : > { %v10874_v20 = vpop.f32.mrb[81].mxu0  ;;  %v10989_v38 = vpop.f32.mrb[83].mxu1  ;;  %11201 = vmatprep.subr.bf16.mxu0 %v12069_v2 }
 0x22c   : > { %v10875_v23 = vadd.f32 %v10874_v20, %v10873_v16  ;;  %v10876_v33 = vpop.f32.mrb[82].mxu0  ;;  %v10990_v58 = vadd.f32 %v10989_v38, %v10988_v31 }
 0x22d   : > { %v10877_v28 = vpop.f32.mrb[83].mxu0 }
 0x22e   : > { %v4535_v52 = vadd.f32 %v10875_v23, %v13252_v27  ;;  %v10878_v34 = vadd.f32 %v10877_v28, %v10876_v33  ;;  %v12070_v33 = vld [vmem:[#allocation10 + $0xa0] sm:$0xff]  }
 0x22f   : > { %11202 = vmatpush3.bf16.msra.mxu0 %v12070_v33 }
 0x230   : > { %v4538_v50 = vadd.f32 %v10878_v34, %v13260_v35  ;;  %v13356_v45 = vadd.f32 %v10987_v30, %v4535_v52  ;;  %v10991_v27 = vpop.f32.mrb[84].mxu1  ;;  %11203 = vmatprep.subr.bf16.mxu0 %v12071_v59 }
 0x231   : > { %v10992_v6 = vpop.f32.mrb[85].mxu1 }
 0x232   : > { %v10879_v63 = vpop.f32.mrb[84].mxu0  ;;  %v13358_v49 = vadd.f32 %v10990_v58, %v4538_v50  ;;  %v10993_v35 = vadd.f32 %v10992_v6, %v10991_v27  ;;  %v10994_v9 = vpop.f32.mrb[86].mxu1  ;;  %v12072_v27 = vld [vmem:[#allocation10 + $0xa8] sm:$0xff]  }
 0x233   : > { %v10880_v0 = vpop.f32.mrb[85].mxu0  ;;  %v10995_v21 = vpop.f32.mrb[87].mxu1  ;;  %11204 = vmatpush3.bf16.msra.mxu0 %v12072_v27  ;;  %v12078_v27 = vld [vmem:[#allocation2] sm:$0xff]  }
 0x234   : > { %v10881_v8 = vadd.f32 %v10880_v0, %v10879_v63  ;;  %v10882_v56 = vpop.f32.mrb[86].mxu0  ;;  %v10996_v23 = vadd.f32 %v10995_v21, %v10994_v9  ;;  %v12068_v0 = vld [vmem:[#allocation10 + $0x38] sm:$0xff]  }
 0x235   : > { %v10883_v7 = vpop.f32.mrb[87].mxu0  ;;  %11096 = vmatpush3.bf16.msra.mxu1 %v12068_v0  ;;  %v12077_v0 = vld [vmem:[#allocation10 + $0xf8] sm:$0xff]  }
 0x236   : > { %v4543_v16 = vadd.f32 %v10881_v8, %v13264_v53  ;;  %v10884_v20 = vadd.f32 %v10883_v7, %v10882_v56  ;;  %v12073_v7 = vld [vmem:[#allocation10 + $0xf0] sm:$0xff]  }
 0x237   : > { %11205 = vmatprep.subr.bf16.mxu0 %v12073_v7  ;;  %v12079_v7 = vld [vmem:[#allocation10 + $0xb8] sm:$0xff]  }
 0x238   : > { %v4546_v25 = vadd.f32 %v10884_v20, %v13268_v61  ;;  %v13362_v28 = vadd.f32 %v10993_v35, %v4543_v16  ;;  %v10997_v34 = vpop.f32.mrb[88].mxu1  ;;  %v12075_v35 = vld [vmem:[#allocation2] sm:$0xff]   ;;  %v12074_v20 = vld [vmem:[#allocation10 + $0xb0] sm:$0xff]  }
 0x239   : > { %v10998_v58 = vpop.f32.mrb[89].mxu1  ;;  %v5974_v21 = vshll.u32 %v12075_v35, 16  ;;  %11206 = vmatpush3.bf16.msra.mxu0 %v12074_v20 }
 0x23a   : > { %v10885_v30 = vpop.f32.mrb[88].mxu0  ;;  %v13364_v31 = vadd.f32 %v10996_v23, %v4546_v25  ;;  %v10999_v53 = vadd.f32 %v10998_v58, %v10997_v34  ;;  %v11000_v50 = vpop.f32.mrb[90].mxu1  ;;  %v12076_v34 = vld [vmem:[#allocation2 + $0x8] ss:$0 sps:$4 sm:$0x11]   ;;  %11207 = vmatprep.subr.bf16.mxu0 %v12077_v0 }
 0x23b   : > { %v10886_v52 = vpop.f32.mrb[89].mxu0  ;;  %v11001_v61 = vpop.f32.mrb[91].mxu1  ;;  %v5979_v57 = vshll.u32 %v12076_v34, 16 }
 0x23c   : > { %v10887_v38 = vadd.f32 %v10886_v52, %v10885_v30  ;;  %v10888_v24 = vpop.f32.mrb[90].mxu0  ;;  %v11002_v8 = vadd.f32 %v11001_v61, %v11000_v50 }
 0x23d   : > { %v10889_v46 = vpop.f32.mrb[91].mxu0  ;;  %v5981_v61 = vrot.slane %v5979_v57, 1  ;;  %11208 = vmatpush3.bf16.msra.mxu0 %v12079_v7 }
 0x23e   : > { %v4551_v63 = vadd.f32 %v10887_v38, %v13270_v11  ;;  %v10890_v40 = vadd.f32 %v10889_v46, %v10888_v24  ;;  %v5972_v38 = vshrl.u32 %v12075_v35, 16 }
 0x240   : > { %v4554_v56 = vadd.f32 %v10890_v40, %v13277_v62  ;;  %v13368_v6 = vadd.f32 %v10999_v53, %v4551_v63  ;;  %v11003_v11 = vpop.f32.mrb[92].mxu1  ;;  %v5976_v53 = vrot.slane %v5974_v21, 1 }
 0x241   : > { %v11004_v25 = vpop.f32.mrb[93].mxu1 }
 0x242   : > { %v10891_v9 = vpop.f32.mrb[92].mxu0  ;;  %v13370_v2 = vadd.f32 %v11002_v8, %v4554_v56  ;;  %v11005_v52 = vadd.f32 %v11004_v25, %v11003_v11  ;;  %v11006_v62 = vpop.f32.mrb[94].mxu1  ;;  %v5977_v40 = vor.u32 %v5976_v53, %v5972_v38 }
 0x243   : > { %v10892_v16 = vpop.f32.mrb[93].mxu0  ;;  %v11007_v46 = vpop.f32.mrb[95].mxu1 }
 0x244   : > { %v10893_v23 = vadd.f32 %v10892_v16, %v10891_v9  ;;  %v10894_v33 = vpop.f32.mrb[94].mxu0  ;;  %v11008_v50 = vadd.f32 %v11007_v46, %v11006_v62 }
 0x245   : > { %v10895_v30 = vpop.f32.mrb[95].mxu0 }
 0x246   : > { %v4559_v24 = vadd.f32 %v10893_v23, %v13279_v19  ;;  %v10896_v58 = vadd.f32 %v10895_v30, %v10894_v33  ;;  %v5982_v19 = vsel %vm1343_vm6, %v5977_v40, %v5981_v61 }
 0x247   : > { %8803 = vmatprep.mubr.bf16.mxu1 %v5982_v19 }
 0x248   : > { %v4562_v59 = vadd.f32 %v10896_v58, %v13282_v29  ;;  %v13374_v63 = vadd.f32 %v11005_v52, %v4559_v24  ;;  %v11009_v9 = vpop.f32.mrb[96].mxu1  ;;  %8804 = vmatmul.mubr.bf16.vlgmr.msra.gmra.mrb[128].mxu1 %v12078_v27 }
 0x249   : > { %v11010_v20 = vpop.f32.mrb[97].mxu1 }
 0x24a   : > { %v10897_v8 = vpop.f32.mrb[96].mxu0  ;;  %v13376_v56 = vadd.f32 %v11008_v50, %v4562_v59  ;;  %v11011_v21 = vadd.f32 %v11010_v20, %v11009_v9  ;;  %v11012_v23 = vpop.f32.mrb[98].mxu1 }
 0x24b   : > { %v10898_v35 = vpop.f32.mrb[97].mxu0  ;;  %v11013_v30 = vpop.f32.mrb[99].mxu1 }
 0x24c   : > { %v10899_v16 = vadd.f32 %v10898_v35, %v10897_v8  ;;  %v10900_v11 = vpop.f32.mrb[98].mxu0  ;;  %v11014_v52 = vadd.f32 %v11013_v30, %v11012_v23 }
 0x24d   : > { %v10901_v29 = vpop.f32.mrb[99].mxu0 }
 0x24e   : > { %v4567_v33 = vadd.f32 %v10899_v16, %v13285_v43  ;;  %v10902_v25 = vadd.f32 %v10901_v29, %v10900_v11 }
 0x250   : > { %v4570_v62 = vadd.f32 %v10902_v25, %v13287_v54  ;;  %v13381_v34 = vadd.f32 %v11011_v21, %v4567_v33  ;;  %v11015_v46 = vpop.f32.mrb[100].mxu1 }
 0x251   : > { %v11016_v57 = vpop.f32.mrb[101].mxu1 }
 0x252   : > { %v10903_v38 = vpop.f32.mrb[100].mxu0  ;;  %v13383_v24 = vadd.f32 %v11014_v52, %v4570_v62  ;;  %v11017_v40 = vadd.f32 %v11016_v57, %v11015_v46  ;;  %v11018_v61 = vpop.f32.mrb[102].mxu1 }
 0x253   : > { %v10904_v58 = vpop.f32.mrb[101].mxu0  ;;  %v11019_v27 = vpop.f32.mrb[103].mxu1 }
 0x254   : > { %v10905_v53 = vadd.f32 %v10904_v58, %v10903_v38  ;;  %v10906_v50 = vpop.f32.mrb[102].mxu0  ;;  %v11020_v8 = vadd.f32 %v11019_v27, %v11018_v61 }
 0x255   : > { %v10907_v59 = vpop.f32.mrb[103].mxu0 }
 0x256   : > { %v4575_v43 = vadd.f32 %v10905_v53, %v13291_v12  ;;  %v10908_v0 = vadd.f32 %v10907_v59, %v10906_v50  ;;  %v12081_v53 = vld [vmem:[#allocation10 + $0x140] sm:$0xff]  }
 0x257   : > { %11305 = vmatprep.subr.bf16.mxu1 %v12081_v53 }
 0x258   : > { %v4578_v54 = vadd.f32 %v10908_v0, %v13293_v17  ;;  %v13387_v7 = vadd.f32 %v11017_v40, %v4575_v43  ;;  %v11021_v20 = vpop.f32.mrb[104].mxu1  ;;  %v12084_v43 = vld [vmem:[#allocation10 + $0x100] sm:$0xff]  }
 0x259   : > { %v11022_v21 = vpop.f32.mrb[105].mxu1  ;;  %11306 = vmatpush3.bf16.msra.mxu1 %v12084_v43 }
 0x25a   : > { %v10909_v35 = vpop.f32.mrb[104].mxu0  ;;  %v13389_v9 = vadd.f32 %v11020_v8, %v4578_v54  ;;  %v11023_v12 = vadd.f32 %v11022_v21, %v11021_v20  ;;  %v11024_v25 = vpop.f32.mrb[106].mxu1 }
 0x25b   : > { %v10910_v19 = vpop.f32.mrb[105].mxu0  ;;  %v11025_v30 = vpop.f32.mrb[107].mxu1 }
 0x25c   : > { %v10911_v16 = vadd.f32 %v10910_v19, %v10909_v35  ;;  %v10912_v11 = vpop.f32.mrb[106].mxu0  ;;  %v11026_v17 = vadd.f32 %v11025_v30, %v11024_v25 }
 0x25d   : > { %v10913_v29 = vpop.f32.mrb[107].mxu0 }
 0x25e   : > { %v4583_v23 = vadd.f32 %v10911_v16, %v13295_v39  ;;  %v10914_v33 = vadd.f32 %v10913_v29, %v10912_v11 }
 0x260   : > { %v4586_v52 = vadd.f32 %v10914_v33, %v13299_v55  ;;  %v13393_v62 = vadd.f32 %v11023_v12, %v4583_v23  ;;  %v11027_v40 = vpop.f32.mrb[108].mxu1 }
 0x261   : > { %v11028_v0 = vpop.f32.mrb[109].mxu1 }
 0x262   : > { %v10915_v38 = vpop.f32.mrb[108].mxu0  ;;  %v13395_v58 = vadd.f32 %v11026_v17, %v4586_v52  ;;  %v11029_v27 = vadd.f32 %v11028_v0, %v11027_v40  ;;  %v11030_v8 = vpop.f32.mrb[110].mxu1 }
 0x263   : > { %v10916_v46 = vpop.f32.mrb[109].mxu0  ;;  %v11031_v54 = vpop.f32.mrb[111].mxu1 }
 0x264   : > { %v10917_v50 = vadd.f32 %v10916_v46, %v10915_v38  ;;  %v10918_v57 = vpop.f32.mrb[110].mxu0  ;;  %v11032_v35 = vadd.f32 %v11031_v54, %v11030_v8 }
 0x265   : > { %v10919_v59 = vpop.f32.mrb[111].mxu0 }
 0x266   : > { %v4591_v39 = vadd.f32 %v10917_v50, %v13301_v14  ;;  %v10920_v61 = vadd.f32 %v10919_v59, %v10918_v57 }
 0x268   : > { %v4594_v55 = vadd.f32 %v10920_v61, %v13303_v42  ;;  %v13399_v19 = vadd.f32 %v11029_v27, %v4591_v39  ;;  %v11033_v12 = vpop.f32.mrb[112].mxu1 }
 0x269   : > { %v11034_v25 = vpop.f32.mrb[113].mxu1 }
 0x26a   : > { %v10921_v16 = vpop.f32.mrb[112].mxu0  ;;  %v13401_v20 = vadd.f32 %v11032_v35, %v4594_v55  ;;  %v11035_v30 = vadd.f32 %v11034_v25, %v11033_v12  ;;  %v11036_v52 = vpop.f32.mrb[114].mxu1 }
 0x26b   : > { %v10922_v11 = vpop.f32.mrb[113].mxu0  ;;  %v11037_v17 = vpop.f32.mrb[115].mxu1 }
 0x26c   : > { %v10923_v29 = vadd.f32 %v10922_v11, %v10921_v16  ;;  %v10924_v21 = vpop.f32.mrb[114].mxu0  ;;  %v11038_v38 = vadd.f32 %v11037_v17, %v11036_v52  ;;  %v12095_v16 = vld [vmem:[#allocation10 + $0x148] sm:$0xff]  }
 0x26d   : > { %v10925_v14 = vpop.f32.mrb[115].mxu0  ;;  %11307 = vmatprep.subr.bf16.mxu1 %v12095_v16  ;;  %v12083_v16 = vld [vmem:[#allocation2 + $0x8] ss:$0 sps:$4 sm:$0x11]  }
 0x26e   : > { %v4599_v23 = vadd.f32 %v10923_v29, %v13307_v51  ;;  %v10926_v33 = vadd.f32 %v10925_v14, %v10924_v21 }
 0x270   : > { %v4602_v42 = vadd.f32 %v10926_v33, %v13309_v3  ;;  %v13405_v53 = vadd.f32 %v11035_v30, %v4599_v23  ;;  %v11039_v43 = vpop.f32.mrb[116].mxu1 }
 0x271   : > { %v11040_v0 = vpop.f32.mrb[117].mxu1 }
 0x272   : > { %v10927_v46 = vpop.f32.mrb[116].mxu0  ;;  %v13407_v39 = vadd.f32 %v11038_v38, %v4602_v42  ;;  %v11041_v55 = vadd.f32 %v11040_v0, %v11039_v43  ;;  %v11042_v27 = vpop.f32.mrb[118].mxu1 }
 0x273   : > { %v10928_v50 = vpop.f32.mrb[117].mxu0  ;;  %v11043_v8 = vpop.f32.mrb[119].mxu1 }
 0x274   : > { %v10929_v57 = vadd.f32 %v10928_v50, %v10927_v46  ;;  %v10930_v59 = vpop.f32.mrb[118].mxu0  ;;  %v11044_v54 = vadd.f32 %v11043_v8, %v11042_v27  ;;  %v12082_v27 = vld [vmem:[#allocation2] sm:$0xfe]  }
 0x275   : > { %v10931_v40 = vpop.f32.mrb[119].mxu0 }
 0x276   : > { %v4607_v51 = vadd.f32 %v10929_v57, %v13313_v36  ;;  %v10932_v61 = vadd.f32 %v10931_v40, %v10930_v59 }
 0x278   : > { %v4610_v3 = vadd.f32 %v10932_v61, %v13315_v41  ;;  %v13411_v35 = vadd.f32 %v11041_v55, %v4607_v51  ;;  %v12100_v41 = vld [vmem:[#allocation10 + $0x108] sm:$0xff]   ;;  %v13423_v55 = vld [vmem:[#allocation7 + $0x2] ss:$0 sm:$0xff] }
 0x279   : > { %11308 = vmatpush3.bf16.msra.mxu1 %v12100_v41 }
 0x27a   : > { %v10933_v11 = vpop.f32.mrb[120].mxu0  ;;  %v13413_v21 = vadd.f32 %v11044_v54, %v4610_v3 }
 0x27b   : > { %v10934_v29 = vpop.f32.mrb[121].mxu0 }
 0x27c   : > { %v10935_v14 = vadd.f32 %v10934_v29, %v10933_v11  ;;  %v10936_v23 = vpop.f32.mrb[122].mxu0 }
 0x27d   : > { %v10937_v36 = vpop.f32.mrb[123].mxu0 }
 0x27e   : > { %v4615_v33 = vadd.f32 %v10935_v14, %v13321_v60  ;;  %v10938_v12 = vadd.f32 %v10937_v36, %v10936_v23 }
 0x280   : > { %v4618_v42 = vadd.f32 %v10938_v12, %v13323_v32 }
 0x283   : > { %v11045_v25 = vpop.f32.mrb[120].mxu1 }
 0x284   : > { %v11046_v30 = vpop.f32.mrb[121].mxu1 }
 0x285   : > { %v11047_v17 = vadd.f32 %v11046_v30, %v11045_v25  ;;  %v11048_v38 = vpop.f32.mrb[122].mxu1 }
 0x286   : > { %v11049_v50 = vpop.f32.mrb[123].mxu1 }
 0x287   : > { %v10939_v52 = vpop.f32.mrb[124].mxu0  ;;  %v11050_v40 = vadd.f32 %v11049_v50, %v11048_v38  ;;  %v13417_v61 = vadd.f32 %v11047_v17, %v4615_v33  ;;  %v13426_v33 = vld [vmem:[#allocation7 + $0x3] ss:$0 sm:$0xff]  ;;  %v6371_v38 = vrot.slane %v12082_v27, 1  ;;  %v12109_v50 = vld [vmem:[#allocation10 + $0x150] sm:$0xff]  }
 0x288   : > { %v10940_v46 = vpop.f32.mrb[125].mxu0  ;;  %11309 = vmatprep.subr.bf16.mxu1 %v12109_v50 }
 0x289   : > { %v10941_v57 = vadd.f32 %v10940_v46, %v10939_v52  ;;  %v10942_v59 = vpop.f32.mrb[126].mxu0  ;;  %v13420_v3 = vadd.f32 %v11050_v40, %v4618_v42  ;;  %v6372_v46 = vrot.slane %v12083_v16, 1 }
 0x28a   : > { %v10943_v51 = vpop.f32.mrb[127].mxu0 }
 0x28b   : > { %v4623_v60 = vadd.f32 %v10941_v57, %v13326_v1  ;;  %v10944_v43 = vadd.f32 %v10943_v51, %v10942_v59  ;;  %v11051_v0 = vpop.f32.mrb[124].mxu1  ;;  %v12114_v57 = vld [vmem:[#allocation10 + $0x110] sm:$0xff]  }
 0x28c   : > { %v11052_v8 = vpop.f32.mrb[125].mxu1  ;;  %11310 = vmatpush3.bf16.msra.mxu1 %v12114_v57 }
 0x28d   : > { %v4626_v32 = vadd.f32 %v10944_v43, %v13328_v5  ;;  %v11053_v11 = vadd.f32 %v11052_v8, %v11051_v0  ;;  %v11054_v29 = vpop.f32.mrb[126].mxu1  ;;  %v13429_v5 = vld [vmem:[#allocation7 + $0x4] ss:$0 sm:$0xff] }
 0x28e   : > { %v11055_v36 = vpop.f32.mrb[127].mxu1 }
 0x28f   : > { %v11571_v54 = vpop.f32.mrb[128].mxu0  ;;  %v11056_v41 = vadd.f32 %v11055_v36, %v11054_v29  ;;  %v13433_v52 = vadd.f32 %v11053_v11, %v4623_v60 }
 0x290   : > { %v4833_v14 = vadd.f32 %v11571_v54, %v13338_v4  ;;  %v4824_v23 = vpop.f32.mrb[129].mxu0  ;;  %v12128_v54 = vld [vmem:[#allocation10 + $0x118] sm:$0xff]  }
 0x291   : > { %v4825_v1 = vadd.f32 %v4824_v23, %v13332_v47  ;;  %v11572_v12 = vpop.f32.mrb[130].mxu0  ;;  %v12123_v47 = vld [vmem:[#allocation10 + $0x158] sm:$0xff]   ;;  %v13439_v51 = vadd.f32 %v11056_v41, %v4626_v32  ;;  %v13448_v32 = vsel %vm1744_vm10, %v6371_v38, %v6372_v46 }
 0x292   : > { %v4957_v42 = vmul.f32 %v13423_v55, %v4833_v14  ;;  %v4836_v25 = vadd.f32 %v11572_v12, %v13340_v10  ;;  %v4827_v30 = vpop.f32.mrb[131].mxu0  ;;  %11311 = vmatprep.subr.bf16.mxu1 %v12123_v47 }
 0x293   : > { %v4955_v17 = vmul.f32 %v13423_v55, %v4825_v1  ;;  %v4828_v4 = vadd.f32 %v4827_v30, %v13334_v44  ;;  %11312 = vmatpush3.bf16.msra.mxu1 %v12128_v54 }
 0x294   : > { %v4993_v59 = vadd.f32 %v13426_v33, %v4957_v42  ;;  %v4958_v40 = vmul.f32 %v13423_v55, %v4836_v25 }
 0x295   : > { %v4991_v10 = vadd.f32 %v13426_v33, %v4955_v17  ;;  %v4956_v60 = vmul.f32 %v13423_v55, %v4828_v4 }
 0x296   : > { %vm5025_vm11 = vcmp.ge.f32.partialorder %v4993_v59, 0.0  ;;  %v5061_v43 = vmul.f32 %v13429_v5, %v4993_v59  ;;  %v4994_v44 = vadd.f32 %v13426_v33, %v4958_v40 }
 0x297   : > { %vm5023_vm12 = vcmp.ge.f32.partialorder %v4991_v10, 0.0  ;;  %v5059_v0 = vmul.f32 %v13429_v5, %v4991_v10  ;;  %v4992_v27 = vadd.f32 %v13426_v33, %v4956_v60  ;;  %v11575_v8 = vpop.f32.mrb[132].mxu0 }
 0x298   : > { %v5093_v16 = vsel %vm5025_vm11, %v4993_v59, %v5061_v43  ;;  %vm5026_vm13 = vcmp.ge.f32.partialorder %v4994_v44, 0.0  ;;  %v5062_v11 = vmul.f32 %v13429_v5, %v4994_v44  ;;  %v4849_v29 = vadd.f32 %v11575_v8, %v13350_v13  ;;  %v4840_v14 = vpop.f32.mrb[133].mxu0 }
 0x299   : > { %v10578_v23 = vpack.c.bf16 %v5093_v16, %v5093_v16  ;;  %v5091_v36 = vsel %vm5023_vm12, %v4991_v10, %v5059_v0  ;;  %vm5024_vm14 = vcmp.ge.f32.partialorder %v4992_v27, 0.0  ;;  %v5060_v1 = vmul.f32 %v13429_v5, %v4992_v27  ;;  %v13453_v12 = vpop.f32.mrb[134].mxu0 }
 0x29a   : > { %v10576_v41 = vpack.c.bf16 %v5091_v36, %v5091_v36  ;;  %v5094_v42 = vsel %vm5026_vm13, %v4994_v44, %v5062_v11  ;;  %v4961_v25 = vmul.f32 %v13423_v55, %v4849_v29  ;;  %v4841_v30 = vadd.f32 %v4840_v14, %v13344_v37  ;;  %v4843_v17 = vpop.f32.mrb[135].mxu0  ;;  %v5546_v44 = vld [vmem:[#allocation2 + $0x18] sm:$0xf]  ;;  %v5539_v11 = vld [vmem:[#allocation2 + $0xc] sm:$0xf] }
 0x29b   : > { %v5237_v4 = vshrl.u32 %v10578_v23, 16  ;;  %v5240_v38 = vshll.u32 %v10578_v23, 16  ;;  %v10579_v46 = vpack.c.bf16 %v5094_v42, %v5094_v42  ;;  %v5092_v13 = vsel %vm5024_vm14, %v4992_v27, %v5060_v1  ;;  %v5550_v1 = vld [vmem:[#allocation2 + $0x20] sm:$0x1] }
 0x29c   : > { %v5220_v50 = vshrl.u32 %v10576_v41, 16  ;;  %v5223_v57 = vshll.u32 %v10576_v41, 16  ;;  %v10577_v47 = vpack.c.bf16 %v5092_v13, %v5092_v13  ;;  %v4997_v59 = vadd.f32 %v13426_v33, %v4961_v25 }
 0x29d   : > { %v5239_v40 = vrot.slane %v5237_v4, 7  ;;  %v5245_v10 = vshrl.u32 %v10579_v46, 16  ;;  %v5248_v60 = vshll.u32 %v10579_v46, 16  ;;  %v4959_v43 = vmul.f32 %v13423_v55, %v4841_v30  ;;  %v12136_v30 = vld [vmem:[#allocation10 + $0x1c0] sm:$0xff]  }
 0x29e   : > { %v5222_v0 = vrot.slane %v5220_v50, 7  ;;  %v5228_v8 = vshrl.u32 %v10577_v47, 16  ;;  %v5231_v37 = vshll.u32 %v10577_v47, 16  ;;  %vm5029_vm15 = vcmp.ge.f32.partialorder %v4997_v59, 0.0  ;;  %11417 = vmatprep.subr.bf16.mxu0 %v12136_v30 }
 0x29f   : > { %v5242_v54 = vor.u32 %v5240_v38, %v5239_v40  ;;  %v5243_v16 = vrot.slane %v5239_v40, 4  ;;  %v5247_v29 = vrot.slane %v5245_v10, 7  ;;  %v5065_v27 = vmul.f32 %v13429_v5, %v4997_v59  ;;  %v11579_v14 = vpop.f32.mrb[136].mxu0  ;;  %v5543_v38 = vld [vmem:[#allocation2 + $0x14] sm:$0x1] }
 0x2a0   : > { %v5225_v23 = vor.u32 %v5223_v57, %v5222_v0  ;;  %v5226_v36 = vrot.slane %v5222_v0, 4  ;;  %v5230_v41 = vrot.slane %v5228_v8, 7  ;;  %v4995_v42 = vadd.f32 %v13426_v33, %v4959_v43  ;;  %v4856_v25 = vpop.f32.mrb[137].mxu0  ;;  %v12139_v43 = vld [vmem:[#allocation10 + $0x160] sm:$0xff]  }
 0x2a1   : > { %v5547_v4 = vsel %vm12873_vm8, %v5242_v54, %v5546_v44  ;;  %v5250_v46 = vor.u32 %v5248_v60, %v5247_v29  ;;  %v5252_v13 = vrot.slane %v5247_v29, 4  ;;  %v5097_v50 = vsel %vm5029_vm15, %v4997_v59, %v5065_v27  ;;  %v11580_v47 = vpop.f32.mrb[138].mxu0  ;;  %11313 = vmatprep.subr.bf16.mxu1 %v12139_v43 }
 0x2a2   : > { %5548 = vst [vmem:[#allocation2 + $0x18] sm:$0xf] %v5547_v4  ;;  %v5540_v57 = vsel %vm12873_vm8, %v5225_v23, %v5539_v11  ;;  %v5233_v40 = vor.u32 %v5231_v37, %v5230_v41  ;;  %v5235_v10 = vrot.slane %v5230_v41, 4  ;;  %v10582_v0 = vpack.c.bf16 %v5097_v50, %v5097_v50  ;;  %v4859_v8 = vpop.f32.mrb[139].mxu0 }
 0x2a3   : > { %5541 = vst [vmem:[#allocation2 + $0xc] sm:$0xf] %v5540_v57  ;;  %v5251_v44 = vsel %vm12880_vm9, %v5243_v16, %v5250_v46  ;;  %v5551_v60 = vsel %vm12833_vm4, %v5252_v13, %v5550_v1  ;;  %vm5027_vm0 = vcmp.ge.f32.partialorder %v4995_v42, 0.0  ;;  %v5063_v59 = vmul.f32 %v13429_v5, %v4995_v42  ;;  %v5560_v46 = vld [vmem:[#allocation2 + $0x30] sm:$0xf] }
 0x2a4   : > { %5549 = vst [vmem:[#allocation2 + $0x1c] sm:$0xf] %v5251_v44  ;;  %5552 = vst [vmem:[#allocation2 + $0x20] sm:$0x1] %v5551_v60  ;;  %v5234_v37 = vsel %vm12880_vm9, %v5226_v36, %v5233_v40  ;;  %v5544_v54 = vsel %vm12833_vm4, %v5235_v10, %v5543_v38  ;;  %v5271_v11 = vshrl.u32 %v10582_v0, 16  ;;  %v5274_v29 = vshll.u32 %v10582_v0, 16 }
 0x2a5   : > { %5542 = vst [vmem:[#allocation2 + $0x10] sm:$0xf] %v5234_v37  ;;  %5545 = vst [vmem:[#allocation2 + $0x14] sm:$0x1] %v5544_v54  ;;  %v5095_v16 = vsel %vm5027_vm0, %v4995_v42, %v5063_v59  ;;  %v4852_v27 = vadd.f32 %v13453_v12, %v13352_v18  ;;  %v4844_v23 = vadd.f32 %v4843_v17, %v13346_v48  ;;  %v12144_v48 = vld [vmem:[#allocation10 + $0x120] sm:$0xff]  }
 0x2a6   : > { %v4865_v1 = vadd.f32 %v11579_v14, %v13362_v28  ;;  %v13479_v41 = vrot.slane %v5271_v11, 7  ;;  %v10580_v30 = vpack.c.bf16 %v5095_v16, %v5095_v16  ;;  %v4857_v36 = vadd.f32 %v4856_v25, %v13356_v45  ;;  %11314 = vmatpush3.bf16.msra.mxu1 %v12144_v48  ;;  %v5553_v44 = vld [vmem:[#allocation2 + $0x24] sm:$0xf] }
 0x2a7   : > { %v4868_v4 = vadd.f32 %v11580_v47, %v13364_v31  ;;  %v4962_v13 = vmul.f32 %v13423_v55, %v4852_v27  ;;  %v4960_v38 = vmul.f32 %v13423_v55, %v4844_v23  ;;  %v4860_v18 = vadd.f32 %v4859_v8, %v13358_v49  ;;  %v12137_v16 = vld [vmem:[#allocation10 + $0x180] sm:$0xff]  }
 0x2a8   : > { %v4965_v42 = vmul.f32 %v13423_v55, %v4865_v1  ;;  %v13487_v12 = vpop.f32.mrb[140].mxu0  ;;  %v5276_v28 = vor.u32 %v5274_v29, %v13479_v41  ;;  %v5277_v17 = vrot.slane %v13479_v41, 4  ;;  %v5254_v14 = vshrl.u32 %v10580_v30, 16 }
 0x2a9   : > { %v5257_v45 = vshll.u32 %v10580_v30, 16  ;;  %v13491_v25 = vpop.f32.mrb[141].mxu0  ;;  %v4998_v31 = vadd.f32 %v13426_v33, %v4962_v13  ;;  %v4996_v50 = vadd.f32 %v13426_v33, %v4960_v38  ;;  %v4963_v57 = vmul.f32 %v13423_v55, %v4857_v36 }
 0x2aa   : > { %v5001_v47 = vadd.f32 %v13426_v33, %v4965_v42  ;;  %v13497_v49 = vpop.f32.mrb[142].mxu0  ;;  %v5561_v40 = vsel %vm12873_vm8, %v5276_v28, %v5560_v46  ;;  %v13501_v10 = vrot.slane %v5254_v14, 7  ;;  %v4966_v0 = vmul.f32 %v13423_v55, %v4868_v4 }
 0x2ab   : > { %v4964_v8 = vmul.f32 %v13423_v55, %v4860_v18  ;;  %v13505_v43 = vpop.f32.mrb[143].mxu0  ;;  %5562 = vst [vmem:[#allocation2 + $0x30] sm:$0xf] %v5561_v40  ;;  %vm5030_vm1 = vcmp.ge.f32.partialorder %v4998_v31, 0.0  ;;  %v5066_v60 = vmul.f32 %v13429_v5, %v4998_v31  ;;  %vm5028_vm2 = vcmp.ge.f32.partialorder %v4996_v50, 0.0  ;;  %v12085_v38 = vld [vmem:[#allocation2 + $0x18] sm:$0xff]  }
 0x2ac   : > { %v5064_v59 = vmul.f32 %v13429_v5, %v4996_v50  ;;  %v5259_v37 = vor.u32 %v5257_v45, %v13501_v10  ;;  %v5260_v54 = vrot.slane %v13501_v10, 4  ;;  %vm5033_vm3 = vcmp.ge.f32.partialorder %v5001_v47, 0.0  ;;  %v12080_v29 = vld [vmem:[#allocation2 + $0xc] sm:$0xff]  }
 0x2ad   : > { %v5069_v11 = vmul.f32 %v13429_v5, %v5001_v47  ;;  %v5098_v27 = vsel %vm5030_vm1, %v4998_v31, %v5066_v60  ;;  %v4999_v1 = vadd.f32 %v13426_v33, %v4963_v57  ;;  %v5002_v30 = vadd.f32 %v13426_v33, %v4966_v0  ;;  %8964 = vmatprep.mubr.bf16.mxu0 %v12080_v29  ;;  %v5564_v57 = vld [vmem:[#allocation2 + $0x38] sm:$0x1]  ;;  %v5557_v29 = vld [vmem:[#allocation2 + $0x2c] sm:$0x1] }
 0x2ae   : > { %v5096_v23 = vsel %vm5028_vm2, %v4996_v50, %v5064_v59  ;;  %v5554_v36 = vsel %vm12873_vm8, %v5259_v37, %v5553_v44  ;;  %v10583_v4 = vpack.c.bf16 %v5098_v27, %v5098_v27  ;;  %8965 = vmatmul.mubr.bf16.vlgmr.msra.gmra.mrb[160].mxu0 %v13448_v32  ;;  %v12153_v37 = vld [vmem:[#allocation10 + $0x188] sm:$0xff]  }
 0x2af   : > { %v10581_v46 = vpack.c.bf16 %v5096_v23, %v5096_v23  ;;  %v5101_v13 = vsel %vm5033_vm3, %v5001_v47, %v5069_v11  ;;  %5555 = vst [vmem:[#allocation2 + $0x24] sm:$0xf] %v5554_v36  ;;  %vm5031_vm5 = vcmp.ge.f32.partialorder %v4999_v1, 0.0  ;;  %v5067_v18 = vmul.f32 %v13429_v5, %v4999_v1  ;;  %8972 = vmatprep.mubr.bf16.mxu0 %v12085_v38  ;;  %v12152_v47 = vld [vmem:[#allocation10 + $0x1c8] sm:$0xff]  }
 0x2b0   : > { %v10586_v42 = vpack.c.bf16 %v5101_v13, %v5101_v13  ;;  %vm5034_vm7 = vcmp.ge.f32.partialorder %v5002_v30, 0.0  ;;  %v5279_v28 = vshrl.u32 %v10583_v4, 16  ;;  %v5282_v14 = vshll.u32 %v10583_v4, 16  ;;  %11418 = vmatpush3.bf16.msra.mxu0 %v12137_v16  ;;  %v12155_v13 = vld [vmem:[#allocation10 + $0x168] sm:$0xff]  }
 0x2b1   : > { %v5262_v45 = vshrl.u32 %v10581_v46, 16  ;;  %v5265_v31 = vshll.u32 %v10581_v46, 16  ;;  %v5099_v44 = vsel %vm5031_vm5, %v4999_v1, %v5067_v18  ;;  %v5070_v60 = vmul.f32 %v13429_v5, %v5002_v30  ;;  %11419 = vmatprep.subr.bf16.mxu0 %v12152_v47  ;;  %11315 = vmatprep.subr.bf16.mxu1 %v12155_v13  ;;  %v12160_v10 = vld [vmem:[#allocation10 + $0x128] sm:$0xff]  }
 0x2b2   : > { %v13517_v48 = vpop.f32.mrb[144].mxu0  ;;  %v5305_v40 = vshrl.u32 %v10586_v42, 16  ;;  %v5308_v0 = vshll.u32 %v10586_v42, 16  ;;  %v5281_v32 = vrot.slane %v5279_v28, 7  ;;  %v10584_v27 = vpack.c.bf16 %v5099_v44, %v5099_v44  ;;  %11316 = vmatpush3.bf16.msra.mxu1 %v12160_v10  ;;  %v5571_v10 = vld [vmem:[#allocation2 + $0x44] sm:$0x1] }
 0x2b3   : > { %v13520_v50 = vpop.f32.mrb[145].mxu0  ;;  %v5264_v11 = vrot.slane %v5262_v45, 7  ;;  %v5000_v23 = vadd.f32 %v13426_v33, %v4964_v8  ;;  %v5102_v4 = vsel %vm5034_vm7, %v5002_v30, %v5070_v60  ;;  %v4881_v1 = vadd.f32 %v13487_v12, %v13374_v63  ;;  %v5574_v45 = vld [vmem:[#allocation2 + $0x48] sm:$0xf]  ;;  %v5567_v30 = vld [vmem:[#allocation2 + $0x3c] sm:$0xf] }
 0x2b4   : > { %v13524_v59 = vpop.f32.mrb[146].mxu0  ;;  %v13529_v16 = vrot.slane %v5305_v40, 7  ;;  %v4873_v46 = vadd.f32 %v13491_v25, %v13368_v6  ;;  %v5284_v38 = vor.u32 %v5282_v14, %v5281_v32  ;;  %v5286_v42 = vrot.slane %v5281_v32, 4  ;;  %11420 = vmatpush3.bf16.msra.mxu0 %v12153_v37 }
 0x2b5   : > { %v13527_v36 = vpop.f32.mrb[147].mxu0  ;;  %v5267_v18 = vor.u32 %v5265_v31, %v5264_v11  ;;  %v5269_v28 = vrot.slane %v5264_v11, 4  ;;  %v5288_v40 = vshrl.u32 %v10584_v27, 16  ;;  %v5291_v44 = vshll.u32 %v10584_v27, 16 }
 0x2b6   : > { %v5310_v8 = vor.u32 %v5308_v0, %v13529_v16  ;;  %v5311_v47 = vrot.slane %v13529_v16, 4  ;;  %v5285_v63 = vsel %vm12880_vm9, %v5277_v17, %v5284_v38  ;;  %v5565_v6 = vsel %vm12833_vm4, %v5286_v42, %v5564_v57 }
 0x2b7   : > { %v5268_v12 = vsel %vm12880_vm9, %v5260_v54, %v5267_v18  ;;  %v5558_v25 = vsel %vm12833_vm4, %v5269_v28, %v5557_v29  ;;  %5563 = vst [vmem:[#allocation2 + $0x34] sm:$0xf] %v5285_v63  ;;  %5566 = vst [vmem:[#allocation2 + $0x38] sm:$0x1] %v5565_v6  ;;  %v13552_v17 = vrot.slane %v5288_v40, 7  ;;  %v10587_v14 = vpack.c.bf16 %v5102_v4, %v5102_v4 }
 0x2b8   : > { %5556 = vst [vmem:[#allocation2 + $0x28] sm:$0xf] %v5268_v12  ;;  %5559 = vst [vmem:[#allocation2 + $0x2c] sm:$0x1] %v5558_v25  ;;  %v5575_v41 = vsel %vm12873_vm8, %v5310_v8, %v5574_v45  ;;  %vm5032_vm11 = vcmp.ge.f32.partialorder %v5000_v23, 0.0  ;;  %v5068_v54 = vmul.f32 %v13429_v5, %v5000_v23  ;;  %v4969_v57 = vmul.f32 %v13423_v55, %v4881_v1 }
 0x2b9   : > { %5576 = vst [vmem:[#allocation2 + $0x48] sm:$0xf] %v5575_v41  ;;  %v4967_v0 = vmul.f32 %v13423_v55, %v4873_v46  ;;  %v4884_v60 = vadd.f32 %v13497_v49, %v13376_v56  ;;  %v5293_v32 = vor.u32 %v5291_v44, %v13552_v17  ;;  %v5294_v11 = vrot.slane %v13552_v17, 4  ;;  %v5578_v4 = vld [vmem:[#allocation2 + $0x50] sm:$0x1] }
 0x2ba   : > { %v5313_v29 = vshrl.u32 %v10587_v14, 16  ;;  %v5316_v27 = vshll.u32 %v10587_v14, 16  ;;  %v5100_v13 = vsel %vm5032_vm11, %v5000_v23, %v5068_v54  ;;  %v5005_v1 = vadd.f32 %v13426_v33, %v4969_v57 }
 0x2bb   : > { %v5003_v46 = vadd.f32 %v13426_v33, %v4967_v0  ;;  %v4970_v56 = vmul.f32 %v13423_v55, %v4884_v60  ;;  %v5568_v38 = vsel %vm12873_vm8, %v5293_v32, %v5567_v30  ;;  %v10585_v18 = vpack.c.bf16 %v5100_v13, %v5100_v13  ;;  %v5588_v13 = vld [vmem:[#allocation2 + $0x60] sm:$0xf] }
 0x2bc   : > { %v5315_v42 = vrot.slane %v5313_v29, 7  ;;  %v4876_v28 = vadd.f32 %v13505_v43, %v13370_v2  ;;  %5569 = vst [vmem:[#allocation2 + $0x3c] sm:$0xf] %v5568_v38  ;;  %vm5037_vm12 = vcmp.ge.f32.partialorder %v5005_v1, 0.0  ;;  %v5073_v23 = vmul.f32 %v13429_v5, %v5005_v1 }
 0x2bd   : > { %vm5035_vm13 = vcmp.ge.f32.partialorder %v5003_v46, 0.0  ;;  %v5071_v45 = vmul.f32 %v13429_v5, %v5003_v46  ;;  %v5296_v44 = vshrl.u32 %v10585_v18, 16  ;;  %v5299_v63 = vshll.u32 %v10585_v18, 16 }
 0x2be   : > { %v5318_v8 = vor.u32 %v5316_v27, %v5315_v42  ;;  %v5320_v40 = vrot.slane %v5315_v42, 4  ;;  %v5105_v6 = vsel %vm5037_vm12, %v5005_v1, %v5073_v23  ;;  %v5006_v25 = vadd.f32 %v13426_v33, %v4970_v56 }
 0x2bf   : > { %v5103_v12 = vsel %vm5035_vm13, %v5003_v46, %v5071_v45  ;;  %v4968_v30 = vmul.f32 %v13423_v55, %v4876_v28  ;;  %v5298_v41 = vrot.slane %v5296_v44, 7  ;;  %v10590_v17 = vpack.c.bf16 %v5105_v6, %v5105_v6 }
 0x2c0   : > { %v13554_v31 = vpop.f32.mrb[148].mxu0  ;;  %v5319_v2 = vsel %vm12880_vm9, %v5311_v47, %v5318_v8  ;;  %v5579_v43 = vsel %vm12833_vm4, %v5320_v40, %v5578_v4  ;;  %v10588_v54 = vpack.c.bf16 %v5103_v12, %v5103_v12  ;;  %vm5038_vm14 = vcmp.ge.f32.partialorder %v5006_v25, 0.0  ;;  %v5581_v8 = vld [vmem:[#allocation2 + $0x54] sm:$0xf] }
 0x2c1   : > { %v13561_v37 = vpop.f32.mrb[149].mxu0  ;;  %5577 = vst [vmem:[#allocation2 + $0x4c] sm:$0xf] %v5319_v2  ;;  %5580 = vst [vmem:[#allocation2 + $0x50] sm:$0x1] %v5579_v43  ;;  %v5074_v57 = vmul.f32 %v13429_v5, %v5006_v25  ;;  %v5004_v0 = vadd.f32 %v13426_v33, %v4968_v30  ;;  %v5301_v32 = vor.u32 %v5299_v63, %v5298_v41  ;;  %v5303_v47 = vrot.slane %v5298_v41, 4 }
 0x2c2   : > { %v13565_v16 = vpop.f32.mrb[150].mxu0  ;;  %v5339_v29 = vshrl.u32 %v10590_v17, 16  ;;  %v5342_v27 = vshll.u32 %v10590_v17, 16  ;;  %v5322_v1 = vshrl.u32 %v10588_v54, 16  ;;  %v5325_v46 = vshll.u32 %v10588_v54, 16 }
 0x2c3   : > { %v13571_v49 = vpop.f32.mrb[151].mxu0  ;;  %v5106_v56 = vsel %vm5038_vm14, %v5006_v25, %v5074_v57  ;;  %vm5036_vm15 = vcmp.ge.f32.partialorder %v5004_v0, 0.0  ;;  %v5302_v42 = vsel %vm12880_vm9, %v5294_v11, %v5301_v32  ;;  %v5572_v18 = vsel %vm12833_vm4, %v5303_v47, %v5571_v10  ;;  %v5592_v43 = vld [vmem:[#allocation2 + $0x68] sm:$0x1] }
 0x2c4   : > { %v5341_v28 = vrot.slane %v5339_v29, 7  ;;  %v10591_v23 = vpack.c.bf16 %v5106_v56, %v5106_v56  ;;  %5570 = vst [vmem:[#allocation2 + $0x40] sm:$0xf] %v5302_v42  ;;  %5573 = vst [vmem:[#allocation2 + $0x44] sm:$0x1] %v5572_v18  ;;  %v5324_v45 = vrot.slane %v5322_v1, 7  ;;  %v5072_v40 = vmul.f32 %v13429_v5, %v5004_v0 }
 0x2c5   : > { %v4897_v44 = vadd.f32 %v13517_v48, %v13387_v7  ;;  %v4889_v63 = vadd.f32 %v13520_v50, %v13381_v34  ;;  %v4892_v32 = vadd.f32 %v13527_v36, %v13383_v24  ;;  %v5585_v56 = vld [vmem:[#allocation2 + $0x5c] sm:$0x1] }
 0x2c6   : > { %v5344_v6 = vor.u32 %v5342_v27, %v5341_v28  ;;  %v5345_v12 = vrot.slane %v5341_v28, 4  ;;  %v5347_v11 = vshrl.u32 %v10591_v23, 16  ;;  %v5350_v25 = vshll.u32 %v10591_v23, 16 }
 0x2c7   : > { %v5327_v30 = vor.u32 %v5325_v46, %v5324_v45  ;;  %v5328_v2 = vrot.slane %v5324_v45, 4  ;;  %v5104_v41 = vsel %vm5036_vm15, %v5004_v0, %v5072_v40  ;;  %v4973_v17 = vmul.f32 %v13423_v55, %v4897_v44 }
 0x2c8   : > { %v13585_v14 = vpop.f32.mrb[152].mxu0  ;;  %v5589_v10 = vsel %vm12873_vm8, %v5344_v6, %v5588_v13  ;;  %v5349_v54 = vrot.slane %v5347_v11, 7  ;;  %v10589_v57 = vpack.c.bf16 %v5104_v41, %v5104_v41  ;;  %v4971_v7 = vmul.f32 %v13423_v55, %v4889_v63  ;;  %v12115_v15 = vld [vmem:[#allocation2 + $0x48] sm:$0xff]  }
 0x2c9   : > { %v13589_v60 = vpop.f32.mrb[153].mxu0  ;;  %5590 = vst [vmem:[#allocation2 + $0x60] sm:$0xf] %v5589_v10  ;;  %v5582_v34 = vsel %vm12873_vm8, %v5327_v30, %v5581_v8  ;;  %v5009_v50 = vadd.f32 %v13426_v33, %v4973_v17  ;;  %v4900_v0 = vadd.f32 %v13524_v59, %v13389_v9  ;;  %v13625_v59 = vld [vmem:[#allocation2 + $0xc] sm:$0xff]   ;;  %v4972_v45 = vmul.f32 %v13423_v55, %v4892_v32 }
 0x2ca   : > { %v13591_v4 = vpop.f32.mrb[154].mxu0  ;;  %5583 = vst [vmem:[#allocation2 + $0x54] sm:$0xf] %v5582_v34  ;;  %v5352_v29 = vor.u32 %v5350_v25, %v5349_v54  ;;  %v5354_v27 = vrot.slane %v5349_v54, 4  ;;  %v5330_v13 = vshrl.u32 %v10589_v57, 16  ;;  %v5333_v1 = vshll.u32 %v10589_v57, 16 }
 0x2cb   : > { %v13593_v38 = vpop.f32.mrb[155].mxu0  ;;  %vm5041_vm0 = vcmp.ge.f32.partialorder %v5009_v50, 0.0  ;;  %v5077_v42 = vmul.f32 %v13429_v5, %v5009_v50  ;;  %v5007_v18 = vadd.f32 %v13426_v33, %v4971_v7  ;;  %v4974_v9 = vmul.f32 %v13423_v55, %v4900_v0 }
 0x2cc   : > { %v5353_v36 = vsel %vm12880_vm9, %v5345_v12, %v5352_v29  ;;  %v5593_v28 = vsel %vm12833_vm4, %v5354_v27, %v5592_v43  ;;  %v5332_v23 = vrot.slane %v5330_v13, 7  ;;  %v5008_v25 = vadd.f32 %v13426_v33, %v4972_v45  ;;  %v12087_v12 = vld [vmem:[#allocation2 + $0x14] ss:$0 sps:$4 sm:$0x11]   ;;  %v5602_v13 = vld [vmem:[#allocation2 + $0x78] sm:$0xf] }
 0x2cd   : > { %5591 = vst [vmem:[#allocation2 + $0x64] sm:$0xf] %v5353_v36  ;;  %5594 = vst [vmem:[#allocation2 + $0x68] sm:$0x1] %v5593_v28  ;;  %v5109_v8 = vsel %vm5041_vm0, %v5009_v50, %v5077_v42  ;;  %vm5039_vm1 = vcmp.ge.f32.partialorder %v5007_v18, 0.0  ;;  %v5075_v40 = vmul.f32 %v13429_v5, %v5007_v18  ;;  %v5010_v44 = vadd.f32 %v13426_v33, %v4974_v9 }
 0x2ce   : > { %v5335_v63 = vor.u32 %v5333_v1, %v5332_v23  ;;  %v5337_v6 = vrot.slane %v5332_v23, 4  ;;  %v10594_v11 = vpack.c.bf16 %v5109_v8, %v5109_v8  ;;  %v5984_v41 = vshrl.u32 %v13625_v59, 16  ;;  %v5595_v28 = vld [vmem:[#allocation2 + $0x6c] sm:$0xf] }
 0x2cf   : > { %v5107_v30 = vsel %vm5039_vm1, %v5007_v18, %v5075_v40  ;;  %vm5042_vm2 = vcmp.ge.f32.partialorder %v5010_v44, 0.0  ;;  %v5078_v43 = vmul.f32 %v13429_v5, %v5010_v44  ;;  %vm5040_vm3 = vcmp.ge.f32.partialorder %v5008_v25, 0.0  ;;  %v12168_v18 = vld [vmem:[#allocation10 + $0x1d0] sm:$0xff]   ;;  %v5606_v40 = vld [vmem:[#allocation2 + $0x80] sm:$0x1] }
 0x2d0   : > { %v13609_v48 = vpop.f32.mrb[156].mxu0  ;;  %v5336_v17 = vsel %vm12880_vm9, %v5328_v2, %v5335_v63  ;;  %v5586_v10 = vsel %vm12833_vm4, %v5337_v6, %v5585_v56  ;;  %v5373_v54 = vshrl.u32 %v10594_v11, 16  ;;  %v5376_v57 = vshll.u32 %v10594_v11, 16  ;;  %11421 = vmatprep.subr.bf16.mxu0 %v12168_v18 }
 0x2d1   : > { %v13618_v47 = vpop.f32.mrb[157].mxu0  ;;  %5584 = vst [vmem:[#allocation2 + $0x58] sm:$0xf] %v5336_v17  ;;  %5587 = vst [vmem:[#allocation2 + $0x5c] sm:$0x1] %v5586_v10  ;;  %v10592_v7 = vpack.c.bf16 %v5107_v30, %v5107_v30  ;;  %v5110_v34 = vsel %vm5042_vm2, %v5010_v44, %v5078_v43  ;;  %v5076_v50 = vmul.f32 %v13429_v5, %v5008_v25  ;;  %v5986_v29 = vshll.u32 %v13625_v59, 16 }
 0x2d2   : > { %v13620_v46 = vpop.f32.mrb[158].mxu0  ;;  %v5375_v0 = vrot.slane %v5373_v54, 7  ;;  %v10595_v32 = vpack.c.bf16 %v5110_v34, %v5110_v34  ;;  %v5991_v27 = vshll.u32 %v12087_v12, 16  ;;  %v4913_v56 = vadd.f32 %v13554_v31, %v13399_v19  ;;  %v12089_v59 = vld [vmem:[#allocation2 + $0x18] sm:$0xff]   ;;  %v12091_v30 = vld [vmem:[#allocation2 + $0xc] sm:$0xfe]  }
 0x2d3   : > { %v13627_v24 = vpop.f32.mrb[159].mxu0  ;;  %v5356_v1 = vshrl.u32 %v10592_v7, 16  ;;  %v5359_v2 = vshll.u32 %v10592_v7, 16  ;;  %v5108_v42 = vsel %vm5040_vm3, %v5008_v25, %v5076_v50  ;;  %v5988_v63 = vrot.slane %v5986_v29, 1  ;;  %v5599_v50 = vld [vmem:[#allocation2 + $0x74] sm:$0x1] }
 0x2d4   : > { %v5378_v9 = vor.u32 %v5376_v57, %v5375_v0  ;;  %v5379_v36 = vrot.slane %v5375_v0, 4  ;;  %v5381_v23 = vshrl.u32 %v10595_v32, 16  ;;  %v5384_v45 = vshll.u32 %v10595_v32, 16  ;;  %v12090_v31 = vld [vmem:[#allocation2 + $0x20] ss:$0 sps:$4 sm:$0x11]  }
 0x2d5   : > { %v5358_v8 = vrot.slane %v5356_v1, 7  ;;  %v10593_v44 = vpack.c.bf16 %v5108_v42, %v5108_v42  ;;  %v5993_v6 = vrot.slane %v5991_v27, 1  ;;  %v4977_v12 = vmul.f32 %v13423_v55, %v4913_v56  ;;  %v12092_v57 = vld [vmem:[#allocation2 + $0x14] ss:$0 sps:$4 sm:$0x11]  }
 0x2d6   : > { %v5603_v11 = vsel %vm12873_vm8, %v5378_v9, %v5602_v13  ;;  %v5383_v25 = vrot.slane %v5381_v23, 7  ;;  %v4905_v19 = vadd.f32 %v13561_v37, %v13393_v62  ;;  %v5989_v0 = vor.u32 %v5988_v63, %v5984_v41  ;;  %v12088_v41 = vld [vmem:[#allocation2 + $0xc] sm:$0xff]  }
 0x2d7   : > { %5604 = vst [vmem:[#allocation2 + $0x78] sm:$0xf] %v5603_v11  ;;  %v5361_v43 = vor.u32 %v5359_v2, %v5358_v8  ;;  %v5362_v17 = vrot.slane %v5358_v8, 4  ;;  %v5364_v10 = vshrl.u32 %v10593_v44, 16  ;;  %v5367_v54 = vshll.u32 %v10593_v44, 16 }
 0x2d8   : > { %v5386_v7 = vor.u32 %v5384_v45, %v5383_v25  ;;  %v5388_v34 = vrot.slane %v5383_v25, 4  ;;  %v5013_v32 = vadd.f32 %v13426_v33, %v4977_v12  ;;  %v4975_v62 = vmul.f32 %v13423_v55, %v4905_v19  ;;  %v12093_v12 = vld [vmem:[#allocation2 + $0x24] sm:$0xff]   ;;  %v12133_v22 = vld [vmem:[#allocation2 + $0x54] sm:$0xfe]  }
 0x2d9   : > { %v5596_v29 = vsel %vm12873_vm8, %v5361_v43, %v5595_v28  ;;  %v5366_v27 = vrot.slane %v5364_v10, 7  ;;  %v5996_v37 = vshrl.u32 %v12089_v59, 16  ;;  %v5994_v2 = vsel %vm1343_vm6, %v5989_v0, %v5993_v6 }
 0x2da   : > { %5597 = vst [vmem:[#allocation2 + $0x6c] sm:$0xf] %v5596_v29  ;;  %v5387_v13 = vsel %vm12880_vm9, %v5379_v36, %v5386_v7  ;;  %v5607_v1 = vsel %vm12833_vm4, %v5388_v34, %v5606_v40  ;;  %vm5045_vm5 = vcmp.ge.f32.partialorder %v5013_v32, 0.0  ;;  %8811 = vmatprep.mubr.bf16.mxu1 %v5994_v2  ;;  %v5081_v18 = vmul.f32 %v13429_v5, %v5013_v32  ;;  %v13690_v29 = vld [vmem:[#allocation7 + $0x3] ss:$0 sm:$0xff] }
 0x2db   : > { %5605 = vst [vmem:[#allocation2 + $0x7c] sm:$0xf] %v5387_v13  ;;  %5608 = vst [vmem:[#allocation2 + $0x80] sm:$0x1] %v5607_v1  ;;  %v5369_v42 = vor.u32 %v5367_v54, %v5366_v27  ;;  %v5371_v56 = vrot.slane %v5366_v27, 4  ;;  %v5011_v55 = vadd.f32 %v13426_v33, %v4975_v62  ;;  %8812 = vmatmul.mubr.bf16.gmra.mrb[132].mxu1 %v12088_v41  ;;  %v5998_v9 = vshll.u32 %v12089_v59, 16 }
 0x2dc   : > { %v6003_v28 = vshll.u32 %v12090_v31, 16  ;;  %v6374_v36 = vrot.slane %v12091_v30, 1  ;;  %v6375_v23 = vrot.slane %v12092_v57, 1  ;;  %v5113_v40 = vsel %vm5045_vm5, %v5013_v32, %v5081_v18  ;;  %v13669_v59 = vld [vmem:[#allocation2 + $0x24] sm:$0xff]   ;;  %v12169_v30 = vld [vmem:[#allocation10 + $0x190] sm:$0xff]  }
 0x2dd   : > { %v5370_v45 = vsel %vm12880_vm9, %v5362_v17, %v5369_v42  ;;  %v5600_v8 = vsel %vm12833_vm4, %v5371_v56, %v5599_v50  ;;  %vm5043_vm7 = vcmp.ge.f32.partialorder %v5011_v55, 0.0  ;;  %v10598_v44 = vpack.c.bf16 %v5113_v40, %v5113_v40  ;;  %v13679_v57 = vld [vmem:[#allocation7 + $0x2] ss:$0 sm:$0xff]  ;;  %11422 = vmatpush3.bf16.msra.mxu0 %v12169_v30  ;;  %v5609_v2 = vld [vmem:[#allocation2 + $0x84] sm:$0xf] }
 0x2de   : > { %5598 = vst [vmem:[#allocation2 + $0x70] sm:$0xf] %v5370_v45  ;;  %5601 = vst [vmem:[#allocation2 + $0x74] sm:$0x1] %v5600_v8  ;;  %v5079_v63 = vmul.f32 %v13429_v5, %v5011_v55  ;;  %v6000_v33 = vrot.slane %v5998_v9, 1  ;;  %v6005_v6 = vrot.slane %v6003_v28, 1  ;;  %v6376_v11 = vsel %vm1744_vm10, %v6374_v36, %v6375_v23 }
 0x2df   : > { %v4916_v25 = vadd.f32 %v13565_v16, %v13401_v20  ;;  %v4908_v19 = vadd.f32 %v13571_v49, %v13395_v58  ;;  %v4929_v31 = vadd.f32 %v13585_v14, %v13411_v35  ;;  %v5407_v43 = vshrl.u32 %v10598_v44, 16  ;;  %8973 = vmatmul.mubr.bf16.gmra.mrb[164].mxu0 %v6376_v11  ;;  %v5616_v35 = vld [vmem:[#allocation2 + $0x90] sm:$0xf]  ;;  %v12094_v14 = vld [vmem:[#allocation2 + $0x18] sm:$0xff]  }
 0x2e0   : > { %v5410_v17 = vshll.u32 %v10598_v44, 16  ;;  %v5111_v5 = vsel %vm5043_vm7, %v5011_v55, %v5079_v63  ;;  %v6001_v10 = vor.u32 %v6000_v33, %v5996_v37  ;;  %8980 = vmatprep.mubr.bf16.mxu0 %v12093_v12  ;;  %v4921_v34 = vadd.f32 %v13589_v60, %v13405_v53  ;;  %v13700_v41 = vld [vmem:[#allocation7 + $0x4] ss:$0 sm:$0xff]  ;;  %v12097_v9 = vld [vmem:[#allocation2 + $0x2c] ss:$0 sps:$4 sm:$0x11]  }
 0x2e1   : > { %v10596_v54 = vpack.c.bf16 %v5111_v5, %v5111_v5  ;;  %v4978_v7 = vmul.f32 %v13679_v57, %v4916_v25  ;;  %v4976_v20 = vmul.f32 %v13679_v57, %v4908_v19  ;;  %v4981_v58 = vmul.f32 %v13679_v57, %v4929_v31  ;;  %v12098_v8 = vld [vmem:[#allocation2 + $0x18] sm:$0xfe]   ;;  %v12099_v12 = vld [vmem:[#allocation2 + $0x20] ss:$0 sps:$4 sm:$0x11]  }
 0x2e2   : > { %v13684_v16 = vrot.slane %v5407_v43, 7  ;;  %v6006_v49 = vsel %vm1343_vm6, %v6001_v10, %v6005_v6  ;;  %v6008_v50 = vshrl.u32 %v13669_v59, 16  ;;  %v4979_v53 = vmul.f32 %v13679_v57, %v4921_v34 }
 0x2e3   : > { %v5390_v0 = vshrl.u32 %v10596_v54, 16  ;;  %v5393_v32 = vshll.u32 %v10596_v54, 16  ;;  %8819 = vmatprep.mubr.bf16.mxu1 %v6006_v49  ;;  %v5014_v27 = vadd.f32 %v13690_v29, %v4978_v7  ;;  %v5012_v62 = vadd.f32 %v13690_v29, %v4976_v20 }
 0x2e4   : > { %v5412_v37 = vor.u32 %v5410_v17, %v13684_v16  ;;  %v5413_v13 = vrot.slane %v13684_v16, 4  ;;  %v5017_v1 = vadd.f32 %v13690_v29, %v4981_v58  ;;  %8820 = vmatmul.mubr.bf16.gmra.mrb[136].mxu1 %v12094_v14  ;;  %v5015_v45 = vadd.f32 %v13690_v29, %v4979_v53  ;;  %v5620_v17 = vld [vmem:[#allocation2 + $0x98] sm:$0x1] }
 0x2e5   : > { %v13698_v60 = vrot.slane %v5390_v0, 7  ;;  %vm5046_vm11 = vcmp.ge.f32.partialorder %v5014_v27, 0.0  ;;  %v5082_v42 = vmul.f32 %v13700_v41, %v5014_v27  ;;  %vm5044_vm12 = vcmp.ge.f32.partialorder %v5012_v62, 0.0  ;;  %v5630_v0 = vld [vmem:[#allocation2 + $0xa8] sm:$0xf] }
 0x2e6   : > { %v5617_v56 = vsel %vm12873_vm8, %v5412_v37, %v5616_v35  ;;  %v5080_v18 = vmul.f32 %v13700_v41, %v5012_v62  ;;  %vm5049_vm13 = vcmp.ge.f32.partialorder %v5017_v1, 0.0  ;;  %v5085_v55 = vmul.f32 %v13700_v41, %v5017_v1  ;;  %v12141_v26 = vld [vmem:[#allocation2 + $0x74] ss:$0 sps:$4 sm:$0x11]  }
 0x2e7   : > { %5618 = vst [vmem:[#allocation2 + $0x90] sm:$0xf] %v5617_v56  ;;  %v5395_v28 = vor.u32 %v5393_v32, %v13698_v60  ;;  %v5396_v36 = vrot.slane %v13698_v60, 4  ;;  %v5114_v23 = vsel %vm5046_vm11, %v5014_v27, %v5082_v42  ;;  %v6010_v33 = vshll.u32 %v13669_v59, 16  ;;  %v5613_v59 = vld [vmem:[#allocation2 + $0x8c] sm:$0x1] }
 0x2e8   : > { %v10599_v40 = vpack.c.bf16 %v5114_v23, %v5114_v23  ;;  %v5112_v44 = vsel %vm5044_vm12, %v5012_v62, %v5080_v18  ;;  %v5117_v63 = vsel %vm5049_vm13, %v5017_v1, %v5085_v55  ;;  %vm5047_vm14 = vcmp.ge.f32.partialorder %v5015_v45, 0.0  ;;  %v12103_v62 = vld [vmem:[#allocation2 + $0x30] sm:$0xff]  }
 0x2e9   : > { %v5610_v6 = vsel %vm12873_vm8, %v5395_v28, %v5609_v2  ;;  %v10597_v11 = vpack.c.bf16 %v5112_v44, %v5112_v44  ;;  %v10602_v25 = vpack.c.bf16 %v5117_v63, %v5117_v63  ;;  %v5083_v30 = vmul.f32 %v13700_v41, %v5015_v45  ;;  %v12171_v2 = vld [vmem:[#allocation10 + $0x170] sm:$0xff]  }
 0x2ea   : > { %5611 = vst [vmem:[#allocation2 + $0x84] sm:$0xf] %v5610_v6  ;;  %v5415_v19 = vshrl.u32 %v10599_v40, 16  ;;  %v5418_v31 = vshll.u32 %v10599_v40, 16  ;;  %v6012_v43 = vrot.slane %v6010_v33, 1  ;;  %v6015_v49 = vshll.u32 %v12097_v9, 16  ;;  %11317 = vmatprep.subr.bf16.mxu1 %v12171_v2 }
 0x2eb   : > { %v5398_v5 = vshrl.u32 %v10597_v11, 16  ;;  %v5401_v10 = vshll.u32 %v10597_v11, 16  ;;  %v5441_v54 = vshrl.u32 %v10602_v25, 16  ;;  %v5444_v7 = vshll.u32 %v10602_v25, 16  ;;  %v12105_v25 = vld [vmem:[#allocation2 + $0x24] sm:$0xfe]  }
 0x2ec   : > { %v5417_v20 = vrot.slane %v5415_v19, 7  ;;  %v5115_v58 = vsel %vm5047_vm14, %v5015_v45, %v5083_v30  ;;  %v6013_v35 = vor.u32 %v6012_v43, %v6008_v50  ;;  %v6377_v27 = vrot.slane %v12098_v8, 1  ;;  %v12102_v50 = vld [vmem:[#allocation2 + $0x24] sm:$0xff]   ;;  %v12104_v9 = vld [vmem:[#allocation2 + $0x38] ss:$0 sps:$4 sm:$0x11]  }
 0x2ed   : > { %v5400_v14 = vrot.slane %v5398_v5, 7  ;;  %v13714_v34 = vrot.slane %v5441_v54, 7  ;;  %v10600_v32 = vpack.c.bf16 %v5115_v58, %v5115_v58  ;;  %v6017_v53 = vrot.slane %v6015_v49, 1  ;;  %v12108_v2 = vld [vmem:[#allocation2 + $0x30] sm:$0xff]  }
 0x2ee   : > { %v5420_v37 = vor.u32 %v5418_v31, %v5417_v20  ;;  %v5422_v1 = vrot.slane %v5417_v20, 4  ;;  %v6378_v60 = vrot.slane %v12099_v12, 1  ;;  %v4932_v6 = vadd.f32 %v13591_v4, %v13413_v21  ;;  %v5623_v12 = vld [vmem:[#allocation2 + $0x9c] sm:$0xf]  ;;  %v12176_v20 = vld [vmem:[#allocation10 + $0x130] sm:$0xff]  }
 0x2ef   : > { %v5403_v42 = vor.u32 %v5401_v10, %v5400_v14  ;;  %v5405_v56 = vrot.slane %v5400_v14, 4  ;;  %v5446_v18 = vor.u32 %v5444_v7, %v13714_v34  ;;  %v5447_v55 = vrot.slane %v13714_v34, 4  ;;  %v12184_v14 = vld [vmem:[#allocation10 + $0x1d8] sm:$0xff]   ;;  %11318 = vmatpush3.bf16.msra.mxu1 %v12176_v20 }
 0x2f0   : > { %v5421_v28 = vsel %vm12880_vm9, %v5413_v13, %v5420_v37  ;;  %v5621_v23 = vsel %vm12833_vm4, %v5422_v1, %v5620_v17  ;;  %v5424_v45 = vshrl.u32 %v10600_v32, 16  ;;  %v5427_v8 = vshll.u32 %v10600_v32, 16  ;;  %11423 = vmatprep.subr.bf16.mxu0 %v12184_v14  ;;  %v12118_v14 = vld [vmem:[#allocation2 + $0x50] ss:$0 sps:$4 sm:$0x11]  }
 0x2f1   : > { %5619 = vst [vmem:[#allocation2 + $0x94] sm:$0xf] %v5421_v28  ;;  %5622 = vst [vmem:[#allocation2 + $0x98] sm:$0x1] %v5621_v23  ;;  %v5404_v40 = vsel %vm12880_vm9, %v5396_v36, %v5403_v42  ;;  %v5614_v44 = vsel %vm12833_vm4, %v5405_v56, %v5613_v59  ;;  %v5631_v16 = vsel %vm12873_vm8, %v5446_v18, %v5630_v0  ;;  %v12101_v36 = vld [vmem:[#allocation2 + $0x30] sm:$0xff]   ;;  %v6020_v30 = vshrl.u32 %v12103_v62, 16 }
 0x2f2   : > { %v6018_v63 = vsel %vm1343_vm6, %v6013_v35, %v6017_v53  ;;  %5612 = vst [vmem:[#allocation2 + $0x88] sm:$0xf] %v5404_v40  ;;  %5615 = vst [vmem:[#allocation2 + $0x8c] sm:$0x1] %v5614_v44  ;;  %v13731_v13 = vrot.slane %v5424_v45, 7  ;;  %v6379_v33 = vsel %vm1744_vm10, %v6377_v27, %v6378_v60  ;;  %v4924_v11 = vadd.f32 %v13593_v38, %v13407_v39  ;;  %v13759_v28 = vld [vmem:[#allocation2 + $0x3c] sm:$0xff]  }
 0x2f3   : > { %5632 = vst [vmem:[#allocation2 + $0xa8] sm:$0xf] %v5631_v16  ;;  %8827 = vmatprep.mubr.bf16.mxu1 %v6018_v63  ;;  %8981 = vmatmul.mubr.bf16.gmra.mrb[168].mxu0 %v6379_v33  ;;  %v4945_v19 = vadd.f32 %v13609_v48, %v13433_v52  ;;  %v4937_v31 = vadd.f32 %v13618_v47, %v13417_v61  ;;  %v6022_v43 = vshll.u32 %v12103_v62, 16  ;;  %v12106_v38 = vld [vmem:[#allocation2 + $0x2c] ss:$0 sps:$4 sm:$0x11]  }
 0x2f4   : > { %8828 = vmatmul.mubr.bf16.gmra.mrb[140].mxu1 %v12102_v50  ;;  %v5429_v17 = vor.u32 %v5427_v8, %v13731_v13  ;;  %v5430_v21 = vrot.slane %v13731_v13, 4  ;;  %v4982_v4 = vmul.f32 %v13679_v57, %v4932_v6  ;;  %8988 = vmatprep.mubr.bf16.mxu0 %v12101_v36  ;;  %v4980_v39 = vmul.f32 %v13679_v57, %v4924_v11  ;;  %v5634_v6 = vld [vmem:[#allocation2 + $0xb0] sm:$0x1]  ;;  %v5627_v36 = vld [vmem:[#allocation2 + $0xa4] sm:$0x1] }
 0x2f5   : > { %v4985_v5 = vmul.f32 %v13679_v57, %v4945_v19  ;;  %v4983_v52 = vmul.f32 %v13679_v57, %v4937_v31  ;;  %v6024_v48 = vrot.slane %v6022_v43, 1  ;;  %v6027_v10 = vshll.u32 %v12104_v9, 16  ;;  %v12107_v9 = vld [vmem:[#allocation2 + $0x3c] sm:$0xff]  }
 0x2f6   : > { %v5624_v61 = vsel %vm12873_vm8, %v5429_v17, %v5623_v12  ;;  %v5018_v47 = vadd.f32 %v13690_v29, %v4982_v4  ;;  %v5016_v54 = vadd.f32 %v13690_v29, %v4980_v39  ;;  %v6380_v7 = vrot.slane %v12105_v25, 1  ;;  %v5644_v43 = vld [vmem:[#allocation2 + $0xc0] sm:$0xf]  ;;  %v5637_v17 = vld [vmem:[#allocation2 + $0xb4] sm:$0xf] }
 0x2f7   : > { %5625 = vst [vmem:[#allocation2 + $0x9c] sm:$0xf] %v5624_v61  ;;  %v5021_v59 = vadd.f32 %v13690_v29, %v4985_v5  ;;  %v5019_v58 = vadd.f32 %v13690_v29, %v4983_v52  ;;  %v6025_v35 = vor.u32 %v6024_v48, %v6020_v30  ;;  %v6029_v49 = vrot.slane %v6027_v10, 1  ;;  %v12112_v4 = vld [vmem:[#allocation2 + $0x30] sm:$0xfe]  }
 0x2f8   : > { %vm5050_vm15 = vcmp.ge.f32.partialorder %v5018_v47, 0.0  ;;  %v5086_v0 = vmul.f32 %v13700_v41, %v5018_v47  ;;  %vm5048_vm0 = vcmp.ge.f32.partialorder %v5016_v54, 0.0  ;;  %v5084_v32 = vmul.f32 %v13700_v41, %v5016_v54 }
 0x2f9   : > { %vm5053_vm1 = vcmp.ge.f32.partialorder %v5021_v59, 0.0  ;;  %v5089_v27 = vmul.f32 %v13700_v41, %v5021_v59  ;;  %vm5051_vm2 = vcmp.ge.f32.partialorder %v5019_v58, 0.0  ;;  %v5087_v62 = vmul.f32 %v13700_v41, %v5019_v58 }
 0x2fa   : > { %v5118_v37 = vsel %vm5050_vm15, %v5018_v47, %v5086_v0  ;;  %v5116_v1 = vsel %vm5048_vm0, %v5016_v54, %v5084_v32  ;;  %v6030_v53 = vsel %vm1343_vm6, %v6025_v35, %v6029_v49  ;;  %v6381_v60 = vrot.slane %v12106_v38, 1  ;;  %v12113_v54 = vld [vmem:[#allocation2 + $0x38] ss:$0 sps:$4 sm:$0x11]   ;;  %v12117_v49 = vld [vmem:[#allocation2 + $0x48] sm:$0xff]  }
 0x2fb   : > { %v10603_v42 = vpack.c.bf16 %v5118_v37, %v5118_v37  ;;  %v10601_v56 = vpack.c.bf16 %v5116_v1, %v5116_v1  ;;  %v5121_v18 = vsel %vm5053_vm1, %v5021_v59, %v5089_v27  ;;  %v5119_v50 = vsel %vm5051_vm2, %v5019_v58, %v5087_v62  ;;  %8835 = vmatprep.mubr.bf16.mxu1 %v6030_v53  ;;  %v12185_v0 = vld [vmem:[#allocation10 + $0x198] sm:$0xff]   ;;  %v12120_v27 = vld [vmem:[#allocation2 + $0x44] ss:$0 sps:$4 sm:$0x11]  }
 0x2fc   : > { %v10606_v23 = vpack.c.bf16 %v5121_v18, %v5121_v18  ;;  %v10604_v45 = vpack.c.bf16 %v5119_v50, %v5119_v50  ;;  %v6382_v8 = vsel %vm1744_vm10, %v6380_v7, %v6381_v60  ;;  %v4948_v40 = vadd.f32 %v13620_v46, %v13439_v51  ;;  %8836 = vmatmul.mubr.bf16.gmra.mrb[144].mxu1 %v12108_v2  ;;  %v12111_v46 = vld [vmem:[#allocation2 + $0x44] ss:$0 sps:$4 sm:$0x11]   ;;  %v12119_v32 = vld [vmem:[#allocation2 + $0x3c] sm:$0xfe]  }
 0x2fd   : > { %v5449_v44 = vshrl.u32 %v10603_v42, 16  ;;  %v5452_v16 = vshll.u32 %v10603_v42, 16  ;;  %v5432_v63 = vshrl.u32 %v10601_v56, 16  ;;  %v5435_v33 = vshll.u32 %v10601_v56, 16  ;;  %8989 = vmatmul.mubr.bf16.gmra.mrb[172].mxu0 %v6382_v8 }
 0x2fe   : > { %v5475_v11 = vshrl.u32 %v10606_v23, 16  ;;  %v5478_v25 = vshll.u32 %v10606_v23, 16  ;;  %v5458_v12 = vshrl.u32 %v10604_v45, 16  ;;  %v5461_v19 = vshll.u32 %v10604_v45, 16  ;;  %8996 = vmatprep.mubr.bf16.mxu0 %v12107_v9  ;;  %11424 = vmatpush3.bf16.msra.mxu0 %v12185_v0  ;;  %v12124_v9 = vld [vmem:[#allocation2 + $0x54] sm:$0xff]  }
 0x2ff   : > { %v5451_v31 = vrot.slane %v5449_v44, 7  ;;  %v5434_v30 = vrot.slane %v5432_v63, 7  ;;  %v4940_v51 = vadd.f32 %v13627_v24, %v13420_v3  ;;  %v4986_v5 = vmul.f32 %v13679_v57, %v4948_v40  ;;  %v12125_v8 = vld [vmem:[#allocation2 + $0x5c] ss:$0 sps:$4 sm:$0x11]  }
 0x300   : > { %v13766_v39 = vrot.slane %v5475_v11, 7  ;;  %v13768_v38 = vrot.slane %v5458_v12, 7  ;;  %v6034_v52 = vshll.u32 %v13759_v28, 16  ;;  %v6032_v3 = vshrl.u32 %v13759_v28, 16  ;;  %v12187_v40 = vld [vmem:[#allocation10 + $0x178] sm:$0xff]  }
 0x301   : > { %v5454_v48 = vor.u32 %v5452_v16, %v5451_v31  ;;  %v5456_v10 = vrot.slane %v5451_v31, 4  ;;  %v5437_v61 = vor.u32 %v5435_v33, %v5434_v30  ;;  %v5439_v47 = vrot.slane %v5434_v30, 4  ;;  %11319 = vmatprep.subr.bf16.mxu1 %v12187_v40  ;;  %v12192_v11 = vld [vmem:[#allocation10 + $0x138] sm:$0xff]   ;;  %v12131_v31 = vld [vmem:[#allocation2 + $0x60] sm:$0xff]  }
 0x302   : > { %v5480_v7 = vor.u32 %v5478_v25, %v13766_v39  ;;  %v5463_v20 = vor.u32 %v5461_v19, %v13768_v38  ;;  %v5022_v13 = vadd.f32 %v13690_v29, %v4986_v5  ;;  %v6036_v62 = vrot.slane %v6034_v52, 1  ;;  %11320 = vmatpush3.bf16.msra.mxu1 %v12192_v11 }
 0x303   : > { %v5455_v24 = vsel %vm12880_vm9, %v5447_v55, %v5454_v48  ;;  %v5635_v59 = vsel %vm12833_vm4, %v5456_v10, %v5634_v6  ;;  %v5438_v58 = vsel %vm12880_vm9, %v5430_v21, %v5437_v61  ;;  %v5628_v35 = vsel %vm12833_vm4, %v5439_v47, %v5627_v36  ;;  %v5641_v47 = vld [vmem:[#allocation2 + $0xbc] sm:$0x1] }
 0x304   : > { %5633 = vst [vmem:[#allocation2 + $0xac] sm:$0xf] %v5455_v24  ;;  %5636 = vst [vmem:[#allocation2 + $0xb0] sm:$0x1] %v5635_v59  ;;  %v5645_v34 = vsel %vm12873_vm8, %v5480_v7, %v5644_v43  ;;  %v5638_v55 = vsel %vm12873_vm8, %v5463_v20, %v5637_v17  ;;  %v4984_v21 = vmul.f32 %v13679_v57, %v4940_v51  ;;  %v6039_v37 = vshll.u32 %v12111_v46, 16  ;;  %v12116_v57 = vld [vmem:[#allocation2 + $0x3c] sm:$0xff]  }
 0x305   : > { %5626 = vst [vmem:[#allocation2 + $0xa0] sm:$0xf] %v5438_v58  ;;  %5629 = vst [vmem:[#allocation2 + $0xa4] sm:$0x1] %v5628_v35  ;;  %v6383_v1 = vrot.slane %v12112_v4, 1  ;;  %v6384_v53 = vrot.slane %v12113_v54, 1  ;;  %v5090_v60 = vmul.f32 %v13700_v41, %v5022_v13  ;;  %v6037_v42 = vor.u32 %v6036_v62, %v6032_v3 }
 0x306   : > { %5646 = vst [vmem:[#allocation2 + $0xc0] sm:$0xf] %v5645_v34  ;;  %5639 = vst [vmem:[#allocation2 + $0xb4] sm:$0xf] %v5638_v55  ;;  %vm5054_vm3 = vcmp.ge.f32.partialorder %v5022_v13, 0.0  ;;  %v5020_v2 = vadd.f32 %v13690_v29, %v4984_v21  ;;  %v6041_v56 = vrot.slane %v6039_v37, 1 }
 0x307   : > { %v6385_v18 = vsel %vm1744_vm10, %v6383_v1, %v6384_v53  ;;  %v6046_v50 = vshll.u32 %v12117_v49, 16  ;;  %v5122_v28 = vsel %vm5054_vm3, %v5022_v13, %v5090_v60  ;;  %v6051_v45 = vshll.u32 %v12118_v14, 16  ;;  %v5648_v43 = vld [vmem:[#allocation2 + $0xc8] sm:$0x1]  ;;  %v12126_v46 = vld [vmem:[#allocation2 + $0x48] sm:$0xfe]  }
 0x308   : > { %vm5052_vm8 = vcmp.ge.f32.partialorder %v5020_v2, 0.0  ;;  %v5088_v23 = vmul.f32 %v13700_v41, %v5020_v2  ;;  %8997 = vmatmul.mubr.bf16.gmra.mrb[176].mxu0 %v6385_v18  ;;  %v10607_v44 = vpack.c.bf16 %v5122_v28, %v5122_v28  ;;  %v6042_v16 = vsel %vm1343_vm6, %v6037_v42, %v6041_v56  ;;  %v12127_v4 = vld [vmem:[#allocation2 + $0x50] ss:$0 sps:$4 sm:$0x11]   ;;  %v12121_v7 = vld [vmem:[#allocation2 + $0x54] sm:$0xff]   ;;  %v12129_v42 = vld [vmem:[#allocation2 + $0x60] sm:$0xff]  }
 0x309   : > { %9004 = vmatprep.mubr.bf16.mxu0 %v12115_v15  ;;  %v6044_v29 = vshrl.u32 %v12117_v49, 16  ;;  %v6048_v63 = vrot.slane %v6046_v50, 1  ;;  %8843 = vmatprep.mubr.bf16.mxu1 %v6042_v16  ;;  %v6386_v6 = vrot.slane %v12119_v32, 1  ;;  %v6387_v36 = vrot.slane %v12120_v27, 1  ;;  %v12122_v32 = vld [vmem:[#allocation2 + $0x48] sm:$0xff]   ;;  %v12130_v28 = vld [vmem:[#allocation2 + $0x54] sm:$0xff]  }
 0x30a   : > { %v5120_v33 = vsel %vm5052_vm8, %v5020_v2, %v5088_v23  ;;  %v5483_v25 = vshrl.u32 %v10607_v44, 16  ;;  %8844 = vmatmul.mubr.bf16.gmra.mrb[148].mxu1 %v12116_v57  ;;  %v6053_v19 = vrot.slane %v6051_v45, 1  ;;  %v5481_v30 = vrot.slane %v13766_v39, 4  ;;  %v12132_v58 = vld [vmem:[#allocation2 + $0x68] ss:$0 sps:$4 sm:$0x11]  }
 0x30b   : > { %v10605_v12 = vpack.c.bf16 %v5120_v33, %v5120_v33  ;;  %v6049_v41 = vor.u32 %v6048_v63, %v6044_v29  ;;  %v6058_v17 = vshll.u32 %v12124_v9, 16  ;;  %v6063_v51 = vshll.u32 %v12125_v8, 16  ;;  %v12140_v60 = vld [vmem:[#allocation2 + $0x6c] sm:$0xff]   ;;  %v12134_v56 = vld [vmem:[#allocation2 + $0x5c] ss:$0 sps:$4 sm:$0x11]  }
 0x30c   : > { %v5485_v5 = vrot.slane %v5483_v25, 7  ;;  %v5486_v52 = vshll.u32 %v10607_v44, 16  ;;  %v6388_v54 = vsel %vm1744_vm10, %v6386_v6, %v6387_v36  ;;  %v6056_v20 = vshrl.u32 %v12124_v9, 16  ;;  %v12193_v9 = vld [vmem:[#allocation10 + $0x1e0] sm:$0xff]   ;;  %v12147_v16 = vld [vmem:[#allocation2 + $0x78] sm:$0xff]   ;;  %v12196_v36 = vld [vmem:[#allocation10 + $0x1e8] sm:$0xff]  }
 0x30d   : > { %v5466_v48 = vshrl.u32 %v10605_v12, 16  ;;  %v6054_v10 = vsel %vm1343_vm6, %v6049_v41, %v6053_v19  ;;  %v5469_v61 = vshll.u32 %v10605_v12, 16  ;;  %v6060_v3 = vrot.slane %v6058_v17, 1  ;;  %11425 = vmatprep.subr.bf16.mxu0 %v12193_v9  ;;  %v12195_v33 = vld [vmem:[#allocation10 + $0x1a0] sm:$0xff]   ;;  %v12135_v25 = vld [vmem:[#allocation2 + $0x6c] sm:$0xff]  }
 0x30e   : > { %8851 = vmatprep.mubr.bf16.mxu1 %v6054_v10  ;;  %v5488_v39 = vor.u32 %v5486_v52, %v5485_v5  ;;  %v5490_v24 = vrot.slane %v5485_v5, 4  ;;  %v6070_v35 = vshll.u32 %v12131_v31, 16  ;;  %v5464_v49 = vrot.slane %v13768_v38, 4  ;;  %v12142_v6 = vld [vmem:[#allocation2 + $0x60] sm:$0xfe]   ;;  %11426 = vmatpush3.bf16.msra.mxu0 %v12195_v33  ;;  %v12145_v10 = vld [vmem:[#allocation2 + $0x78] sm:$0xff]  }
 0x30f   : > { %v5468_v59 = vrot.slane %v5466_v48, 7  ;;  %v6061_v14 = vor.u32 %v6060_v3, %v6056_v20  ;;  %v6065_v0 = vrot.slane %v6063_v51, 1  ;;  %v6389_v27 = vrot.slane %v12126_v46, 1  ;;  %v12143_v41 = vld [vmem:[#allocation2 + $0x68] ss:$0 sps:$4 sm:$0x11]   ;;  %11427 = vmatprep.subr.bf16.mxu0 %v12196_v36 }
 0x310   : > { %9005 = vmatmul.mubr.bf16.gmra.mrb[180].mxu0 %v6388_v54  ;;  %v5489_v34 = vsel %vm12880_vm9, %v5481_v30, %v5488_v39  ;;  %v5649_v55 = vsel %vm12833_vm4, %v5490_v24, %v5648_v43  ;;  %v6390_v62 = vrot.slane %v12127_v4, 1  ;;  %v6072_v53 = vrot.slane %v6070_v35, 1  ;;  %v12148_v30 = vld [vmem:[#allocation2 + $0x80] ss:$0 sps:$4 sm:$0x11]   ;;  %v12156_v51 = vld [vmem:[#allocation2 + $0x84] sm:$0xff]  }
 0x311   : > { %v5471_v13 = vor.u32 %v5469_v61, %v5468_v59  ;;  %v5473_v21 = vrot.slane %v5468_v59, 4  ;;  %9012 = vmatprep.mubr.bf16.mxu0 %v12121_v7  ;;  %5647 = vst [vmem:[#allocation2 + $0xc4] sm:$0xf] %v5489_v34  ;;  %5650 = vst [vmem:[#allocation2 + $0xc8] sm:$0x1] %v5649_v55  ;;  %v6066_v1 = vsel %vm1343_vm6, %v6061_v14, %v6065_v0  ;;  %v6068_v2 = vshrl.u32 %v12131_v31, 16 }
 0x312   : > { %8852 = vmatmul.mubr.bf16.gmra.mrb[152].mxu1 %v12122_v32  ;;  %v6075_v15 = vshll.u32 %v12132_v58, 16  ;;  %v6391_v18 = vsel %vm1744_vm10, %v6389_v27, %v6390_v62  ;;  %v6082_v50 = vshll.u32 %v12140_v60, 16  ;;  %v6392_v8 = vrot.slane %v12133_v22, 1  ;;  %v12197_v31 = vld [vmem:[#allocation10 + $0x1a8] sm:$0xff]   ;;  %v12138_v43 = vld [vmem:[#allocation2 + $0x60] sm:$0xff]   ;;  %v12203_v48 = vld [vmem:[#allocation10 + $0x1f0] sm:$0xff]  }
 0x313   : > { %v5472_v38 = vsel %vm12880_vm9, %v5464_v49, %v5471_v13  ;;  %v5642_v37 = vsel %vm12833_vm4, %v5473_v21, %v5641_v47  ;;  %8859 = vmatprep.mubr.bf16.mxu1 %v6066_v1  ;;  %v6073_v57 = vor.u32 %v6072_v53, %v6068_v2  ;;  %v6393_v40 = vrot.slane %v12134_v56, 1  ;;  %11428 = vmatpush3.bf16.msra.mxu0 %v12197_v31  ;;  %v12149_v54 = vld [vmem:[#allocation2 + $0x6c] sm:$0xfe]   ;;  %v12150_v39 = vld [vmem:[#allocation2 + $0x74] ss:$0 sps:$4 sm:$0x11]  }
 0x314   : > { %5640 = vst [vmem:[#allocation2 + $0xb8] sm:$0xf] %v5472_v38  ;;  %5643 = vst [vmem:[#allocation2 + $0xbc] sm:$0x1] %v5642_v37  ;;  %v6077_v23 = vrot.slane %v6075_v15, 1  ;;  %v6084_v44 = vrot.slane %v6082_v50, 1  ;;  %11429 = vmatprep.subr.bf16.mxu0 %v12203_v48 }
 0x315   : > { %v6080_v29 = vshrl.u32 %v12140_v60, 16  ;;  %v6087_v63 = vshll.u32 %v12141_v26, 16  ;;  %v6394_v11 = vsel %vm1744_vm10, %v6392_v8, %v6393_v40  ;;  %v6094_v19 = vshll.u32 %v12147_v16, 16  ;;  %v12204_v7 = vld [vmem:[#allocation10 + $0x1b0] sm:$0xff]   ;;  %v12207_v0 = vld [vmem:[#allocation10 + $0x1f8] sm:$0xff]   ;;  %v13817_v38 = vld [vmem:[#allocation10 + $0x200] sm:$0xff]  }
 0x316   : > { %v6078_v45 = vsel %vm1343_vm6, %v6073_v57, %v6077_v23  ;;  %v6395_v4 = vrot.slane %v12142_v6, 1  ;;  %v6396_v5 = vrot.slane %v12143_v41, 1  ;;  %v6092_v61 = vshrl.u32 %v12147_v16, 16  ;;  %v12157_v59 = vld [vmem:[#allocation2 + $0x8c] ss:$0 sps:$4 sm:$0x11]   ;;  %11601 = vmatprep.subr.bf16.mxu1 %v13817_v38 }
 0x317   : > { %v6085_v12 = vor.u32 %v6084_v44, %v6080_v29  ;;  %v6089_v17 = vrot.slane %v6087_v63, 1  ;;  %v6096_v52 = vrot.slane %v6094_v19, 1  ;;  %v6099_v47 = vshll.u32 %v12148_v30, 16  ;;  %v12146_v58 = vld [vmem:[#allocation2 + $0x6c] sm:$0xff]   ;;  %11430 = vmatpush3.bf16.msra.mxu0 %v12204_v7  ;;  %v12208_v34 = vld [vmem:[#allocation10 + $0x1b8] sm:$0xff]   ;;  %v12151_v37 = vld [vmem:[#allocation2 + $0x84] sm:$0xff]  }
 0x318   : > { %9013 = vmatmul.mubr.bf16.gmra.mrb[184].mxu0 %v6391_v18  ;;  %v6397_v20 = vsel %vm1744_vm10, %v6395_v4, %v6396_v5  ;;  %v6106_v24 = vshll.u32 %v12156_v51, 16  ;;  %v6398_v49 = vrot.slane %v12149_v54, 1  ;;  %v12163_v14 = vld [vmem:[#allocation2 + $0x90] sm:$0xff]   ;;  %v6399_v13 = vrot.slane %v12150_v39, 1  ;;  %v12158_v27 = vld [vmem:[#allocation2 + $0x78] sm:$0xfe]   ;;  %11431 = vmatprep.subr.bf16.mxu0 %v12207_v0 }
 0x319   : > { %9020 = vmatprep.mubr.bf16.mxu0 %v12129_v42  ;;  %v6090_v46 = vsel %vm1343_vm6, %v6085_v12, %v6089_v17  ;;  %v6097_v3 = vor.u32 %v6096_v52, %v6092_v61  ;;  %v6101_v35 = vrot.slane %v6099_v47, 1  ;;  %v6104_v32 = vshrl.u32 %v12156_v51, 16  ;;  %v12159_v1 = vld [vmem:[#allocation2 + $0x80] ss:$0 sps:$4 sm:$0x11]   ;;  %v12154_v42 = vld [vmem:[#allocation2 + $0x78] sm:$0xff]  }
 0x31a   : > { %8860 = vmatmul.mubr.bf16.gmra.mrb[156].mxu1 %v12130_v28  ;;  %v6108_v21 = vrot.slane %v6106_v24, 1  ;;  %v6111_v62 = vshll.u32 %v12157_v59, 16  ;;  %v6400_v53 = vsel %vm1744_vm10, %v6398_v49, %v6399_v13  ;;  %v12164_v2 = vld [vmem:[#allocation2 + $0x98] ss:$0 sps:$4 sm:$0x11]   ;;  %v6118_v15 = vshll.u32 %v12163_v14, 16 }
 0x31b   : > { %8867 = vmatprep.mubr.bf16.mxu1 %v6078_v45  ;;  %v6102_v55 = vsel %vm1343_vm6, %v6097_v3, %v6101_v35  ;;  %11432 = vmatpush3.bf16.msra.mxu0 %v12208_v34  ;;  %v6401_v18 = vrot.slane %v12158_v27, 1  ;;  %v12172_v57 = vld [vmem:[#allocation2 + $0x9c] sm:$0xff]   ;;  %v6402_v50 = vrot.slane %v12159_v1, 1  ;;  %v12165_v26 = vld [vmem:[#allocation2 + $0x84] sm:$0xfe]   ;;  %v6116_v28 = vshrl.u32 %v12163_v14, 16 }
 0x31c   : > { %v6109_v60 = vor.u32 %v6108_v21, %v6104_v32  ;;  %v6113_v56 = vrot.slane %v6111_v62, 1  ;;  %v6120_v9 = vrot.slane %v6118_v15, 1  ;;  %v6123_v23 = vshll.u32 %v12164_v2, 16  ;;  %v12166_v45 = vld [vmem:[#allocation2 + $0x8c] ss:$0 sps:$4 sm:$0x11]  }
 0x31d   : > { %v6130_v8 = vshll.u32 %v12172_v57, 16  ;;  %v6403_v40 = vsel %vm1744_vm10, %v6401_v18, %v6402_v50  ;;  %v12161_v44 = vld [vmem:[#allocation2 + $0x90] sm:$0xff]   ;;  %v12173_v29 = vld [vmem:[#allocation2 + $0xa4] ss:$0 sps:$4 sm:$0x11]   ;;  %v6404_v6 = vrot.slane %v12165_v26, 1 }
 0x31e   : > { %v6114_v22 = vsel %vm1343_vm6, %v6109_v60, %v6113_v56  ;;  %v6121_v16 = vor.u32 %v6120_v9, %v6116_v28  ;;  %v12162_v63 = vld [vmem:[#allocation2 + $0x84] sm:$0xff]   ;;  %v6125_v33 = vrot.slane %v6123_v23, 1  ;;  %v6405_v36 = vrot.slane %v12166_v45, 1  ;;  %v12174_v41 = vld [vmem:[#allocation2 + $0x90] sm:$0xfe]   ;;  %v12167_v17 = vld [vmem:[#allocation2 + $0x9c] sm:$0xff]  }
 0x31f   : > { %v6128_v19 = vshrl.u32 %v12172_v57, 16  ;;  %v6135_v31 = vshll.u32 %v12173_v29, 16  ;;  %v12175_v30 = vld [vmem:[#allocation2 + $0x98] ss:$0 sps:$4 sm:$0x11]   ;;  %v12170_v5 = vld [vmem:[#allocation2 + $0x90] sm:$0xff]  }
 0x320   : > { %9021 = vmatmul.mubr.bf16.gmra.mrb[188].mxu0 %v6394_v11  ;;  %v6132_v11 = vrot.slane %v6130_v8, 1  ;;  %v6126_v12 = vsel %vm1343_vm6, %v6121_v16, %v6125_v33  ;;  %v12180_v4 = vld [vmem:[#allocation2 + $0xb0] ss:$0 sps:$4 sm:$0x11]   ;;  %v6407_v48 = vrot.slane %v12174_v41, 1  ;;  %v6408_v47 = vrot.slane %v12175_v30, 1 }
 0x321   : > { %9028 = vmatprep.mubr.bf16.mxu0 %v12135_v25  ;;  %v12179_v25 = vld [vmem:[#allocation2 + $0xa8] sm:$0xff]   ;;  %v6137_v52 = vrot.slane %v6135_v31, 1  ;;  %v12181_v7 = vld [vmem:[#allocation2 + $0x9c] sm:$0xfe]   ;;  %v6147_v3 = vshll.u32 %v12180_v4, 16 }
 0x322   : > { %8868 = vmatmul.mubr.bf16.gmra.mrb[160].mxu1 %v12138_v43  ;;  %v6406_v43 = vsel %vm1744_vm10, %v6404_v6, %v6405_v36  ;;  %v6133_v51 = vor.u32 %v6132_v11, %v6128_v19  ;;  %v12177_v39 = vld [vmem:[#allocation2 + $0xa8] sm:$0xff]   ;;  %v12182_v24 = vld [vmem:[#allocation2 + $0xa4] ss:$0 sps:$4 sm:$0x11]   ;;  %v6409_v59 = vsel %vm1744_vm10, %v6407_v48, %v6408_v47  ;;  %v12178_v14 = vld [vmem:[#allocation2 + $0x9c] sm:$0xff]   ;;  %v6410_v34 = vrot.slane %v12181_v7, 1 }
 0x323   : > { %8875 = vmatprep.mubr.bf16.mxu1 %v6090_v46  ;;  %v6142_v46 = vshll.u32 %v12179_v25, 16  ;;  %v12189_v35 = vld [vmem:[#allocation2 + $0xbc] ss:$0 sps:$4 sm:$0x11]   ;;  %v6149_v0 = vrot.slane %v6147_v3, 1  ;;  %v12186_v60 = vld [vmem:[#allocation2 + $0xa8] sm:$0xff]  }
 0x324   : > { %v6138_v61 = vsel %vm1343_vm6, %v6133_v51, %v6137_v52  ;;  %v12190_v13 = vld [vmem:[#allocation2 + $0xa8] sm:$0xfe]   ;;  %v6159_v27 = vshll.u32 %v12189_v35, 16  ;;  %v12205_v56 = vld [vmem:[#allocation2 + $0x18] sm:$0xff]  }
 0x325   : > { %v6144_v54 = vrot.slane %v6142_v46, 1  ;;  %v12199_v18 = vld [vmem:[#allocation2 + $0xb4] sm:$0xfe]   ;;  %v12200_v57 = vld [vmem:[#allocation2 + $0xbc] ss:$0 sps:$4 sm:$0x11]  }
 0x326   : > { %v6161_v15 = vrot.slane %v6159_v27, 1  ;;  %v12201_v50 = vld [vmem:[#allocation2 + $0xc] sm:$0xfe]   ;;  %v12202_v9 = vld [vmem:[#allocation2 + $0x14] ss:$0 sps:$4 sm:$0x11]  }
 0x327   : > { %v12206_v28 = vld [vmem:[#allocation2 + $0x20] ss:$0 sps:$4 sm:$0x11]   ;;  %v7574_v45 = vshll.u32 %v12205_v56, 16  ;;  %v7572_v16 = vshrl.u32 %v12205_v56, 16  ;;  %v12198_v6 = vld [vmem:[#allocation2 + $0xb4] sm:$0xff]  }
 0x328   : > { %9029 = vmatmul.mubr.bf16.gmra.mrb[192].mxu0 %v6397_v20  ;;  %v6140_v20 = vshrl.u32 %v12179_v25, 16  ;;  %v12210_v8 = vld [vmem:[#allocation2 + $0x14] ss:$0 sps:$4 sm:$0x11]   ;;  %v7171_v36 = vrot.slane %v12201_v50, 1  ;;  %v7172_v11 = vrot.slane %v12202_v9, 1 }
 0x329   : > { %9036 = vmatprep.mubr.bf16.mxu0 %v12145_v10  ;;  %v12188_v10 = vld [vmem:[#allocation2 + $0xb4] sm:$0xff]   ;;  %v7576_v25 = vrot.slane %v7574_v45, 1  ;;  %v12215_v41 = vld [vmem:[#allocation2 + $0x24] sm:$0xff]   ;;  %v6779_v19 = vshll.u32 %v12210_v8, 16  ;;  %v12230_v45 = vld [vmem:[#allocation2 + $0x3c] sm:$0xff]  }
 0x32a   : > { %8876 = vmatmul.mubr.bf16.gmra.mrb[164].mxu1 %v12146_v58  ;;  %v6145_v58 = vor.u32 %v6144_v54, %v6140_v20  ;;  %v6154_v49 = vshll.u32 %v12188_v10, 16  ;;  %v6152_v62 = vshrl.u32 %v12188_v10, 16  ;;  %v12213_v31 = vld [vmem:[#allocation2 + $0x20] ss:$0 sps:$4 sm:$0x11]   ;;  %v12217_v30 = vld [vmem:[#allocation2 + $0x18] sm:$0xff]   ;;  %v7173_v46 = vsel %vm1744_vm10, %v7171_v36, %v7172_v11 }
 0x32b   : > { %8883 = vmatprep.mubr.bf16.mxu1 %v6102_v55  ;;  %v6411_v55 = vrot.slane %v12182_v24, 1  ;;  %v12216_v51 = vld [vmem:[#allocation2 + $0x2c] ss:$0 sps:$4 sm:$0x11]   ;;  %v7577_v52 = vor.u32 %v7576_v25, %v7572_v16  ;;  %v6781_v10 = vrot.slane %v6779_v19, 1  ;;  %v7175_v3 = vrot.slane %v12213_v31, 1 }
 0x32c   : > { %v6150_v21 = vsel %vm1343_vm6, %v6145_v58, %v6149_v0  ;;  %v6156_v32 = vrot.slane %v6154_v49, 1  ;;  %v12218_v54 = vld [vmem:[#allocation2 + $0x20] ss:$0 sps:$4 sm:$0x11]   ;;  %v7584_v24 = vshrl.u32 %v12215_v41, 16  ;;  %v7591_v58 = vshll.u32 %v12216_v51, 16 }
 0x32d   : > { %v6412_v1 = vsel %vm1744_vm10, %v6410_v34, %v6411_v55  ;;  %v6784_v35 = vshrl.u32 %v12217_v30, 16  ;;  %v12219_v0 = vld [vmem:[#allocation2 + $0x24] sm:$0xfe]   ;;  %v12220_v34 = vld [vmem:[#allocation2 + $0x2c] ss:$0 sps:$4 sm:$0x11]  }
 0x32e   : > { %v6157_v2 = vor.u32 %v6156_v32, %v6152_v62  ;;  %v12224_v55 = vld [vmem:[#allocation2 + $0x24] sm:$0xff]   ;;  %v12233_v36 = vld [vmem:[#allocation2 + $0x38] ss:$0 sps:$4 sm:$0x11]  }
 0x32f   : > { %v12226_v32 = vld [vmem:[#allocation10 + $0x208] sm:$0xff]   ;;  %v6798_v9 = vshll.u32 %v12224_v55, 16  ;;  %v6796_v25 = vshrl.u32 %v12224_v55, 16 }
 0x330   : > { %9037 = vmatmul.mubr.bf16.gmra.mrb[196].mxu0 %v6400_v53  ;;  %v12183_v53 = vld [vmem:[#allocation2 + $0xb4] sm:$0xff]   ;;  %v6162_v23 = vsel %vm1343_vm6, %v6157_v2, %v6161_v15  ;;  %v7593_v2 = vrot.slane %v7591_v58, 1  ;;  %v12240_v58 = vld [vmem:[#allocation2 + $0x44] ss:$0 sps:$4 sm:$0x11]  }
 0x331   : > { %9044 = vmatprep.mubr.bf16.mxu0 %v12151_v37  ;;  %v12191_v37 = vld [vmem:[#allocation2 + $0xb0] ss:$0 sps:$4 sm:$0x11]  }
 0x332   : > { %8884 = vmatmul.mubr.bf16.gmra.mrb[168].mxu1 %v12154_v42  ;;  %v6413_v42 = vrot.slane %v12190_v13, 1  ;;  %v6414_v26 = vrot.slane %v12191_v37, 1  ;;  %v6791_v13 = vshll.u32 %v12218_v54, 16  ;;  %v12225_v37 = vld [vmem:[#allocation2 + $0x2c] ss:$0 sps:$4 sm:$0x11]  }
 0x333   : > { %8891 = vmatprep.mubr.bf16.mxu1 %v6114_v22  ;;  %v12209_v22 = vld [vmem:[#allocation2 + $0xc] sm:$0xff]  }
 0x334   : > { %v6415_v29 = vsel %vm1744_vm10, %v6413_v42, %v6414_v26  ;;  %v6774_v33 = vshll.u32 %v12209_v22, 16  ;;  %v6772_v4 = vshrl.u32 %v12209_v22, 16  ;;  %v6793_v42 = vrot.slane %v6791_v13, 1  ;;  %v12238_v54 = vld [vmem:[#allocation2 + $0x50] ss:$0 sps:$4 sm:$0x11]  }
 0x335   : > { %v7178_v22 = vrot.slane %v12220_v34, 1 }
 0x338   : > { %9045 = vmatmul.mubr.bf16.gmra.mrb[200].mxu0 %v6403_v40  ;;  %v12194_v40 = vld [vmem:[#allocation2 + $0xc0] sm:$0xff]  }
 0x339   : > { %9052 = vmatprep.mubr.bf16.mxu0 %v12161_v44  ;;  %v6416_v44 = vrot.slane %v12199_v18, 1  ;;  %v12241_v18 = vld [vmem:[#allocation10 + $0x210] sm:$0xff]  }
 0x33a   : > { %8892 = vmatmul.mubr.bf16.gmra.mrb[172].mxu1 %v12162_v63  ;;  %v6417_v63 = vrot.slane %v12200_v57, 1  ;;  %v7177_v57 = vrot.slane %v12219_v0, 1  ;;  %v12229_v0 = vld [vmem:[#allocation2 + $0x30] sm:$0xff]  }
 0x33b   : > { %8899 = vmatprep.mubr.bf16.mxu1 %v6126_v12  ;;  %v7579_v12 = vshll.u32 %v12206_v28, 16  ;;  %v6803_v28 = vshll.u32 %v12225_v37, 16  ;;  %v7627_v37 = vshll.u32 %v12238_v54, 16 }
 0x33c   : > { %v6418_v7 = vsel %vm1744_vm10, %v6416_v44, %v6417_v63  ;;  %v12256_v44 = vld [vmem:[#allocation10 + $0x218] sm:$0xff]   ;;  %v12232_v63 = vld [vmem:[#allocation2 + $0x30] sm:$0xff]  }
 0x33d   : > { %v7581_v48 = vrot.slane %v7579_v12, 1  ;;  %v12221_v12 = vld [vmem:[#allocation2 + $0x24] sm:$0xff]   ;;  %v6805_v19 = vrot.slane %v6803_v28, 1  ;;  %v7629_v28 = vrot.slane %v7627_v37, 1  ;;  %v12260_v37 = vld [vmem:[#allocation2 + $0x6c] sm:$0xff]  }
 0x33f   : > { %v7582_v49 = vsel %vm1343_vm6, %v7577_v52, %v7581_v48  ;;  %v12237_v52 = vld [vmem:[#allocation2 + $0x48] sm:$0xff]  }
 0x340   : > { %9053 = vmatmul.mubr.bf16.gmra.mrb[204].mxu0 %v6406_v43  ;;  %v12212_v43 = vld [vmem:[#allocation2 + $0x18] sm:$0xfe]   ;;  %v7620_v13 = vshrl.u32 %v12237_v52, 16 }
 0x341   : > { %9060 = vmatprep.mubr.bf16.mxu0 %v12167_v17  ;;  %v6776_v17 = vrot.slane %v6774_v33, 1  ;;  %v7174_v47 = vrot.slane %v12212_v43, 1  ;;  %v7179_v33 = vsel %vm1744_vm10, %v7177_v57, %v7178_v22  ;;  %v12271_v43 = vld [vmem:[#allocation10 + $0x220] sm:$0xff]  }
 0x342   : > { %8900 = vmatmul.mubr.bf16.gmra.mrb[176].mxu1 %v12170_v5  ;;  %v7586_v5 = vshll.u32 %v12215_v41, 16 }
 0x343   : > { %8907 = vmatprep.mubr.bf16.mxu1 %v6138_v61  ;;  %v6786_v61 = vshll.u32 %v12217_v30, 16  ;;  %v6777_v20 = vor.u32 %v6776_v17, %v6772_v4 }
 0x345   : > { %v6782_v27 = vsel %vm1343_vm6, %v6777_v20, %v6781_v10  ;;  %v6815_v10 = vshll.u32 %v12233_v36, 16 }
 0x348   : > { %9061 = vmatmul.mubr.bf16.gmra.mrb[208].mxu0 %v6409_v59  ;;  %v7588_v59 = vrot.slane %v7586_v5, 1  ;;  %v12234_v5 = vld [vmem:[#allocation2 + $0x3c] sm:$0xfe]  }
 0x349   : > { %9068 = vmatprep.mubr.bf16.mxu0 %v12177_v39  ;;  %v12222_v39 = vld [vmem:[#allocation2 + $0x30] sm:$0xff]   ;;  %v7183_v34 = vrot.slane %v12234_v5, 1 }
 0x34a   : > { %8908 = vmatmul.mubr.bf16.gmra.mrb[180].mxu1 %v12178_v14  ;;  %v6788_v14 = vrot.slane %v6786_v61, 1  ;;  %v7598_v62 = vshll.u32 %v12222_v39, 16  ;;  %v7596_v56 = vshrl.u32 %v12222_v39, 16  ;;  %v12235_v61 = vld [vmem:[#allocation2 + $0x44] ss:$0 sps:$4 sm:$0x11]  }
 0x34b   : > { %8915 = vmatprep.mubr.bf16.mxu1 %v6150_v21  ;;  %v12223_v21 = vld [vmem:[#allocation2 + $0x38] ss:$0 sps:$4 sm:$0x11]   ;;  %v7184_v55 = vrot.slane %v12235_v61, 1 }
 0x34c   : > { %v6789_v15 = vor.u32 %v6788_v14, %v6784_v35  ;;  %v7600_v50 = vrot.slane %v7598_v62, 1  ;;  %v7603_v26 = vshll.u32 %v12223_v21, 16  ;;  %v6817_v14 = vrot.slane %v6815_v10, 1 }
 0x34d   : > { %v7185_v22 = vsel %vm1744_vm10, %v7183_v34, %v7184_v55 }
 0x34e   : > { %v6794_v16 = vsel %vm1343_vm6, %v6789_v15, %v6793_v42  ;;  %v7601_v11 = vor.u32 %v7600_v50, %v7596_v56  ;;  %v7605_v41 = vrot.slane %v7603_v26, 1  ;;  %v12246_v15 = vld [vmem:[#allocation2 + $0x5c] ss:$0 sps:$4 sm:$0x11]   ;;  %v12242_v42 = vld [vmem:[#allocation2 + $0x48] sm:$0xfe]  }
 0x34f   : > { %v12248_v50 = vld [vmem:[#allocation2 + $0x50] ss:$0 sps:$4 sm:$0x11]  }
 0x350   : > { %9069 = vmatmul.mubr.bf16.gmra.mrb[212].mxu0 %v6412_v1  ;;  %v7176_v1 = vsel %vm1744_vm10, %v7174_v47, %v7175_v3  ;;  %v7606_v48 = vsel %vm1343_vm6, %v7601_v11, %v7605_v41  ;;  %v7608_v47 = vshrl.u32 %v12230_v45, 16  ;;  %v6808_v3 = vshrl.u32 %v12232_v63, 16  ;;  %v12249_v41 = vld [vmem:[#allocation2 + $0x54] sm:$0xfe]  }
 0x351   : > { %9076 = vmatprep.mubr.bf16.mxu0 %v12183_v53  ;;  %v12214_v53 = vld [vmem:[#allocation2 + $0x18] sm:$0xff]   ;;  %v6839_v11 = vshll.u32 %v12248_v50, 16 }
 0x352   : > { %8916 = vmatmul.mubr.bf16.gmra.mrb[184].mxu1 %v12186_v60  ;;  %v7589_v60 = vor.u32 %v7588_v59, %v7584_v24  ;;  %v7622_v59 = vshll.u32 %v12237_v52, 16 }
 0x353   : > { %8923 = vmatprep.mubr.bf16.mxu1 %v6162_v23  ;;  %v12228_v23 = vld [vmem:[#allocation2 + $0x38] ss:$0 sps:$4 sm:$0x11]  }
 0x354   : > { %v7594_v8 = vsel %vm1343_vm6, %v7589_v60, %v7593_v2  ;;  %v7181_v30 = vrot.slane %v12228_v23, 1  ;;  %v7624_v62 = vrot.slane %v7622_v59, 1  ;;  %v6827_v2 = vshll.u32 %v12240_v58, 16  ;;  %v12244_v59 = vld [vmem:[#allocation2 + $0x48] sm:$0xff]  }
 0x355   : > { %v7189_v58 = vrot.slane %v12249_v41, 1  ;;  %v12268_v41 = vld [vmem:[#allocation2 + $0x80] ss:$0 sps:$4 sm:$0x11]  }
 0x356   : > { %v7625_v26 = vor.u32 %v7624_v62, %v7620_v13  ;;  %v12257_v62 = vld [vmem:[#allocation2 + $0x60] sm:$0xfe]  }
 0x358   : > { %9077 = vmatmul.mubr.bf16.gmra.mrb[216].mxu0 %v6415_v29  ;;  %v6800_v29 = vrot.slane %v6798_v9, 1 }
 0x359   : > { %9084 = vmatprep.mubr.bf16.mxu0 %v12194_v40  ;;  %v12227_v40 = vld [vmem:[#allocation2 + $0x30] sm:$0xfe]  }
 0x35a   : > { %8924 = vmatmul.mubr.bf16.gmra.mrb[188].mxu1 %v12198_v6  ;;  %v7610_v6 = vshll.u32 %v12230_v45, 16  ;;  %v7180_v31 = vrot.slane %v12227_v40, 1  ;;  %v6801_v17 = vor.u32 %v6800_v29, %v6796_v25  ;;  %v12236_v45 = vld [vmem:[#allocation2 + $0x3c] sm:$0xff]   ;;  %v7186_v40 = vrot.slane %v12242_v42, 1 }
 0x35b   : > { %9125 = vmatprep.mubr.bf16.mxu1 %v7173_v46  ;;  %v6810_v46 = vshll.u32 %v12232_v63, 16  ;;  %v7639_v63 = vshll.u32 %v12246_v15, 16  ;;  %v12252_v25 = vld [vmem:[#allocation2 + $0x60] sm:$0xff]  }
 0x35c   : > { %v7612_v4 = vrot.slane %v7610_v6, 1  ;;  %v6806_v20 = vsel %vm1343_vm6, %v6801_v17, %v6805_v19  ;;  %v7182_v24 = vsel %vm1744_vm10, %v7180_v31, %v7181_v30  ;;  %v12250_v19 = vld [vmem:[#allocation2 + $0x5c] ss:$0 sps:$4 sm:$0x11]   ;;  %v12254_v31 = vld [vmem:[#allocation2 + $0x54] sm:$0xff]   ;;  %v7646_v52 = vshll.u32 %v12252_v25, 16 }
 0x35d   : > { %v6812_v39 = vrot.slane %v6810_v46, 1  ;;  %v12253_v30 = vld [vmem:[#allocation2 + $0x68] ss:$0 sps:$4 sm:$0x11]   ;;  %v7641_v61 = vrot.slane %v7639_v63, 1  ;;  %v6844_v42 = vshrl.u32 %v12254_v31, 16 }
 0x35e   : > { %v7613_v35 = vor.u32 %v7612_v4, %v7608_v47  ;;  %v6846_v47 = vshll.u32 %v12254_v31, 16  ;;  %v7648_v34 = vrot.slane %v7646_v52, 1  ;;  %v7651_v55 = vshll.u32 %v12253_v30, 16 }
 0x360   : > { %9085 = vmatmul.mubr.bf16.gmra.mrb[220].mxu0 %v6418_v7  ;;  %v12239_v7 = vld [vmem:[#allocation2 + $0x3c] sm:$0xff]  }
 0x361   : > { %9286 = vmatprep.mubr.bf16.mxu0 %v7582_v49  ;;  %v6822_v21 = vshll.u32 %v12239_v7, 16  ;;  %v6820_v23 = vshrl.u32 %v12239_v7, 16 }
 0x362   : > { %9126 = vmatmul.mubr.bf16.vlgmr.msra.gmra.mrb[192].mxu1 %v6782_v27  ;;  %v6813_v27 = vor.u32 %v6812_v39, %v6808_v3  ;;  %v6841_v3 = vrot.slane %v6839_v11, 1 }
 0x363   : > { %9133 = vmatprep.mubr.bf16.mxu1 %v7176_v1  ;;  %11602 = vmatpush3.bf16.msra.mxu1 %v13817_v38  ;;  %v12231_v38 = vld [vmem:[#allocation2 + $0x44] ss:$0 sps:$4 sm:$0x11]   ;;  %v12243_v1 = vld [vmem:[#allocation2 + $0x50] ss:$0 sps:$4 sm:$0x11]  }
 0x364   : > { %11603 = vmatprep.subr.bf16.mxu1 %v12226_v32  ;;  %v7615_v51 = vshll.u32 %v12231_v38, 16  ;;  %v6818_v56 = vsel %vm1343_vm6, %v6813_v27, %v6817_v14  ;;  %v7187_v38 = vrot.slane %v12243_v1, 1  ;;  %v6848_v27 = vrot.slane %v6846_v47, 1 }
 0x366   : > { %v7617_v49 = vrot.slane %v7615_v51, 1  ;;  %v7188_v5 = vsel %vm1744_vm10, %v7186_v40, %v7187_v38  ;;  %v7656_v38 = vshrl.u32 %v12260_v37, 16 }
 0x367   : > { %11604 = vmatpush3.bf16.msra.mxu1 %v12226_v32  ;;  %v12245_v32 = vld [vmem:[#allocation2 + $0x54] sm:$0xff]  }
 0x368   : > { %9287 = vmatmul.mubr.bf16.vlgmr.msra.gmra.mrb[224].mxu0 %v12214_v53  ;;  %11605 = vmatprep.subr.bf16.mxu1 %v12241_v18  ;;  %v12247_v53 = vld [vmem:[#allocation2 + $0x48] sm:$0xff]   ;;  %v7618_v60 = vsel %vm1343_vm6, %v7613_v35, %v7617_v49  ;;  %v7634_v57 = vshll.u32 %v12245_v32, 16  ;;  %v7190_v35 = vrot.slane %v12250_v19, 1  ;;  %v7644_v49 = vshrl.u32 %v12252_v25, 16 }
 0x369   : > { %9294 = vmatprep.mubr.bf16.mxu0 %v7594_v8  ;;  %v6834_v9 = vshll.u32 %v12247_v53, 16  ;;  %v6829_v8 = vrot.slane %v6827_v2, 1  ;;  %v6832_v51 = vshrl.u32 %v12247_v53, 16  ;;  %v12261_v2 = vld [vmem:[#allocation2 + $0x74] ss:$0 sps:$4 sm:$0x11]  }
 0x36a   : > { %9134 = vmatmul.mubr.bf16.gmra.mrb[196].mxu1 %v6794_v16  ;;  %v12286_v16 = vld [vmem:[#allocation10 + $0x228] sm:$0xff]   ;;  %v7636_v6 = vrot.slane %v7634_v57, 1  ;;  %v7191_v57 = vsel %vm1744_vm10, %v7189_v58, %v7190_v35  ;;  %v7663_v63 = vshll.u32 %v12261_v2, 16  ;;  %v12272_v58 = vld [vmem:[#allocation2 + $0x78] sm:$0xfe]  }
 0x36b   : > { %9141 = vmatprep.mubr.bf16.mxu1 %v7179_v33  ;;  %11606 = vmatpush3.bf16.msra.mxu1 %v12241_v18  ;;  %v6824_v18 = vrot.slane %v6822_v21, 1  ;;  %v11097_v33 = vpop.f32.mrb[128].mxu1  ;;  %v6836_v36 = vrot.slane %v6834_v9, 1  ;;  %v12251_v9 = vld [vmem:[#allocation2 + $0x54] sm:$0xff]   ;;  %v12264_v25 = vld [vmem:[#allocation2 + $0x6c] sm:$0xfe]  }
 0x36c   : > { %11607 = vmatprep.subr.bf16.mxu1 %v12256_v44  ;;  %v7665_v52 = vrot.slane %v7663_v63, 1  ;;  %v12273_v35 = vld [vmem:[#allocation2 + $0x80] ss:$0 sps:$4 sm:$0x11]  }
 0x36d   : > { %v6825_v29 = vor.u32 %v6824_v18, %v6820_v23  ;;  %v12263_v23 = vld [vmem:[#allocation2 + $0x68] ss:$0 sps:$4 sm:$0x11]  }
 0x36e   : > { %v6863_v11 = vshll.u32 %v12263_v23, 16  ;;  %v12280_v23 = vld [vmem:[#allocation2 + $0x8c] ss:$0 sps:$4 sm:$0x11]  }
 0x36f   : > { %11608 = vmatpush3.bf16.msra.mxu1 %v12256_v44  ;;  %v7632_v44 = vshrl.u32 %v12245_v32, 16  ;;  %v6830_v17 = vsel %vm1343_vm6, %v6825_v29, %v6829_v8  ;;  %v7192_v8 = vrot.slane %v12257_v62, 1  ;;  %v12269_v29 = vld [vmem:[#allocation2 + $0x6c] sm:$0xff]  }
 0x370   : > { %9295 = vmatmul.mubr.bf16.gmra.mrb[228].mxu0 %v12221_v12  ;;  %11609 = vmatprep.subr.bf16.mxu1 %v12271_v43  ;;  %v7630_v12 = vsel %vm1343_vm6, %v7625_v26, %v7629_v28  ;;  %v7649_v26 = vor.u32 %v7648_v34, %v7644_v49  ;;  %v7658_v28 = vshll.u32 %v12260_v37, 16  ;;  %v12277_v34 = vld [vmem:[#allocation2 + $0x78] sm:$0xff]   ;;  %v12278_v37 = vld [vmem:[#allocation2 + $0x80] ss:$0 sps:$4 sm:$0x11]  }
 0x371   : > { %9302 = vmatprep.mubr.bf16.mxu0 %v7606_v48  ;;  %v12255_v48 = vld [vmem:[#allocation2 + $0x5c] ss:$0 sps:$4 sm:$0x11]   ;;  %v7637_v10 = vor.u32 %v7636_v6, %v7632_v44 }
 0x372   : > { %9142 = vmatmul.mubr.bf16.gmra.mrb[200].mxu1 %v6806_v20  ;;  %v6837_v20 = vor.u32 %v6836_v36, %v6832_v51  ;;  %v6851_v13 = vshll.u32 %v12255_v48, 16  ;;  %v7660_v36 = vrot.slane %v7658_v28, 1  ;;  %v6870_v51 = vshll.u32 %v12269_v29, 16 }
 0x373   : > { %9149 = vmatprep.mubr.bf16.mxu1 %v7182_v24  ;;  %11610 = vmatpush3.bf16.msra.mxu1 %v12271_v43  ;;  %v11098_v43 = vpop.f32.mrb[129].mxu1  ;;  %v7642_v32 = vsel %vm1343_vm6, %v7637_v10, %v7641_v61  ;;  %v6865_v48 = vrot.slane %v6863_v11, 1  ;;  %v7195_v10 = vrot.slane %v12264_v25, 1  ;;  %v12275_v61 = vld [vmem:[#allocation2 + $0x84] sm:$0xff]   ;;  %v6887_v28 = vshll.u32 %v12278_v37, 16 }
 0x374   : > { %11611 = vmatprep.subr.bf16.mxu1 %v12286_v16  ;;  %v11099_v46 = vadd.f32 %v11098_v43, %v11097_v33  ;;  %v11100_v4 = vpop.f32.mrb[130].mxu1  ;;  %v6842_v15 = vsel %vm1343_vm6, %v6837_v20, %v6841_v3  ;;  %v6853_v50 = vrot.slane %v6851_v13, 1  ;;  %v12301_v33 = vld [vmem:[#allocation10 + $0x230] sm:$0xff]   ;;  %v7675_v3 = vshll.u32 %v12268_v41, 16 }
 0x375   : > { %v11101_v54 = vpop.f32.mrb[131].mxu1  ;;  %v7682_v49 = vshll.u32 %v12275_v61, 16  ;;  %v7680_v62 = vshrl.u32 %v12275_v61, 16  ;;  %v6889_v11 = vrot.slane %v6887_v28, 1 }
 0x376   : > { %v11102_v39 = vadd.f32 %v11101_v54, %v11100_v4  ;;  %v7661_v4 = vor.u32 %v7660_v36, %v7656_v38  ;;  %v7677_v13 = vrot.slane %v7675_v3, 1  ;;  %v12274_v36 = vld [vmem:[#allocation2 + $0x78] sm:$0xff]  }
 0x377   : > { %11612 = vmatpush3.bf16.msra.mxu1 %v12286_v16  ;;  %v12267_v16 = vld [vmem:[#allocation2 + $0x78] sm:$0xff]  }
 0x378   : > { %9303 = vmatmul.mubr.bf16.gmra.mrb[232].mxu0 %v12229_v0  ;;  %11613 = vmatprep.subr.bf16.mxu1 %v12301_v33  ;;  %v7670_v30 = vshll.u32 %v12267_v16, 16 }
 0x379   : > { %9310 = vmatprep.mubr.bf16.mxu0 %v7618_v60  ;;  %v12258_v60 = vld [vmem:[#allocation2 + $0x68] ss:$0 sps:$4 sm:$0x11]  }
 0x37a   : > { %9150 = vmatmul.mubr.bf16.gmra.mrb[204].mxu1 %v6818_v56  ;;  %v12262_v56 = vld [vmem:[#allocation2 + $0x60] sm:$0xff]   ;;  %v7193_v40 = vrot.slane %v12258_v60, 1  ;;  %v7672_v20 = vrot.slane %v7670_v30, 1  ;;  %v7198_v60 = vrot.slane %v12272_v58, 1 }
 0x37b   : > { %9157 = vmatprep.mubr.bf16.mxu1 %v7185_v22  ;;  %v7653_v22 = vrot.slane %v7651_v55, 1  ;;  %v6858_v44 = vshll.u32 %v12262_v56, 16  ;;  %11614 = vmatpush3.bf16.msra.mxu1 %v12301_v33  ;;  %v12291_v30 = vld [vmem:[#allocation2 + $0xa4] ss:$0 sps:$4 sm:$0x11]  }
 0x37c   : > { %v7194_v43 = vsel %vm1744_vm10, %v7192_v8, %v7193_v40  ;;  %v12284_v8 = vld [vmem:[#allocation2 + $0x84] sm:$0xff]  }
 0x37d   : > { %v7654_v6 = vsel %vm1343_vm6, %v7649_v26, %v7653_v22  ;;  %v6860_v31 = vrot.slane %v6858_v44, 1  ;;  %v12285_v44 = vld [vmem:[#allocation2 + $0x8c] ss:$0 sps:$4 sm:$0x11]   ;;  %v6894_v41 = vshll.u32 %v12284_v8, 16  ;;  %v6892_v3 = vshrl.u32 %v12284_v8, 16 }
 0x380   : > { %9311 = vmatmul.mubr.bf16.gmra.mrb[236].mxu0 %v12236_v45  ;;  %v6849_v45 = vor.u32 %v6848_v27, %v6844_v42  ;;  %v7684_v42 = vrot.slane %v7682_v49, 1 }
 0x381   : > { %9318 = vmatprep.mubr.bf16.mxu0 %v7630_v12  ;;  %v11209_v7 = vpop.f32.mrb[160].mxu0  ;;  %v12265_v12 = vld [vmem:[#allocation2 + $0x74] ss:$0 sps:$4 sm:$0x11]  }
 0x382   : > { %9158 = vmatmul.mubr.bf16.gmra.mrb[208].mxu1 %v6830_v17  ;;  %v11210_v24 = vpop.f32.mrb[161].mxu0  ;;  %v6854_v19 = vsel %vm1343_vm6, %v6849_v45, %v6853_v50  ;;  %v12270_v17 = vld [vmem:[#allocation2 + $0x74] ss:$0 sps:$4 sm:$0x11]   ;;  %v7196_v54 = vrot.slane %v12265_v12, 1  ;;  %v7685_v63 = vor.u32 %v7684_v42, %v7680_v62  ;;  %v7202_v12 = vrot.slane %v12280_v23, 1 }
 0x383   : > { %9165 = vmatprep.mubr.bf16.mxu1 %v7188_v5  ;;  %v11211_v14 = vadd.f32 %v11210_v24, %v11209_v7  ;;  %v11212_v0 = vpop.f32.mrb[162].mxu0  ;;  %v6856_v5 = vshrl.u32 %v12262_v56, 16  ;;  %v7668_v7 = vshrl.u32 %v12267_v16, 16  ;;  %v6875_v24 = vshll.u32 %v12270_v17, 16  ;;  %v12279_v50 = vld [vmem:[#allocation2 + $0x84] sm:$0xfe]  }
 0x384   : > { %v11213_v21 = vpop.f32.mrb[163].mxu0  ;;  %v7197_v55 = vsel %vm1744_vm10, %v7195_v10, %v7196_v54  ;;  %v6882_v56 = vshll.u32 %v12277_v34, 16  ;;  %v12283_v45 = vld [vmem:[#allocation2 + $0x98] ss:$0 sps:$4 sm:$0x11]   ;;  %v7201_v25 = vrot.slane %v12279_v50, 1 }
 0x385   : > { %v13850_v1 = vadd.f32 %v11211_v14, %v11099_v46  ;;  %v11214_v53 = vadd.f32 %v11213_v21, %v11212_v0  ;;  %v12259_v46 = vld [vmem:[#allocation2 + $0x60] sm:$0xff]   ;;  %v6861_v47 = vor.u32 %v6860_v31, %v6856_v5  ;;  %v12276_v0 = vld [vmem:[#allocation2 + $0x8c] ss:$0 sps:$4 sm:$0x11]   ;;  %v6868_v21 = vshrl.u32 %v12269_v29, 16  ;;  %v12292_v10 = vld [vmem:[#allocation2 + $0x90] sm:$0xff]  }
 0x386   : > { %v7673_v27 = vor.u32 %v7672_v20, %v7668_v7  ;;  %v7687_v22 = vshll.u32 %v12276_v0, 16  ;;  %v6884_v38 = vrot.slane %v6882_v56, 1  ;;  %v12290_v31 = vld [vmem:[#allocation2 + $0x9c] sm:$0xff]   ;;  %v7699_v17 = vshll.u32 %v12283_v45, 16 }
 0x387   : > { %v13853_v18 = vadd.f32 %v11214_v53, %v11102_v39  ;;  %v6872_v39 = vrot.slane %v6870_v51, 1  ;;  %v6866_v14 = vsel %vm1343_vm6, %v6861_v47, %v6865_v48  ;;  %v6877_v53 = vrot.slane %v6875_v24, 1  ;;  %v12287_v51 = vld [vmem:[#allocation2 + $0x90] sm:$0xfe]   ;;  %v12281_v24 = vld [vmem:[#allocation2 + $0x84] sm:$0xff]  }
 0x388   : > { %9319 = vmatmul.mubr.bf16.gmra.mrb[240].mxu0 %v12244_v59  ;;  %v7666_v59 = vsel %vm1343_vm6, %v7661_v4, %v7665_v52  ;;  %v7678_v26 = vsel %vm1343_vm6, %v7673_v27, %v7677_v13  ;;  %v7689_v33 = vrot.slane %v7687_v22, 1  ;;  %v6899_v4 = vshll.u32 %v12285_v44, 16  ;;  %v12288_v5 = vld [vmem:[#allocation2 + $0x98] ss:$0 sps:$4 sm:$0x11]  }
 0x389   : > { %9326 = vmatprep.mubr.bf16.mxu0 %v7642_v32  ;;  %v12266_v32 = vld [vmem:[#allocation2 + $0x6c] sm:$0xff]   ;;  %v6873_v2 = vor.u32 %v6872_v39, %v6868_v21  ;;  %v6896_v48 = vrot.slane %v6894_v41, 1  ;;  %v7706_v47 = vshll.u32 %v12290_v31, 16  ;;  %v7711_v54 = vshll.u32 %v12291_v30, 16  ;;  %v12294_v27 = vld [vmem:[#allocation2 + $0x9c] sm:$0xfe]  }
 0x38a   : > { %9166 = vmatmul.mubr.bf16.gmra.mrb[212].mxu1 %v6842_v15  ;;  %v7199_v15 = vrot.slane %v12273_v35, 1  ;;  %v7203_v7 = vsel %vm1744_vm10, %v7201_v25, %v7202_v12  ;;  %v12293_v39 = vld [vmem:[#allocation2 + $0x98] ss:$0 sps:$4 sm:$0x11]   ;;  %v6901_v58 = vrot.slane %v6899_v4, 1  ;;  %v7204_v35 = vrot.slane %v12287_v51, 1 }
 0x38b   : > { %9173 = vmatprep.mubr.bf16.mxu1 %v7191_v57  ;;  %v12316_v57 = vld [vmem:[#allocation10 + $0x238] sm:$0xff]   ;;  %v6878_v40 = vsel %vm1343_vm6, %v6873_v2, %v6877_v53  ;;  %v7205_v49 = vrot.slane %v12288_v5, 1  ;;  %v6906_v0 = vshll.u32 %v12292_v10, 16  ;;  %v7708_v13 = vrot.slane %v7706_v47, 1  ;;  %v12302_v5 = vld [vmem:[#allocation2 + $0xa8] sm:$0xfe]  }
 0x38c   : > { %11615 = vmatprep.subr.bf16.mxu1 %v12316_v57  ;;  %v7200_v16 = vsel %vm1744_vm10, %v7198_v60, %v7199_v15  ;;  %v7713_v21 = vrot.slane %v7711_v54, 1  ;;  %v6911_v62 = vshll.u32 %v12293_v39, 16  ;;  %v12295_v60 = vld [vmem:[#allocation2 + $0xa4] ss:$0 sps:$4 sm:$0x11]  }
 0x38d   : > { %11616 = vmatpush3.bf16.msra.mxu1 %v12316_v57  ;;  %v6908_v15 = vrot.slane %v6906_v0, 1  ;;  %v12298_v42 = vld [vmem:[#allocation2 + $0xb0] ss:$0 sps:$4 sm:$0x11]   ;;  %v7206_v28 = vsel %vm1744_vm10, %v7204_v35, %v7205_v49 }
 0x38e   : > { %v6913_v44 = vrot.slane %v6911_v62, 1  ;;  %v7723_v12 = vshll.u32 %v12298_v42, 16  ;;  %v12308_v49 = vld [vmem:[#allocation2 + $0xb0] ss:$0 sps:$4 sm:$0x11]  }
 0x38f   : > { %v6935_v42 = vshll.u32 %v12308_v49, 16 }
 0x390   : > { %9327 = vmatmul.mubr.bf16.gmra.mrb[244].mxu0 %v12251_v9  ;;  %v12282_v9 = vld [vmem:[#allocation2 + $0x90] sm:$0xff]   ;;  %v7725_v0 = vrot.slane %v7723_v12, 1 }
 0x391   : > { %9334 = vmatprep.mubr.bf16.mxu0 %v7654_v6  ;;  %v7694_v29 = vshll.u32 %v12282_v9, 16  ;;  %v6880_v6 = vshrl.u32 %v12277_v34, 16  ;;  %v7692_v52 = vshrl.u32 %v12282_v9, 16  ;;  %v13868_v34 = vld [vmem:[#allocation2 + $0xa8] sm:$0xff]  }
 0x392   : > { %9174 = vmatmul.mubr.bf16.gmra.mrb[216].mxu1 %v6854_v19  ;;  %v7718_v56 = vshll.u32 %v13868_v34, 16 }
 0x393   : > { %9181 = vmatprep.mubr.bf16.mxu1 %v7194_v43  ;;  %v6885_v19 = vor.u32 %v6884_v38, %v6880_v6  ;;  %v7696_v43 = vrot.slane %v7694_v29, 1  ;;  %v12289_v38 = vld [vmem:[#allocation2 + $0x90] sm:$0xff]   ;;  %v7208_v29 = vrot.slane %v12295_v60, 1  ;;  %v12312_v60 = vld [vmem:[#allocation2 + $0xc0] sm:$0xff]  }
 0x394   : > { %v7720_v6 = vrot.slane %v7718_v56, 1  ;;  %v12309_v56 = vld [vmem:[#allocation2 + $0xb4] sm:$0xfe]  }
 0x395   : > { %v6890_v61 = vsel %vm1343_vm6, %v6885_v19, %v6889_v11  ;;  %v7697_v20 = vor.u32 %v7696_v43, %v7692_v52 }
 0x398   : > { %9335 = vmatmul.mubr.bf16.gmra.mrb[248].mxu0 %v12259_v46  ;;  %v7690_v46 = vsel %vm1343_vm6, %v7685_v63, %v7689_v33  ;;  %v7716_v63 = vshrl.u32 %v13868_v34, 16 }
 0x399   : > { %9342 = vmatprep.mubr.bf16.mxu0 %v7666_v59  ;;  %v7701_v59 = vrot.slane %v7699_v17, 1 }
 0x39a   : > { %9182 = vmatmul.mubr.bf16.gmra.mrb[220].mxu1 %v6866_v14  ;;  %v6897_v14 = vor.u32 %v6896_v48, %v6892_v3  ;;  %v12307_v48 = vld [vmem:[#allocation2 + $0xa8] sm:$0xff]   ;;  %v12306_v3 = vld [vmem:[#allocation2 + $0xbc] ss:$0 sps:$4 sm:$0x11]   ;;  %v7721_v35 = vor.u32 %v7720_v6, %v7716_v63  ;;  %v7213_v63 = vrot.slane %v12309_v56, 1  ;;  %v7740_v6 = vshrl.u32 %v12312_v60, 16 }
 0x39b   : > { %9189 = vmatprep.mubr.bf16.mxu1 %v7197_v55  ;;  %v7704_v55 = vshrl.u32 %v12290_v31, 16  ;;  %v7702_v53 = vsel %vm1343_vm6, %v7697_v20, %v7701_v59  ;;  %v12305_v31 = vld [vmem:[#allocation2 + $0xb4] sm:$0xff]  }
 0x39c   : > { %v6902_v50 = vsel %vm1343_vm6, %v6897_v14, %v6901_v58  ;;  %v7730_v39 = vshll.u32 %v12305_v31, 16  ;;  %v6930_v14 = vshll.u32 %v12307_v48, 16 }
 0x39d   : > { %v7709_v23 = vor.u32 %v7708_v13, %v7704_v55  ;;  %v12296_v55 = vld [vmem:[#allocation2 + $0x9c] sm:$0xff]  }
 0x39e   : > { %v7732_v62 = vrot.slane %v7730_v39, 1 }
 0x39f   : > { %v7714_v4 = vsel %vm1343_vm6, %v7709_v23, %v7713_v21  ;;  %v7210_v21 = vrot.slane %v12302_v5, 1  ;;  %v7742_v23 = vshll.u32 %v12312_v60, 16 }
 0x3a0   : > { %9343 = vmatmul.mubr.bf16.gmra.mrb[252].mxu0 %v12266_v32  ;;  %v6904_v32 = vshrl.u32 %v12292_v10, 16 }
 0x3a1   : > { %9350 = vmatprep.mubr.bf16.mxu0 %v7678_v26  ;;  %v12299_v26 = vld [vmem:[#allocation2 + $0x9c] sm:$0xff]  }
 0x3a2   : > { %9190 = vmatmul.mubr.bf16.gmra.mrb[224].mxu1 %v6878_v40  ;;  %v12300_v40 = vld [vmem:[#allocation2 + $0xa4] ss:$0 sps:$4 sm:$0x11]   ;;  %v6909_v25 = vor.u32 %v6908_v15, %v6904_v32  ;;  %v6918_v19 = vshll.u32 %v12299_v26, 16  ;;  %v6916_v17 = vshrl.u32 %v12299_v26, 16  ;;  %v6932_v15 = vrot.slane %v6930_v14, 1 }
 0x3a3   : > { %9197 = vmatprep.mubr.bf16.mxu1 %v7200_v16  ;;  %v7207_v16 = vrot.slane %v12294_v27, 1  ;;  %v6923_v51 = vshll.u32 %v12300_v40, 16  ;;  %v7728_v27 = vshrl.u32 %v12305_v31, 16  ;;  %v12317_v14 = vld [vmem:[#allocation2 + $0xc0] sm:$0xfe]  }
 0x3a4   : > { %v6920_v20 = vrot.slane %v6918_v19, 1 }
 0x3a5   : > { %v7209_v59 = vsel %vm1744_vm10, %v7207_v16, %v7208_v29  ;;  %v6925_v34 = vrot.slane %v6923_v51, 1  ;;  %v7733_v26 = vor.u32 %v7732_v62, %v7728_v27 }
 0x3a6   : > { %v6921_v13 = vor.u32 %v6920_v20, %v6916_v17  ;;  %v12320_v20 = vld [vmem:[#allocation2 + $0xc0] sm:$0xff]  }
 0x3a8   : > { %9351 = vmatmul.mubr.bf16.gmra.mrb[0].mxu0 %v12274_v36 }
 0x3a9   : > { %9358 = vmatprep.mubr.bf16.mxu0 %v7690_v46 }
 0x3aa   : > { %9198 = vmatmul.mubr.bf16.gmra.mrb[228].mxu1 %v6890_v61  ;;  %v12303_v61 = vld [vmem:[#allocation2 + $0xb0] ss:$0 sps:$4 sm:$0x11]  }
 0x3ab   : > { %9205 = vmatprep.mubr.bf16.mxu1 %v7203_v7  ;;  %v6914_v7 = vsel %vm1343_vm6, %v6909_v25, %v6913_v44  ;;  %v7211_v32 = vrot.slane %v12303_v61, 1  ;;  %v6937_v44 = vrot.slane %v6935_v42, 1 }
 0x3ae   : > { %v11103_v37 = vpop.f32.mrb[132].mxu1 }
 0x3af   : > { %v11104_v2 = vpop.f32.mrb[133].mxu1 }
 0x3b0   : > { %9359 = vmatmul.mubr.bf16.gmra.mrb[4].mxu0 %v12281_v24  ;;  %v11105_v57 = vadd.f32 %v11104_v2, %v11103_v37  ;;  %v11106_v22 = vpop.f32.mrb[134].mxu1  ;;  %v7735_v37 = vshll.u32 %v12306_v3, 16  ;;  %v7726_v2 = vsel %vm1343_vm6, %v7721_v35, %v7725_v0 }
 0x3b1   : > { %9366 = vmatprep.mubr.bf16.mxu0 %v7702_v53  ;;  %v11107_v9 = vpop.f32.mrb[135].mxu1  ;;  %v6928_v53 = vshrl.u32 %v12307_v48, 16 }
 0x3b2   : > { %9206 = vmatmul.mubr.bf16.gmra.mrb[232].mxu1 %v6902_v50  ;;  %v11215_v45 = vpop.f32.mrb[164].mxu0  ;;  %v11108_v8 = vadd.f32 %v11107_v9, %v11106_v22  ;;  %v12314_v22 = vld [vmem:[#allocation2 + $0xb4] sm:$0xff]   ;;  %v6926_v50 = vsel %vm1343_vm6, %v6921_v13, %v6925_v34  ;;  %v7212_v9 = vsel %vm1744_vm10, %v7210_v21, %v7211_v32  ;;  %v7737_v40 = vrot.slane %v7735_v37, 1 }
 0x3b3   : > { %9213 = vmatprep.mubr.bf16.mxu1 %v7206_v28  ;;  %v11216_v33 = vpop.f32.mrb[165].mxu0  ;;  %v12313_v28 = vld [vmem:[#allocation2 + $0xc8] ss:$0 sps:$4 sm:$0x11]   ;;  %v6942_v16 = vshll.u32 %v12314_v22, 16  ;;  %v12311_v21 = vld [vmem:[#allocation2 + $0xb4] sm:$0xff]  }
 0x3b4   : > { %v11217_v36 = vadd.f32 %v11216_v33, %v11215_v45  ;;  %v11218_v11 = vpop.f32.mrb[166].mxu0  ;;  %v12315_v45 = vld [vmem:[#allocation2 + $0xbc] ss:$0 sps:$4 sm:$0x11]   ;;  %v7738_v25 = vsel %vm1343_vm6, %v7733_v26, %v7737_v40  ;;  %v7747_v19 = vshll.u32 %v12313_v28, 16  ;;  %v6954_v32 = vshll.u32 %v12320_v20, 16 }
 0x3b5   : > { %v11219_v41 = vpop.f32.mrb[167].mxu0  ;;  %v6947_v5 = vshll.u32 %v12315_v45, 16 }
 0x3b6   : > { %v13875_v30 = vadd.f32 %v11217_v36, %v11105_v57  ;;  %v11220_v43 = vadd.f32 %v11219_v41, %v11218_v11  ;;  %v12310_v57 = vld [vmem:[#allocation2 + $0xbc] ss:$0 sps:$4 sm:$0x11]   ;;  %v12322_v11 = vld [vmem:[#allocation2 + $0xcc] sm:$0xff]   ;;  %v7744_v41 = vrot.slane %v7742_v23, 1  ;;  %v6956_v45 = vrot.slane %v6954_v32, 1 }
 0x3b7   : > { %v11109_v46 = vpop.f32.mrb[136].mxu1  ;;  %v7214_v33 = vrot.slane %v12310_v57, 1  ;;  %v7754_v35 = vshll.u32 %v12322_v11, 16  ;;  %v7752_v27 = vshrl.u32 %v12322_v11, 16  ;;  %v6949_v37 = vrot.slane %v6947_v5, 1 }
 0x3b8   : > { %9367 = vmatmul.mubr.bf16.gmra.mrb[8].mxu0 %v12289_v38  ;;  %v11110_v52 = vpop.f32.mrb[137].mxu1  ;;  %v13878_v10 = vadd.f32 %v11220_v43, %v11108_v8  ;;  %v12304_v8 = vld [vmem:[#allocation2 + $0xa8] sm:$0xff]   ;;  %v6933_v38 = vor.u32 %v6932_v15, %v6928_v53  ;;  %v7745_v34 = vor.u32 %v7744_v41, %v7740_v6  ;;  %v7216_v53 = vrot.slane %v12317_v14, 1 }
 0x3b9   : > { %9374 = vmatprep.mubr.bf16.mxu0 %v7714_v4  ;;  %v13880_v47 = vadd.f32 %v11110_v52, %v11109_v46  ;;  %v11112_v54 = vpop.f32.mrb[138].mxu1  ;;  %v6940_v4 = vshrl.u32 %v12314_v22, 16  ;;  %v7215_v49 = vsel %vm1744_vm10, %v7213_v63, %v7214_v33  ;;  %v12325_v63 = vld [vmem:[#allocation2 + $0x20] ss:$0 sps:$4 sm:$0x11]  }
 0x3ba   : > { %v11113_v24 = vpop.f32.mrb[139].mxu1  ;;  %9214 = vmatmul.mubr.bf16.gmra.mrb[236].mxu1 %v6914_v7  ;;  %v6938_v48 = vsel %vm1343_vm6, %v6933_v38, %v6937_v44  ;;  %v12318_v7 = vld [vmem:[#allocation2 + $0xc8] ss:$0 sps:$4 sm:$0x11]  }
 0x3bb   : > { %v13884_v58 = vadd.f32 %v11113_v24, %v11112_v54  ;;  %9221 = vmatprep.mubr.bf16.mxu1 %v7209_v59  ;;  %v6944_v54 = vrot.slane %v6942_v16, 1  ;;  %v12323_v59 = vld [vmem:[#allocation2 + $0xd4] ss:$0 sps:$4 sm:$0x11]   ;;  %v7217_v60 = vrot.slane %v12318_v7, 1  ;;  %v12326_v7 = vld [vmem:[#allocation2 + $0xcc] sm:$0xff]  }
 0x3bc   : > { %v7759_v62 = vshll.u32 %v12323_v59, 16 }
 0x3bd   : > { %v6945_v13 = vor.u32 %v6944_v54, %v6940_v4  ;;  %v7218_v44 = vsel %vm1744_vm10, %v7216_v53, %v7217_v60  ;;  %v12327_v4 = vld [vmem:[#allocation2 + $0x24] sm:$0xfe]   ;;  %v12331_v60 = vld [vmem:[#allocation2 + $0x3c] sm:$0xfe]  }
 0x3be   : > { %v7761_v40 = vrot.slane %v7759_v62, 1 }
 0x3bf   : > { %v6950_v22 = vsel %vm1343_vm6, %v6945_v13, %v6949_v37 }
 0x3c0   : > { %9375 = vmatmul.mubr.bf16.gmra.mrb[12].mxu0 %v12296_v55  ;;  %v7749_v55 = vrot.slane %v7747_v19, 1 }
 0x3c1   : > { %9382 = vmatprep.mubr.bf16.mxu0 %v7726_v2 }
 0x3c2   : > { %9222 = vmatmul.mubr.bf16.gmra.mrb[240].mxu1 %v6926_v50  ;;  %v7750_v15 = vsel %vm1343_vm6, %v7745_v34, %v7749_v55 }
 0x3c3   : > { %9229 = vmatprep.mubr.bf16.mxu1 %v7212_v9 }
 0x3c6   : > { %v11221_v29 = vpop.f32.mrb[168].mxu0 }
 0x3c7   : > { %v11115_v36 = vpop.f32.mrb[140].mxu1  ;;  %v11222_v12 = vpop.f32.mrb[169].mxu0 }
 0x3c8   : > { %v11116_v31 = vpop.f32.mrb[141].mxu1  ;;  %9383 = vmatmul.mubr.bf16.gmra.mrb[16].mxu0 %v12304_v8  ;;  %v11223_v43 = vadd.f32 %v11222_v12, %v11221_v29  ;;  %v11224_v17 = vpop.f32.mrb[170].mxu0  ;;  %v12324_v29 = vld [vmem:[#allocation2 + $0x18] sm:$0xfe]   ;;  %v12319_v12 = vld [vmem:[#allocation2 + $0xc0] sm:$0xff]  }
 0x3c9   : > { %v11117_v51 = vadd.f32 %v11116_v31, %v11115_v36  ;;  %v11118_v46 = vpop.f32.mrb[142].mxu1  ;;  %9390 = vmatprep.mubr.bf16.mxu0 %v7738_v25  ;;  %v11225_v52 = vpop.f32.mrb[171].mxu0  ;;  %v6952_v36 = vshrl.u32 %v12320_v20, 16  ;;  %v7971_v31 = vrot.slane %v12324_v29, 1 }
 0x3ca   : > { %v11119_v61 = vpop.f32.mrb[143].mxu1  ;;  %v13892_v3 = vadd.f32 %v11223_v43, %v13880_v47  ;;  %v11226_v39 = vadd.f32 %v11225_v52, %v11224_v17  ;;  %9230 = vmatmul.mubr.bf16.gmra.mrb[244].mxu1 %v6938_v48  ;;  %v7756_v47 = vrot.slane %v7754_v35, 1  ;;  %v7972_v43 = vrot.slane %v12325_v63, 1  ;;  %v12329_v48 = vld [vmem:[#allocation2 + $0x30] sm:$0xfe]  }
 0x3cb   : > { %v11120_v24 = vadd.f32 %v11119_v61, %v11118_v46  ;;  %9237 = vmatprep.mubr.bf16.mxu1 %v7215_v49  ;;  %v6957_v41 = vor.u32 %v6956_v45, %v6952_v36  ;;  %v12330_v61 = vld [vmem:[#allocation2 + $0x38] ss:$0 sps:$4 sm:$0x11]   ;;  %v7974_v35 = vrot.slane %v12327_v4, 1  ;;  %v7977_v13 = vrot.slane %v12329_v48, 1 }
 0x3cc   : > { %v13896_v0 = vadd.f32 %v11226_v39, %v13884_v58  ;;  %v12321_v58 = vld [vmem:[#allocation2 + $0xc8] ss:$0 sps:$4 sm:$0x11]   ;;  %v7757_v8 = vor.u32 %v7756_v47, %v7752_v27  ;;  %v7973_v52 = vsel %vm1744_vm10, %v7971_v31, %v7972_v43  ;;  %v12337_v43 = vld [vmem:[#allocation2 + $0x60] sm:$0xfe]  }
 0x3cd   : > { %v6959_v11 = vshll.u32 %v12321_v58, 16  ;;  %v12334_v58 = vld [vmem:[#allocation2 + $0x50] ss:$0 sps:$4 sm:$0x11]  }
 0x3ce   : > { %v7762_v19 = vsel %vm1343_vm6, %v7757_v8, %v7761_v40 }
 0x3cf   : > { %v11121_v2 = vpop.f32.mrb[144].mxu1  ;;  %v6961_v17 = vrot.slane %v6959_v11, 1 }
 0x3d0   : > { %9391 = vmatmul.mubr.bf16.gmra.mrb[20].mxu0 %v12311_v21  ;;  %v11227_v42 = vpop.f32.mrb[172].mxu0  ;;  %v11122_v56 = vpop.f32.mrb[145].mxu1  ;;  %v7978_v21 = vrot.slane %v12330_v61, 1 }
 0x3d1   : > { %9398 = vmatprep.mubr.bf16.mxu0 %v7750_v15  ;;  %v11228_v57 = vpop.f32.mrb[173].mxu0  ;;  %v11123_v50 = vadd.f32 %v11122_v56, %v11121_v2  ;;  %v11124_v9 = vpop.f32.mrb[146].mxu1  ;;  %v6962_v46 = vsel %vm1343_vm6, %v6957_v41, %v6961_v17  ;;  %v12332_v2 = vld [vmem:[#allocation2 + $0x44] ss:$0 sps:$4 sm:$0x11]  }
 0x3d2   : > { %v11229_v26 = vadd.f32 %v11228_v57, %v11227_v42  ;;  %v11230_v28 = vpop.f32.mrb[174].mxu0  ;;  %v11125_v23 = vpop.f32.mrb[147].mxu1  ;;  %9238 = vmatmul.mubr.bf16.gmra.mrb[248].mxu1 %v6950_v22  ;;  %v7979_v42 = vsel %vm1744_vm10, %v7977_v13, %v7978_v21  ;;  %v12333_v56 = vld [vmem:[#allocation2 + $0x48] sm:$0xfe]  }
 0x3d3   : > { %v11231_v38 = vpop.f32.mrb[175].mxu0  ;;  %v11126_v16 = vadd.f32 %v11125_v23, %v11124_v9  ;;  %9245 = vmatprep.mubr.bf16.mxu1 %v7218_v44  ;;  %v7981_v23 = vrot.slane %v12332_v2, 1  ;;  %v7984_v44 = vrot.slane %v12334_v58, 1  ;;  %v12336_v41 = vld [vmem:[#allocation2 + $0x5c] ss:$0 sps:$4 sm:$0x11]  }
 0x3d4   : > { %v13901_v33 = vadd.f32 %v11229_v26, %v11117_v51  ;;  %v11232_v6 = vadd.f32 %v11231_v38, %v11230_v28  ;;  %v12328_v51 = vld [vmem:[#allocation2 + $0x2c] ss:$0 sps:$4 sm:$0x11]   ;;  %v7980_v28 = vrot.slane %v12331_v60, 1  ;;  %v7983_v38 = vrot.slane %v12333_v56, 1 }
 0x3d5   : > { %v7975_v49 = vrot.slane %v12328_v51, 1  ;;  %v12338_v17 = vld [vmem:[#allocation2 + $0x68] ss:$0 sps:$4 sm:$0x11]   ;;  %v7987_v61 = vrot.slane %v12336_v41, 1 }
 0x3d6   : > { %v13903_v25 = vadd.f32 %v11232_v6, %v11120_v24  ;;  %v7982_v11 = vsel %vm1744_vm10, %v7980_v28, %v7981_v23  ;;  %v7985_v31 = vsel %vm1744_vm10, %v7983_v38, %v7984_v44  ;;  %v12339_v21 = vld [vmem:[#allocation2 + $0x6c] sm:$0xfe]   ;;  %v12346_v41 = vld [vmem:[#allocation2 + $0x98] ss:$0 sps:$4 sm:$0x11]  }
 0x3d7   : > { %v7976_v53 = vsel %vm1744_vm10, %v7974_v35, %v7975_v49  ;;  %v7992_v58 = vrot.slane %v12339_v21, 1 }
 0x3d8   : > { %9399 = vmatmul.mubr.bf16.gmra.mrb[24].mxu0 %v12319_v12  ;;  %v12335_v12 = vld [vmem:[#allocation2 + $0x54] sm:$0xfe]  }
 0x3d9   : > { %9406 = vmatprep.mubr.bf16.mxu0 %v7762_v19  ;;  %v7986_v48 = vrot.slane %v12335_v12, 1  ;;  %v12345_v12 = vld [vmem:[#allocation2 + $0x90] sm:$0xfe]  }
 0x3da   : > { %9246 = vmatmul.mubr.bf16.gmra.mrb[252].mxu1 %v6962_v46 }
 0x3db   : > { %v11233_v5 = vpop.f32.mrb[176].mxu0  ;;  %11617 = vmatprep.mubr.bf16.mxu1 %v7973_v52  ;;  %v7988_v13 = vsel %vm1744_vm10, %v7986_v48, %v7987_v61  ;;  %v8001_v61 = vrot.slane %v12345_v12, 1  ;;  %v12353_v12 = vld [vmem:[#allocation2 + $0xc0] sm:$0xfe]  }
 0x3dc   : > { %v11234_v54 = vpop.f32.mrb[177].mxu0 }
 0x3dd   : > { %v11235_v20 = vadd.f32 %v11234_v54, %v11233_v5  ;;  %v11236_v39 = vpop.f32.mrb[178].mxu0  ;;  %v11127_v59 = vpop.f32.mrb[148].mxu1 }
 0x3de   : > { %v11237_v24 = vpop.f32.mrb[179].mxu0  ;;  %v11128_v55 = vpop.f32.mrb[149].mxu1 }
 0x3df   : > { %v13908_v14 = vadd.f32 %v11235_v20, %v11123_v50  ;;  %v11238_v34 = vadd.f32 %v11237_v24, %v11236_v39  ;;  %v11129_v32 = vadd.f32 %v11128_v55, %v11127_v59  ;;  %v11130_v27 = vpop.f32.mrb[150].mxu1  ;;  %v7989_v39 = vrot.slane %v12337_v43, 1 }
 0x3e0   : > { %9407 = vmatmul.mubr.bf16.gmra.mrb[28].mxu0 %v12326_v7  ;;  %v11131_v62 = vpop.f32.mrb[151].mxu1  ;;  %v7990_v24 = vrot.slane %v12338_v17, 1 }
 0x3e1   : > { %v13910_v47 = vadd.f32 %v11238_v34, %v11126_v16  ;;  %v11132_v37 = vadd.f32 %v11131_v62, %v11130_v27 }
 0x3e2   : > { %11618 = vmatmul.mubr.bf16.vlgmr.msra.gmra.mrb[0].mxu1 %v7976_v53  ;;  %v7991_v62 = vsel %vm1744_vm10, %v7989_v39, %v7990_v24  ;;  %v12342_v53 = vld [vmem:[#allocation2 + $0x80] ss:$0 sps:$4 sm:$0x11]  }
 0x3e3   : > { %v11239_v15 = vpop.f32.mrb[180].mxu0  ;;  %11621 = vmatprep.mubr.bf16.mxu1 %v7979_v42  ;;  %v7996_v28 = vrot.slane %v12342_v53, 1 }
 0x3e4   : > { %v11240_v57 = vpop.f32.mrb[181].mxu0 }
 0x3e5   : > { %v11241_v22 = vadd.f32 %v11240_v57, %v11239_v15  ;;  %v11242_v50 = vpop.f32.mrb[182].mxu0  ;;  %v11133_v26 = vpop.f32.mrb[152].mxu1 }
 0x3e6   : > { %v11243_v9 = vpop.f32.mrb[183].mxu0  ;;  %v11134_v40 = vpop.f32.mrb[153].mxu1 }
 0x3e7   : > { %v13914_v45 = vadd.f32 %v11241_v22, %v11129_v32  ;;  %v11244_v8 = vadd.f32 %v11243_v9, %v11242_v50  ;;  %v11135_v16 = vadd.f32 %v11134_v40, %v11133_v26  ;;  %v11136_v29 = vpop.f32.mrb[154].mxu1  ;;  %v12340_v32 = vld [vmem:[#allocation2 + $0x74] ss:$0 sps:$4 sm:$0x11]  }
 0x3e8   : > { %v11137_v6 = vpop.f32.mrb[155].mxu1  ;;  %v7993_v57 = vrot.slane %v12340_v32, 1 }
 0x3e9   : > { %v13916_v63 = vadd.f32 %v11244_v8, %v11132_v37  ;;  %v11138_v36 = vadd.f32 %v11137_v6, %v11136_v29  ;;  %v12341_v37 = vld [vmem:[#allocation2 + $0x78] sm:$0xfe]   ;;  %v12343_v29 = vld [vmem:[#allocation2 + $0x84] sm:$0xfe]  }
 0x3ea   : > { %11622 = vmatmul.mubr.bf16.gmra.mrb[4].mxu1 %v7982_v11  ;;  %v7995_v26 = vrot.slane %v12341_v37, 1  ;;  %v12344_v6 = vld [vmem:[#allocation2 + $0x8c] ss:$0 sps:$4 sm:$0x11]  }
 0x3eb   : > { %v11245_v19 = vpop.f32.mrb[184].mxu0  ;;  %11625 = vmatprep.mubr.bf16.mxu1 %v7985_v31 }
 0x3ec   : > { %v11246_v46 = vpop.f32.mrb[185].mxu0  ;;  %v7997_v11 = vsel %vm1744_vm10, %v7995_v26, %v7996_v28 }
 0x3ed   : > { %v11247_v4 = vadd.f32 %v11246_v46, %v11245_v19  ;;  %v11248_v51 = vpop.f32.mrb[186].mxu0  ;;  %v11139_v52 = vpop.f32.mrb[156].mxu1 }
 0x3ee   : > { %v11249_v5 = vpop.f32.mrb[187].mxu0  ;;  %v11140_v20 = vpop.f32.mrb[157].mxu1 }
 0x3ef   : > { %v13920_v54 = vadd.f32 %v11247_v4, %v11135_v16  ;;  %v11250_v7 = vadd.f32 %v11249_v5, %v11248_v51  ;;  %v11141_v59 = vadd.f32 %v11140_v20, %v11139_v52  ;;  %v11142_v35 = vpop.f32.mrb[158].mxu1  ;;  %v7994_v16 = vsel %vm1744_vm10, %v7992_v58, %v7993_v57 }
 0x3f0   : > { %v11143_v34 = vpop.f32.mrb[159].mxu1  ;;  %v7998_v4 = vrot.slane %v12343_v29, 1  ;;  %v7999_v51 = vrot.slane %v12344_v6, 1  ;;  %v12351_v29 = vld [vmem:[#allocation2 + $0xb4] sm:$0xfe]  }
 0x3f1   : > { %v13922_v49 = vadd.f32 %v11250_v7, %v11138_v36  ;;  %v11144_v55 = vadd.f32 %v11143_v34, %v11142_v35  ;;  %v8002_v7 = vrot.slane %v12346_v41, 1  ;;  %v12352_v6 = vld [vmem:[#allocation2 + $0xbc] ss:$0 sps:$4 sm:$0x11]  }
 0x3f2   : > { %11626 = vmatmul.mubr.bf16.gmra.mrb[8].mxu1 %v7988_v13  ;;  %v8000_v34 = vsel %vm1744_vm10, %v7998_v4, %v7999_v51  ;;  %v12348_v13 = vld [vmem:[#allocation2 + $0xa4] ss:$0 sps:$4 sm:$0x11]   ;;  %v12354_v41 = vld [vmem:[#allocation2 + $0xc8] ss:$0 sps:$4 sm:$0x11]  }
 0x3f3   : > { %v11251_v27 = vpop.f32.mrb[188].mxu0  ;;  %11629 = vmatprep.mubr.bf16.mxu1 %v7991_v62  ;;  %v8003_v32 = vsel %vm1744_vm10, %v8001_v61, %v8002_v7  ;;  %v12350_v62 = vld [vmem:[#allocation2 + $0xb0] ss:$0 sps:$4 sm:$0x11]   ;;  %v8010_v4 = vrot.slane %v12351_v29, 1  ;;  %v8011_v51 = vrot.slane %v12352_v6, 1 }
 0x3f4   : > { %v11252_v60 = vpop.f32.mrb[189].mxu0  ;;  %v8008_v26 = vrot.slane %v12350_v62, 1  ;;  %v8013_v7 = vrot.slane %v12353_v12, 1 }
 0x3f5   : > { %v11253_v2 = vadd.f32 %v11252_v60, %v11251_v27  ;;  %v11254_v15 = vpop.f32.mrb[190].mxu0  ;;  %v11145_v56 = vpop.f32.mrb[160].mxu1  ;;  %v12349_v27 = vld [vmem:[#allocation2 + $0xa8] sm:$0xfe]  }
 0x3f6   : > { %v11255_v42 = vpop.f32.mrb[191].mxu0  ;;  %v11146_v9 = vpop.f32.mrb[161].mxu1 }
 0x3f7   : > { %v13926_v22 = vadd.f32 %v11253_v2, %v11141_v59  ;;  %v11256_v50 = vadd.f32 %v11255_v42, %v11254_v15  ;;  %v11147_v23 = vadd.f32 %v11146_v9, %v11145_v56  ;;  %v11148_v8 = vpop.f32.mrb[162].mxu1  ;;  %v8005_v56 = vrot.slane %v12348_v13, 1 }
 0x3f8   : > { %v11149_v38 = vpop.f32.mrb[163].mxu1  ;;  %v8007_v9 = vrot.slane %v12349_v27, 1 }
 0x3f9   : > { %v13928_v40 = vadd.f32 %v11256_v50, %v11144_v55  ;;  %v11150_v44 = vadd.f32 %v11149_v38, %v11148_v8  ;;  %v12347_v55 = vld [vmem:[#allocation2 + $0x9c] sm:$0xfe]  }
 0x3fa   : > { %11630 = vmatmul.mubr.bf16.gmra.mrb[12].mxu1 %v7994_v16  ;;  %v8004_v42 = vrot.slane %v12347_v55, 1 }
 0x3fb   : > { %v11257_v36 = vpop.f32.mrb[192].mxu0  ;;  %11633 = vmatprep.mubr.bf16.mxu1 %v7997_v11  ;;  %v8009_v11 = vsel %vm1744_vm10, %v8007_v9, %v8008_v26 }
 0x3fc   : > { %v11258_v19 = vpop.f32.mrb[193].mxu0  ;;  %v8006_v16 = vsel %vm1744_vm10, %v8004_v42, %v8005_v56 }
 0x3fd   : > { %v11259_v31 = vadd.f32 %v11258_v19, %v11257_v36  ;;  %v11260_v43 = vpop.f32.mrb[194].mxu0  ;;  %v11151_v46 = vpop.f32.mrb[164].mxu1 }
 0x3fe   : > { %v11261_v17 = vpop.f32.mrb[195].mxu0  ;;  %v11152_v48 = vpop.f32.mrb[165].mxu1 }
 0x3ff   : > { %v13932_v5 = vadd.f32 %v11259_v31, %v11147_v23  ;;  %v11262_v52 = vadd.f32 %v11261_v17, %v11260_v43  ;;  %v11153_v20 = vadd.f32 %v11152_v48, %v11151_v46  ;;  %v11154_v39 = vpop.f32.mrb[166].mxu1 }
 0x400   : > { %v11155_v59 = vpop.f32.mrb[167].mxu1 }
 0x401   : > { %v13934_v24 = vadd.f32 %v11262_v52, %v11150_v44  ;;  %v11156_v35 = vadd.f32 %v11155_v59, %v11154_v39 }
 0x402   : > { %11634 = vmatmul.mubr.bf16.gmra.mrb[16].mxu1 %v8000_v34  ;;  %v12356_v34 = vld [vmem:[#allocation2 + $0xd4] ss:$0 sps:$4 sm:$0x11]  }
 0x403   : > { %v11263_v21 = vpop.f32.mrb[196].mxu0  ;;  %11637 = vmatprep.mubr.bf16.mxu1 %v8003_v32  ;;  %v8012_v32 = vsel %vm1744_vm10, %v8010_v4, %v8011_v51 }
 0x404   : > { %v11264_v37 = vpop.f32.mrb[197].mxu0 }
 0x405   : > { %v11265_v53 = vadd.f32 %v11264_v37, %v11263_v21  ;;  %v11266_v60 = vpop.f32.mrb[198].mxu0  ;;  %v11157_v15 = vpop.f32.mrb[168].mxu1 }
 0x406   : > { %v11267_v2 = vpop.f32.mrb[199].mxu0  ;;  %v11158_v50 = vpop.f32.mrb[169].mxu1 }
 0x407   : > { %v13938_v58 = vadd.f32 %v11265_v53, %v11153_v20  ;;  %v11268_v57 = vadd.f32 %v11267_v2, %v11266_v60  ;;  %v11159_v28 = vadd.f32 %v11158_v50, %v11157_v15  ;;  %v11160_v23 = vpop.f32.mrb[170].mxu1  ;;  %v8014_v20 = vrot.slane %v12354_v41, 1 }
 0x408   : > { %v11161_v38 = vpop.f32.mrb[171].mxu1  ;;  %v8017_v60 = vrot.slane %v12356_v34, 1 }
 0x409   : > { %v13940_v8 = vadd.f32 %v11268_v57, %v11156_v35  ;;  %v11162_v44 = vadd.f32 %v11161_v38, %v11160_v23  ;;  %v12355_v35 = vld [vmem:[#allocation2 + $0xcc] sm:$0xfe]   ;;  %v8015_v62 = vsel %vm1744_vm10, %v8013_v7, %v8014_v20 }
 0x40a   : > { %11638 = vmatmul.mubr.bf16.gmra.mrb[20].mxu1 %v8006_v16  ;;  %v8016_v53 = vrot.slane %v12355_v35, 1 }
 0x40b   : > { %v11269_v36 = vpop.f32.mrb[200].mxu0  ;;  %11641 = vmatprep.mubr.bf16.mxu1 %v8009_v11 }
 0x40c   : > { %v11270_v19 = vpop.f32.mrb[201].mxu0  ;;  %v8018_v23 = vsel %vm1744_vm10, %v8016_v53, %v8017_v60 }
 0x40d   : > { %v11271_v31 = vadd.f32 %v11270_v19, %v11269_v36  ;;  %v11272_v43 = vpop.f32.mrb[202].mxu0  ;;  %v11163_v46 = vpop.f32.mrb[172].mxu1 }
 0x40e   : > { %v11273_v17 = vpop.f32.mrb[203].mxu0  ;;  %v11164_v61 = vpop.f32.mrb[173].mxu1 }
 0x40f   : > { %v13944_v52 = vadd.f32 %v11271_v31, %v11159_v28  ;;  %v11274_v48 = vadd.f32 %v11273_v17, %v11272_v43  ;;  %v11165_v39 = vadd.f32 %v11164_v61, %v11163_v46  ;;  %v11166_v59 = vpop.f32.mrb[174].mxu1 }
 0x410   : > { %v11167_v13 = vpop.f32.mrb[175].mxu1 }
 0x411   : > { %v13946_v55 = vadd.f32 %v11274_v48, %v11162_v44  ;;  %v11168_v21 = vadd.f32 %v11167_v13, %v11166_v59 }
 0x412   : > { %11642 = vmatmul.mubr.bf16.gmra.mrb[24].mxu1 %v8012_v32 }
 0x413   : > { %v11275_v27 = vpop.f32.mrb[204].mxu0  ;;  %11645 = vmatprep.mubr.bf16.mxu1 %v8015_v62 }
 0x414   : > { %v11276_v37 = vpop.f32.mrb[205].mxu0 }
 0x415   : > { %v11277_v2 = vadd.f32 %v11276_v37, %v11275_v27  ;;  %v11278_v15 = vpop.f32.mrb[206].mxu0  ;;  %v11169_v56 = vpop.f32.mrb[176].mxu1 }
 0x416   : > { %v11279_v42 = vpop.f32.mrb[207].mxu0  ;;  %v11170_v9 = vpop.f32.mrb[177].mxu1 }
 0x417   : > { %v13950_v57 = vadd.f32 %v11277_v2, %v11165_v39  ;;  %v11280_v50 = vadd.f32 %v11279_v42, %v11278_v15  ;;  %v11171_v26 = vadd.f32 %v11170_v9, %v11169_v56  ;;  %v11172_v28 = vpop.f32.mrb[178].mxu1 }
 0x418   : > { %v11173_v44 = vpop.f32.mrb[179].mxu1 }
 0x419   : > { %v13953_v38 = vadd.f32 %v11280_v50, %v11168_v21  ;;  %v11174_v16 = vadd.f32 %v11173_v44, %v11172_v28 }
 0x41a   : > { %11646 = vmatmul.mubr.bf16.gmra.mrb[28].mxu1 %v8018_v23 }
 0x41b   : > { %v11281_v29 = vpop.f32.mrb[208].mxu0 }
 0x41c   : > { %v11282_v6 = vpop.f32.mrb[209].mxu0 }
 0x41d   : > { %v11283_v36 = vadd.f32 %v11282_v6, %v11281_v29  ;;  %v11284_v11 = vpop.f32.mrb[210].mxu0  ;;  %v11175_v41 = vpop.f32.mrb[180].mxu1 }
 0x41e   : > { %v11285_v12 = vpop.f32.mrb[211].mxu0  ;;  %v11176_v43 = vpop.f32.mrb[181].mxu1 }
 0x41f   : > { %v13955_v19 = vadd.f32 %v11283_v36, %v11171_v26  ;;  %v11286_v31 = vadd.f32 %v11285_v12, %v11284_v11  ;;  %v11177_v17 = vadd.f32 %v11176_v43, %v11175_v41  ;;  %v11178_v46 = vpop.f32.mrb[182].mxu1 }
 0x420   : > { %v11179_v51 = vpop.f32.mrb[183].mxu1 }
 0x421   : > { %v13957_v4 = vadd.f32 %v11286_v31, %v11174_v16  ;;  %v11180_v48 = vadd.f32 %v11179_v51, %v11178_v46 }
 0x423   : > { %v11287_v61 = vpop.f32.mrb[212].mxu0 }
 0x424   : > { %v11288_v7 = vpop.f32.mrb[213].mxu0 }
 0x425   : > { %v11289_v20 = vadd.f32 %v11288_v7, %v11287_v61  ;;  %v11290_v39 = vpop.f32.mrb[214].mxu0  ;;  %v11181_v35 = vpop.f32.mrb[184].mxu1 }
 0x426   : > { %v11291_v59 = vpop.f32.mrb[215].mxu0  ;;  %v11182_v21 = vpop.f32.mrb[185].mxu1 }
 0x427   : > { %v13959_v34 = vadd.f32 %v11289_v20, %v11177_v17  ;;  %v11292_v13 = vadd.f32 %v11291_v59, %v11290_v39  ;;  %v11183_v32 = vadd.f32 %v11182_v21, %v11181_v35  ;;  %v11184_v27 = vpop.f32.mrb[186].mxu1 }
 0x428   : > { %v11185_v37 = vpop.f32.mrb[187].mxu1 }
 0x429   : > { %v13961_v62 = vadd.f32 %v11292_v13, %v11180_v48  ;;  %v11186_v53 = vadd.f32 %v11185_v37, %v11184_v27 }
 0x42b   : > { %v11293_v60 = vpop.f32.mrb[216].mxu0 }
 0x42c   : > { %v11294_v2 = vpop.f32.mrb[217].mxu0 }
 0x42d   : > { %v11295_v15 = vadd.f32 %v11294_v2, %v11293_v60  ;;  %v11296_v42 = vpop.f32.mrb[218].mxu0  ;;  %v11187_v50 = vpop.f32.mrb[188].mxu1 }
 0x42e   : > { %v11297_v56 = vpop.f32.mrb[219].mxu0  ;;  %v11188_v28 = vpop.f32.mrb[189].mxu1 }
 0x42f   : > { %v13963_v9 = vadd.f32 %v11295_v15, %v11183_v32  ;;  %v11298_v26 = vadd.f32 %v11297_v56, %v11296_v42  ;;  %v11189_v23 = vadd.f32 %v11188_v28, %v11187_v50  ;;  %v11190_v44 = vpop.f32.mrb[190].mxu1 }
 0x430   : > { %v11191_v29 = vpop.f32.mrb[191].mxu1 }
 0x431   : > { %v13965_v16 = vadd.f32 %v11298_v26, %v11186_v53  ;;  %v11192_v6 = vadd.f32 %v11191_v29, %v11190_v44 }
 0x433   : > { %v11299_v36 = vpop.f32.mrb[220].mxu0 }
 0x434   : > { %v11300_v11 = vpop.f32.mrb[221].mxu0 }
 0x435   : > { %v11301_v12 = vadd.f32 %v11300_v11, %v11299_v36  ;;  %v11302_v41 = vpop.f32.mrb[222].mxu0  ;;  %v11321_v43 = vpop.f32.mrb[192].mxu1 }
 0x436   : > { %v11303_v31 = vpop.f32.mrb[223].mxu0  ;;  %v11322_v51 = vpop.f32.mrb[193].mxu1 }
 0x437   : > { %v13967_v17 = vadd.f32 %v11301_v12, %v11189_v23  ;;  %v11304_v46 = vadd.f32 %v11303_v31, %v11302_v41  ;;  %v11323_v48 = vadd.f32 %v11322_v51, %v11321_v43  ;;  %v11324_v61 = vpop.f32.mrb[194].mxu1 }
 0x438   : > { %v11325_v20 = vpop.f32.mrb[195].mxu1 }
 0x439   : > { %v13969_v7 = vadd.f32 %v11304_v46, %v11192_v6  ;;  %v9128_v39 = vadd.f32 %v11323_v48, %v13850_v1  ;;  %v11326_v59 = vadd.f32 %v11325_v20, %v11324_v61 }
 0x43b   : > { %v11433_v35 = vpop.f32.mrb[224].mxu0  ;;  %v9131_v21 = vadd.f32 %v11326_v59, %v13853_v18 }
 0x43c   : > { %v11434_v13 = vpop.f32.mrb[225].mxu0 }
 0x43d   : > { %v11435_v32 = vadd.f32 %v11434_v13, %v11433_v35  ;;  %v11436_v27 = vpop.f32.mrb[226].mxu0  ;;  %v11327_v53 = vpop.f32.mrb[196].mxu1 }
 0x43e   : > { %v11437_v37 = vpop.f32.mrb[227].mxu0  ;;  %v11328_v2 = vpop.f32.mrb[197].mxu1 }
 0x43f   : > { %v11438_v60 = vadd.f32 %v11437_v37, %v11436_v27  ;;  %v13973_v15 = vadd.f32 %v11435_v32, %v9128_v39  ;;  %v11329_v42 = vadd.f32 %v11328_v2, %v11327_v53  ;;  %v11330_v56 = vpop.f32.mrb[198].mxu1 }
 0x440   : > { %v11331_v50 = vpop.f32.mrb[199].mxu1 }
 0x441   : > { %v13975_v26 = vadd.f32 %v11438_v60, %v9131_v21  ;;  %v9136_v1 = vadd.f32 %v11329_v42, %v13875_v30  ;;  %v11332_v28 = vadd.f32 %v11331_v50, %v11330_v56 }
 0x443   : > { %v11439_v23 = vpop.f32.mrb[228].mxu0  ;;  %v9139_v18 = vadd.f32 %v11332_v28, %v13878_v10 }
 0x444   : > { %v11440_v44 = vpop.f32.mrb[229].mxu0 }
 0x445   : > { %v11441_v29 = vadd.f32 %v11440_v44, %v11439_v23  ;;  %v11442_v6 = vpop.f32.mrb[230].mxu0  ;;  %v11333_v11 = vpop.f32.mrb[200].mxu1 }
 0x446   : > { %v11443_v36 = vpop.f32.mrb[231].mxu0  ;;  %v11334_v41 = vpop.f32.mrb[201].mxu1 }
 0x447   : > { %v11444_v12 = vadd.f32 %v11443_v36, %v11442_v6  ;;  %v13979_v31 = vadd.f32 %v11441_v29, %v9136_v1  ;;  %v11335_v43 = vadd.f32 %v11334_v41, %v11333_v11  ;;  %v11336_v46 = vpop.f32.mrb[202].mxu1 }
 0x448   : > { %v11337_v51 = vpop.f32.mrb[203].mxu1 }
 0x449   : > { %v13981_v48 = vadd.f32 %v11444_v12, %v9139_v18  ;;  %v9144_v30 = vadd.f32 %v11335_v43, %v13892_v3  ;;  %v11338_v61 = vadd.f32 %v11337_v51, %v11336_v46 }
 0x44b   : > { %v11445_v20 = vpop.f32.mrb[232].mxu0  ;;  %v9147_v10 = vadd.f32 %v11338_v61, %v13896_v0 }
 0x44c   : > { %v11446_v39 = vpop.f32.mrb[233].mxu0 }
 0x44d   : > { %v11447_v59 = vadd.f32 %v11446_v39, %v11445_v20  ;;  %v11448_v35 = vpop.f32.mrb[234].mxu0  ;;  %v11339_v21 = vpop.f32.mrb[204].mxu1 }
 0x44e   : > { %v11449_v13 = vpop.f32.mrb[235].mxu0  ;;  %v11340_v27 = vpop.f32.mrb[205].mxu1 }
 0x44f   : > { %v11450_v32 = vadd.f32 %v11449_v13, %v11448_v35  ;;  %v13985_v37 = vadd.f32 %v11447_v59, %v9144_v30  ;;  %v11341_v53 = vadd.f32 %v11340_v27, %v11339_v21  ;;  %v11342_v60 = vpop.f32.mrb[206].mxu1 }
 0x450   : > { %v11343_v2 = vpop.f32.mrb[207].mxu1 }
 0x451   : > { %v13987_v42 = vadd.f32 %v11450_v32, %v9147_v10  ;;  %v9152_v3 = vadd.f32 %v11341_v53, %v13901_v33  ;;  %v11344_v56 = vadd.f32 %v11343_v2, %v11342_v60 }
 0x453   : > { %v11451_v50 = vpop.f32.mrb[236].mxu0  ;;  %v9155_v0 = vadd.f32 %v11344_v56, %v13903_v25 }
 0x454   : > { %v11452_v1 = vpop.f32.mrb[237].mxu0 }
 0x455   : > { %v11453_v28 = vadd.f32 %v11452_v1, %v11451_v50  ;;  %v11454_v23 = vpop.f32.mrb[238].mxu0  ;;  %v11345_v18 = vpop.f32.mrb[208].mxu1 }
 0x456   : > { %v11455_v44 = vpop.f32.mrb[239].mxu0  ;;  %v11346_v6 = vpop.f32.mrb[209].mxu1 }
 0x457   : > { %v11456_v29 = vadd.f32 %v11455_v44, %v11454_v23  ;;  %v13991_v36 = vadd.f32 %v11453_v28, %v9152_v3  ;;  %v11347_v11 = vadd.f32 %v11346_v6, %v11345_v18  ;;  %v11348_v12 = vpop.f32.mrb[210].mxu1 }
 0x458   : > { %v11349_v41 = vpop.f32.mrb[211].mxu1 }
 0x459   : > { %v13993_v43 = vadd.f32 %v11456_v29, %v9155_v0  ;;  %v9160_v33 = vadd.f32 %v11347_v11, %v13908_v14  ;;  %v11350_v46 = vadd.f32 %v11349_v41, %v11348_v12 }
 0x45b   : > { %v11457_v51 = vpop.f32.mrb[240].mxu0  ;;  %v9163_v25 = vadd.f32 %v11350_v46, %v13910_v47 }
 0x45c   : > { %v11458_v30 = vpop.f32.mrb[241].mxu0 }
 0x45d   : > { %v11459_v61 = vadd.f32 %v11458_v30, %v11457_v51  ;;  %v11460_v20 = vpop.f32.mrb[242].mxu0  ;;  %v11351_v10 = vpop.f32.mrb[212].mxu1 }
 0x45e   : > { %v11461_v39 = vpop.f32.mrb[243].mxu0  ;;  %v11352_v35 = vpop.f32.mrb[213].mxu1 }
 0x45f   : > { %v11462_v59 = vadd.f32 %v11461_v39, %v11460_v20  ;;  %v13997_v13 = vadd.f32 %v11459_v61, %v9160_v33  ;;  %v11353_v21 = vadd.f32 %v11352_v35, %v11351_v10  ;;  %v11354_v32 = vpop.f32.mrb[214].mxu1 }
 0x460   : > { %v11355_v27 = vpop.f32.mrb[215].mxu1 }
 0x461   : > { %v13999_v53 = vadd.f32 %v11462_v59, %v9163_v25  ;;  %v9168_v14 = vadd.f32 %v11353_v21, %v13914_v45  ;;  %v11356_v60 = vadd.f32 %v11355_v27, %v11354_v32 }
 0x463   : > { %v11463_v2 = vpop.f32.mrb[244].mxu0  ;;  %v9171_v47 = vadd.f32 %v11356_v60, %v13916_v63 }
 0x464   : > { %v11464_v3 = vpop.f32.mrb[245].mxu0 }
 0x465   : > { %v11465_v56 = vadd.f32 %v11464_v3, %v11463_v2  ;;  %v11466_v50 = vpop.f32.mrb[246].mxu0  ;;  %v11357_v0 = vpop.f32.mrb[216].mxu1 }
 0x466   : > { %v11467_v1 = vpop.f32.mrb[247].mxu0  ;;  %v11358_v23 = vpop.f32.mrb[217].mxu1 }
 0x467   : > { %v11468_v28 = vadd.f32 %v11467_v1, %v11466_v50  ;;  %v14003_v44 = vadd.f32 %v11465_v56, %v9168_v14  ;;  %v11359_v18 = vadd.f32 %v11358_v23, %v11357_v0  ;;  %v11360_v29 = vpop.f32.mrb[218].mxu1 }
 0x468   : > { %v11361_v6 = vpop.f32.mrb[219].mxu1 }
 0x469   : > { %v14005_v11 = vadd.f32 %v11468_v28, %v9171_v47  ;;  %v9176_v45 = vadd.f32 %v11359_v18, %v13920_v54  ;;  %v11362_v12 = vadd.f32 %v11361_v6, %v11360_v29 }
 0x46b   : > { %v11469_v41 = vpop.f32.mrb[248].mxu0  ;;  %v9179_v63 = vadd.f32 %v11362_v12, %v13922_v49 }
 0x46c   : > { %v11470_v33 = vpop.f32.mrb[249].mxu0 }
 0x46d   : > { %v11471_v46 = vadd.f32 %v11470_v33, %v11469_v41  ;;  %v11472_v51 = vpop.f32.mrb[250].mxu0  ;;  %v11363_v25 = vpop.f32.mrb[220].mxu1 }
 0x46e   : > { %v11473_v30 = vpop.f32.mrb[251].mxu0  ;;  %v11364_v20 = vpop.f32.mrb[221].mxu1 }
 0x46f   : > { %v11474_v61 = vadd.f32 %v11473_v30, %v11472_v51  ;;  %v14009_v39 = vadd.f32 %v11471_v46, %v9176_v45  ;;  %v11365_v10 = vadd.f32 %v11364_v20, %v11363_v25  ;;  %v11366_v59 = vpop.f32.mrb[222].mxu1 }
 0x470   : > { %v11367_v35 = vpop.f32.mrb[223].mxu1 }
 0x471   : > { %v14011_v21 = vadd.f32 %v11474_v61, %v9179_v63  ;;  %v9184_v54 = vadd.f32 %v11365_v10, %v13926_v22  ;;  %v11368_v32 = vadd.f32 %v11367_v35, %v11366_v59 }
 0x473   : > { %v11475_v27 = vpop.f32.mrb[252].mxu0  ;;  %v9187_v49 = vadd.f32 %v11368_v32, %v13928_v40 }
 0x474   : > { %v11476_v14 = vpop.f32.mrb[253].mxu0 }
 0x475   : > { %v11477_v60 = vadd.f32 %v11476_v14, %v11475_v27  ;;  %v11478_v2 = vpop.f32.mrb[254].mxu0  ;;  %v11369_v47 = vpop.f32.mrb[224].mxu1 }
 0x476   : > { %v11479_v3 = vpop.f32.mrb[255].mxu0  ;;  %v11370_v50 = vpop.f32.mrb[225].mxu1 }
 0x477   : > { %v11480_v56 = vadd.f32 %v11479_v3, %v11478_v2  ;;  %v14015_v1 = vadd.f32 %v11477_v60, %v9184_v54  ;;  %v11371_v0 = vadd.f32 %v11370_v50, %v11369_v47  ;;  %v11372_v28 = vpop.f32.mrb[226].mxu1 }
 0x478   : > { %v11373_v23 = vpop.f32.mrb[227].mxu1 }
 0x479   : > { %v14017_v18 = vadd.f32 %v11480_v56, %v9187_v49  ;;  %v9192_v22 = vadd.f32 %v11371_v0, %v13932_v5  ;;  %v11374_v29 = vadd.f32 %v11373_v23, %v11372_v28 }
 0x47b   : > { %v11481_v6 = vpop.f32.mrb[0].mxu0  ;;  %v9195_v40 = vadd.f32 %v11374_v29, %v13934_v24 }
 0x47c   : > { %v11482_v45 = vpop.f32.mrb[1].mxu0 }
 0x47d   : > { %v11483_v12 = vadd.f32 %v11482_v45, %v11481_v6  ;;  %v11484_v41 = vpop.f32.mrb[2].mxu0  ;;  %v11375_v63 = vpop.f32.mrb[228].mxu1 }
 0x47e   : > { %v11485_v33 = vpop.f32.mrb[3].mxu0  ;;  %v11376_v51 = vpop.f32.mrb[229].mxu1 }
 0x47f   : > { %v11486_v46 = vadd.f32 %v11485_v33, %v11484_v41  ;;  %v14021_v30 = vadd.f32 %v11483_v12, %v9192_v22  ;;  %v11377_v25 = vadd.f32 %v11376_v51, %v11375_v63  ;;  %v11378_v61 = vpop.f32.mrb[230].mxu1 }
 0x480   : > { %v11379_v20 = vpop.f32.mrb[231].mxu1 }
 0x481   : > { %v14023_v10 = vadd.f32 %v11486_v46, %v9195_v40  ;;  %v9200_v5 = vadd.f32 %v11377_v25, %v13938_v58  ;;  %v11380_v59 = vadd.f32 %v11379_v20, %v11378_v61 }
 0x483   : > { %v11487_v35 = vpop.f32.mrb[4].mxu0  ;;  %v9203_v24 = vadd.f32 %v11380_v59, %v13940_v8 }
 0x484   : > { %v11488_v54 = vpop.f32.mrb[5].mxu0 }
 0x485   : > { %v11489_v32 = vadd.f32 %v11488_v54, %v11487_v35  ;;  %v11490_v27 = vpop.f32.mrb[6].mxu0  ;;  %v11381_v49 = vpop.f32.mrb[232].mxu1 }
 0x486   : > { %v11491_v14 = vpop.f32.mrb[7].mxu0  ;;  %v11382_v2 = vpop.f32.mrb[233].mxu1 }
 0x487   : > { %v11492_v60 = vadd.f32 %v11491_v14, %v11490_v27  ;;  %v14027_v3 = vadd.f32 %v11489_v32, %v9200_v5  ;;  %v11383_v47 = vadd.f32 %v11382_v2, %v11381_v49  ;;  %v11384_v56 = vpop.f32.mrb[234].mxu1 }
 0x488   : > { %v11385_v50 = vpop.f32.mrb[235].mxu1 }
 0x489   : > { %v14029_v0 = vadd.f32 %v11492_v60, %v9203_v24  ;;  %v9208_v58 = vadd.f32 %v11383_v47, %v13944_v52  ;;  %v11386_v28 = vadd.f32 %v11385_v50, %v11384_v56 }
 0x48b   : > { %v11493_v23 = vpop.f32.mrb[8].mxu0  ;;  %v9211_v8 = vadd.f32 %v11386_v28, %v13946_v55 }
 0x48c   : > { %v11494_v22 = vpop.f32.mrb[9].mxu0 }
 0x48d   : > { %v11495_v29 = vadd.f32 %v11494_v22, %v11493_v23  ;;  %v11496_v6 = vpop.f32.mrb[10].mxu0  ;;  %v11387_v40 = vpop.f32.mrb[236].mxu1 }
 0x48e   : > { %v11497_v45 = vpop.f32.mrb[11].mxu0  ;;  %v11388_v41 = vpop.f32.mrb[237].mxu1 }
 0x48f   : > { %v11498_v12 = vadd.f32 %v11497_v45, %v11496_v6  ;;  %v14033_v33 = vadd.f32 %v11495_v29, %v9208_v58  ;;  %v11389_v63 = vadd.f32 %v11388_v41, %v11387_v40  ;;  %v11390_v46 = vpop.f32.mrb[238].mxu1 }
 0x490   : > { %v11391_v51 = vpop.f32.mrb[239].mxu1 }
 0x491   : > { %v14035_v25 = vadd.f32 %v11498_v12, %v9211_v8  ;;  %v9216_v52 = vadd.f32 %v11389_v63, %v13950_v57  ;;  %v11392_v61 = vadd.f32 %v11391_v51, %v11390_v46 }
 0x493   : > { %v11499_v20 = vpop.f32.mrb[12].mxu0  ;;  %v9219_v55 = vadd.f32 %v11392_v61, %v13953_v38 }
 0x494   : > { %v11500_v5 = vpop.f32.mrb[13].mxu0 }
 0x495   : > { %v11501_v59 = vadd.f32 %v11500_v5, %v11499_v20  ;;  %v11502_v35 = vpop.f32.mrb[14].mxu0  ;;  %v11393_v24 = vpop.f32.mrb[240].mxu1 }
 0x496   : > { %v11503_v54 = vpop.f32.mrb[15].mxu0  ;;  %v11394_v27 = vpop.f32.mrb[241].mxu1 }
 0x497   : > { %v11504_v32 = vadd.f32 %v11503_v54, %v11502_v35  ;;  %v14039_v14 = vadd.f32 %v11501_v59, %v9216_v52  ;;  %v11395_v49 = vadd.f32 %v11394_v27, %v11393_v24  ;;  %v11396_v60 = vpop.f32.mrb[242].mxu1 }
 0x498   : > { %v11397_v2 = vpop.f32.mrb[243].mxu1 }
 0x499   : > { %v14041_v47 = vadd.f32 %v11504_v32, %v9219_v55  ;;  %v9224_v57 = vadd.f32 %v11395_v49, %v13955_v19  ;;  %v11398_v56 = vadd.f32 %v11397_v2, %v11396_v60 }
 0x49b   : > { %v11505_v50 = vpop.f32.mrb[16].mxu0  ;;  %v9227_v38 = vadd.f32 %v11398_v56, %v13957_v4 }
 0x49c   : > { %v11506_v58 = vpop.f32.mrb[17].mxu0 }
 0x49d   : > { %v11507_v28 = vadd.f32 %v11506_v58, %v11505_v50  ;;  %v11508_v23 = vpop.f32.mrb[18].mxu0  ;;  %v11399_v8 = vpop.f32.mrb[244].mxu1 }
 0x49e   : > { %v11509_v22 = vpop.f32.mrb[19].mxu0  ;;  %v11400_v6 = vpop.f32.mrb[245].mxu1 }
 0x49f   : > { %v11510_v29 = vadd.f32 %v11509_v22, %v11508_v23  ;;  %v14045_v45 = vadd.f32 %v11507_v28, %v9224_v57  ;;  %v11401_v40 = vadd.f32 %v11400_v6, %v11399_v8  ;;  %v11402_v12 = vpop.f32.mrb[246].mxu1 }
 0x4a0   : > { %v11403_v41 = vpop.f32.mrb[247].mxu1 }
 0x4a1   : > { %v14047_v63 = vadd.f32 %v11510_v29, %v9227_v38  ;;  %v9232_v19 = vadd.f32 %v11401_v40, %v13959_v34  ;;  %v11404_v46 = vadd.f32 %v11403_v41, %v11402_v12 }
 0x4a3   : > { %v11511_v51 = vpop.f32.mrb[20].mxu0  ;;  %v9235_v4 = vadd.f32 %v11404_v46, %v13961_v62 }
 0x4a4   : > { %v11512_v52 = vpop.f32.mrb[21].mxu0 }
 0x4a5   : > { %v11513_v61 = vadd.f32 %v11512_v52, %v11511_v51  ;;  %v11514_v20 = vpop.f32.mrb[22].mxu0  ;;  %v11405_v55 = vpop.f32.mrb[248].mxu1 }
 0x4a6   : > { %v11515_v5 = vpop.f32.mrb[23].mxu0  ;;  %v11406_v35 = vpop.f32.mrb[249].mxu1 }
 0x4a7   : > { %v11516_v59 = vadd.f32 %v11515_v5, %v11514_v20  ;;  %v14051_v54 = vadd.f32 %v11513_v61, %v9232_v19  ;;  %v11407_v24 = vadd.f32 %v11406_v35, %v11405_v55  ;;  %v11408_v32 = vpop.f32.mrb[250].mxu1  ;;  %v14068_v35 = vld [vmem:[#allocation7 + $0x6] ss:$0 sm:$0xff] }
 0x4a8   : > { %v11409_v27 = vpop.f32.mrb[251].mxu1 }
 0x4a9   : > { %v14053_v49 = vadd.f32 %v11516_v59, %v9235_v4  ;;  %v9240_v34 = vadd.f32 %v11407_v24, %v13963_v9  ;;  %v11410_v60 = vadd.f32 %v11409_v27, %v11408_v32  ;;  %v14063_v4 = vld [vmem:[#allocation7 + $0x5] ss:$0 sm:$0xff] }
 0x4ab   : > { %v11517_v2 = vpop.f32.mrb[24].mxu0  ;;  %v9243_v62 = vadd.f32 %v11410_v60, %v13965_v16 }
 0x4ac   : > { %v11518_v57 = vpop.f32.mrb[25].mxu0 }
 0x4ad   : > { %v11519_v56 = vadd.f32 %v11518_v57, %v11517_v2  ;;  %v11520_v50 = vpop.f32.mrb[26].mxu0  ;;  %v11411_v38 = vpop.f32.mrb[252].mxu1 }
 0x4ae   : > { %v11521_v58 = vpop.f32.mrb[27].mxu0  ;;  %v11412_v23 = vpop.f32.mrb[253].mxu1 }
 0x4af   : > { %v11522_v28 = vadd.f32 %v11521_v58, %v11520_v50  ;;  %v14057_v22 = vadd.f32 %v11519_v56, %v9240_v34  ;;  %v11413_v8 = vadd.f32 %v11412_v23, %v11411_v38  ;;  %v11414_v29 = vpop.f32.mrb[254].mxu1  ;;  %v12362_v56 = vld [vmem:[%s12813_s28 + $0x10] sm:$0xff]  ;;  %v12363_v58 = vld [vmem:[%s12813_s28] sm:$0xff] }
 0x4b0   : > { %v11415_v6 = vpop.f32.mrb[255].mxu1 }
 0x4b1   : > { %v14059_v40 = vadd.f32 %v11522_v28, %v9243_v62  ;;  %v9248_v9 = vadd.f32 %v11413_v8, %v13967_v17  ;;  %v11416_v12 = vadd.f32 %v11415_v6, %v11414_v29 }
 0x4b3   : > { %v11523_v41 = vpop.f32.mrb[28].mxu0  ;;  %v9251_v19 = vadd.f32 %v11416_v12, %v13969_v7 }
 0x4b4   : > { %v11524_v16 = vpop.f32.mrb[29].mxu0 }
 0x4b5   : > { %v11525_v46 = vadd.f32 %v11524_v16, %v11523_v41  ;;  %v11526_v51 = vpop.f32.mrb[30].mxu0  ;;  %v11619_v61 = vpop.f32.mrb[0].mxu1 }
 0x4b6   : > { %v11527_v52 = vpop.f32.mrb[31].mxu0  ;;  %v9458_v5 = vadd.f32 %v11619_v61, %v13979_v31  ;;  %v9449_v55 = vpop.f32.mrb[1].mxu1 }
 0x4b7   : > { %v11528_v20 = vadd.f32 %v11527_v52, %v11526_v51  ;;  %v14066_v59 = vadd.f32 %v11525_v46, %v9248_v9  ;;  %v9450_v17 = vadd.f32 %v9449_v55, %v13973_v15  ;;  %v11620_v7 = vpop.f32.mrb[2].mxu1  ;;  %v12365_v9 = vld [vmem:[%s12813_s28 + $0x8] sm:$0xff]  ;;  %v12366_v55 = vld [vmem:[%s12813_s28 + $0x30] sm:$0xff] }
 0x4b8   : > { %v9582_v24 = vmul.f32 %v14063_v4, %v9458_v5  ;;  %v9461_v32 = vadd.f32 %v11620_v7, %v13981_v48  ;;  %v9452_v27 = vpop.f32.mrb[3].mxu1  ;;  %v12367_v7 = vld [vmem:[%s12813_s28 + $0x20] sm:$0xff] }
 0x4b9   : > { %v14073_v34 = vadd.f32 %v11528_v20, %v9251_v19  ;;  %v9580_v31 = vmul.f32 %v14063_v4, %v9450_v17  ;;  %v9453_v60 = vadd.f32 %v9452_v27, %v13975_v26  ;;  %v12364_v26 = vld [vmem:[%s12813_s28 + $0x18] sm:$0xff] }
 0x4ba   : > { %v9618_v2 = vadd.f32 %v14068_v35, %v9582_v24  ;;  %v9583_v57 = vmul.f32 %v14063_v4, %v9461_v32  ;;  %v12368_v27 = vld [vmem:[%s12813_s28 + $0x38] sm:$0xff] }
 0x4bb   : > { %v9616_v15 = vadd.f32 %v14068_v35, %v9580_v31  ;;  %v9581_v62 = vmul.f32 %v14063_v4, %v9453_v60 }
 0x4bc   : > { %v9650_v48 = vadd.f32 %v12362_v56, %v9618_v2  ;;  %v9619_v50 = vadd.f32 %v14068_v35, %v9583_v57  ;;  %v12369_v57 = vld [vmem:[%s12813_s28 + $0x28] sm:$0xff] }
 0x4bd   : > { %v9648_v38 = vadd.f32 %v12363_v58, %v9616_v15  ;;  %v9617_v28 = vadd.f32 %v14068_v35, %v9581_v62  ;;  %v11623_v23 = vpop.f32.mrb[4].mxu1 }
 0x4be   : > { %9682 = vst [vmem:[%s14087_s21 + $0x10] sm:$0xff] %v9650_v48  ;;  %v9651_v8 = vadd.f32 %v12364_v26, %v9619_v50  ;;  %v9474_v29 = vadd.f32 %v11623_v23, %v13991_v36  ;;  %v9465_v6 = vpop.f32.mrb[5].mxu1 }
 0x4bf   : > { %9680 = vst [vmem:[%s14087_s21] sm:$0xff] %v9648_v38  ;;  %v9649_v12 = vadd.f32 %v12365_v9, %v9617_v28  ;;  %v9466_v41 = vadd.f32 %v9465_v6, %v13985_v37  ;;  %v11624_v19 = vpop.f32.mrb[6].mxu1  ;;  %v12371_v6 = vld [vmem:[%s12813_s28 + $0x40] sm:$0xff] }
 0x4c0   : > { %9683 = vst [vmem:[%s14087_s21 + $0x18] sm:$0xff] %v9651_v8  ;;  %v9586_v16 = vmul.f32 %v14063_v4, %v9474_v29  ;;  %v9477_v46 = vadd.f32 %v11624_v19, %v13993_v43  ;;  %v9468_v51 = vpop.f32.mrb[7].mxu1  ;;  %v12370_v8 = vld [vmem:[%s12813_s28 + $0x50] sm:$0xff] }
 0x4c1   : > { %9681 = vst [vmem:[%s14087_s21 + $0x8] sm:$0xff] %v9649_v12  ;;  %v9584_v36 = vmul.f32 %v14063_v4, %v9466_v41  ;;  %v9469_v52 = vadd.f32 %v9468_v51, %v13987_v42  ;;  %v12372_v41 = vld [vmem:[%s12813_s28 + $0x58] sm:$0xff]  ;;  %v12373_v51 = vld [vmem:[%s12813_s28 + $0x48] sm:$0xff] }
 0x4c2   : > { %v9622_v61 = vadd.f32 %v14068_v35, %v9586_v16  ;;  %v9587_v37 = vmul.f32 %v14063_v4, %v9477_v46 }
 0x4c3   : > { %v9620_v20 = vadd.f32 %v14068_v35, %v9584_v36  ;;  %v9585_v5 = vmul.f32 %v14063_v4, %v9469_v52 }
 0x4c4   : > { %v9654_v43 = vadd.f32 %v12366_v55, %v9622_v61  ;;  %v9623_v17 = vadd.f32 %v14068_v35, %v9587_v37 }
 0x4c5   : > { %v9652_v24 = vadd.f32 %v12367_v7, %v9620_v20  ;;  %v9621_v32 = vadd.f32 %v14068_v35, %v9585_v5  ;;  %v11627_v42 = vpop.f32.mrb[8].mxu1 }
 0x4c6   : > { %9686 = vst [vmem:[%s14087_s21 + $0x30] sm:$0xff] %v9654_v43  ;;  %v9655_v31 = vadd.f32 %v12368_v27, %v9623_v17  ;;  %v9490_v60 = vadd.f32 %v11627_v42, %v14003_v44  ;;  %v9481_v2 = vpop.f32.mrb[9].mxu1  ;;  %v12375_v42 = vld [vmem:[%s12813_s28 + $0x60] sm:$0xff] }
 0x4c7   : > { %9684 = vst [vmem:[%s14087_s21 + $0x20] sm:$0xff] %v9652_v24  ;;  %v9653_v15 = vadd.f32 %v12369_v57, %v9621_v32  ;;  %v9482_v62 = vadd.f32 %v9481_v2, %v13997_v13  ;;  %v11628_v56 = vpop.f32.mrb[10].mxu1  ;;  %v12374_v24 = vld [vmem:[%s12813_s28 + $0x70] sm:$0xff] }
 0x4c8   : > { %9687 = vst [vmem:[%s14087_s21 + $0x38] sm:$0xff] %v9655_v31  ;;  %v9590_v48 = vmul.f32 %v14063_v4, %v9490_v60  ;;  %v9493_v50 = vadd.f32 %v11628_v56, %v14005_v11  ;;  %v9484_v58 = vpop.f32.mrb[11].mxu1  ;;  %v12376_v60 = vld [vmem:[%s12813_s28 + $0x78] sm:$0xff] }
 0x4c9   : > { %9685 = vst [vmem:[%s14087_s21 + $0x28] sm:$0xff] %v9653_v15  ;;  %v9588_v44 = vmul.f32 %v14063_v4, %v9482_v62  ;;  %v9485_v38 = vadd.f32 %v9484_v58, %v13999_v53  ;;  %v12377_v62 = vld [vmem:[%s12813_s28 + $0x68] sm:$0xff] }
 0x4ca   : > { %v9626_v28 = vadd.f32 %v14068_v35, %v9590_v48  ;;  %v9591_v13 = vmul.f32 %v14063_v4, %v9493_v50 }
 0x4cb   : > { %v9624_v23 = vadd.f32 %v14068_v35, %v9588_v44  ;;  %v9589_v26 = vmul.f32 %v14063_v4, %v9485_v38 }
 0x4cc   : > { %v9658_v11 = vadd.f32 %v12370_v8, %v9626_v28  ;;  %v9627_v29 = vadd.f32 %v14068_v35, %v9591_v13  ;;  %v12378_v8 = vld [vmem:[%s12813_s28 + $0x90] sm:$0xff] }
 0x4cd   : > { %v9656_v9 = vadd.f32 %v12371_v6, %v9624_v23  ;;  %v9625_v12 = vadd.f32 %v14068_v35, %v9589_v26  ;;  %v11631_v53 = vpop.f32.mrb[12].mxu1 }
 0x4ce   : > { %9690 = vst [vmem:[%s14087_s21 + $0x50] sm:$0xff] %v9658_v11  ;;  %v9659_v19 = vadd.f32 %v12372_v41, %v9627_v29  ;;  %v9506_v16 = vadd.f32 %v11631_v53, %v14015_v1  ;;  %v9497_v46 = vpop.f32.mrb[13].mxu1  ;;  %v12379_v29 = vld [vmem:[%s12813_s28 + $0x80] sm:$0xff] }
 0x4cf   : > { %9688 = vst [vmem:[%s14087_s21 + $0x40] sm:$0xff] %v9656_v9  ;;  %v9657_v36 = vadd.f32 %v12373_v51, %v9625_v12  ;;  %v9498_v52 = vadd.f32 %v9497_v46, %v14009_v39  ;;  %v11632_v61 = vpop.f32.mrb[14].mxu1  ;;  %v12380_v12 = vld [vmem:[%s12813_s28 + $0x98] sm:$0xff] }
 0x4d0   : > { %9691 = vst [vmem:[%s14087_s21 + $0x58] sm:$0xff] %v9659_v19  ;;  %v9594_v37 = vmul.f32 %v14063_v4, %v9506_v16  ;;  %v9509_v20 = vadd.f32 %v11632_v61, %v14017_v18  ;;  %v9500_v5 = vpop.f32.mrb[15].mxu1  ;;  %v12381_v16 = vld [vmem:[%s12813_s28 + $0x88] sm:$0xff] }
 0x4d1   : > { %9689 = vst [vmem:[%s14087_s21 + $0x48] sm:$0xff] %v9657_v36  ;;  %v9592_v1 = vmul.f32 %v14063_v4, %v9498_v52  ;;  %v9501_v55 = vadd.f32 %v9500_v5, %v14011_v21 }
 0x4d2   : > { %v9630_v43 = vadd.f32 %v14068_v35, %v9594_v37  ;;  %v9595_v39 = vmul.f32 %v14063_v4, %v9509_v20 }
 0x4d3   : > { %v9628_v17 = vadd.f32 %v14068_v35, %v9592_v1  ;;  %v9593_v7 = vmul.f32 %v14063_v4, %v9501_v55 }
 0x4d4   : > { %v9662_v18 = vadd.f32 %v12374_v24, %v9630_v43  ;;  %v9631_v32 = vadd.f32 %v14068_v35, %v9595_v39  ;;  %v12382_v43 = vld [vmem:[%s12813_s28 + $0xb0] sm:$0xff] }
 0x4d5   : > { %v9660_v27 = vadd.f32 %v12375_v42, %v9628_v17  ;;  %v9629_v31 = vadd.f32 %v14068_v35, %v9593_v7  ;;  %v11635_v21 = vpop.f32.mrb[16].mxu1  ;;  %v12383_v17 = vld [vmem:[%s12813_s28 + $0xa0] sm:$0xff] }
 0x4d6   : > { %9694 = vst [vmem:[%s14087_s21 + $0x70] sm:$0xff] %v9662_v18  ;;  %v9663_v2 = vadd.f32 %v12376_v60, %v9631_v32  ;;  %v9522_v57 = vadd.f32 %v11635_v21, %v14027_v3  ;;  %v9513_v15 = vpop.f32.mrb[17].mxu1  ;;  %v12384_v18 = vld [vmem:[%s12813_s28 + $0xb8] sm:$0xff] }
 0x4d7   : > { %9692 = vst [vmem:[%s14087_s21 + $0x60] sm:$0xff] %v9660_v27  ;;  %v9661_v56 = vadd.f32 %v12377_v62, %v9629_v31  ;;  %v9514_v48 = vadd.f32 %v9513_v15, %v14021_v30  ;;  %v11636_v50 = vpop.f32.mrb[18].mxu1  ;;  %v12385_v31 = vld [vmem:[%s12813_s28 + $0xa8] sm:$0xff] }
 0x4d8   : > { %9695 = vst [vmem:[%s14087_s21 + $0x78] sm:$0xff] %v9663_v2  ;;  %v9598_v58 = vmul.f32 %v14063_v4, %v9522_v57  ;;  %v9525_v44 = vadd.f32 %v11636_v50, %v14029_v0  ;;  %v9516_v38 = vpop.f32.mrb[19].mxu1 }
 0x4d9   : > { %9693 = vst [vmem:[%s14087_s21 + $0x68] sm:$0xff] %v9661_v56  ;;  %v9596_v3 = vmul.f32 %v14063_v4, %v9514_v48  ;;  %v9517_v28 = vadd.f32 %v9516_v38, %v14023_v10 }
 0x4da   : > { %v9634_v13 = vadd.f32 %v14068_v35, %v9598_v58  ;;  %v9599_v30 = vmul.f32 %v14063_v4, %v9525_v44  ;;  %v12386_v44 = vld [vmem:[%s12813_s28 + $0xd0] sm:$0xff] }
 0x4db   : > { %v9632_v23 = vadd.f32 %v14068_v35, %v9596_v3  ;;  %v9597_v26 = vmul.f32 %v14063_v4, %v9517_v28  ;;  %v12387_v3 = vld [vmem:[%s12813_s28 + $0xc0] sm:$0xff] }
 0x4dc   : > { %v9666_v0 = vadd.f32 %v12378_v8, %v9634_v13  ;;  %v9635_v11 = vadd.f32 %v14068_v35, %v9599_v30  ;;  %v12388_v30 = vld [vmem:[%s12813_s28 + $0xd8] sm:$0xff] }
 0x4dd   : > { %v9664_v6 = vadd.f32 %v12379_v29, %v9632_v23  ;;  %v9633_v9 = vadd.f32 %v14068_v35, %v9597_v26  ;;  %v11639_v10 = vpop.f32.mrb[20].mxu1 }
 0x4de   : > { %9698 = vst [vmem:[%s14087_s21 + $0x90] sm:$0xff] %v9666_v0  ;;  %v9667_v53 = vadd.f32 %v12380_v12, %v9635_v11  ;;  %v9538_v41 = vadd.f32 %v11639_v10, %v14039_v14  ;;  %v9529_v19 = vpop.f32.mrb[21].mxu1  ;;  %v12389_v0 = vld [vmem:[%s12813_s28 + $0xc8] sm:$0xff] }
 0x4df   : > { %9696 = vst [vmem:[%s14087_s21 + $0x80] sm:$0xff] %v9664_v6  ;;  %v9665_v46 = vadd.f32 %v12381_v16, %v9633_v9  ;;  %v9530_v51 = vadd.f32 %v9529_v19, %v14033_v33  ;;  %v11640_v36 = vpop.f32.mrb[22].mxu1 }
 0x4e0   : > { %9699 = vst [vmem:[%s14087_s21 + $0x98] sm:$0xff] %v9667_v53  ;;  %v9602_v52 = vmul.f32 %v14063_v4, %v9538_v41  ;;  %v9541_v61 = vadd.f32 %v11640_v36, %v14041_v47  ;;  %v9532_v37 = vpop.f32.mrb[23].mxu1 }
 0x4e1   : > { %9697 = vst [vmem:[%s14087_s21 + $0x88] sm:$0xff] %v9665_v46  ;;  %v9600_v14 = vmul.f32 %v14063_v4, %v9530_v51  ;;  %v9533_v20 = vadd.f32 %v9532_v37, %v14035_v25 }
 0x4e2   : > { %v9638_v5 = vadd.f32 %v14068_v35, %v9602_v52  ;;  %v9603_v33 = vmul.f32 %v14063_v4, %v9541_v61  ;;  %v12392_v61 = vld [vmem:[%s12813_s28 + $0xf8] sm:$0xff] }
 0x4e3   : > { %v9636_v1 = vadd.f32 %v14068_v35, %v9600_v14  ;;  %v9601_v55 = vmul.f32 %v14063_v4, %v9533_v20 }
 0x4e4   : > { %v9670_v47 = vadd.f32 %v12382_v43, %v9638_v5  ;;  %v9639_v39 = vadd.f32 %v14068_v35, %v9603_v33 }
 0x4e5   : > { %v9668_v7 = vadd.f32 %v12383_v17, %v9636_v1  ;;  %v9637_v24 = vadd.f32 %v14068_v35, %v9601_v55  ;;  %v11643_v25 = vpop.f32.mrb[24].mxu1 }
 0x4e6   : > { %9702 = vst [vmem:[%s14087_s21 + $0xb0] sm:$0xff] %v9670_v47  ;;  %v9671_v32 = vadd.f32 %v12384_v18, %v9639_v39  ;;  %v9554_v42 = vadd.f32 %v11643_v25, %v14051_v54  ;;  %v9545_v27 = vpop.f32.mrb[25].mxu1 }
 0x4e7   : > { %9700 = vst [vmem:[%s14087_s21 + $0xa0] sm:$0xff] %v9668_v7  ;;  %v9669_v21 = vadd.f32 %v12385_v31, %v9637_v24  ;;  %v9546_v60 = vadd.f32 %v9545_v27, %v14045_v45  ;;  %v11644_v2 = vpop.f32.mrb[26].mxu1 }
 0x4e8   : > { %9703 = vst [vmem:[%s14087_s21 + $0xb8] sm:$0xff] %v9671_v32  ;;  %v9606_v57 = vmul.f32 %v14063_v4, %v9554_v42  ;;  %v9557_v15 = vadd.f32 %v11644_v2, %v14053_v49  ;;  %v9548_v62 = vpop.f32.mrb[27].mxu1 }
 0x4e9   : > { %9701 = vst [vmem:[%s14087_s21 + $0xa8] sm:$0xff] %v9669_v21  ;;  %v9604_v54 = vmul.f32 %v14063_v4, %v9546_v60  ;;  %v9549_v56 = vadd.f32 %v9548_v62, %v14047_v63 }
 0x4ea   : > { %v9642_v48 = vadd.f32 %v14068_v35, %v9606_v57  ;;  %v9607_v45 = vmul.f32 %v14063_v4, %v9557_v15 }
 0x4eb   : > { %v9640_v50 = vadd.f32 %v14068_v35, %v9604_v54  ;;  %v9605_v58 = vmul.f32 %v14063_v4, %v9549_v56 }
 0x4ec   : > { %v9674_v49 = vadd.f32 %v12386_v44, %v9642_v48  ;;  %v9643_v38 = vadd.f32 %v14068_v35, %v9607_v45 }
 0x4ed   : > { %v9672_v28 = vadd.f32 %v12387_v3, %v9640_v50  ;;  %v9641_v13 = vadd.f32 %v14068_v35, %v9605_v58  ;;  %v11647_v63 = vpop.f32.mrb[28].mxu1 }
 0x4ee   : > { %9706 = vst [vmem:[%s14087_s21 + $0xd0] sm:$0xff] %v9674_v49  ;;  %v9675_v23 = vadd.f32 %v12388_v30, %v9643_v38  ;;  %v9570_v26 = vadd.f32 %v11647_v63, %v14066_v59  ;;  %v9561_v8 = vpop.f32.mrb[29].mxu1 }
 0x4ef   : > { %9704 = vst [vmem:[%s14087_s21 + $0xc0] sm:$0xff] %v9672_v28  ;;  %v9673_v11 = vadd.f32 %v12389_v0, %v9641_v13  ;;  %v9562_v29 = vadd.f32 %v9561_v8, %v14057_v22  ;;  %v11648_v6 = vpop.f32.mrb[30].mxu1 }
 0x4f0   : > { %9707 = vst [vmem:[%s14087_s21 + $0xd8] sm:$0xff] %v9675_v23  ;;  %v9610_v9 = vmul.f32 %v14063_v4, %v9570_v26  ;;  %v9573_v10 = vadd.f32 %v11648_v6, %v14073_v34  ;;  %v9564_v12 = vpop.f32.mrb[31].mxu1  ;;  %v12390_v34 = vld [vmem:[%s12813_s28 + $0xf0] sm:$0xff] }
 0x4f1   : > { %9705 = vst [vmem:[%s14087_s21 + $0xc8] sm:$0xff] %v9673_v11  ;;  %v9608_v59 = vmul.f32 %v14063_v4, %v9562_v29  ;;  %v9565_v53 = vadd.f32 %v9564_v12, %v14059_v40  ;;  %v12391_v40 = vld [vmem:[%s12813_s28 + $0xe0] sm:$0xff] }
 0x4f2   : > { %v9646_v41 = vadd.f32 %v14068_v35, %v9610_v9  ;;  %v9611_v19 = vmul.f32 %v14063_v4, %v9573_v10 }
 0x4f3   : > { %v9644_v22 = vadd.f32 %v14068_v35, %v9608_v59  ;;  %v9609_v16 = vmul.f32 %v14063_v4, %v9565_v53  ;;  %v12393_v4 = vld [vmem:[%s12813_s28 + $0xe8] sm:$0xff] }
 0x4f4   : > { %v9678_v46 = vadd.f32 %v12390_v34, %v9646_v41  ;;  %v9647_v51 = vadd.f32 %v14068_v35, %v9611_v19 }
 0x4f5   : > { %v9676_v36 = vadd.f32 %v12391_v40, %v9644_v22  ;;  %v9645_v52 = vadd.f32 %v14068_v35, %v9609_v16 }
 0x4f6   : > { %9710 = vst [vmem:[%s14087_s21 + $0xf0] sm:$0xff] %v9678_v46  ;;  %v9679_v37 = vadd.f32 %v12392_v61, %v9647_v51 }
 0x4f7   : > { %9708 = vst [vmem:[%s14087_s21 + $0xe0] sm:$0xff] %v9676_v36  ;;  %v9677_v14 = vadd.f32 %v12393_v4, %v9645_v52 }
 0x4f8   : > { %9711 = vst [vmem:[%s14087_s21 + $0xf8] sm:$0xff] %v9679_v37 }
 0x4f9   : > { %9709 = vst [vmem:[%s14087_s21 + $0xe8] sm:$0xff] %v9677_v14 }
 0x4fa   : > { %12521 = shalt.err (!%p12518_p13)
}
 0x4fb   : > { %s12522_s11 = scalar_lea.hbm %s14236_s19, 4096  ;;  %s12526_s8 = scalar_lea.hbm %s14290_s4, 8192 }
 0x4fc   : > { %p12523_p0 = scmp.ne.s32.totalorder %s14236_s19, %s12522_s11  ;;  %p12527_p9 = scmp.lt.u32.totalorder %s14236_s19, %s14290_s4 }
 0x4fd   : > { %p12528_p12 = scmp.lt.u32.totalorder %s12526_s8, %s12522_s11  ;;  %p12530_p1 = scmp.lt.u32.totalorder %s12522_s11, %s14236_s19 }
 0x4fe   : > { %p12524_p5 = pnand %p12523_p0, %p12759_p6 }
 0x4ff   : > { %p12529_p2 = por %p12528_p12, %p12527_p9 }
 0x500   : > { %p12525_p11 = pneg %p12524_p5 }
 0x501   : > { %p12531_p4 = por %p12530_p1, %p12529_p2 }
 0x503   : > { %p12532_p8 = pnand %p12531_p4, %p12525_p11 }
 0x505   : > { %12535 = shalt.err (!%p12532_p8)
}
 0x506   : > { %s12594_s21 = smov 128   ;;  %s12595_s23 = smov 8  }
 0x507   : > { %11663 = dma.vmem_to_hbm [thread:$0]  (%p12759_p6), %s14238_s24, 4096, %s14236_s19, %s9713_s6, %s12594_s21, %s12594_s21, %s12595_s23  }
 0x508 PF: > { %s9741_s29 = sand.u32 1, %s12570_s15   ;;  %p14316_p3 = scmp.ne.s32.totalorder %s14295_s22, 0 }
 0x509   : > { %p14317_p7 = scmp.ge.s32.totalorder %s12582_s18, 2  ;;  %s9742_s5 = scalar_lea.sflag [#allocation6], %s9741_s29 }
 0x50b   : > { %p11680_p10 = pnand %p14317_p7, %p14316_p3 }
 0x50d   : > { %12565 = dma.done.wait (!%p11680_p10), %s9742_s5, 4096  }
 0x50e   : > { %12567 = vsyncadd (!%p11680_p10), %s9742_s5, 4294963200  ;;  %p19_p13 = scmp.ge.s32.totalorder %s12745_s10, 4   ;;  %s14318_s15 = smov %s12574_s16 }
 0x50f   : > { %s14319_s16 = smov %s12578_s17  ;;  %s14320_s17 = smov %s12755_s12 }
 0x510   : > { %s14321_s18 = smov %s12745_s10  ;;  %21 = sbr.rel (!%p19_p13) target bundleno = 7 (0x7), region = 96 }
 0x517   :  { %9747 = vsyncpa [#allocation5], 1 }
 0x518   :  { %9749 = vsyncpa [#allocation5 + $0x1], 1 }
 0x519   :  { %9750 = vsyncpa [#allocation8], 1 }
 0x51a   :  { %9751 = vsyncpa [#allocation11], 1 }
 0x51b   :  { %9752 = vsyncpa [#allocation6], 1 }
 0x51c   :  { %9754 = vsyncpa [#allocation6 + $0x1], 1 }

</bundles_post_ra>
